<compile_context>
chip_gen: v7x
topology: tpu7x:2x2x1
jax: 0.10.0
libtpu: 0.0.40
codegen_flags: <defaults>
</compile_context>

<pallas_src>
import functools

import jax
import jax.numpy as jnp
from jax.experimental import pallas as pl
from jax.experimental.pallas import tpu as pltpu


# ----------------------------------------------------------------------------
# Pallas kernels
# ----------------------------------------------------------------------------
def _vmem_spec():
    return pl.BlockSpec(memory_space=pltpu.MemorySpace.VMEM)


def _conv_mm_kernel(p_ref, w_ref, b_ref, o_ref):
    """o = relu(p @ w + b).  p:(M,K) bf16, w:(K,Cout) bf16, b:(1,Cout) f32."""
    acc = jnp.dot(p_ref[...], w_ref[...], preferred_element_type=jnp.float32)
    o_ref[...] = jnp.maximum(acc + b_ref[...], 0.0).astype(o_ref.dtype)


def _fc_dueling_kernel(x_ref, w1_ref, b1_ref, wa_ref, ba_ref, wv_ref, bv_ref,
                       o_ref, *, hidden):
    """Fused FC path:
         h   = relu(x @ W1 + b1)      W1 = [W1_adv | W1_val]  -> (B, 2*hidden)
         adv = h[:, :hidden] @ Wa + ba                        -> (B, A)
         val = h[:, hidden:] @ Wv + bv                        -> (B, 1)
         out = val + adv - mean(adv, axis=1)
    ha/hv stay in VMEM (never written back to HBM).
    """
    x = x_ref[...]                                            # (B, 3136) bf16
    h = jnp.dot(x, w1_ref[...], preferred_element_type=jnp.float32)
    h = jnp.maximum(h + b1_ref[...], 0.0)                     # (B, 1024) f32
    ha = h[:, :hidden].astype(jnp.bfloat16)                   # lane-aligned split
    hv = h[:, hidden:].astype(jnp.bfloat16)
    adv = jnp.dot(ha, wa_ref[...], preferred_element_type=jnp.float32) + ba_ref[...]
    val = jnp.dot(hv, wv_ref[...], preferred_element_type=jnp.float32) + bv_ref[...]
    # full (B, num_actions) block -> mean sees exactly the valid action lanes
    adv_mean = jnp.mean(adv, axis=1, keepdims=True)
    o_ref[...] = (val + adv - adv_mean).astype(o_ref.dtype)


# ----------------------------------------------------------------------------
# Pallas wrappers
# ----------------------------------------------------------------------------
def conv_matmul_relu(patches, w, b):
    """Single-block matmul+bias+ReLU (tiles are tiny and fit VMEM easily)."""
    M, _ = patches.shape
    Cout = w.shape[1]
    return pl.pallas_call(
        _conv_mm_kernel,
        out_shape=jax.ShapeDtypeStruct((M, Cout), jnp.bfloat16),
        in_specs=[_vmem_spec(), _vmem_spec(), _vmem_spec()],
        out_specs=_vmem_spec(),
    )(patches, w, b)


def fc_dueling(flat, w1, b1, wa, ba, wv, bv, num_actions, hidden=512):
    B = flat.shape[0]
    return pl.pallas_call(
        functools.partial(_fc_dueling_kernel, hidden=hidden),
        out_shape=jax.ShapeDtypeStruct((B, num_actions), jnp.float32),
        in_specs=[_vmem_spec()] * 7,
        out_specs=_vmem_spec(),
        compiler_params=pltpu.CompilerParams(vmem_limit_bytes=32 * 1024 * 1024),
    )(flat, w1, b1, wa, ba, wv, bv)


# ----------------------------------------------------------------------------
# Glue: NHWC im2col (static strided slices + concat; no transposes)
# ----------------------------------------------------------------------------
def _im2col_nhwc(x, k, stride):
    """x: (N, H, W, C) -> patches (N*Ho*Wo, k*k*C), feature order (kh, kw, C)."""
    N, H, W, C = x.shape
    Ho = (H - k) // stride + 1
    Wo = (W - k) // stride + 1
    slabs = [x[:, i:i + stride * Ho:stride, j:j + stride * Wo:stride, :]
             for i in range(k) for j in range(k)]
    p = jnp.concatenate(slabs, axis=-1)            # (N, Ho, Wo, k*k*C)
    return p.reshape(N * Ho * Wo, k * k * C), Ho, Wo


def conv2d_relu_nhwc(x, w_mat, b, k, stride):
    """PyTorch-semantics valid Conv2d + ReLU in NHWC.  w_mat: (k*k*Cin, Cout) bf16."""
    N = x.shape[0]
    patches, Ho, Wo = _im2col_nhwc(x, k, stride)
    out = conv_matmul_relu(patches, w_mat, b)      # (N*Ho*Wo, Cout) bf16
    return out.reshape(N, Ho, Wo, -1)              # free reshape, stays NHWC


# ----------------------------------------------------------------------------
# Parameters: synthetic PyTorch-layout weights + one-time kernel-layout prep
# ----------------------------------------------------------------------------
def init_torch_params(key, in_channels=4, num_actions=18):
    """Deterministic synthetic weights in the *PyTorch* layouts of Dueling_DQN."""
    def _w(k, shape, fan_in):
        return jax.random.normal(k, shape, jnp.float32) / jnp.sqrt(fan_in)

    keys = jax.random.split(key, 14)
    p = {}
    p["conv1_w"] = _w(keys[0], (32, in_channels, 8, 8), in_channels * 64)
    p["conv1_b"] = _w(keys[1], (32,), in_channels * 64)
    p["conv2_w"] = _w(keys[2], (64, 32, 4, 4), 32 * 16)
    p["conv2_b"] = _w(keys[3], (64,), 32 * 16)
    p["conv3_w"] = _w(keys[4], (64, 64, 3, 3), 64 * 9)
    p["conv3_b"] = _w(keys[5], (64,), 64 * 9)
    p["fc1_adv_w"] = _w(keys[6], (512, 7 * 7 * 64), 7 * 7 * 64)   # (out, in)
    p["fc1_adv_b"] = _w(keys[7], (512,), 7 * 7 * 64)
    p["fc1_val_w"] = _w(keys[8], (512, 7 * 7 * 64), 7 * 7 * 64)
    p["fc1_val_b"] = _w(keys[9], (512,), 7 * 7 * 64)
    p["fc2_adv_w"] = _w(keys[10], (num_actions, 512), 512)
    p["fc2_adv_b"] = _w(keys[11], (num_actions,), 512)
    p["fc2_val_w"] = _w(keys[12], (1, 512), 512)
    p["fc2_val_b"] = _w(keys[13], (1,), 512)
    return p


def prepare_params(tp, num_actions=18):
    """One-time conversion PyTorch layouts -> kernel layouts (bf16 weights):
       * conv:  (Cout,Cin,kh,kw) -> (kh*kw*Cin, Cout)   [matches NHWC im2col order]
       * fc1:   adv/val fused -> (3136, 1024); rows permuted from NCHW-flatten
                order (c,h,w) to NHWC-flatten order (h,w,c)
       * fc2:   (out,in) -> (in,out); biases reshaped to 2-D rows.
    """
    def conv_w(w):
        Cout, Cin, k, _ = w.shape
        return (jnp.transpose(w, (2, 3, 1, 0))
                .reshape(k * k * Cin, Cout).astype(jnp.bfloat16))

    def fc1_w(w):  # (512, 3136) cols ordered (c,h,w) -> (3136, 512) rows (h,w,c)
        return (jnp.transpose(w.reshape(512, 64, 7, 7), (2, 3, 1, 0))
                .reshape(7 * 7 * 64, 512))

    p = {}
    p["conv1_w"] = conv_w(tp["conv1_w"]); p["conv1_b"] = tp["conv1_b"].reshape(1, -1)
    p["conv2_w"] = conv_w(tp["conv2_w"]); p["conv2_b"] = tp["conv2_b"].reshape(1, -1)
    p["conv3_w"] = conv_w(tp["conv3_w"]); p["conv3_b"] = tp["conv3_b"].reshape(1, -1)
    p["fc1_w"] = jnp.concatenate([fc1_w(tp["fc1_adv_w"]), fc1_w(tp["fc1_val_w"])],
                                 axis=1).astype(jnp.bfloat16)          # (3136, 1024)
    p["fc1_b"] = jnp.concatenate([tp["fc1_adv_b"], tp["fc1_val_b"]]).reshape(1, -1)
    p["fc2_adv_w"] = jnp.transpose(tp["fc2_adv_w"]).astype(jnp.bfloat16)  # (512, A)
    p["fc2_adv_b"] = tp["fc2_adv_b"].reshape(1, num_actions)
    p["fc2_val_w"] = jnp.transpose(tp["fc2_val_w"]).astype(jnp.bfloat16)  # (512, 1)
    p["fc2_val_b"] = tp["fc2_val_b"].reshape(1, 1)
    return p


# ----------------------------------------------------------------------------
# Forward pass
# ----------------------------------------------------------------------------
def dueling_dqn_forward(x_nchw, params, num_actions=18):
    # one-time layout change to the internal NHWC/bf16 convention
    x = jnp.transpose(x_nchw, (0, 2, 3, 1)).astype(jnp.bfloat16)

    x = conv2d_relu_nhwc(x, params["conv1_w"], params["conv1_b"], k=8, stride=4)
    x = conv2d_relu_nhwc(x, params["conv2_w"], params["conv2_b"], k=4, stride=2)
    x = conv2d_relu_nhwc(x, params["conv3_w"], params["conv3_b"], k=3, stride=1)

    N = x.shape[0]
    flat = x.reshape(N, -1)   # NHWC flatten; fc1 rows were permuted at init to match

    return fc_dueling(flat,
                      params["fc1_w"], params["fc1_b"],
                      params["fc2_adv_w"], params["fc2_adv_b"],
                      params["fc2_val_w"], params["fc2_val_b"],
                      num_actions)


if __name__ == "__main__":
    key = jax.random.PRNGKey(0)
    pkey, xkey = jax.random.split(key)

    num_actions = 18
    torch_params = init_torch_params(pkey, in_channels=4, num_actions=num_actions)
    params = prepare_params(torch_params, num_actions=num_actions)  # one-time prep

    # FC1 expects 7*7*64 features -> 84x84 Atari frames; batch kept small.
    x = jax.random.normal(xkey, (2, 4, 84, 84), jnp.float32)

    fwd = jax.jit(functools.partial(dueling_dqn_forward, num_actions=num_actions))
    out = fwd(x, params)
    jax.block_until_ready(out)

    assert out.shape == (2, num_actions)
    assert out.dtype == jnp.float32
    print("KERNEL_OK")
</pallas_src>

<mosaic_0001>
module attributes {stable_mosaic.version = 11 : i64} {
  func.func @_conv_mm_kernel(%arg0: memref<800x256xbf16, #tpu.memory_space<vmem>>, %arg1: memref<256x32xbf16, #tpu.memory_space<vmem>>, %arg2: memref<1x32xf32, #tpu.memory_space<vmem>>, %arg3: memref<800x32xbf16, #tpu.memory_space<vmem>>) attributes {dimension_semantics = [], scalar_prefetch = 0 : i64, scratch_operands = 0 : i64, tpu.core_type = #tpu.core_type<tc>} {
    %c0 = arith.constant 0 : index
    %c0_0 = arith.constant 0 : index
    %0 = vector.load %arg0[%c0, %c0_0] : memref<800x256xbf16, #tpu.memory_space<vmem>>, vector<800x256xbf16>
    %c0_1 = arith.constant 0 : index
    %c0_2 = arith.constant 0 : index
    %1 = vector.load %arg1[%c0_1, %c0_2] : memref<256x32xbf16, #tpu.memory_space<vmem>>, vector<256x32xbf16>
    %cst = arith.constant dense<0.000000e+00> : vector<800x32xf32>
    %2 = tpu.matmul %0, %1, %cst {dimension_numbers = #tpu.dot_dimension_numbers<[1], [0], [0], [1], [0, 0, 1, 1], [], []>} : vector<800x256xbf16>, vector<256x32xbf16>, vector<800x32xf32> -> vector<800x32xf32>
    %c0_3 = arith.constant 0 : index
    %c0_4 = arith.constant 0 : index
    %3 = vector.load %arg2[%c0_3, %c0_4] : memref<1x32xf32, #tpu.memory_space<vmem>>, vector<1x32xf32>
    %4 = vector.broadcast %3 : vector<1x32xf32> to vector<800x32xf32>
    %5 = arith.addf %2, %4 : vector<800x32xf32>
    %cst_5 = arith.constant 0.000000e+00 : f32
    %6 = vector.broadcast %cst_5 : f32 to vector<800x32xf32>
    %7 = arith.maximumf %5, %6 : vector<800x32xf32>
    %8 = arith.truncf %7 : vector<800x32xf32> to vector<800x32xbf16>
    %c0_6 = arith.constant 0 : index
    %c0_7 = arith.constant 0 : index
    %9 = vector.load %arg3[%c0_6, %c0_7] : memref<800x32xbf16, #tpu.memory_space<vmem>>, vector<800x32xbf16>
    tpu.vector_store %arg3[%c0_6, %c0_7], %8 {strides = array<i32>} : memref<800x32xbf16, #tpu.memory_space<vmem>>, vector<800x32xbf16>,
    return
  }
}

module attributes {stable_mosaic.version = 11 : i64} {
  func.func @_conv_mm_kernel(%arg0: memref<162x512xbf16, #tpu.memory_space<vmem>>, %arg1: memref<512x64xbf16, #tpu.memory_space<vmem>>, %arg2: memref<1x64xf32, #tpu.memory_space<vmem>>, %arg3: memref<162x64xbf16, #tpu.memory_space<vmem>>) attributes {dimension_semantics = [], scalar_prefetch = 0 : i64, scratch_operands = 0 : i64, tpu.core_type = #tpu.core_type<tc>} {
    %c0 = arith.constant 0 : index
    %c0_0 = arith.constant 0 : index
    %0 = vector.load %arg0[%c0, %c0_0] : memref<162x512xbf16, #tpu.memory_space<vmem>>, vector<162x512xbf16>
    %c0_1 = arith.constant 0 : index
    %c0_2 = arith.constant 0 : index
    %1 = vector.load %arg1[%c0_1, %c0_2] : memref<512x64xbf16, #tpu.memory_space<vmem>>, vector<512x64xbf16>
    %cst = arith.constant dense<0.000000e+00> : vector<162x64xf32>
    %2 = tpu.matmul %0, %1, %cst {dimension_numbers = #tpu.dot_dimension_numbers<[1], [0], [0], [1], [0, 0, 1, 1], [], []>} : vector<162x512xbf16>, vector<512x64xbf16>, vector<162x64xf32> -> vector<162x64xf32>
    %c0_3 = arith.constant 0 : index
    %c0_4 = arith.constant 0 : index
    %3 = vector.load %arg2[%c0_3, %c0_4] : memref<1x64xf32, #tpu.memory_space<vmem>>, vector<1x64xf32>
    %4 = vector.broadcast %3 : vector<1x64xf32> to vector<162x64xf32>
    %5 = arith.addf %2, %4 : vector<162x64xf32>
    %cst_5 = arith.constant 0.000000e+00 : f32
    %6 = vector.broadcast %cst_5 : f32 to vector<162x64xf32>
    %7 = arith.maximumf %5, %6 : vector<162x64xf32>
    %8 = arith.truncf %7 : vector<162x64xf32> to vector<162x64xbf16>
    %c0_6 = arith.constant 0 : index
    %c0_7 = arith.constant 0 : index
    %9 = vector.load %arg3[%c0_6, %c0_7] : memref<162x64xbf16, #tpu.memory_space<vmem>>, vector<162x64xbf16>
    tpu.vector_store %arg3[%c0_6, %c0_7], %8 {strides = array<i32>} : memref<162x64xbf16, #tpu.memory_space<vmem>>, vector<162x64xbf16>,
    return
  }
}

module attributes {stable_mosaic.version = 11 : i64} {
  func.func @_conv_mm_kernel(%arg0: memref<98x576xbf16, #tpu.memory_space<vmem>>, %arg1: memref<576x64xbf16, #tpu.memory_space<vmem>>, %arg2: memref<1x64xf32, #tpu.memory_space<vmem>>, %arg3: memref<98x64xbf16, #tpu.memory_space<vmem>>) attributes {dimension_semantics = [], scalar_prefetch = 0 : i64, scratch_operands = 0 : i64, tpu.core_type = #tpu.core_type<tc>} {
    %c0 = arith.constant 0 : index
    %c0_0 = arith.constant 0 : index
    %0 = vector.load %arg0[%c0, %c0_0] : memref<98x576xbf16, #tpu.memory_space<vmem>>, vector<98x576xbf16>
    %c0_1 = arith.constant 0 : index
    %c0_2 = arith.constant 0 : index
    %1 = vector.load %arg1[%c0_1, %c0_2] : memref<576x64xbf16, #tpu.memory_space<vmem>>, vector<576x64xbf16>
    %cst = arith.constant dense<0.000000e+00> : vector<98x64xf32>
    %2 = tpu.matmul %0, %1, %cst {dimension_numbers = #tpu.dot_dimension_numbers<[1], [0], [0], [1], [0, 0, 1, 1], [], []>} : vector<98x576xbf16>, vector<576x64xbf16>, vector<98x64xf32> -> vector<98x64xf32>
    %c0_3 = arith.constant 0 : index
    %c0_4 = arith.constant 0 : index
    %3 = vector.load %arg2[%c0_3, %c0_4] : memref<1x64xf32, #tpu.memory_space<vmem>>, vector<1x64xf32>
    %4 = vector.broadcast %3 : vector<1x64xf32> to vector<98x64xf32>
    %5 = arith.addf %2, %4 : vector<98x64xf32>
    %cst_5 = arith.constant 0.000000e+00 : f32
    %6 = vector.broadcast %cst_5 : f32 to vector<98x64xf32>
    %7 = arith.maximumf %5, %6 : vector<98x64xf32>
    %8 = arith.truncf %7 : vector<98x64xf32> to vector<98x64xbf16>
    %c0_6 = arith.constant 0 : index
    %c0_7 = arith.constant 0 : index
    %9 = vector.load %arg3[%c0_6, %c0_7] : memref<98x64xbf16, #tpu.memory_space<vmem>>, vector<98x64xbf16>
    tpu.vector_store %arg3[%c0_6, %c0_7], %8 {strides = array<i32>} : memref<98x64xbf16, #tpu.memory_space<vmem>>, vector<98x64xbf16>,
    return
  }
}

module attributes {stable_mosaic.version = 11 : i64} {
  func.func @_fc_dueling_kernel(%arg0: memref<2x3136xbf16, #tpu.memory_space<vmem>>, %arg1: memref<3136x1024xbf16, #tpu.memory_space<vmem>>, %arg2: memref<1x1024xf32, #tpu.memory_space<vmem>>, %arg3: memref<512x18xbf16, #tpu.memory_space<vmem>>, %arg4: memref<1x18xf32, #tpu.memory_space<vmem>>, %arg5: memref<512x1xbf16, #tpu.memory_space<vmem>>, %arg6: memref<1x1xf32, #tpu.memory_space<vmem>>, %arg7: memref<2x18xf32, #tpu.memory_space<vmem>>) attributes {dimension_semantics = [], scalar_prefetch = 0 : i64, scratch_operands = 0 : i64, tpu.core_type = #tpu.core_type<tc>} {
    %c0 = arith.constant 0 : index
    %c0_0 = arith.constant 0 : index
    %0 = vector.load %arg0[%c0, %c0_0] : memref<2x3136xbf16, #tpu.memory_space<vmem>>, vector<2x3136xbf16>
    %c0_1 = arith.constant 0 : index
    %c0_2 = arith.constant 0 : index
    %1 = vector.load %arg1[%c0_1, %c0_2] : memref<3136x1024xbf16, #tpu.memory_space<vmem>>, vector<3136x1024xbf16>
    %cst = arith.constant dense<0.000000e+00> : vector<2x1024xf32>
    %2 = tpu.matmul %0, %1, %cst {dimension_numbers = #tpu.dot_dimension_numbers<[1], [0], [0], [1], [0, 0, 1, 1], [], []>} : vector<2x3136xbf16>, vector<3136x1024xbf16>, vector<2x1024xf32> -> vector<2x1024xf32>
    %c0_3 = arith.constant 0 : index
    %c0_4 = arith.constant 0 : index
    %3 = vector.load %arg2[%c0_3, %c0_4] : memref<1x1024xf32, #tpu.memory_space<vmem>>, vector<1x1024xf32>
    %4 = vector.broadcast %3 : vector<1x1024xf32> to vector<2x1024xf32>
    %5 = arith.addf %2, %4 : vector<2x1024xf32>
    %cst_5 = arith.constant 0.000000e+00 : f32
    %6 = vector.broadcast %cst_5 : f32 to vector<2x1024xf32>
    %7 = arith.maximumf %5, %6 : vector<2x1024xf32>
    %8 = vector.extract_strided_slice %7 {offsets = [0, 0], sizes = [2, 512], strides = [1, 1]} : vector<2x1024xf32> to vector<2x512xf32>
    %9 = arith.truncf %8 : vector<2x512xf32> to vector<2x512xbf16>
    %10 = vector.extract_strided_slice %7 {offsets = [0, 512], sizes = [2, 512], strides = [1, 1]} : vector<2x1024xf32> to vector<2x512xf32>
    %11 = arith.truncf %10 : vector<2x512xf32> to vector<2x512xbf16>
    %c0_6 = arith.constant 0 : index
    %c0_7 = arith.constant 0 : index
    %12 = vector.load %arg3[%c0_6, %c0_7] : memref<512x18xbf16, #tpu.memory_space<vmem>>, vector<512x18xbf16>
    %cst_8 = arith.constant dense<0.000000e+00> : vector<2x18xf32>
    %13 = tpu.matmul %9, %12, %cst_8 {dimension_numbers = #tpu.dot_dimension_numbers<[1], [0], [0], [1], [0, 0, 1, 1], [], []>} : vector<2x512xbf16>, vector<512x18xbf16>, vector<2x18xf32> -> vector<2x18xf32>
    %c0_9 = arith.constant 0 : index
    %c0_10 = arith.constant 0 : index
    %14 = vector.load %arg4[%c0_9, %c0_10] : memref<1x18xf32, #tpu.memory_space<vmem>>, vector<1x18xf32>
    %15 = vector.broadcast %14 : vector<1x18xf32> to vector<2x18xf32>
    %16 = arith.addf %13, %15 : vector<2x18xf32>
    %c0_11 = arith.constant 0 : index
    %c0_12 = arith.constant 0 : index
    %17 = vector.load %arg5[%c0_11, %c0_12] : memref<512x1xbf16, #tpu.memory_space<vmem>>, vector<512x1xbf16>
    %cst_13 = arith.constant dense<0.000000e+00> : vector<2x1xf32>
    %18 = tpu.matmul %11, %17, %cst_13 {dimension_numbers = #tpu.dot_dimension_numbers<[1], [0], [0], [1], [0, 0, 1, 1], [], []>} : vector<2x512xbf16>, vector<512x1xbf16>, vector<2x1xf32> -> vector<2x1xf32>
    %c0_14 = arith.constant 0 : index
    %c0_15 = arith.constant 0 : index
    %19 = vector.load %arg6[%c0_14, %c0_15] : memref<1x1xf32, #tpu.memory_space<vmem>>, vector<1x1xf32>
    %20 = vector.broadcast %19 : vector<1x1xf32> to vector<2x1xf32>
    %21 = arith.addf %18, %20 : vector<2x1xf32>
    %cst_16 = arith.constant dense<0.000000e+00> : vector<2xf32>
    %22 = vector.multi_reduction <add>, %16, %cst_16 [1] : vector<2x18xf32> to vector<2xf32>
    %23 = vector.shape_cast %22 : vector<2xf32> to vector<2x1xf32>
    %cst_17 = arith.constant 1.800000e+01 : f32
    %24 = vector.broadcast %cst_17 : f32 to vector<2x1xf32>
    %25 = arith.divf %23, %24 : vector<2x1xf32>
    %26 = vector.broadcast %21 : vector<2x1xf32> to vector<2x18xf32>
    %27 = arith.addf %26, %16 : vector<2x18xf32>
    %28 = vector.broadcast %25 : vector<2x1xf32> to vector<2x18xf32>
    %29 = arith.subf %27, %28 : vector<2x18xf32>
    %c0_18 = arith.constant 0 : index
    %c0_19 = arith.constant 0 : index
    %30 = vector.load %arg7[%c0_18, %c0_19] : memref<2x18xf32, #tpu.memory_space<vmem>>, vector<2x18xf32>
    tpu.vector_store %arg7[%c0_18, %c0_19], %29 {strides = array<i32>} : memref<2x18xf32, #tpu.memory_space<vmem>>, vector<2x18xf32>,
    return
  }
}

</mosaic_0001>

<bundles_post_ra>
// kernel: dueling_dqn_forward.4
= control target key start
LH: loop header
LB: loop body
LE: loop exit
PB: predicated region body
PF: predicated region fallthrough
CT: control target
= control target key end

     0   :  { %v2305_v0 = vmov 0   ;;  %vm1683_vm0 = vcmask 257024   ;;  %s3216_s1 = inlined_call_operand.vmem [shape: bf16[256,32], index: 1, kind: input, shape index: {}]   ;;  %s3217_s0 = inlined_call_operand.vmem [shape: bf16[800,256], index: 0, kind: input, shape index: {}]   ;;  %s3218_s2 = inlined_call_operand.vmem [shape: f32[1,32], index: 2, kind: input, shape index: {}]   ;;  %s3219_s3 = inlined_call_operand.vmem [shape: bf16[800,32], index: 3, kind: output, shape index: {}]  }
   0x1   :  { %750 = vmatprep.subr.bf16.mxu0 %v2305_v0  ;;  %2105 = vmatprep.subr.bf16.mxu1 %v2305_v0  ;;  %v2138_v1 = vld [vmem:[%s3216_s1] sm:$0xff]   ;;  %v2139_v2 = vld [vmem:[%s3216_s1 + $0x8] sm:$0xff]   ;;  %v2140_v3 = vld [vmem:[%s3216_s1 + $0x10] sm:$0xff]  }
   0x2   :  { %751 = vmatpush1.bf16.msra.mxu0 %v2138_v1  ;;  %2121 = vmatpush1.bf16.msra.mxu1 %v2138_v1  ;;  %v2141_v4 = vld [vmem:[%s3216_s1 + $0x18] sm:$0xff]   ;;  %v2142_v5 = vld [vmem:[%s3216_s1 + $0x20] sm:$0xff]   ;;  %v2143_v7 = vld [vmem:[%s3216_s1 + $0x28] sm:$0xff]  }
   0x3   :  { %752 = vmatprep.subr.bf16.mxu0 %v2305_v0  ;;  %2106 = vmatprep.subr.bf16.mxu1 %v2305_v0  ;;  %v2156_v6 = vld [vmem:[%s3217_s0 + $0x4] ss:$8 sps:$4 sm:$0xff]   ;;  %v2159_v8 = vld [vmem:[%s3217_s0 + $0x194] ss:$8 sps:$4 sm:$0xff]   ;;  %v2154_v19 = vld [vmem:[%s3217_s0] ss:$8 sps:$4 sm:$0xff]  }
   0x4   :  { %782 = vmatprep.mubr.bf16.mxu0 %v2156_v6  ;;  %982 = vmatprep.mubr.bf16.mxu1 %v2159_v8  ;;  %v2144_v9 = vld [vmem:[%s3216_s1 + $0x30] sm:$0xff]   ;;  %v2145_v10 = vld [vmem:[%s3216_s1 + $0x38] sm:$0xff]   ;;  %v2146_v11 = vld [vmem:[%s3216_s1 + $0x40] sm:$0xff]  }
   0x5   :  { %v2147_v12 = vld [vmem:[%s3216_s1 + $0x48] sm:$0xff]   ;;  %v2148_v13 = vld [vmem:[%s3216_s1 + $0x50] sm:$0xff]   ;;  %v2149_v14 = vld [vmem:[%s3216_s1 + $0x58] sm:$0xff]  }
   0x6   :  { %753 = vmatpush1.bf16.msra.mxu0 %v2139_v2  ;;  %2122 = vmatpush1.bf16.msra.mxu1 %v2139_v2  ;;  %v2150_v15 = vld [vmem:[%s3216_s1 + $0x60] sm:$0xff]   ;;  %v2151_v16 = vld [vmem:[%s3216_s1 + $0x68] sm:$0xff]   ;;  %v2152_v17 = vld [vmem:[%s3216_s1 + $0x70] sm:$0xff]  }
   0x7   :  { %754 = vmatprep.subr.bf16.mxu0 %v2305_v0  ;;  %2107 = vmatprep.subr.bf16.mxu1 %v2305_v0  ;;  %v2153_v18 = vld [vmem:[%s3216_s1 + $0x78] sm:$0xff]   ;;  %v2162_v22 = vld [vmem:[%s3217_s0 + $0x1a4] ss:$8 sps:$4 sm:$0xff]   ;;  %v2165_v24 = vld [vmem:[%s3217_s0 + $0x1a0] ss:$8 sps:$4 sm:$0xff]  }
   0x8   :  { %v2157_v20 = vld [vmem:[%s3217_s0 + $0x190] ss:$8 sps:$4 sm:$0xff]   ;;  %v2160_v21 = vld [vmem:[%s3217_s0 + $0x14] ss:$8 sps:$4 sm:$0xff]   ;;  %v2166_v25 = vld [vmem:[%s3217_s0 + $0x24] ss:$8 sps:$4 sm:$0xff]  }
   0x9   :  { %v2164_v23 = vld [vmem:[%s3217_s0 + $0x10] ss:$8 sps:$4 sm:$0xff]   ;;  %v2168_v26 = vld [vmem:[%s3217_s0 + $0x1b4] ss:$8 sps:$4 sm:$0xff]   ;;  %v2170_v27 = vld [vmem:[%s3217_s0 + $0x20] ss:$8 sps:$4 sm:$0xff]  }
   0xa   :  { %755 = vmatpush1.bf16.msra.mxu0 %v2140_v3  ;;  %2123 = vmatpush1.bf16.msra.mxu1 %v2140_v3  ;;  %v2171_v28 = vld [vmem:[%s3217_s0 + $0x1b0] ss:$8 sps:$4 sm:$0xff]   ;;  %v2172_v29 = vld [vmem:[%s3217_s0 + $0x34] ss:$8 sps:$4 sm:$0xff]   ;;  %v2174_v30 = vld [vmem:[%s3217_s0 + $0x1c4] ss:$8 sps:$4 sm:$0xff]  }
   0xb   :  { %756 = vmatprep.subr.bf16.mxu0 %v2305_v0  ;;  %2108 = vmatprep.subr.bf16.mxu1 %v2305_v0  ;;  %v2176_v31 = vld [vmem:[%s3217_s0 + $0x30] ss:$8 sps:$4 sm:$0xff]   ;;  %v2177_v32 = vld [vmem:[%s3217_s0 + $0x1c0] ss:$8 sps:$4 sm:$0xff]   ;;  %v2178_v33 = vld [vmem:[%s3217_s0 + $0x44] ss:$8 sps:$4 sm:$0xff]  }
   0xc   :  { %v2180_v34 = vld [vmem:[%s3217_s0 + $0x1d4] ss:$8 sps:$4 sm:$0xff]   ;;  %v2182_v35 = vld [vmem:[%s3217_s0 + $0x40] ss:$8 sps:$4 sm:$0xff]   ;;  %v2183_v36 = vld [vmem:[%s3217_s0 + $0x1d0] ss:$8 sps:$4 sm:$0xff]  }
   0xd   :  { %v2184_v37 = vld [vmem:[%s3217_s0 + $0x54] ss:$8 sps:$4 sm:$0xff]   ;;  %v2186_v38 = vld [vmem:[%s3217_s0 + $0x1e4] ss:$8 sps:$4 sm:$0xff]   ;;  %v2188_v39 = vld [vmem:[%s3217_s0 + $0x50] ss:$8 sps:$4 sm:$0xff]  }
   0xe   :  { %757 = vmatpush1.bf16.msra.mxu0 %v2141_v4  ;;  %2124 = vmatpush1.bf16.msra.mxu1 %v2141_v4  ;;  %v2189_v40 = vld [vmem:[%s3217_s0 + $0x1e0] ss:$8 sps:$4 sm:$0xff]   ;;  %v2190_v41 = vld [vmem:[%s3217_s0 + $0x64] ss:$8 sps:$4 sm:$0xff]   ;;  %v2192_v42 = vld [vmem:[%s3217_s0 + $0x1f4] ss:$8 sps:$4 sm:$0xff]  }
   0xf   :  { %758 = vmatprep.subr.bf16.mxu0 %v2305_v0  ;;  %2109 = vmatprep.subr.bf16.mxu1 %v2305_v0  ;;  %v2194_v43 = vld [vmem:[%s3217_s0 + $0x60] ss:$8 sps:$4 sm:$0xff]   ;;  %v2195_v44 = vld [vmem:[%s3217_s0 + $0x1f0] ss:$8 sps:$4 sm:$0xff]   ;;  %v2196_v45 = vld [vmem:[%s3217_s0 + $0x74] ss:$8 sps:$4 sm:$0xff]  }
  0x10   :  { %v2198_v46 = vld [vmem:[%s3217_s0 + $0x204] ss:$8 sps:$4 sm:$0xff]   ;;  %v2200_v47 = vld [vmem:[%s3217_s0 + $0x70] ss:$8 sps:$4 sm:$0xff]   ;;  %v2201_v48 = vld [vmem:[%s3217_s0 + $0x200] ss:$8 sps:$4 sm:$0xff]  }
  0x11   :  { %v2202_v49 = vld [vmem:[%s3217_s0 + $0x84] ss:$8 sps:$4 sm:$0xff]   ;;  %v2204_v50 = vld [vmem:[%s3217_s0 + $0x214] ss:$8 sps:$4 sm:$0xff]   ;;  %v2206_v51 = vld [vmem:[%s3217_s0 + $0x80] ss:$8 sps:$4 sm:$0xff]  }
  0x12   :  { %759 = vmatpush1.bf16.msra.mxu0 %v2142_v5  ;;  %2125 = vmatpush1.bf16.msra.mxu1 %v2142_v5  ;;  %v2207_v52 = vld [vmem:[%s3217_s0 + $0x210] ss:$8 sps:$4 sm:$0xff]   ;;  %v2208_v53 = vld [vmem:[%s3217_s0 + $0x94] ss:$8 sps:$4 sm:$0xff]   ;;  %v2210_v54 = vld [vmem:[%s3217_s0 + $0x224] ss:$8 sps:$4 sm:$0xff]  }
  0x13   :  { %760 = vmatprep.subr.bf16.mxu0 %v2305_v0  ;;  %2110 = vmatprep.subr.bf16.mxu1 %v2305_v0  ;;  %v2212_v55 = vld [vmem:[%s3217_s0 + $0x90] ss:$8 sps:$4 sm:$0xff]   ;;  %v2213_v56 = vld [vmem:[%s3217_s0 + $0x220] ss:$8 sps:$4 sm:$0xff]   ;;  %v2214_v57 = vld [vmem:[%s3217_s0 + $0xa4] ss:$8 sps:$4 sm:$0xff]  }
  0x14   :  { %v2216_v58 = vld [vmem:[%s3217_s0 + $0x234] ss:$8 sps:$4 sm:$0xff]   ;;  %v2218_v59 = vld [vmem:[%s3217_s0 + $0xa0] ss:$8 sps:$4 sm:$0xff]   ;;  %v2219_v60 = vld [vmem:[%s3217_s0 + $0x230] ss:$8 sps:$4 sm:$0xff]  }
  0x15   :  { %v2220_v61 = vld [vmem:[%s3217_s0 + $0xb4] ss:$8 sps:$4 sm:$0xff]   ;;  %v2222_v62 = vld [vmem:[%s3217_s0 + $0x244] ss:$8 sps:$4 sm:$0xff]   ;;  %v2224_v63 = vld [vmem:[%s3217_s0 + $0xb0] ss:$8 sps:$4 sm:$0xff]  }
  0x16   :  { %761 = vmatpush1.bf16.msra.mxu0 %v2143_v7  ;;  %2126 = vmatpush1.bf16.msra.mxu1 %v2143_v7  ;;  %v2226_v1 = vld [vmem:[%s3217_s0 + $0xc4] ss:$8 sps:$4 sm:$0xff]   ;;  %v2228_v2 = vld [vmem:[%s3217_s0 + $0x254] ss:$8 sps:$4 sm:$0xff]   ;;  %v2230_v3 = vld [vmem:[%s3217_s0 + $0xc0] ss:$8 sps:$4 sm:$0xff]  }
  0x17   :  { %762 = vmatprep.subr.bf16.mxu0 %v2305_v0  ;;  %2111 = vmatprep.subr.bf16.mxu1 %v2305_v0  ;;  %v2231_v4 = vld [vmem:[%s3217_s0 + $0x250] ss:$8 sps:$4 sm:$0xff]   ;;  %v2232_v5 = vld [vmem:[%s3217_s0 + $0xd4] ss:$8 sps:$4 sm:$0xff]   ;;  %v2234_v6 = vld [vmem:[%s3217_s0 + $0x264] ss:$8 sps:$4 sm:$0xff]  }
  0x18   :  { %v2236_v7 = vld [vmem:[%s3217_s0 + $0xd0] ss:$8 sps:$4 sm:$0xff]   ;;  %v2237_v8 = vld [vmem:[%s3217_s0 + $0x260] ss:$8 sps:$4 sm:$0xff]  }
  0x1a   :  { %763 = vmatpush1.bf16.msra.mxu0 %v2144_v9  ;;  %2127 = vmatpush1.bf16.msra.mxu1 %v2144_v9  ;;  %v2238_v9 = vld [vmem:[%s3217_s0 + $0xe4] ss:$8 sps:$4 sm:$0xff]  }
  0x1b   :  { %764 = vmatprep.subr.bf16.mxu0 %v2305_v0  ;;  %2112 = vmatprep.subr.bf16.mxu1 %v2305_v0 }
  0x1e   :  { %765 = vmatpush1.bf16.msra.mxu0 %v2145_v10  ;;  %2128 = vmatpush1.bf16.msra.mxu1 %v2145_v10  ;;  %v2240_v10 = vld [vmem:[%s3217_s0 + $0x274] ss:$8 sps:$4 sm:$0xff]  }
  0x1f   :  { %766 = vmatprep.subr.bf16.mxu0 %v2305_v0  ;;  %2113 = vmatprep.subr.bf16.mxu1 %v2305_v0 }
  0x22   :  { %767 = vmatpush1.bf16.msra.mxu0 %v2146_v11  ;;  %2129 = vmatpush1.bf16.msra.mxu1 %v2146_v11  ;;  %v2242_v11 = vld [vmem:[%s3217_s0 + $0xe0] ss:$8 sps:$4 sm:$0xff]  }
  0x23   :  { %768 = vmatprep.subr.bf16.mxu0 %v2305_v0  ;;  %2114 = vmatprep.subr.bf16.mxu1 %v2305_v0 }
  0x26   :  { %769 = vmatpush1.bf16.msra.mxu0 %v2147_v12  ;;  %2130 = vmatpush1.bf16.msra.mxu1 %v2147_v12  ;;  %v2243_v12 = vld [vmem:[%s3217_s0 + $0x270] ss:$8 sps:$4 sm:$0xff]  }
  0x27   :  { %770 = vmatprep.subr.bf16.mxu0 %v2305_v0  ;;  %2115 = vmatprep.subr.bf16.mxu1 %v2305_v0 }
  0x2a   :  { %771 = vmatpush1.bf16.msra.mxu0 %v2148_v13  ;;  %2131 = vmatpush1.bf16.msra.mxu1 %v2148_v13  ;;  %v2244_v13 = vld [vmem:[%s3217_s0 + $0xf4] ss:$8 sps:$4 sm:$0xff]  }
  0x2b   :  { %772 = vmatprep.subr.bf16.mxu0 %v2305_v0  ;;  %2116 = vmatprep.subr.bf16.mxu1 %v2305_v0 }
  0x2e   :  { %773 = vmatpush1.bf16.msra.mxu0 %v2149_v14  ;;  %2132 = vmatpush1.bf16.msra.mxu1 %v2149_v14  ;;  %v2246_v14 = vld [vmem:[%s3217_s0 + $0x284] ss:$8 sps:$4 sm:$0xff]  }
  0x2f   :  { %774 = vmatprep.subr.bf16.mxu0 %v2305_v0  ;;  %2117 = vmatprep.subr.bf16.mxu1 %v2305_v0 }
  0x32   :  { %775 = vmatpush1.bf16.msra.mxu0 %v2150_v15  ;;  %2133 = vmatpush1.bf16.msra.mxu1 %v2150_v15  ;;  %v2248_v15 = vld [vmem:[%s3217_s0 + $0xf0] ss:$8 sps:$4 sm:$0xff]  }
  0x33   :  { %776 = vmatprep.subr.bf16.mxu0 %v2305_v0  ;;  %2118 = vmatprep.subr.bf16.mxu1 %v2305_v0 }
  0x36   :  { %777 = vmatpush1.bf16.msra.mxu0 %v2151_v16  ;;  %2134 = vmatpush1.bf16.msra.mxu1 %v2151_v16  ;;  %v2249_v16 = vld [vmem:[%s3217_s0 + $0x280] ss:$8 sps:$4 sm:$0xff]  }
  0x37   :  { %778 = vmatprep.subr.bf16.mxu0 %v2305_v0  ;;  %2119 = vmatprep.subr.bf16.mxu1 %v2305_v0 }
  0x3a   :  { %779 = vmatpush1.bf16.msra.mxu0 %v2152_v17  ;;  %2135 = vmatpush1.bf16.msra.mxu1 %v2152_v17  ;;  %v2250_v17 = vld [vmem:[%s3217_s0 + $0x104] ss:$8 sps:$4 sm:$0xff]  }
  0x3b   :  { %780 = vmatprep.subr.bf16.mxu0 %v2305_v0  ;;  %2120 = vmatprep.subr.bf16.mxu1 %v2305_v0  ;;  %v2225_v0 = vld [vmem:[%s3217_s0 + $0x240] ss:$8 sps:$4 sm:$0xff]  }
  0x3e   :  { %781 = vmatpush1.bf16.msra.mxu0 %v2153_v18  ;;  %2136 = vmatpush1.bf16.msra.mxu1 %v2153_v18  ;;  %v2252_v18 = vld [vmem:[%s3217_s0 + $0x294] ss:$8 sps:$4 sm:$0xff]  }
  0x41   :  { %783 = vmatmul.mubr.bf16.vlgmr.msra.gmra.mrb[0].mxu0 %v2154_v19  ;;  %983 = vmatmul.mubr.bf16.vlgmr.msra.gmra.mrb[0].mxu1 %v2157_v20  ;;  %v2254_v19 = vld [vmem:[%s3217_s0 + $0x100] ss:$8 sps:$4 sm:$0xff]   ;;  %v2255_v20 = vld [vmem:[%s3217_s0 + $0x290] ss:$8 sps:$4 sm:$0xff]  }
  0x42   :  { %790 = vmatprep.mubr.bf16.mxu0 %v2160_v21  ;;  %990 = vmatprep.mubr.bf16.mxu1 %v2162_v22  ;;  %v2256_v21 = vld [vmem:[%s3217_s0 + $0x114] ss:$8 sps:$4 sm:$0xff]   ;;  %v2258_v22 = vld [vmem:[%s3217_s0 + $0x2a4] ss:$8 sps:$4 sm:$0xff]  }
  0x49   :  { %791 = vmatmul.mubr.bf16.gmra.mrb[4].mxu0 %v2164_v23  ;;  %991 = vmatmul.mubr.bf16.gmra.mrb[4].mxu1 %v2165_v24  ;;  %v2260_v23 = vld [vmem:[%s3217_s0 + $0x110] ss:$8 sps:$4 sm:$0xff]   ;;  %v2261_v24 = vld [vmem:[%s3217_s0 + $0x2a0] ss:$8 sps:$4 sm:$0xff]  }
  0x4a   :  { %798 = vmatprep.mubr.bf16.mxu0 %v2166_v25  ;;  %998 = vmatprep.mubr.bf16.mxu1 %v2168_v26  ;;  %v2262_v25 = vld [vmem:[%s3217_s0 + $0x124] ss:$8 sps:$4 sm:$0xff]   ;;  %v2264_v26 = vld [vmem:[%s3217_s0 + $0x2b4] ss:$8 sps:$4 sm:$0xff]  }
  0x51   :  { %799 = vmatmul.mubr.bf16.gmra.mrb[8].mxu0 %v2170_v27  ;;  %999 = vmatmul.mubr.bf16.gmra.mrb[8].mxu1 %v2171_v28  ;;  %v2266_v27 = vld [vmem:[%s3217_s0 + $0x120] ss:$8 sps:$4 sm:$0xff]   ;;  %v2267_v28 = vld [vmem:[%s3217_s0 + $0x2b0] ss:$8 sps:$4 sm:$0xff]  }
  0x52   :  { %806 = vmatprep.mubr.bf16.mxu0 %v2172_v29  ;;  %1006 = vmatprep.mubr.bf16.mxu1 %v2174_v30  ;;  %v2268_v29 = vld [vmem:[%s3217_s0 + $0x134] ss:$8 sps:$4 sm:$0xff]   ;;  %v2270_v30 = vld [vmem:[%s3217_s0 + $0x2c4] ss:$8 sps:$4 sm:$0xff]  }
  0x59   :  { %807 = vmatmul.mubr.bf16.gmra.mrb[12].mxu0 %v2176_v31  ;;  %1007 = vmatmul.mubr.bf16.gmra.mrb[12].mxu1 %v2177_v32  ;;  %v2272_v31 = vld [vmem:[%s3217_s0 + $0x130] ss:$8 sps:$4 sm:$0xff]   ;;  %v2273_v32 = vld [vmem:[%s3217_s0 + $0x2c0] ss:$8 sps:$4 sm:$0xff]  }
  0x5a   :  { %814 = vmatprep.mubr.bf16.mxu0 %v2178_v33  ;;  %1014 = vmatprep.mubr.bf16.mxu1 %v2180_v34  ;;  %v2274_v33 = vld [vmem:[%s3217_s0 + $0x144] ss:$8 sps:$4 sm:$0xff]   ;;  %v2276_v34 = vld [vmem:[%s3217_s0 + $0x2d4] ss:$8 sps:$4 sm:$0xff]  }
  0x61   :  { %815 = vmatmul.mubr.bf16.gmra.mrb[16].mxu0 %v2182_v35  ;;  %1015 = vmatmul.mubr.bf16.gmra.mrb[16].mxu1 %v2183_v36  ;;  %v2278_v35 = vld [vmem:[%s3217_s0 + $0x140] ss:$8 sps:$4 sm:$0xff]   ;;  %v2279_v36 = vld [vmem:[%s3217_s0 + $0x2d0] ss:$8 sps:$4 sm:$0xff]  }
  0x62   :  { %822 = vmatprep.mubr.bf16.mxu0 %v2184_v37  ;;  %1022 = vmatprep.mubr.bf16.mxu1 %v2186_v38  ;;  %v2280_v37 = vld [vmem:[%s3217_s0 + $0x154] ss:$8 sps:$4 sm:$0xff]   ;;  %v2282_v38 = vld [vmem:[%s3217_s0 + $0x2e4] ss:$8 sps:$4 sm:$0xff]  }
  0x69   :  { %823 = vmatmul.mubr.bf16.gmra.mrb[20].mxu0 %v2188_v39  ;;  %1023 = vmatmul.mubr.bf16.gmra.mrb[20].mxu1 %v2189_v40  ;;  %v2284_v39 = vld [vmem:[%s3217_s0 + $0x150] ss:$8 sps:$4 sm:$0xff]   ;;  %v2285_v40 = vld [vmem:[%s3217_s0 + $0x2e0] ss:$8 sps:$4 sm:$0xff]  }
  0x6a   :  { %830 = vmatprep.mubr.bf16.mxu0 %v2190_v41  ;;  %1030 = vmatprep.mubr.bf16.mxu1 %v2192_v42  ;;  %v2286_v41 = vld [vmem:[%s3217_s0 + $0x164] ss:$8 sps:$4 sm:$0xff]   ;;  %v2288_v42 = vld [vmem:[%s3217_s0 + $0x2f4] ss:$8 sps:$4 sm:$0xff]  }
  0x71   :  { %831 = vmatmul.mubr.bf16.gmra.mrb[24].mxu0 %v2194_v43  ;;  %1031 = vmatmul.mubr.bf16.gmra.mrb[24].mxu1 %v2195_v44  ;;  %v2290_v43 = vld [vmem:[%s3217_s0 + $0x160] ss:$8 sps:$4 sm:$0xff]   ;;  %v2291_v44 = vld [vmem:[%s3217_s0 + $0x2f0] ss:$8 sps:$4 sm:$0xff]  }
  0x72   :  { %838 = vmatprep.mubr.bf16.mxu0 %v2196_v45  ;;  %1038 = vmatprep.mubr.bf16.mxu1 %v2198_v46  ;;  %v2292_v45 = vld [vmem:[%s3217_s0 + $0x174] ss:$8 sps:$4 sm:$0xff]   ;;  %v2294_v46 = vld [vmem:[%s3217_s0 + $0x304] ss:$8 sps:$4 sm:$0xff]  }
  0x79   :  { %839 = vmatmul.mubr.bf16.gmra.mrb[28].mxu0 %v2200_v47  ;;  %1039 = vmatmul.mubr.bf16.gmra.mrb[28].mxu1 %v2201_v48  ;;  %v2296_v47 = vld [vmem:[%s3217_s0 + $0x170] ss:$8 sps:$4 sm:$0xff]   ;;  %v2297_v48 = vld [vmem:[%s3217_s0 + $0x300] ss:$8 sps:$4 sm:$0xff]  }
  0x7a   :  { %846 = vmatprep.mubr.bf16.mxu0 %v2202_v49  ;;  %1046 = vmatprep.mubr.bf16.mxu1 %v2204_v50  ;;  %v2298_v49 = vld [vmem:[%s3217_s0 + $0x184] ss:$8 sps:$4 sm:$0xff]   ;;  %v2300_v50 = vld [vmem:[%s3217_s0 + $0x314] ss:$8 sps:$4 sm:$0xff]  }
  0x81   :  { %847 = vmatmul.mubr.bf16.gmra.mrb[32].mxu0 %v2206_v51  ;;  %1047 = vmatmul.mubr.bf16.gmra.mrb[32].mxu1 %v2207_v52  ;;  %v2302_v51 = vld [vmem:[%s3217_s0 + $0x180] ss:$8 sps:$4 sm:$0xff]   ;;  %v2303_v52 = vld [vmem:[%s3217_s0 + $0x310] ss:$8 sps:$4 sm:$0xff]  }
  0x82   :  { %854 = vmatprep.mubr.bf16.mxu0 %v2208_v53  ;;  %1054 = vmatprep.mubr.bf16.mxu1 %v2210_v54  ;;  %v2709_v53 = vld [vmem:[%s3218_s2] ss:$0 sm:$0xff] }
  0x89   :  { %855 = vmatmul.mubr.bf16.gmra.mrb[36].mxu0 %v2212_v55  ;;  %1055 = vmatmul.mubr.bf16.gmra.mrb[36].mxu1 %v2213_v56 }
  0x8a   :  { %862 = vmatprep.mubr.bf16.mxu0 %v2214_v57  ;;  %1062 = vmatprep.mubr.bf16.mxu1 %v2216_v58 }
  0x91   :  { %863 = vmatmul.mubr.bf16.gmra.mrb[40].mxu0 %v2218_v59  ;;  %1063 = vmatmul.mubr.bf16.gmra.mrb[40].mxu1 %v2219_v60 }
  0x92   :  { %870 = vmatprep.mubr.bf16.mxu0 %v2220_v61  ;;  %1070 = vmatprep.mubr.bf16.mxu1 %v2222_v62 }
  0x99   :  { %871 = vmatmul.mubr.bf16.gmra.mrb[44].mxu0 %v2224_v63  ;;  %1071 = vmatmul.mubr.bf16.gmra.mrb[44].mxu1 %v2225_v0 }
  0x9a   :  { %878 = vmatprep.mubr.bf16.mxu0 %v2226_v1  ;;  %1078 = vmatprep.mubr.bf16.mxu1 %v2228_v2 }
  0xa1   :  { %879 = vmatmul.mubr.bf16.gmra.mrb[48].mxu0 %v2230_v3  ;;  %1079 = vmatmul.mubr.bf16.gmra.mrb[48].mxu1 %v2231_v4 }
  0xa2   :  { %886 = vmatprep.mubr.bf16.mxu0 %v2232_v5  ;;  %1086 = vmatprep.mubr.bf16.mxu1 %v2234_v6 }
  0xa9   :  { %887 = vmatmul.mubr.bf16.gmra.mrb[52].mxu0 %v2236_v7  ;;  %1087 = vmatmul.mubr.bf16.gmra.mrb[52].mxu1 %v2237_v8 }
  0xaa   :  { %894 = vmatprep.mubr.bf16.mxu0 %v2238_v9  ;;  %1094 = vmatprep.mubr.bf16.mxu1 %v2240_v10 }
  0xb1   :  { %895 = vmatmul.mubr.bf16.gmra.mrb[56].mxu0 %v2242_v11  ;;  %1095 = vmatmul.mubr.bf16.gmra.mrb[56].mxu1 %v2243_v12 }
  0xb2   :  { %902 = vmatprep.mubr.bf16.mxu0 %v2244_v13  ;;  %1102 = vmatprep.mubr.bf16.mxu1 %v2246_v14 }
  0xb9   :  { %903 = vmatmul.mubr.bf16.gmra.mrb[60].mxu0 %v2248_v15  ;;  %1103 = vmatmul.mubr.bf16.gmra.mrb[60].mxu1 %v2249_v16 }
  0xba   :  { %910 = vmatprep.mubr.bf16.mxu0 %v2250_v17  ;;  %1110 = vmatprep.mubr.bf16.mxu1 %v2252_v18 }
  0xc1   :  { %911 = vmatmul.mubr.bf16.gmra.mrb[64].mxu0 %v2254_v19  ;;  %1111 = vmatmul.mubr.bf16.gmra.mrb[64].mxu1 %v2255_v20 }
  0xc2   :  { %918 = vmatprep.mubr.bf16.mxu0 %v2256_v21  ;;  %1118 = vmatprep.mubr.bf16.mxu1 %v2258_v22 }
  0xc9   :  { %919 = vmatmul.mubr.bf16.gmra.mrb[68].mxu0 %v2260_v23  ;;  %1119 = vmatmul.mubr.bf16.gmra.mrb[68].mxu1 %v2261_v24 }
  0xca   :  { %926 = vmatprep.mubr.bf16.mxu0 %v2262_v25  ;;  %1126 = vmatprep.mubr.bf16.mxu1 %v2264_v26 }
  0xd1   :  { %927 = vmatmul.mubr.bf16.gmra.mrb[72].mxu0 %v2266_v27  ;;  %1127 = vmatmul.mubr.bf16.gmra.mrb[72].mxu1 %v2267_v28 }
  0xd2   :  { %934 = vmatprep.mubr.bf16.mxu0 %v2268_v29  ;;  %1134 = vmatprep.mubr.bf16.mxu1 %v2270_v30 }
  0xd9   :  { %935 = vmatmul.mubr.bf16.gmra.mrb[76].mxu0 %v2272_v31  ;;  %1135 = vmatmul.mubr.bf16.gmra.mrb[76].mxu1 %v2273_v32 }
  0xda   :  { %942 = vmatprep.mubr.bf16.mxu0 %v2274_v33  ;;  %1142 = vmatprep.mubr.bf16.mxu1 %v2276_v34 }
  0xe1   :  { %943 = vmatmul.mubr.bf16.gmra.mrb[80].mxu0 %v2278_v35  ;;  %1143 = vmatmul.mubr.bf16.gmra.mrb[80].mxu1 %v2279_v36 }
  0xe2   :  { %950 = vmatprep.mubr.bf16.mxu0 %v2280_v37  ;;  %1150 = vmatprep.mubr.bf16.mxu1 %v2282_v38 }
  0xe9   :  { %951 = vmatmul.mubr.bf16.gmra.mrb[84].mxu0 %v2284_v39  ;;  %1151 = vmatmul.mubr.bf16.gmra.mrb[84].mxu1 %v2285_v40 }
  0xea   :  { %958 = vmatprep.mubr.bf16.mxu0 %v2286_v41  ;;  %1158 = vmatprep.mubr.bf16.mxu1 %v2288_v42 }
  0xf1   :  { %959 = vmatmul.mubr.bf16.gmra.mrb[88].mxu0 %v2290_v43  ;;  %1159 = vmatmul.mubr.bf16.gmra.mrb[88].mxu1 %v2291_v44 }
  0xf2   :  { %966 = vmatprep.mubr.bf16.mxu0 %v2292_v45  ;;  %1166 = vmatprep.mubr.bf16.mxu1 %v2294_v46 }
  0xf9   :  { %967 = vmatmul.mubr.bf16.gmra.mrb[92].mxu0 %v2296_v47  ;;  %1167 = vmatmul.mubr.bf16.gmra.mrb[92].mxu1 %v2297_v48 }
  0xfa   :  { %974 = vmatprep.mubr.bf16.mxu0 %v2298_v49  ;;  %1174 = vmatprep.mubr.bf16.mxu1 %v2300_v50 }
 0x101   :  { %975 = vmatmul.mubr.bf16.gmra.mrb[96].mxu0 %v2302_v51  ;;  %1175 = vmatmul.mubr.bf16.gmra.mrb[96].mxu1 %v2303_v52 }
 0x114   :  { %v784_v54 = vpop.f32.mrb[0].mxu0  ;;  %v984_v55 = vpop.f32.mrb[0].mxu1 }
 0x115   :  { %v785_v56 = vadd.f32 %v2709_v53, %v784_v54  ;;  %v985_v57 = vadd.f32 %v2709_v53, %v984_v55  ;;  %v786_v58 = vpop.f32.mrb[1].mxu0  ;;  %v986_v59 = vpop.f32.mrb[1].mxu1 }
 0x116   :  { %v787_v60 = vpop.f32.mrb[2].mxu0  ;;  %v987_v61 = vpop.f32.mrb[2].mxu1 }
 0x117   :  { %v1183_v62 = vmax.f32 %v785_v56, 0.0  ;;  %v1233_v63 = vmax.f32 %v985_v57, 0.0  ;;  %v788_v0 = vadd.f32 %v2709_v53, %v787_v60  ;;  %v988_v1 = vadd.f32 %v2709_v53, %v987_v61  ;;  %v789_v2 = vpop.f32.mrb[3].mxu0  ;;  %v989_v3 = vpop.f32.mrb[3].mxu1 }
 0x119   :  { %v2005_v4 = vpack.c.bf16 %v1183_v62, %v1183_v62  ;;  %v2055_v5 = vpack.c.bf16 %v1233_v63, %v1233_v63  ;;  %v1184_v6 = vmax.f32 %v788_v0, 0.0  ;;  %v1234_v7 = vmax.f32 %v988_v1, 0.0 }
 0x11b   :  { %1684 = vst.msk [vmem:[%s3219_s3] sm:$0xf] %vm1683_vm0, %v2005_v4  ;;  %1734 = vst.msk [vmem:[%s3219_s3 + $0xc8] sm:$0xf] %vm1683_vm0, %v2055_v5  ;;  %v2006_v8 = vpack.c.bf16 %v1184_v6, %v1184_v6  ;;  %v2056_v9 = vpack.c.bf16 %v1234_v7, %v1234_v7 }
 0x11c   :  { %v792_v10 = vpop.f32.mrb[4].mxu0  ;;  %v992_v11 = vpop.f32.mrb[4].mxu1 }
 0x11d   :  { %1685 = vst.msk [vmem:[%s3219_s3 + $0x4] sm:$0xf] %vm1683_vm0, %v2006_v8  ;;  %1735 = vst.msk [vmem:[%s3219_s3 + $0xcc] sm:$0xf] %vm1683_vm0, %v2056_v9  ;;  %v793_v12 = vadd.f32 %v2709_v53, %v792_v10  ;;  %v993_v13 = vadd.f32 %v2709_v53, %v992_v11  ;;  %v794_v14 = vpop.f32.mrb[5].mxu0  ;;  %v994_v15 = vpop.f32.mrb[5].mxu1 }
 0x11e   :  { %v795_v16 = vpop.f32.mrb[6].mxu0  ;;  %v995_v17 = vpop.f32.mrb[6].mxu1 }
 0x11f   :  { %v1185_v18 = vmax.f32 %v793_v12, 0.0  ;;  %v1235_v19 = vmax.f32 %v993_v13, 0.0  ;;  %v796_v20 = vadd.f32 %v2709_v53, %v795_v16  ;;  %v996_v21 = vadd.f32 %v2709_v53, %v995_v17  ;;  %v797_v22 = vpop.f32.mrb[7].mxu0  ;;  %v997_v23 = vpop.f32.mrb[7].mxu1 }
 0x121   :  { %v2007_v24 = vpack.c.bf16 %v1185_v18, %v1185_v18  ;;  %v2057_v25 = vpack.c.bf16 %v1235_v19, %v1235_v19  ;;  %v1186_v26 = vmax.f32 %v796_v20, 0.0  ;;  %v1236_v27 = vmax.f32 %v996_v21, 0.0 }
 0x123   :  { %1686 = vst.msk [vmem:[%s3219_s3 + $0x8] sm:$0xf] %vm1683_vm0, %v2007_v24  ;;  %1736 = vst.msk [vmem:[%s3219_s3 + $0xd0] sm:$0xf] %vm1683_vm0, %v2057_v25  ;;  %v2008_v28 = vpack.c.bf16 %v1186_v26, %v1186_v26  ;;  %v2058_v29 = vpack.c.bf16 %v1236_v27, %v1236_v27 }
 0x124   :  { %v800_v30 = vpop.f32.mrb[8].mxu0  ;;  %v1000_v31 = vpop.f32.mrb[8].mxu1 }
 0x125   :  { %1687 = vst.msk [vmem:[%s3219_s3 + $0xc] sm:$0xf] %vm1683_vm0, %v2008_v28  ;;  %1737 = vst.msk [vmem:[%s3219_s3 + $0xd4] sm:$0xf] %vm1683_vm0, %v2058_v29  ;;  %v801_v32 = vadd.f32 %v2709_v53, %v800_v30  ;;  %v1001_v33 = vadd.f32 %v2709_v53, %v1000_v31  ;;  %v802_v34 = vpop.f32.mrb[9].mxu0  ;;  %v1002_v35 = vpop.f32.mrb[9].mxu1 }
 0x126   :  { %v803_v36 = vpop.f32.mrb[10].mxu0  ;;  %v1003_v37 = vpop.f32.mrb[10].mxu1 }
 0x127   :  { %v1187_v38 = vmax.f32 %v801_v32, 0.0  ;;  %v1237_v39 = vmax.f32 %v1001_v33, 0.0  ;;  %v804_v40 = vadd.f32 %v2709_v53, %v803_v36  ;;  %v1004_v41 = vadd.f32 %v2709_v53, %v1003_v37  ;;  %v805_v42 = vpop.f32.mrb[11].mxu0  ;;  %v1005_v43 = vpop.f32.mrb[11].mxu1 }
 0x129   :  { %v2009_v44 = vpack.c.bf16 %v1187_v38, %v1187_v38  ;;  %v2059_v45 = vpack.c.bf16 %v1237_v39, %v1237_v39  ;;  %v1188_v46 = vmax.f32 %v804_v40, 0.0  ;;  %v1238_v47 = vmax.f32 %v1004_v41, 0.0 }
 0x12b   :  { %1688 = vst.msk [vmem:[%s3219_s3 + $0x10] sm:$0xf] %vm1683_vm0, %v2009_v44  ;;  %1738 = vst.msk [vmem:[%s3219_s3 + $0xd8] sm:$0xf] %vm1683_vm0, %v2059_v45  ;;  %v2010_v48 = vpack.c.bf16 %v1188_v46, %v1188_v46  ;;  %v2060_v49 = vpack.c.bf16 %v1238_v47, %v1238_v47 }
 0x12c   :  { %v808_v50 = vpop.f32.mrb[12].mxu0  ;;  %v1008_v51 = vpop.f32.mrb[12].mxu1 }
 0x12d   :  { %1689 = vst.msk [vmem:[%s3219_s3 + $0x14] sm:$0xf] %vm1683_vm0, %v2010_v48  ;;  %1739 = vst.msk [vmem:[%s3219_s3 + $0xdc] sm:$0xf] %vm1683_vm0, %v2060_v49  ;;  %v809_v52 = vadd.f32 %v2709_v53, %v808_v50  ;;  %v1009_v54 = vadd.f32 %v2709_v53, %v1008_v51  ;;  %v810_v55 = vpop.f32.mrb[13].mxu0  ;;  %v1010_v56 = vpop.f32.mrb[13].mxu1 }
 0x12e   :  { %v811_v57 = vpop.f32.mrb[14].mxu0  ;;  %v1011_v58 = vpop.f32.mrb[14].mxu1 }
 0x12f   :  { %v1189_v59 = vmax.f32 %v809_v52, 0.0  ;;  %v1239_v60 = vmax.f32 %v1009_v54, 0.0  ;;  %v812_v61 = vadd.f32 %v2709_v53, %v811_v57  ;;  %v1012_v62 = vadd.f32 %v2709_v53, %v1011_v58  ;;  %v813_v63 = vpop.f32.mrb[15].mxu0  ;;  %v1013_v0 = vpop.f32.mrb[15].mxu1 }
 0x131   :  { %v2011_v1 = vpack.c.bf16 %v1189_v59, %v1189_v59  ;;  %v2061_v2 = vpack.c.bf16 %v1239_v60, %v1239_v60  ;;  %v1190_v3 = vmax.f32 %v812_v61, 0.0  ;;  %v1240_v4 = vmax.f32 %v1012_v62, 0.0 }
 0x133   :  { %1690 = vst.msk [vmem:[%s3219_s3 + $0x18] sm:$0xf] %vm1683_vm0, %v2011_v1  ;;  %1740 = vst.msk [vmem:[%s3219_s3 + $0xe0] sm:$0xf] %vm1683_vm0, %v2061_v2  ;;  %v2012_v5 = vpack.c.bf16 %v1190_v3, %v1190_v3  ;;  %v2062_v6 = vpack.c.bf16 %v1240_v4, %v1240_v4 }
 0x134   :  { %v816_v7 = vpop.f32.mrb[16].mxu0  ;;  %v1016_v8 = vpop.f32.mrb[16].mxu1 }
 0x135   :  { %1691 = vst.msk [vmem:[%s3219_s3 + $0x1c] sm:$0xf] %vm1683_vm0, %v2012_v5  ;;  %1741 = vst.msk [vmem:[%s3219_s3 + $0xe4] sm:$0xf] %vm1683_vm0, %v2062_v6  ;;  %v817_v9 = vadd.f32 %v2709_v53, %v816_v7  ;;  %v1017_v10 = vadd.f32 %v2709_v53, %v1016_v8  ;;  %v818_v11 = vpop.f32.mrb[17].mxu0  ;;  %v1018_v12 = vpop.f32.mrb[17].mxu1 }
 0x136   :  { %v819_v13 = vpop.f32.mrb[18].mxu0  ;;  %v1019_v14 = vpop.f32.mrb[18].mxu1 }
 0x137   :  { %v1191_v15 = vmax.f32 %v817_v9, 0.0  ;;  %v1241_v16 = vmax.f32 %v1017_v10, 0.0  ;;  %v820_v17 = vadd.f32 %v2709_v53, %v819_v13  ;;  %v1020_v18 = vadd.f32 %v2709_v53, %v1019_v14  ;;  %v821_v19 = vpop.f32.mrb[19].mxu0  ;;  %v1021_v20 = vpop.f32.mrb[19].mxu1 }
 0x139   :  { %v2013_v21 = vpack.c.bf16 %v1191_v15, %v1191_v15  ;;  %v2063_v22 = vpack.c.bf16 %v1241_v16, %v1241_v16  ;;  %v1192_v23 = vmax.f32 %v820_v17, 0.0  ;;  %v1242_v24 = vmax.f32 %v1020_v18, 0.0 }
 0x13b   :  { %1692 = vst.msk [vmem:[%s3219_s3 + $0x20] sm:$0xf] %vm1683_vm0, %v2013_v21  ;;  %1742 = vst.msk [vmem:[%s3219_s3 + $0xe8] sm:$0xf] %vm1683_vm0, %v2063_v22  ;;  %v2014_v25 = vpack.c.bf16 %v1192_v23, %v1192_v23  ;;  %v2064_v26 = vpack.c.bf16 %v1242_v24, %v1242_v24 }
 0x13c   :  { %v824_v27 = vpop.f32.mrb[20].mxu0  ;;  %v1024_v28 = vpop.f32.mrb[20].mxu1 }
 0x13d   :  { %1693 = vst.msk [vmem:[%s3219_s3 + $0x24] sm:$0xf] %vm1683_vm0, %v2014_v25  ;;  %1743 = vst.msk [vmem:[%s3219_s3 + $0xec] sm:$0xf] %vm1683_vm0, %v2064_v26  ;;  %v825_v29 = vadd.f32 %v2709_v53, %v824_v27  ;;  %v1025_v30 = vadd.f32 %v2709_v53, %v1024_v28  ;;  %v826_v31 = vpop.f32.mrb[21].mxu0  ;;  %v1026_v32 = vpop.f32.mrb[21].mxu1 }
 0x13e   :  { %v827_v33 = vpop.f32.mrb[22].mxu0  ;;  %v1027_v34 = vpop.f32.mrb[22].mxu1 }
 0x13f   :  { %v1193_v35 = vmax.f32 %v825_v29, 0.0  ;;  %v1243_v36 = vmax.f32 %v1025_v30, 0.0  ;;  %v828_v37 = vadd.f32 %v2709_v53, %v827_v33  ;;  %v1028_v38 = vadd.f32 %v2709_v53, %v1027_v34  ;;  %v829_v39 = vpop.f32.mrb[23].mxu0  ;;  %v1029_v40 = vpop.f32.mrb[23].mxu1 }
 0x141   :  { %v2015_v41 = vpack.c.bf16 %v1193_v35, %v1193_v35  ;;  %v2065_v42 = vpack.c.bf16 %v1243_v36, %v1243_v36  ;;  %v1194_v43 = vmax.f32 %v828_v37, 0.0  ;;  %v1244_v44 = vmax.f32 %v1028_v38, 0.0 }
 0x143   :  { %1694 = vst.msk [vmem:[%s3219_s3 + $0x28] sm:$0xf] %vm1683_vm0, %v2015_v41  ;;  %1744 = vst.msk [vmem:[%s3219_s3 + $0xf0] sm:$0xf] %vm1683_vm0, %v2065_v42  ;;  %v2016_v45 = vpack.c.bf16 %v1194_v43, %v1194_v43  ;;  %v2066_v46 = vpack.c.bf16 %v1244_v44, %v1244_v44 }
 0x144   :  { %v832_v47 = vpop.f32.mrb[24].mxu0  ;;  %v1032_v48 = vpop.f32.mrb[24].mxu1 }
 0x145   :  { %1695 = vst.msk [vmem:[%s3219_s3 + $0x2c] sm:$0xf] %vm1683_vm0, %v2016_v45  ;;  %1745 = vst.msk [vmem:[%s3219_s3 + $0xf4] sm:$0xf] %vm1683_vm0, %v2066_v46  ;;  %v833_v49 = vadd.f32 %v2709_v53, %v832_v47  ;;  %v1033_v50 = vadd.f32 %v2709_v53, %v1032_v48  ;;  %v834_v51 = vpop.f32.mrb[25].mxu0  ;;  %v1034_v52 = vpop.f32.mrb[25].mxu1 }
 0x146   :  { %v835_v54 = vpop.f32.mrb[26].mxu0  ;;  %v1035_v55 = vpop.f32.mrb[26].mxu1 }
 0x147   :  { %v1195_v56 = vmax.f32 %v833_v49, 0.0  ;;  %v1245_v57 = vmax.f32 %v1033_v50, 0.0  ;;  %v836_v58 = vadd.f32 %v2709_v53, %v835_v54  ;;  %v1036_v59 = vadd.f32 %v2709_v53, %v1035_v55  ;;  %v837_v60 = vpop.f32.mrb[27].mxu0  ;;  %v1037_v61 = vpop.f32.mrb[27].mxu1 }
 0x149   :  { %v2017_v62 = vpack.c.bf16 %v1195_v56, %v1195_v56  ;;  %v2067_v63 = vpack.c.bf16 %v1245_v57, %v1245_v57  ;;  %v1196_v0 = vmax.f32 %v836_v58, 0.0  ;;  %v1246_v1 = vmax.f32 %v1036_v59, 0.0 }
 0x14b   :  { %1696 = vst.msk [vmem:[%s3219_s3 + $0x30] sm:$0xf] %vm1683_vm0, %v2017_v62  ;;  %1746 = vst.msk [vmem:[%s3219_s3 + $0xf8] sm:$0xf] %vm1683_vm0, %v2067_v63  ;;  %v2018_v2 = vpack.c.bf16 %v1196_v0, %v1196_v0  ;;  %v2068_v3 = vpack.c.bf16 %v1246_v1, %v1246_v1 }
 0x14c   :  { %v840_v4 = vpop.f32.mrb[28].mxu0  ;;  %v1040_v5 = vpop.f32.mrb[28].mxu1 }
 0x14d   :  { %1697 = vst.msk [vmem:[%s3219_s3 + $0x34] sm:$0xf] %vm1683_vm0, %v2018_v2  ;;  %1747 = vst.msk [vmem:[%s3219_s3 + $0xfc] sm:$0xf] %vm1683_vm0, %v2068_v3  ;;  %v841_v6 = vadd.f32 %v2709_v53, %v840_v4  ;;  %v1041_v7 = vadd.f32 %v2709_v53, %v1040_v5  ;;  %v842_v8 = vpop.f32.mrb[29].mxu0  ;;  %v1042_v9 = vpop.f32.mrb[29].mxu1 }
 0x14e   :  { %v843_v10 = vpop.f32.mrb[30].mxu0  ;;  %v1043_v11 = vpop.f32.mrb[30].mxu1 }
 0x14f   :  { %v1197_v12 = vmax.f32 %v841_v6, 0.0  ;;  %v1247_v13 = vmax.f32 %v1041_v7, 0.0  ;;  %v844_v14 = vadd.f32 %v2709_v53, %v843_v10  ;;  %v1044_v15 = vadd.f32 %v2709_v53, %v1043_v11  ;;  %v845_v16 = vpop.f32.mrb[31].mxu0  ;;  %v1045_v17 = vpop.f32.mrb[31].mxu1 }
 0x151   :  { %v2019_v18 = vpack.c.bf16 %v1197_v12, %v1197_v12  ;;  %v2069_v19 = vpack.c.bf16 %v1247_v13, %v1247_v13  ;;  %v1198_v20 = vmax.f32 %v844_v14, 0.0  ;;  %v1248_v21 = vmax.f32 %v1044_v15, 0.0 }
 0x153   :  { %1698 = vst.msk [vmem:[%s3219_s3 + $0x38] sm:$0xf] %vm1683_vm0, %v2019_v18  ;;  %1748 = vst.msk [vmem:[%s3219_s3 + $0x100] sm:$0xf] %vm1683_vm0, %v2069_v19  ;;  %v2020_v22 = vpack.c.bf16 %v1198_v20, %v1198_v20  ;;  %v2070_v23 = vpack.c.bf16 %v1248_v21, %v1248_v21 }
 0x154   :  { %v848_v24 = vpop.f32.mrb[32].mxu0  ;;  %v1048_v25 = vpop.f32.mrb[32].mxu1 }
 0x155   :  { %1699 = vst.msk [vmem:[%s3219_s3 + $0x3c] sm:$0xf] %vm1683_vm0, %v2020_v22  ;;  %1749 = vst.msk [vmem:[%s3219_s3 + $0x104] sm:$0xf] %vm1683_vm0, %v2070_v23  ;;  %v849_v26 = vadd.f32 %v2709_v53, %v848_v24  ;;  %v1049_v27 = vadd.f32 %v2709_v53, %v1048_v25  ;;  %v850_v28 = vpop.f32.mrb[33].mxu0  ;;  %v1050_v29 = vpop.f32.mrb[33].mxu1 }
 0x156   :  { %v851_v30 = vpop.f32.mrb[34].mxu0  ;;  %v1051_v31 = vpop.f32.mrb[34].mxu1 }
 0x157   :  { %v1199_v32 = vmax.f32 %v849_v26, 0.0  ;;  %v1249_v33 = vmax.f32 %v1049_v27, 0.0  ;;  %v852_v34 = vadd.f32 %v2709_v53, %v851_v30  ;;  %v1052_v35 = vadd.f32 %v2709_v53, %v1051_v31  ;;  %v853_v36 = vpop.f32.mrb[35].mxu0  ;;  %v1053_v37 = vpop.f32.mrb[35].mxu1 }
 0x159   :  { %v2021_v38 = vpack.c.bf16 %v1199_v32, %v1199_v32  ;;  %v2071_v39 = vpack.c.bf16 %v1249_v33, %v1249_v33  ;;  %v1200_v40 = vmax.f32 %v852_v34, 0.0  ;;  %v1250_v41 = vmax.f32 %v1052_v35, 0.0 }
 0x15b   :  { %1700 = vst.msk [vmem:[%s3219_s3 + $0x40] sm:$0xf] %vm1683_vm0, %v2021_v38  ;;  %1750 = vst.msk [vmem:[%s3219_s3 + $0x108] sm:$0xf] %vm1683_vm0, %v2071_v39  ;;  %v2022_v42 = vpack.c.bf16 %v1200_v40, %v1200_v40  ;;  %v2072_v43 = vpack.c.bf16 %v1250_v41, %v1250_v41 }
 0x15c   :  { %v856_v44 = vpop.f32.mrb[36].mxu0  ;;  %v1056_v45 = vpop.f32.mrb[36].mxu1 }
 0x15d   :  { %1701 = vst.msk [vmem:[%s3219_s3 + $0x44] sm:$0xf] %vm1683_vm0, %v2022_v42  ;;  %1751 = vst.msk [vmem:[%s3219_s3 + $0x10c] sm:$0xf] %vm1683_vm0, %v2072_v43  ;;  %v857_v46 = vadd.f32 %v2709_v53, %v856_v44  ;;  %v1057_v47 = vadd.f32 %v2709_v53, %v1056_v45  ;;  %v858_v48 = vpop.f32.mrb[37].mxu0  ;;  %v1058_v49 = vpop.f32.mrb[37].mxu1 }
 0x15e   :  { %v859_v50 = vpop.f32.mrb[38].mxu0  ;;  %v1059_v51 = vpop.f32.mrb[38].mxu1 }
 0x15f   :  { %v1201_v52 = vmax.f32 %v857_v46, 0.0  ;;  %v1251_v54 = vmax.f32 %v1057_v47, 0.0  ;;  %v860_v55 = vadd.f32 %v2709_v53, %v859_v50  ;;  %v1060_v56 = vadd.f32 %v2709_v53, %v1059_v51  ;;  %v861_v57 = vpop.f32.mrb[39].mxu0  ;;  %v1061_v58 = vpop.f32.mrb[39].mxu1 }
 0x161   :  { %v2023_v59 = vpack.c.bf16 %v1201_v52, %v1201_v52  ;;  %v2073_v60 = vpack.c.bf16 %v1251_v54, %v1251_v54  ;;  %v1202_v61 = vmax.f32 %v860_v55, 0.0  ;;  %v1252_v62 = vmax.f32 %v1060_v56, 0.0 }
 0x163   :  { %1702 = vst.msk [vmem:[%s3219_s3 + $0x48] sm:$0xf] %vm1683_vm0, %v2023_v59  ;;  %1752 = vst.msk [vmem:[%s3219_s3 + $0x110] sm:$0xf] %vm1683_vm0, %v2073_v60  ;;  %v2024_v63 = vpack.c.bf16 %v1202_v61, %v1202_v61  ;;  %v2074_v0 = vpack.c.bf16 %v1252_v62, %v1252_v62 }
 0x164   :  { %v864_v1 = vpop.f32.mrb[40].mxu0  ;;  %v1064_v2 = vpop.f32.mrb[40].mxu1 }
 0x165   :  { %1703 = vst.msk [vmem:[%s3219_s3 + $0x4c] sm:$0xf] %vm1683_vm0, %v2024_v63  ;;  %1753 = vst.msk [vmem:[%s3219_s3 + $0x114] sm:$0xf] %vm1683_vm0, %v2074_v0  ;;  %v865_v3 = vadd.f32 %v2709_v53, %v864_v1  ;;  %v1065_v4 = vadd.f32 %v2709_v53, %v1064_v2  ;;  %v866_v5 = vpop.f32.mrb[41].mxu0  ;;  %v1066_v6 = vpop.f32.mrb[41].mxu1 }
 0x166   :  { %v867_v7 = vpop.f32.mrb[42].mxu0  ;;  %v1067_v8 = vpop.f32.mrb[42].mxu1 }
 0x167   :  { %v1203_v9 = vmax.f32 %v865_v3, 0.0  ;;  %v1253_v10 = vmax.f32 %v1065_v4, 0.0  ;;  %v868_v11 = vadd.f32 %v2709_v53, %v867_v7  ;;  %v1068_v12 = vadd.f32 %v2709_v53, %v1067_v8  ;;  %v869_v13 = vpop.f32.mrb[43].mxu0  ;;  %v1069_v14 = vpop.f32.mrb[43].mxu1 }
 0x169   :  { %v2025_v15 = vpack.c.bf16 %v1203_v9, %v1203_v9  ;;  %v2075_v16 = vpack.c.bf16 %v1253_v10, %v1253_v10  ;;  %v1204_v17 = vmax.f32 %v868_v11, 0.0  ;;  %v1254_v18 = vmax.f32 %v1068_v12, 0.0 }
 0x16b   :  { %1704 = vst.msk [vmem:[%s3219_s3 + $0x50] sm:$0xf] %vm1683_vm0, %v2025_v15  ;;  %1754 = vst.msk [vmem:[%s3219_s3 + $0x118] sm:$0xf] %vm1683_vm0, %v2075_v16  ;;  %v2026_v19 = vpack.c.bf16 %v1204_v17, %v1204_v17  ;;  %v2076_v20 = vpack.c.bf16 %v1254_v18, %v1254_v18 }
 0x16c   :  { %v872_v21 = vpop.f32.mrb[44].mxu0  ;;  %v1072_v22 = vpop.f32.mrb[44].mxu1 }
 0x16d   :  { %1705 = vst.msk [vmem:[%s3219_s3 + $0x54] sm:$0xf] %vm1683_vm0, %v2026_v19  ;;  %1755 = vst.msk [vmem:[%s3219_s3 + $0x11c] sm:$0xf] %vm1683_vm0, %v2076_v20  ;;  %v873_v23 = vadd.f32 %v2709_v53, %v872_v21  ;;  %v1073_v24 = vadd.f32 %v2709_v53, %v1072_v22  ;;  %v874_v25 = vpop.f32.mrb[45].mxu0  ;;  %v1074_v26 = vpop.f32.mrb[45].mxu1 }
 0x16e   :  { %v875_v27 = vpop.f32.mrb[46].mxu0  ;;  %v1075_v28 = vpop.f32.mrb[46].mxu1 }
 0x16f   :  { %v1205_v29 = vmax.f32 %v873_v23, 0.0  ;;  %v1255_v30 = vmax.f32 %v1073_v24, 0.0  ;;  %v876_v31 = vadd.f32 %v2709_v53, %v875_v27  ;;  %v1076_v32 = vadd.f32 %v2709_v53, %v1075_v28  ;;  %v877_v33 = vpop.f32.mrb[47].mxu0  ;;  %v1077_v34 = vpop.f32.mrb[47].mxu1 }
 0x171   :  { %v2027_v35 = vpack.c.bf16 %v1205_v29, %v1205_v29  ;;  %v2077_v36 = vpack.c.bf16 %v1255_v30, %v1255_v30  ;;  %v1206_v37 = vmax.f32 %v876_v31, 0.0  ;;  %v1256_v38 = vmax.f32 %v1076_v32, 0.0 }
 0x173   :  { %1706 = vst.msk [vmem:[%s3219_s3 + $0x58] sm:$0xf] %vm1683_vm0, %v2027_v35  ;;  %1756 = vst.msk [vmem:[%s3219_s3 + $0x120] sm:$0xf] %vm1683_vm0, %v2077_v36  ;;  %v2028_v39 = vpack.c.bf16 %v1206_v37, %v1206_v37  ;;  %v2078_v40 = vpack.c.bf16 %v1256_v38, %v1256_v38 }
 0x174   :  { %v880_v41 = vpop.f32.mrb[48].mxu0  ;;  %v1080_v42 = vpop.f32.mrb[48].mxu1 }
 0x175   :  { %1707 = vst.msk [vmem:[%s3219_s3 + $0x5c] sm:$0xf] %vm1683_vm0, %v2028_v39  ;;  %1757 = vst.msk [vmem:[%s3219_s3 + $0x124] sm:$0xf] %vm1683_vm0, %v2078_v40  ;;  %v881_v43 = vadd.f32 %v2709_v53, %v880_v41  ;;  %v1081_v44 = vadd.f32 %v2709_v53, %v1080_v42  ;;  %v882_v45 = vpop.f32.mrb[49].mxu0  ;;  %v1082_v46 = vpop.f32.mrb[49].mxu1 }
 0x176   :  { %v883_v47 = vpop.f32.mrb[50].mxu0  ;;  %v1083_v48 = vpop.f32.mrb[50].mxu1 }
 0x177   :  { %v1207_v49 = vmax.f32 %v881_v43, 0.0  ;;  %v1257_v50 = vmax.f32 %v1081_v44, 0.0  ;;  %v884_v51 = vadd.f32 %v2709_v53, %v883_v47  ;;  %v1084_v52 = vadd.f32 %v2709_v53, %v1083_v48  ;;  %v885_v54 = vpop.f32.mrb[51].mxu0  ;;  %v1085_v55 = vpop.f32.mrb[51].mxu1 }
 0x179   :  { %v2029_v56 = vpack.c.bf16 %v1207_v49, %v1207_v49  ;;  %v2079_v57 = vpack.c.bf16 %v1257_v50, %v1257_v50  ;;  %v1208_v58 = vmax.f32 %v884_v51, 0.0  ;;  %v1258_v59 = vmax.f32 %v1084_v52, 0.0 }
 0x17b   :  { %1708 = vst.msk [vmem:[%s3219_s3 + $0x60] sm:$0xf] %vm1683_vm0, %v2029_v56  ;;  %1758 = vst.msk [vmem:[%s3219_s3 + $0x128] sm:$0xf] %vm1683_vm0, %v2079_v57  ;;  %v2030_v60 = vpack.c.bf16 %v1208_v58, %v1208_v58  ;;  %v2080_v61 = vpack.c.bf16 %v1258_v59, %v1258_v59 }
 0x17c   :  { %v888_v62 = vpop.f32.mrb[52].mxu0  ;;  %v1088_v63 = vpop.f32.mrb[52].mxu1 }
 0x17d   :  { %1709 = vst.msk [vmem:[%s3219_s3 + $0x64] sm:$0xf] %vm1683_vm0, %v2030_v60  ;;  %1759 = vst.msk [vmem:[%s3219_s3 + $0x12c] sm:$0xf] %vm1683_vm0, %v2080_v61  ;;  %v889_v0 = vadd.f32 %v2709_v53, %v888_v62  ;;  %v1089_v1 = vadd.f32 %v2709_v53, %v1088_v63  ;;  %v890_v2 = vpop.f32.mrb[53].mxu0  ;;  %v1090_v3 = vpop.f32.mrb[53].mxu1 }
 0x17e   :  { %v891_v4 = vpop.f32.mrb[54].mxu0  ;;  %v1091_v5 = vpop.f32.mrb[54].mxu1 }
 0x17f   :  { %v1209_v6 = vmax.f32 %v889_v0, 0.0  ;;  %v1259_v7 = vmax.f32 %v1089_v1, 0.0  ;;  %v892_v8 = vadd.f32 %v2709_v53, %v891_v4  ;;  %v1092_v9 = vadd.f32 %v2709_v53, %v1091_v5  ;;  %v893_v10 = vpop.f32.mrb[55].mxu0  ;;  %v1093_v11 = vpop.f32.mrb[55].mxu1 }
 0x181   :  { %v2031_v12 = vpack.c.bf16 %v1209_v6, %v1209_v6  ;;  %v2081_v13 = vpack.c.bf16 %v1259_v7, %v1259_v7  ;;  %v1210_v14 = vmax.f32 %v892_v8, 0.0  ;;  %v1260_v15 = vmax.f32 %v1092_v9, 0.0 }
 0x183   :  { %1710 = vst.msk [vmem:[%s3219_s3 + $0x68] sm:$0xf] %vm1683_vm0, %v2031_v12  ;;  %1760 = vst.msk [vmem:[%s3219_s3 + $0x130] sm:$0xf] %vm1683_vm0, %v2081_v13  ;;  %v2032_v16 = vpack.c.bf16 %v1210_v14, %v1210_v14  ;;  %v2082_v17 = vpack.c.bf16 %v1260_v15, %v1260_v15 }
 0x184   :  { %v896_v18 = vpop.f32.mrb[56].mxu0  ;;  %v1096_v19 = vpop.f32.mrb[56].mxu1 }
 0x185   :  { %1711 = vst.msk [vmem:[%s3219_s3 + $0x6c] sm:$0xf] %vm1683_vm0, %v2032_v16  ;;  %1761 = vst.msk [vmem:[%s3219_s3 + $0x134] sm:$0xf] %vm1683_vm0, %v2082_v17  ;;  %v897_v20 = vadd.f32 %v2709_v53, %v896_v18  ;;  %v1097_v21 = vadd.f32 %v2709_v53, %v1096_v19  ;;  %v898_v22 = vpop.f32.mrb[57].mxu0  ;;  %v1098_v23 = vpop.f32.mrb[57].mxu1 }
 0x186   :  { %v899_v24 = vpop.f32.mrb[58].mxu0  ;;  %v1099_v25 = vpop.f32.mrb[58].mxu1 }
 0x187   :  { %v1211_v26 = vmax.f32 %v897_v20, 0.0  ;;  %v1261_v27 = vmax.f32 %v1097_v21, 0.0  ;;  %v900_v28 = vadd.f32 %v2709_v53, %v899_v24  ;;  %v1100_v29 = vadd.f32 %v2709_v53, %v1099_v25  ;;  %v901_v30 = vpop.f32.mrb[59].mxu0  ;;  %v1101_v31 = vpop.f32.mrb[59].mxu1 }
 0x189   :  { %v2033_v32 = vpack.c.bf16 %v1211_v26, %v1211_v26  ;;  %v2083_v33 = vpack.c.bf16 %v1261_v27, %v1261_v27  ;;  %v1212_v34 = vmax.f32 %v900_v28, 0.0  ;;  %v1262_v35 = vmax.f32 %v1100_v29, 0.0 }
 0x18b   :  { %1712 = vst.msk [vmem:[%s3219_s3 + $0x70] sm:$0xf] %vm1683_vm0, %v2033_v32  ;;  %1762 = vst.msk [vmem:[%s3219_s3 + $0x138] sm:$0xf] %vm1683_vm0, %v2083_v33  ;;  %v2034_v36 = vpack.c.bf16 %v1212_v34, %v1212_v34  ;;  %v2084_v37 = vpack.c.bf16 %v1262_v35, %v1262_v35 }
 0x18c   :  { %v904_v38 = vpop.f32.mrb[60].mxu0  ;;  %v1104_v39 = vpop.f32.mrb[60].mxu1 }
 0x18d   :  { %1713 = vst.msk [vmem:[%s3219_s3 + $0x74] sm:$0xf] %vm1683_vm0, %v2034_v36  ;;  %1763 = vst.msk [vmem:[%s3219_s3 + $0x13c] sm:$0xf] %vm1683_vm0, %v2084_v37  ;;  %v905_v40 = vadd.f32 %v2709_v53, %v904_v38  ;;  %v1105_v41 = vadd.f32 %v2709_v53, %v1104_v39  ;;  %v906_v42 = vpop.f32.mrb[61].mxu0  ;;  %v1106_v43 = vpop.f32.mrb[61].mxu1 }
 0x18e   :  { %v907_v44 = vpop.f32.mrb[62].mxu0  ;;  %v1107_v45 = vpop.f32.mrb[62].mxu1 }
 0x18f   :  { %v1213_v46 = vmax.f32 %v905_v40, 0.0  ;;  %v1263_v47 = vmax.f32 %v1105_v41, 0.0  ;;  %v908_v48 = vadd.f32 %v2709_v53, %v907_v44  ;;  %v1108_v49 = vadd.f32 %v2709_v53, %v1107_v45  ;;  %v909_v50 = vpop.f32.mrb[63].mxu0  ;;  %v1109_v51 = vpop.f32.mrb[63].mxu1 }
 0x191   :  { %v2035_v52 = vpack.c.bf16 %v1213_v46, %v1213_v46  ;;  %v2085_v54 = vpack.c.bf16 %v1263_v47, %v1263_v47  ;;  %v1214_v55 = vmax.f32 %v908_v48, 0.0  ;;  %v1264_v56 = vmax.f32 %v1108_v49, 0.0 }
 0x193   :  { %1714 = vst.msk [vmem:[%s3219_s3 + $0x78] sm:$0xf] %vm1683_vm0, %v2035_v52  ;;  %1764 = vst.msk [vmem:[%s3219_s3 + $0x140] sm:$0xf] %vm1683_vm0, %v2085_v54  ;;  %v2036_v57 = vpack.c.bf16 %v1214_v55, %v1214_v55  ;;  %v2086_v58 = vpack.c.bf16 %v1264_v56, %v1264_v56 }
 0x194   :  { %v912_v59 = vpop.f32.mrb[64].mxu0  ;;  %v1112_v60 = vpop.f32.mrb[64].mxu1 }
 0x195   :  { %1715 = vst.msk [vmem:[%s3219_s3 + $0x7c] sm:$0xf] %vm1683_vm0, %v2036_v57  ;;  %1765 = vst.msk [vmem:[%s3219_s3 + $0x144] sm:$0xf] %vm1683_vm0, %v2086_v58  ;;  %v913_v61 = vadd.f32 %v2709_v53, %v912_v59  ;;  %v1113_v62 = vadd.f32 %v2709_v53, %v1112_v60  ;;  %v914_v63 = vpop.f32.mrb[65].mxu0  ;;  %v1114_v0 = vpop.f32.mrb[65].mxu1 }
 0x196   :  { %v915_v1 = vpop.f32.mrb[66].mxu0  ;;  %v1115_v2 = vpop.f32.mrb[66].mxu1 }
 0x197   :  { %v1215_v3 = vmax.f32 %v913_v61, 0.0  ;;  %v1265_v4 = vmax.f32 %v1113_v62, 0.0  ;;  %v916_v5 = vadd.f32 %v2709_v53, %v915_v1  ;;  %v1116_v6 = vadd.f32 %v2709_v53, %v1115_v2  ;;  %v917_v7 = vpop.f32.mrb[67].mxu0  ;;  %v1117_v8 = vpop.f32.mrb[67].mxu1 }
 0x199   :  { %v2037_v9 = vpack.c.bf16 %v1215_v3, %v1215_v3  ;;  %v2087_v10 = vpack.c.bf16 %v1265_v4, %v1265_v4  ;;  %v1216_v11 = vmax.f32 %v916_v5, 0.0  ;;  %v1266_v12 = vmax.f32 %v1116_v6, 0.0 }
 0x19b   :  { %1716 = vst.msk [vmem:[%s3219_s3 + $0x80] sm:$0xf] %vm1683_vm0, %v2037_v9  ;;  %1766 = vst.msk [vmem:[%s3219_s3 + $0x148] sm:$0xf] %vm1683_vm0, %v2087_v10  ;;  %v2038_v13 = vpack.c.bf16 %v1216_v11, %v1216_v11  ;;  %v2088_v14 = vpack.c.bf16 %v1266_v12, %v1266_v12 }
 0x19c   :  { %v920_v15 = vpop.f32.mrb[68].mxu0  ;;  %v1120_v16 = vpop.f32.mrb[68].mxu1 }
 0x19d   :  { %1717 = vst.msk [vmem:[%s3219_s3 + $0x84] sm:$0xf] %vm1683_vm0, %v2038_v13  ;;  %1767 = vst.msk [vmem:[%s3219_s3 + $0x14c] sm:$0xf] %vm1683_vm0, %v2088_v14  ;;  %v921_v17 = vadd.f32 %v2709_v53, %v920_v15  ;;  %v1121_v18 = vadd.f32 %v2709_v53, %v1120_v16  ;;  %v922_v19 = vpop.f32.mrb[69].mxu0  ;;  %v1122_v20 = vpop.f32.mrb[69].mxu1 }
 0x19e   :  { %v923_v21 = vpop.f32.mrb[70].mxu0  ;;  %v1123_v22 = vpop.f32.mrb[70].mxu1 }
 0x19f   :  { %v1217_v23 = vmax.f32 %v921_v17, 0.0  ;;  %v1267_v24 = vmax.f32 %v1121_v18, 0.0  ;;  %v924_v25 = vadd.f32 %v2709_v53, %v923_v21  ;;  %v1124_v26 = vadd.f32 %v2709_v53, %v1123_v22  ;;  %v925_v27 = vpop.f32.mrb[71].mxu0  ;;  %v1125_v28 = vpop.f32.mrb[71].mxu1 }
 0x1a1   :  { %v2039_v29 = vpack.c.bf16 %v1217_v23, %v1217_v23  ;;  %v2089_v30 = vpack.c.bf16 %v1267_v24, %v1267_v24  ;;  %v1218_v31 = vmax.f32 %v924_v25, 0.0  ;;  %v1268_v32 = vmax.f32 %v1124_v26, 0.0 }
 0x1a3   :  { %1718 = vst.msk [vmem:[%s3219_s3 + $0x88] sm:$0xf] %vm1683_vm0, %v2039_v29  ;;  %1768 = vst.msk [vmem:[%s3219_s3 + $0x150] sm:$0xf] %vm1683_vm0, %v2089_v30  ;;  %v2040_v33 = vpack.c.bf16 %v1218_v31, %v1218_v31  ;;  %v2090_v34 = vpack.c.bf16 %v1268_v32, %v1268_v32 }
 0x1a4   :  { %v928_v35 = vpop.f32.mrb[72].mxu0  ;;  %v1128_v36 = vpop.f32.mrb[72].mxu1 }
 0x1a5   :  { %1719 = vst.msk [vmem:[%s3219_s3 + $0x8c] sm:$0xf] %vm1683_vm0, %v2040_v33  ;;  %1769 = vst.msk [vmem:[%s3219_s3 + $0x154] sm:$0xf] %vm1683_vm0, %v2090_v34  ;;  %v929_v37 = vadd.f32 %v2709_v53, %v928_v35  ;;  %v1129_v38 = vadd.f32 %v2709_v53, %v1128_v36  ;;  %v930_v39 = vpop.f32.mrb[73].mxu0  ;;  %v1130_v40 = vpop.f32.mrb[73].mxu1 }
 0x1a6   :  { %v931_v41 = vpop.f32.mrb[74].mxu0  ;;  %v1131_v42 = vpop.f32.mrb[74].mxu1 }
 0x1a7   :  { %v1219_v43 = vmax.f32 %v929_v37, 0.0  ;;  %v1269_v44 = vmax.f32 %v1129_v38, 0.0  ;;  %v932_v45 = vadd.f32 %v2709_v53, %v931_v41  ;;  %v1132_v46 = vadd.f32 %v2709_v53, %v1131_v42  ;;  %v933_v47 = vpop.f32.mrb[75].mxu0  ;;  %v1133_v48 = vpop.f32.mrb[75].mxu1  ;;  %v3136_v42 = vld [vmem:[%s3218_s2] ss:$0 sm:$0xff] }
 0x1a9   :  { %v2041_v49 = vpack.c.bf16 %v1219_v43, %v1219_v43  ;;  %v2091_v50 = vpack.c.bf16 %v1269_v44, %v1269_v44  ;;  %v1220_v51 = vmax.f32 %v932_v45, 0.0  ;;  %v1270_v52 = vmax.f32 %v1132_v46, 0.0 }
 0x1ab   :  { %1720 = vst.msk [vmem:[%s3219_s3 + $0x90] sm:$0xf] %vm1683_vm0, %v2041_v49  ;;  %1770 = vst.msk [vmem:[%s3219_s3 + $0x158] sm:$0xf] %vm1683_vm0, %v2091_v50  ;;  %v2042_v54 = vpack.c.bf16 %v1220_v51, %v1220_v51  ;;  %v2092_v55 = vpack.c.bf16 %v1270_v52, %v1270_v52 }
 0x1ac   :  { %v936_v56 = vpop.f32.mrb[76].mxu0  ;;  %v1136_v57 = vpop.f32.mrb[76].mxu1 }
 0x1ad   :  { %1721 = vst.msk [vmem:[%s3219_s3 + $0x94] sm:$0xf] %vm1683_vm0, %v2042_v54  ;;  %1771 = vst.msk [vmem:[%s3219_s3 + $0x15c] sm:$0xf] %vm1683_vm0, %v2092_v55  ;;  %v937_v58 = vadd.f32 %v2709_v53, %v936_v56  ;;  %v1137_v59 = vadd.f32 %v2709_v53, %v1136_v57  ;;  %v938_v60 = vpop.f32.mrb[77].mxu0  ;;  %v1138_v61 = vpop.f32.mrb[77].mxu1 }
 0x1ae   :  { %v939_v62 = vpop.f32.mrb[78].mxu0  ;;  %v1139_v63 = vpop.f32.mrb[78].mxu1 }
 0x1af   :  { %v1221_v0 = vmax.f32 %v937_v58, 0.0  ;;  %v1271_v1 = vmax.f32 %v1137_v59, 0.0  ;;  %v940_v2 = vadd.f32 %v2709_v53, %v939_v62  ;;  %v1140_v3 = vadd.f32 %v2709_v53, %v1139_v63  ;;  %v941_v4 = vpop.f32.mrb[79].mxu0  ;;  %v1141_v5 = vpop.f32.mrb[79].mxu1 }
 0x1b1   :  { %v2043_v6 = vpack.c.bf16 %v1221_v0, %v1221_v0  ;;  %v2093_v7 = vpack.c.bf16 %v1271_v1, %v1271_v1  ;;  %v1222_v8 = vmax.f32 %v940_v2, 0.0  ;;  %v1272_v9 = vmax.f32 %v1140_v3, 0.0 }
 0x1b3   :  { %1722 = vst.msk [vmem:[%s3219_s3 + $0x98] sm:$0xf] %vm1683_vm0, %v2043_v6  ;;  %1772 = vst.msk [vmem:[%s3219_s3 + $0x160] sm:$0xf] %vm1683_vm0, %v2093_v7  ;;  %v2044_v10 = vpack.c.bf16 %v1222_v8, %v1222_v8  ;;  %v2094_v11 = vpack.c.bf16 %v1272_v9, %v1272_v9 }
 0x1b4   :  { %v944_v12 = vpop.f32.mrb[80].mxu0  ;;  %v1144_v13 = vpop.f32.mrb[80].mxu1 }
 0x1b5   :  { %1723 = vst.msk [vmem:[%s3219_s3 + $0x9c] sm:$0xf] %vm1683_vm0, %v2044_v10  ;;  %1773 = vst.msk [vmem:[%s3219_s3 + $0x164] sm:$0xf] %vm1683_vm0, %v2094_v11  ;;  %v945_v14 = vadd.f32 %v2709_v53, %v944_v12  ;;  %v1145_v15 = vadd.f32 %v2709_v53, %v1144_v13  ;;  %v946_v16 = vpop.f32.mrb[81].mxu0  ;;  %v1146_v17 = vpop.f32.mrb[81].mxu1 }
 0x1b6   :  { %v947_v18 = vpop.f32.mrb[82].mxu0  ;;  %v1147_v19 = vpop.f32.mrb[82].mxu1 }
 0x1b7   :  { %v1223_v20 = vmax.f32 %v945_v14, 0.0  ;;  %v1273_v21 = vmax.f32 %v1145_v15, 0.0  ;;  %v948_v22 = vadd.f32 %v2709_v53, %v947_v18  ;;  %v1148_v23 = vadd.f32 %v2709_v53, %v1147_v19  ;;  %v949_v24 = vpop.f32.mrb[83].mxu0  ;;  %v1149_v25 = vpop.f32.mrb[83].mxu1 }
 0x1b9   :  { %v2045_v26 = vpack.c.bf16 %v1223_v20, %v1223_v20  ;;  %v2095_v27 = vpack.c.bf16 %v1273_v21, %v1273_v21  ;;  %v1224_v28 = vmax.f32 %v948_v22, 0.0  ;;  %v1274_v29 = vmax.f32 %v1148_v23, 0.0 }
 0x1bb   :  { %1724 = vst.msk [vmem:[%s3219_s3 + $0xa0] sm:$0xf] %vm1683_vm0, %v2045_v26  ;;  %1774 = vst.msk [vmem:[%s3219_s3 + $0x168] sm:$0xf] %vm1683_vm0, %v2095_v27  ;;  %v2046_v30 = vpack.c.bf16 %v1224_v28, %v1224_v28  ;;  %v2096_v31 = vpack.c.bf16 %v1274_v29, %v1274_v29 }
 0x1bc   :  { %v952_v32 = vpop.f32.mrb[84].mxu0  ;;  %v1152_v33 = vpop.f32.mrb[84].mxu1 }
 0x1bd   :  { %1725 = vst.msk [vmem:[%s3219_s3 + $0xa4] sm:$0xf] %vm1683_vm0, %v2046_v30  ;;  %1775 = vst.msk [vmem:[%s3219_s3 + $0x16c] sm:$0xf] %vm1683_vm0, %v2096_v31  ;;  %v953_v34 = vadd.f32 %v2709_v53, %v952_v32  ;;  %v1153_v35 = vadd.f32 %v2709_v53, %v1152_v33  ;;  %v954_v36 = vpop.f32.mrb[85].mxu0  ;;  %v1154_v37 = vpop.f32.mrb[85].mxu1 }
 0x1be   :  { %v955_v38 = vpop.f32.mrb[86].mxu0  ;;  %v1155_v39 = vpop.f32.mrb[86].mxu1 }
 0x1bf   :  { %v1225_v40 = vmax.f32 %v953_v34, 0.0  ;;  %v1275_v41 = vmax.f32 %v1153_v35, 0.0  ;;  %v956_v43 = vadd.f32 %v3136_v42, %v955_v38  ;;  %v1156_v44 = vadd.f32 %v3136_v42, %v1155_v39  ;;  %v957_v45 = vpop.f32.mrb[87].mxu0  ;;  %v1157_v46 = vpop.f32.mrb[87].mxu1 }
 0x1c1   :  { %v2047_v47 = vpack.c.bf16 %v1225_v40, %v1225_v40  ;;  %v2097_v48 = vpack.c.bf16 %v1275_v41, %v1275_v41  ;;  %v1226_v53 = vmax.f32 %v956_v43, 0.0  ;;  %v1276_v49 = vmax.f32 %v1156_v44, 0.0 }
 0x1c3   :  { %1726 = vst.msk [vmem:[%s3219_s3 + $0xa8] sm:$0xf] %vm1683_vm0, %v2047_v47  ;;  %1776 = vst.msk [vmem:[%s3219_s3 + $0x170] sm:$0xf] %vm1683_vm0, %v2097_v48  ;;  %v2048_v50 = vpack.c.bf16 %v1226_v53, %v1226_v53  ;;  %v2098_v51 = vpack.c.bf16 %v1276_v49, %v1276_v49 }
 0x1c4   :  { %v960_v52 = vpop.f32.mrb[88].mxu0  ;;  %v1160_v54 = vpop.f32.mrb[88].mxu1 }
 0x1c5   :  { %1727 = vst.msk [vmem:[%s3219_s3 + $0xac] sm:$0xf] %vm1683_vm0, %v2048_v50  ;;  %1777 = vst.msk [vmem:[%s3219_s3 + $0x174] sm:$0xf] %vm1683_vm0, %v2098_v51  ;;  %v961_v55 = vadd.f32 %v3136_v42, %v960_v52  ;;  %v1161_v56 = vadd.f32 %v3136_v42, %v1160_v54  ;;  %v962_v57 = vpop.f32.mrb[89].mxu0  ;;  %v1162_v58 = vpop.f32.mrb[89].mxu1 }
 0x1c6   :  { %v963_v59 = vpop.f32.mrb[90].mxu0  ;;  %v1163_v60 = vpop.f32.mrb[90].mxu1 }
 0x1c7   :  { %v1227_v61 = vmax.f32 %v961_v55, 0.0  ;;  %v1277_v62 = vmax.f32 %v1161_v56, 0.0  ;;  %v964_v63 = vadd.f32 %v3136_v42, %v963_v59  ;;  %v1164_v0 = vadd.f32 %v3136_v42, %v1163_v60  ;;  %v965_v1 = vpop.f32.mrb[91].mxu0  ;;  %v1165_v2 = vpop.f32.mrb[91].mxu1 }
 0x1c9   :  { %v2049_v3 = vpack.c.bf16 %v1227_v61, %v1227_v61  ;;  %v2099_v4 = vpack.c.bf16 %v1277_v62, %v1277_v62  ;;  %v1228_v5 = vmax.f32 %v964_v63, 0.0  ;;  %v1278_v6 = vmax.f32 %v1164_v0, 0.0 }
 0x1cb   :  { %1728 = vst.msk [vmem:[%s3219_s3 + $0xb0] sm:$0xf] %vm1683_vm0, %v2049_v3  ;;  %1778 = vst.msk [vmem:[%s3219_s3 + $0x178] sm:$0xf] %vm1683_vm0, %v2099_v4  ;;  %v2050_v7 = vpack.c.bf16 %v1228_v5, %v1228_v5  ;;  %v2100_v8 = vpack.c.bf16 %v1278_v6, %v1278_v6 }
 0x1cc   :  { %v968_v9 = vpop.f32.mrb[92].mxu0  ;;  %v1168_v10 = vpop.f32.mrb[92].mxu1 }
 0x1cd   :  { %1729 = vst.msk [vmem:[%s3219_s3 + $0xb4] sm:$0xf] %vm1683_vm0, %v2050_v7  ;;  %1779 = vst.msk [vmem:[%s3219_s3 + $0x17c] sm:$0xf] %vm1683_vm0, %v2100_v8  ;;  %v969_v11 = vadd.f32 %v3136_v42, %v968_v9  ;;  %v1169_v12 = vadd.f32 %v3136_v42, %v1168_v10  ;;  %v970_v13 = vpop.f32.mrb[93].mxu0  ;;  %v1170_v14 = vpop.f32.mrb[93].mxu1 }
 0x1ce   :  { %v971_v15 = vpop.f32.mrb[94].mxu0  ;;  %v1171_v16 = vpop.f32.mrb[94].mxu1 }
 0x1cf   :  { %v1229_v17 = vmax.f32 %v969_v11, 0.0  ;;  %v1279_v18 = vmax.f32 %v1169_v12, 0.0  ;;  %v972_v19 = vadd.f32 %v3136_v42, %v971_v15  ;;  %v1172_v20 = vadd.f32 %v3136_v42, %v1171_v16  ;;  %v973_v21 = vpop.f32.mrb[95].mxu0  ;;  %v1173_v22 = vpop.f32.mrb[95].mxu1 }
 0x1d1   :  { %v2051_v23 = vpack.c.bf16 %v1229_v17, %v1229_v17  ;;  %v2101_v24 = vpack.c.bf16 %v1279_v18, %v1279_v18  ;;  %v1230_v25 = vmax.f32 %v972_v19, 0.0  ;;  %v1280_v26 = vmax.f32 %v1172_v20, 0.0 }
 0x1d3   :  { %1730 = vst.msk [vmem:[%s3219_s3 + $0xb8] sm:$0xf] %vm1683_vm0, %v2051_v23  ;;  %1780 = vst.msk [vmem:[%s3219_s3 + $0x180] sm:$0xf] %vm1683_vm0, %v2101_v24  ;;  %v2052_v27 = vpack.c.bf16 %v1230_v25, %v1230_v25  ;;  %v2102_v28 = vpack.c.bf16 %v1280_v26, %v1280_v26 }
 0x1d4   :  { %v976_v29 = vpop.f32.mrb[96].mxu0  ;;  %v1176_v30 = vpop.f32.mrb[96].mxu1 }
 0x1d5   :  { %1731 = vst.msk [vmem:[%s3219_s3 + $0xbc] sm:$0xf] %vm1683_vm0, %v2052_v27  ;;  %1781 = vst.msk [vmem:[%s3219_s3 + $0x184] sm:$0xf] %vm1683_vm0, %v2102_v28  ;;  %v977_v31 = vadd.f32 %v3136_v42, %v976_v29  ;;  %v1177_v32 = vadd.f32 %v3136_v42, %v1176_v30  ;;  %v978_v33 = vpop.f32.mrb[97].mxu0  ;;  %v1178_v34 = vpop.f32.mrb[97].mxu1 }
 0x1d6   :  { %v979_v35 = vpop.f32.mrb[98].mxu0  ;;  %v1179_v36 = vpop.f32.mrb[98].mxu1 }
 0x1d7   :  { %v1231_v37 = vmax.f32 %v977_v31, 0.0  ;;  %v1281_v38 = vmax.f32 %v1177_v32, 0.0  ;;  %v980_v39 = vadd.f32 %v3136_v42, %v979_v35  ;;  %v1180_v40 = vadd.f32 %v3136_v42, %v1179_v36  ;;  %v981_v41 = vpop.f32.mrb[99].mxu0  ;;  %v1181_v43 = vpop.f32.mrb[99].mxu1 }
 0x1d9   :  { %v2053_v44 = vpack.c.bf16 %v1231_v37, %v1231_v37  ;;  %v2103_v45 = vpack.c.bf16 %v1281_v38, %v1281_v38  ;;  %v1232_v46 = vmax.f32 %v980_v39, 0.0  ;;  %v1282_v47 = vmax.f32 %v1180_v40, 0.0 }
 0x1db   :  { %1732 = vst.msk [vmem:[%s3219_s3 + $0xc0] sm:$0xf] %vm1683_vm0, %v2053_v44  ;;  %1782 = vst.msk [vmem:[%s3219_s3 + $0x188] sm:$0xf] %vm1683_vm0, %v2103_v45  ;;  %v2054_v48 = vpack.c.bf16 %v1232_v46, %v1232_v46  ;;  %v2104_v53 = vpack.c.bf16 %v1282_v47, %v1282_v47 }
 0x1dd   :  { %1733 = vst.msk [vmem:[%s3219_s3 + $0xc4] sm:$0xf] %vm1683_vm0, %v2054_v48  ;;  %1783 = vst.msk [vmem:[%s3219_s3 + $0x18c] sm:$0xf] %vm1683_vm0, %v2104_v53 }

// kernel: dueling_dqn_forward.5
= control target key start
LH: loop header
LB: loop body
LE: loop exit
PB: predicated region body
PF: predicated region fallthrough
CT: control target
= control target key end

     0   :  { %vm880_vm0 = vcmask 519168   ;;  %vm901_vm1 = vcmask 516096   ;;  %s1637_s1 = inlined_call_operand.vmem [shape: bf16[512,64], index: 1, kind: input, shape index: {}]   ;;  %s1638_s0 = inlined_call_operand.vmem [shape: bf16[162,512], index: 0, kind: input, shape index: {}]   ;;  %s1639_s2 = inlined_call_operand.vmem [shape: f32[1,64], index: 2, kind: input, shape index: {}]   ;;  %s1640_s3 = inlined_call_operand.vmem [shape: bf16[162,64], index: 3, kind: output, shape index: {}]  }
   0x1   :  { %v1190_v0 = vld [vmem:[%s1637_s1 + $0x40] sm:$0xff]   ;;  %v1194_v4 = vld [vmem:[%s1637_s1 + $0x48] sm:$0xff]   ;;  %v1198_v8 = vld [vmem:[%s1637_s1 + $0x50] sm:$0xff]  }
   0x2   :  { %v1191_v1 = vld [vmem:[%s1637_s1 + $0xc0] sm:$0xff]   ;;  %1026 = vmatprep.subr.bf16.mxu0 %v1190_v0  ;;  %v1195_v5 = vld [vmem:[%s1637_s1 + $0xc8] sm:$0xff]   ;;  %v1199_v9 = vld [vmem:[%s1637_s1 + $0xd0] sm:$0xff]  }
   0x3   :  { %v1192_v2 = vld [vmem:[%s1637_s1] sm:$0xff]   ;;  %1108 = vmatprep.subr.bf16.mxu1 %v1191_v1  ;;  %v1196_v6 = vld [vmem:[%s1637_s1 + $0x8] sm:$0xff]   ;;  %v1200_v10 = vld [vmem:[%s1637_s1 + $0x10] sm:$0xff]  }
   0x4   :  { %v1193_v3 = vld [vmem:[%s1637_s1 + $0x80] sm:$0xff]   ;;  %1027 = vmatpush3.bf16.msra.mxu0 %v1192_v2  ;;  %v1197_v7 = vld [vmem:[%s1637_s1 + $0x88] sm:$0xff]   ;;  %v1201_v11 = vld [vmem:[%s1637_s1 + $0x90] sm:$0xff]  }
   0x5   :  { %1109 = vmatpush3.bf16.msra.mxu1 %v1193_v3  ;;  %1028 = vmatprep.subr.bf16.mxu0 %v1194_v4  ;;  %v1202_v12 = vld [vmem:[%s1637_s1 + $0x58] sm:$0xff]   ;;  %v1206_v16 = vld [vmem:[%s1637_s1 + $0x60] sm:$0xff]   ;;  %v1210_v20 = vld [vmem:[%s1637_s1 + $0x68] sm:$0xff]  }
   0x6   :  { %1110 = vmatprep.subr.bf16.mxu1 %v1195_v5  ;;  %v1203_v13 = vld [vmem:[%s1637_s1 + $0xd8] sm:$0xff]   ;;  %v1207_v17 = vld [vmem:[%s1637_s1 + $0xe0] sm:$0xff]   ;;  %v1211_v21 = vld [vmem:[%s1637_s1 + $0xe8] sm:$0xff]  }
   0x7   :  { %v1204_v14 = vld [vmem:[%s1637_s1 + $0x18] sm:$0xff]   ;;  %v1208_v18 = vld [vmem:[%s1637_s1 + $0x20] sm:$0xff]   ;;  %v1212_v22 = vld [vmem:[%s1637_s1 + $0x28] sm:$0xff]  }
   0x8   :  { %1029 = vmatpush3.bf16.msra.mxu0 %v1196_v6  ;;  %v1205_v15 = vld [vmem:[%s1637_s1 + $0x98] sm:$0xff]   ;;  %v1209_v19 = vld [vmem:[%s1637_s1 + $0xa0] sm:$0xff]   ;;  %v1213_v23 = vld [vmem:[%s1637_s1 + $0xa8] sm:$0xff]  }
   0x9   :  { %1111 = vmatpush3.bf16.msra.mxu1 %v1197_v7  ;;  %1030 = vmatprep.subr.bf16.mxu0 %v1198_v8  ;;  %v1214_v24 = vld [vmem:[%s1637_s1 + $0x70] sm:$0xff]   ;;  %v1218_v28 = vld [vmem:[%s1637_s1 + $0x78] sm:$0xff]   ;;  %v55_v6 = vld [vmem:[%s1638_s0 + $0x140] sm:$0x11] }
   0xa   :  { %1112 = vmatprep.subr.bf16.mxu1 %v1199_v9  ;;  %v1215_v25 = vld [vmem:[%s1637_s1 + $0xf0] sm:$0xff]   ;;  %v1219_v29 = vld [vmem:[%s1637_s1 + $0xf8] sm:$0xff]   ;;  %v56_v7 = vld [vmem:[%s1638_s0 + $0x148] sm:$0x11] }
   0xb   :  { %v1216_v26 = vld [vmem:[%s1637_s1 + $0x30] sm:$0xff]   ;;  %v1220_v30 = vld [vmem:[%s1637_s1 + $0x38] sm:$0xff]  }
   0xc   :  { %1031 = vmatpush3.bf16.msra.mxu0 %v1200_v10  ;;  %v1217_v27 = vld [vmem:[%s1637_s1 + $0xb0] sm:$0xff]   ;;  %v1221_v31 = vld [vmem:[%s1637_s1 + $0xb8] sm:$0xff]   ;;  %v949_v10 = vcombine.high %v55_v6, %v55_v6 }
   0xd   :  { %1113 = vmatpush3.bf16.msra.mxu1 %v1201_v11  ;;  %1032 = vmatprep.subr.bf16.mxu0 %v1202_v12  ;;  %v1222_v32 = vld [vmem:[%s1638_s0] ss:$16 sps:$4 sm:$0xff]   ;;  %v1224_v33 = vld [vmem:[%s1638_s0 + $0x4] ss:$16 sps:$4 sm:$0xff]   ;;  %v1225_v34 = vld [vmem:[%s1638_s0 + $0x8] ss:$16 sps:$4 sm:$0xff]   ;;  %v951_v11 = vcombine.high %v56_v7, %v56_v7  ;;  %v948_v12 = vcombine.low %v55_v6, %v55_v6 }
   0xe   :  { %1114 = vmatprep.subr.bf16.mxu1 %v1203_v13  ;;  %v1227_v35 = vld [vmem:[%s1638_s0 + $0xc] ss:$16 sps:$4 sm:$0xff]   ;;  %566 = vmatprep.mubr.bf16.mxu0 %v1224_v33  ;;  %v1228_v36 = vld [vmem:[%s1638_s0 + $0x24] ss:$16 sps:$4 sm:$0xff]   ;;  %v1232_v38 = vld [vmem:[%s1638_s0 + $0x20] ss:$16 sps:$4 sm:$0xff]   ;;  %v950_v13 = vcombine.low %v56_v7, %v56_v7 }
   0xf   :  { %686 = vmatprep.mubr.bf16.mxu1 %v1227_v35  ;;  %v1230_v37 = vld [vmem:[%s1638_s0 + $0x2c] ss:$16 sps:$4 sm:$0xff]   ;;  %v1233_v39 = vld [vmem:[%s1638_s0 + $0x28] ss:$16 sps:$4 sm:$0xff]   ;;  %v1234_v40 = vld [vmem:[%s1638_s0 + $0x44] ss:$16 sps:$4 sm:$0xff]  }
  0x10   :  { %1033 = vmatpush3.bf16.msra.mxu0 %v1204_v14  ;;  %v1236_v41 = vld [vmem:[%s1638_s0 + $0x4c] ss:$16 sps:$4 sm:$0xff]   ;;  %v1238_v42 = vld [vmem:[%s1638_s0 + $0x40] ss:$16 sps:$4 sm:$0xff]   ;;  %v1239_v43 = vld [vmem:[%s1638_s0 + $0x48] ss:$16 sps:$4 sm:$0xff]  }
  0x11   :  { %1115 = vmatpush3.bf16.msra.mxu1 %v1205_v15  ;;  %1034 = vmatprep.subr.bf16.mxu0 %v1206_v16  ;;  %v1240_v44 = vld [vmem:[%s1638_s0 + $0x64] ss:$16 sps:$4 sm:$0xff]   ;;  %v1242_v45 = vld [vmem:[%s1638_s0 + $0x6c] ss:$16 sps:$4 sm:$0xff]   ;;  %v1244_v46 = vld [vmem:[%s1638_s0 + $0x60] ss:$16 sps:$4 sm:$0xff]  }
  0x12   :  { %1116 = vmatprep.subr.bf16.mxu1 %v1207_v17  ;;  %v1245_v47 = vld [vmem:[%s1638_s0 + $0x68] ss:$16 sps:$4 sm:$0xff]   ;;  %v1246_v48 = vld [vmem:[%s1638_s0 + $0x84] ss:$16 sps:$4 sm:$0xff]   ;;  %v1248_v49 = vld [vmem:[%s1638_s0 + $0x8c] ss:$16 sps:$4 sm:$0xff]  }
  0x13   :  { %v1250_v50 = vld [vmem:[%s1638_s0 + $0x80] ss:$16 sps:$4 sm:$0xff]   ;;  %v1251_v51 = vld [vmem:[%s1638_s0 + $0x88] ss:$16 sps:$4 sm:$0xff]   ;;  %v1252_v52 = vld [vmem:[%s1638_s0 + $0xa4] ss:$16 sps:$4 sm:$0xff]  }
  0x14   :  { %1035 = vmatpush3.bf16.msra.mxu0 %v1208_v18  ;;  %v1254_v53 = vld [vmem:[%s1638_s0 + $0xac] ss:$16 sps:$4 sm:$0xff]   ;;  %v1256_v54 = vld [vmem:[%s1638_s0 + $0xa0] ss:$16 sps:$4 sm:$0xff]   ;;  %v1257_v55 = vld [vmem:[%s1638_s0 + $0xa8] ss:$16 sps:$4 sm:$0xff]  }
  0x15   :  { %1117 = vmatpush3.bf16.msra.mxu1 %v1209_v19  ;;  %1036 = vmatprep.subr.bf16.mxu0 %v1210_v20  ;;  %v1258_v56 = vld [vmem:[%s1638_s0 + $0xc4] ss:$16 sps:$4 sm:$0xff]   ;;  %v1260_v57 = vld [vmem:[%s1638_s0 + $0xcc] ss:$16 sps:$4 sm:$0xff]   ;;  %v1262_v58 = vld [vmem:[%s1638_s0 + $0xc0] ss:$16 sps:$4 sm:$0xff]  }
  0x16   :  { %1118 = vmatprep.subr.bf16.mxu1 %v1211_v21  ;;  %v1263_v59 = vld [vmem:[%s1638_s0 + $0xc8] ss:$16 sps:$4 sm:$0xff]   ;;  %v1264_v60 = vld [vmem:[%s1638_s0 + $0xe4] ss:$16 sps:$4 sm:$0xff]   ;;  %v1266_v61 = vld [vmem:[%s1638_s0 + $0xec] ss:$16 sps:$4 sm:$0xff]  }
  0x17   :  { %v1268_v62 = vld [vmem:[%s1638_s0 + $0xe0] ss:$16 sps:$4 sm:$0xff]   ;;  %v1269_v63 = vld [vmem:[%s1638_s0 + $0xe8] ss:$16 sps:$4 sm:$0xff]   ;;  %v1270_v0 = vld [vmem:[%s1638_s0 + $0x104] ss:$16 sps:$4 sm:$0xff]  }
  0x18   :  { %1037 = vmatpush3.bf16.msra.mxu0 %v1212_v22  ;;  %v1272_v1 = vld [vmem:[%s1638_s0 + $0x10c] ss:$16 sps:$4 sm:$0xff]   ;;  %v1274_v2 = vld [vmem:[%s1638_s0 + $0x100] ss:$16 sps:$4 sm:$0xff]   ;;  %v1275_v3 = vld [vmem:[%s1638_s0 + $0x108] ss:$16 sps:$4 sm:$0xff]  }
  0x19   :  { %1119 = vmatpush3.bf16.msra.mxu1 %v1213_v23  ;;  %1038 = vmatprep.subr.bf16.mxu0 %v1214_v24  ;;  %v1276_v4 = vld [vmem:[%s1638_s0 + $0x124] ss:$16 sps:$4 sm:$0xff]   ;;  %v1278_v5 = vld [vmem:[%s1638_s0 + $0x12c] ss:$16 sps:$4 sm:$0xff]   ;;  %v1280_v8 = vld [vmem:[%s1638_s0 + $0x120] ss:$16 sps:$4 sm:$0xff]  }
  0x1a   :  { %1120 = vmatprep.subr.bf16.mxu1 %v1215_v25  ;;  %v1281_v9 = vld [vmem:[%s1638_s0 + $0x128] ss:$16 sps:$4 sm:$0xff]   ;;  %v1531_v16 = vld [vmem:[%s1639_s2] ss:$0 sm:$0xff] }
  0x1c   :  { %1039 = vmatpush3.bf16.msra.mxu0 %v1216_v26 }
  0x1d   :  { %1121 = vmatpush3.bf16.msra.mxu1 %v1217_v27  ;;  %1040 = vmatprep.subr.bf16.mxu0 %v1218_v28 }
  0x1e   :  { %1122 = vmatprep.subr.bf16.mxu1 %v1219_v29 }
  0x20   :  { %1041 = vmatpush3.bf16.msra.mxu0 %v1220_v30 }
  0x21   :  { %1123 = vmatpush3.bf16.msra.mxu1 %v1221_v31 }
  0x23   :  { %567 = vmatmul.mubr.bf16.vlgmr.msra.gmra.mrb[0].mxu0 %v1222_v32 }
  0x24   :  { %687 = vmatmul.mubr.bf16.vlgmr.msra.gmra.mrb[0].mxu1 %v1225_v34  ;;  %574 = vmatprep.mubr.bf16.mxu0 %v1228_v36 }
  0x25   :  { %694 = vmatprep.mubr.bf16.mxu1 %v1230_v37 }
  0x2b   :  { %575 = vmatmul.mubr.bf16.gmra.mrb[4].mxu0 %v1232_v38 }
  0x2c   :  { %695 = vmatmul.mubr.bf16.gmra.mrb[4].mxu1 %v1233_v39  ;;  %582 = vmatprep.mubr.bf16.mxu0 %v1234_v40 }
  0x2d   :  { %702 = vmatprep.mubr.bf16.mxu1 %v1236_v41 }
  0x33   :  { %583 = vmatmul.mubr.bf16.gmra.mrb[8].mxu0 %v1238_v42 }
  0x34   :  { %703 = vmatmul.mubr.bf16.gmra.mrb[8].mxu1 %v1239_v43  ;;  %590 = vmatprep.mubr.bf16.mxu0 %v1240_v44 }
  0x35   :  { %710 = vmatprep.mubr.bf16.mxu1 %v1242_v45 }
  0x3b   :  { %591 = vmatmul.mubr.bf16.gmra.mrb[12].mxu0 %v1244_v46 }
  0x3c   :  { %711 = vmatmul.mubr.bf16.gmra.mrb[12].mxu1 %v1245_v47  ;;  %598 = vmatprep.mubr.bf16.mxu0 %v1246_v48 }
  0x3d   :  { %718 = vmatprep.mubr.bf16.mxu1 %v1248_v49 }
  0x43   :  { %599 = vmatmul.mubr.bf16.gmra.mrb[16].mxu0 %v1250_v50 }
  0x44   :  { %719 = vmatmul.mubr.bf16.gmra.mrb[16].mxu1 %v1251_v51  ;;  %606 = vmatprep.mubr.bf16.mxu0 %v1252_v52 }
  0x45   :  { %726 = vmatprep.mubr.bf16.mxu1 %v1254_v53 }
  0x4b   :  { %607 = vmatmul.mubr.bf16.gmra.mrb[20].mxu0 %v1256_v54 }
  0x4c   :  { %727 = vmatmul.mubr.bf16.gmra.mrb[20].mxu1 %v1257_v55  ;;  %614 = vmatprep.mubr.bf16.mxu0 %v1258_v56 }
  0x4d   :  { %734 = vmatprep.mubr.bf16.mxu1 %v1260_v57 }
  0x53   :  { %615 = vmatmul.mubr.bf16.gmra.mrb[24].mxu0 %v1262_v58 }
  0x54   :  { %735 = vmatmul.mubr.bf16.gmra.mrb[24].mxu1 %v1263_v59  ;;  %622 = vmatprep.mubr.bf16.mxu0 %v1264_v60 }
  0x55   :  { %742 = vmatprep.mubr.bf16.mxu1 %v1266_v61 }
  0x5b   :  { %623 = vmatmul.mubr.bf16.gmra.mrb[28].mxu0 %v1268_v62 }
  0x5c   :  { %743 = vmatmul.mubr.bf16.gmra.mrb[28].mxu1 %v1269_v63  ;;  %630 = vmatprep.mubr.bf16.mxu0 %v1270_v0 }
  0x5d   :  { %750 = vmatprep.mubr.bf16.mxu1 %v1272_v1 }
  0x63   :  { %631 = vmatmul.mubr.bf16.gmra.mrb[32].mxu0 %v1274_v2 }
  0x64   :  { %751 = vmatmul.mubr.bf16.gmra.mrb[32].mxu1 %v1275_v3  ;;  %638 = vmatprep.mubr.bf16.mxu0 %v1276_v4 }
  0x65   :  { %758 = vmatprep.mubr.bf16.mxu1 %v1278_v5 }
  0x6b   :  { %639 = vmatmul.mubr.bf16.gmra.mrb[36].mxu0 %v1280_v8 }
  0x6c   :  { %759 = vmatmul.mubr.bf16.gmra.mrb[36].mxu1 %v1281_v9  ;;  %646 = vmatprep.mubr.bf16.mxu0 %v949_v10 }
  0x6d   :  { %766 = vmatprep.mubr.bf16.mxu1 %v951_v11 }
  0x73   :  { %647 = vmatmul.mubr.bf16.gmra.mrb[40].mxu0 %v948_v12 }
  0x74   :  { %767 = vmatmul.mubr.bf16.gmra.mrb[40].mxu1 %v950_v13 }
  0xf6   :  { %v1042_v14 = vpop.f32.mrb[0].mxu0 }
  0xf7   :  { %v1124_v15 = vpop.f32.mrb[0].mxu1  ;;  %v1043_v17 = vpop.f32.mrb[1].mxu0 }
  0xf8   :  { %v1044_v18 = vadd.f32 %v1043_v17, %v1042_v14  ;;  %v1125_v19 = vpop.f32.mrb[1].mxu1  ;;  %v1045_v20 = vpop.f32.mrb[2].mxu0 }
  0xf9   :  { %v1126_v21 = vadd.f32 %v1125_v19, %v1124_v15  ;;  %v1127_v22 = vpop.f32.mrb[2].mxu1  ;;  %v1046_v23 = vpop.f32.mrb[3].mxu0 }
  0xfa   :  { %v569_v24 = vadd.f32 %v1044_v18, %v1531_v16  ;;  %v1047_v25 = vadd.f32 %v1046_v23, %v1045_v20  ;;  %v1128_v26 = vpop.f32.mrb[3].mxu1 }
  0xfb   :  { %v1129_v27 = vadd.f32 %v1128_v26, %v1127_v22 }
  0xfc   :  { %v689_v28 = vadd.f32 %v1126_v21, %v569_v24  ;;  %v572_v29 = vadd.f32 %v1047_v25, %v1531_v16 }
  0xfe   :  { %v774_v30 = vmax.f32 %v689_v28, 0.0  ;;  %v692_v31 = vadd.f32 %v1129_v27, %v572_v29  ;;  %v1048_v32 = vpop.f32.mrb[4].mxu0 }
  0xff   :  { %v1130_v33 = vpop.f32.mrb[4].mxu1  ;;  %v1049_v34 = vpop.f32.mrb[5].mxu0 }
 0x100   :  { %v1005_v35 = vpack.c.bf16 %v774_v30, %v774_v30  ;;  %v775_v36 = vmax.f32 %v692_v31, 0.0  ;;  %v1050_v37 = vadd.f32 %v1049_v34, %v1048_v32  ;;  %v1131_v38 = vpop.f32.mrb[5].mxu1  ;;  %v1051_v39 = vpop.f32.mrb[6].mxu0 }
 0x101   :  { %v1132_v40 = vadd.f32 %v1131_v38, %v1130_v33  ;;  %v1133_v41 = vpop.f32.mrb[6].mxu1  ;;  %v1052_v42 = vpop.f32.mrb[7].mxu0 }
 0x102   :  { %881 = vst.msk [vmem:[%s1640_s3] sm:$0xf] %vm880_vm0, %v1005_v35  ;;  %v1006_v43 = vpack.c.bf16 %v775_v36, %v775_v36  ;;  %v577_v44 = vadd.f32 %v1050_v37, %v1531_v16  ;;  %v1053_v45 = vadd.f32 %v1052_v42, %v1051_v39  ;;  %v1134_v46 = vpop.f32.mrb[7].mxu1 }
 0x103   :  { %v1135_v47 = vadd.f32 %v1134_v46, %v1133_v41 }
 0x104   :  { %882 = vst.msk [vmem:[%s1640_s3 + $0x4] sm:$0xf] %vm880_vm0, %v1006_v43  ;;  %v697_v48 = vadd.f32 %v1132_v40, %v577_v44  ;;  %v580_v49 = vadd.f32 %v1053_v45, %v1531_v16 }
 0x106   :  { %v776_v50 = vmax.f32 %v697_v48, 0.0  ;;  %v700_v51 = vadd.f32 %v1135_v47, %v580_v49  ;;  %v1054_v52 = vpop.f32.mrb[8].mxu0 }
 0x107   :  { %v1136_v53 = vpop.f32.mrb[8].mxu1  ;;  %v1055_v54 = vpop.f32.mrb[9].mxu0 }
 0x108   :  { %v1007_v55 = vpack.c.bf16 %v776_v50, %v776_v50  ;;  %v777_v56 = vmax.f32 %v700_v51, 0.0  ;;  %v1056_v57 = vadd.f32 %v1055_v54, %v1054_v52  ;;  %v1137_v58 = vpop.f32.mrb[9].mxu1  ;;  %v1057_v59 = vpop.f32.mrb[10].mxu0 }
 0x109   :  { %v1138_v60 = vadd.f32 %v1137_v58, %v1136_v53  ;;  %v1139_v61 = vpop.f32.mrb[10].mxu1  ;;  %v1058_v62 = vpop.f32.mrb[11].mxu0 }
 0x10a   :  { %883 = vst.msk [vmem:[%s1640_s3 + $0x8] sm:$0xf] %vm880_vm0, %v1007_v55  ;;  %v1008_v63 = vpack.c.bf16 %v777_v56, %v777_v56  ;;  %v585_v0 = vadd.f32 %v1056_v57, %v1531_v16  ;;  %v1059_v1 = vadd.f32 %v1058_v62, %v1057_v59  ;;  %v1140_v2 = vpop.f32.mrb[11].mxu1 }
 0x10b   :  { %v1141_v3 = vadd.f32 %v1140_v2, %v1139_v61 }
 0x10c   :  { %884 = vst.msk [vmem:[%s1640_s3 + $0xc] sm:$0xf] %vm880_vm0, %v1008_v63  ;;  %v705_v4 = vadd.f32 %v1138_v60, %v585_v0  ;;  %v588_v5 = vadd.f32 %v1059_v1, %v1531_v16 }
 0x10e   :  { %v778_v6 = vmax.f32 %v705_v4, 0.0  ;;  %v708_v7 = vadd.f32 %v1141_v3, %v588_v5  ;;  %v1060_v8 = vpop.f32.mrb[12].mxu0 }
 0x10f   :  { %v1142_v9 = vpop.f32.mrb[12].mxu1  ;;  %v1061_v10 = vpop.f32.mrb[13].mxu0 }
 0x110   :  { %v1009_v11 = vpack.c.bf16 %v778_v6, %v778_v6  ;;  %v779_v12 = vmax.f32 %v708_v7, 0.0  ;;  %v1062_v13 = vadd.f32 %v1061_v10, %v1060_v8  ;;  %v1143_v14 = vpop.f32.mrb[13].mxu1  ;;  %v1063_v15 = vpop.f32.mrb[14].mxu0 }
 0x111   :  { %v1144_v17 = vadd.f32 %v1143_v14, %v1142_v9  ;;  %v1145_v18 = vpop.f32.mrb[14].mxu1  ;;  %v1064_v19 = vpop.f32.mrb[15].mxu0 }
 0x112   :  { %885 = vst.msk [vmem:[%s1640_s3 + $0x10] sm:$0xf] %vm880_vm0, %v1009_v11  ;;  %v1010_v20 = vpack.c.bf16 %v779_v12, %v779_v12  ;;  %v593_v21 = vadd.f32 %v1062_v13, %v1531_v16  ;;  %v1065_v22 = vadd.f32 %v1064_v19, %v1063_v15  ;;  %v1146_v23 = vpop.f32.mrb[15].mxu1 }
 0x113   :  { %v1147_v24 = vadd.f32 %v1146_v23, %v1145_v18 }
 0x114   :  { %886 = vst.msk [vmem:[%s1640_s3 + $0x14] sm:$0xf] %vm880_vm0, %v1010_v20  ;;  %v713_v25 = vadd.f32 %v1144_v17, %v593_v21  ;;  %v596_v26 = vadd.f32 %v1065_v22, %v1531_v16 }
 0x116   :  { %v780_v27 = vmax.f32 %v713_v25, 0.0  ;;  %v716_v28 = vadd.f32 %v1147_v24, %v596_v26  ;;  %v1066_v29 = vpop.f32.mrb[16].mxu0 }
 0x117   :  { %v1148_v30 = vpop.f32.mrb[16].mxu1  ;;  %v1067_v31 = vpop.f32.mrb[17].mxu0 }
 0x118   :  { %v1011_v32 = vpack.c.bf16 %v780_v27, %v780_v27  ;;  %v781_v33 = vmax.f32 %v716_v28, 0.0  ;;  %v1068_v34 = vadd.f32 %v1067_v31, %v1066_v29  ;;  %v1149_v35 = vpop.f32.mrb[17].mxu1  ;;  %v1069_v36 = vpop.f32.mrb[18].mxu0 }
 0x119   :  { %v1150_v37 = vadd.f32 %v1149_v35, %v1148_v30  ;;  %v1151_v38 = vpop.f32.mrb[18].mxu1  ;;  %v1070_v39 = vpop.f32.mrb[19].mxu0 }
 0x11a   :  { %887 = vst.msk [vmem:[%s1640_s3 + $0x18] sm:$0xf] %vm880_vm0, %v1011_v32  ;;  %v1012_v40 = vpack.c.bf16 %v781_v33, %v781_v33  ;;  %v601_v41 = vadd.f32 %v1068_v34, %v1531_v16  ;;  %v1071_v42 = vadd.f32 %v1070_v39, %v1069_v36  ;;  %v1152_v43 = vpop.f32.mrb[19].mxu1 }
 0x11b   :  { %v1153_v44 = vadd.f32 %v1152_v43, %v1151_v38 }
 0x11c   :  { %888 = vst.msk [vmem:[%s1640_s3 + $0x1c] sm:$0xf] %vm880_vm0, %v1012_v40  ;;  %v721_v45 = vadd.f32 %v1150_v37, %v601_v41  ;;  %v604_v46 = vadd.f32 %v1071_v42, %v1531_v16 }
 0x11e   :  { %v782_v47 = vmax.f32 %v721_v45, 0.0  ;;  %v724_v48 = vadd.f32 %v1153_v44, %v604_v46  ;;  %v1072_v49 = vpop.f32.mrb[20].mxu0 }
 0x11f   :  { %v1154_v50 = vpop.f32.mrb[20].mxu1  ;;  %v1073_v51 = vpop.f32.mrb[21].mxu0 }
 0x120   :  { %v1013_v52 = vpack.c.bf16 %v782_v47, %v782_v47  ;;  %v783_v53 = vmax.f32 %v724_v48, 0.0  ;;  %v1074_v54 = vadd.f32 %v1073_v51, %v1072_v49  ;;  %v1155_v55 = vpop.f32.mrb[21].mxu1  ;;  %v1075_v56 = vpop.f32.mrb[22].mxu0 }
 0x121   :  { %v1156_v57 = vadd.f32 %v1155_v55, %v1154_v50  ;;  %v1157_v58 = vpop.f32.mrb[22].mxu1  ;;  %v1076_v59 = vpop.f32.mrb[23].mxu0 }
 0x122   :  { %889 = vst.msk [vmem:[%s1640_s3 + $0x20] sm:$0xf] %vm880_vm0, %v1013_v52  ;;  %v1014_v60 = vpack.c.bf16 %v783_v53, %v783_v53  ;;  %v609_v61 = vadd.f32 %v1074_v54, %v1531_v16  ;;  %v1077_v62 = vadd.f32 %v1076_v59, %v1075_v56  ;;  %v1158_v63 = vpop.f32.mrb[23].mxu1 }
 0x123   :  { %v1159_v0 = vadd.f32 %v1158_v63, %v1157_v58 }
 0x124   :  { %890 = vst.msk [vmem:[%s1640_s3 + $0x24] sm:$0xf] %vm880_vm0, %v1014_v60  ;;  %v729_v1 = vadd.f32 %v1156_v57, %v609_v61  ;;  %v612_v2 = vadd.f32 %v1077_v62, %v1531_v16 }
 0x126   :  { %v784_v3 = vmax.f32 %v729_v1, 0.0  ;;  %v732_v4 = vadd.f32 %v1159_v0, %v612_v2  ;;  %v1078_v5 = vpop.f32.mrb[24].mxu0 }
 0x127   :  { %v1160_v6 = vpop.f32.mrb[24].mxu1  ;;  %v1079_v7 = vpop.f32.mrb[25].mxu0 }
 0x128   :  { %v1015_v8 = vpack.c.bf16 %v784_v3, %v784_v3  ;;  %v785_v9 = vmax.f32 %v732_v4, 0.0  ;;  %v1080_v10 = vadd.f32 %v1079_v7, %v1078_v5  ;;  %v1161_v11 = vpop.f32.mrb[25].mxu1  ;;  %v1081_v12 = vpop.f32.mrb[26].mxu0 }
 0x129   :  { %v1162_v13 = vadd.f32 %v1161_v11, %v1160_v6  ;;  %v1163_v14 = vpop.f32.mrb[26].mxu1  ;;  %v1082_v15 = vpop.f32.mrb[27].mxu0 }
 0x12a   :  { %891 = vst.msk [vmem:[%s1640_s3 + $0x28] sm:$0xf] %vm880_vm0, %v1015_v8  ;;  %v1016_v17 = vpack.c.bf16 %v785_v9, %v785_v9  ;;  %v617_v18 = vadd.f32 %v1080_v10, %v1531_v16  ;;  %v1083_v19 = vadd.f32 %v1082_v15, %v1081_v12  ;;  %v1164_v20 = vpop.f32.mrb[27].mxu1 }
 0x12b   :  { %v1165_v21 = vadd.f32 %v1164_v20, %v1163_v14 }
 0x12c   :  { %892 = vst.msk [vmem:[%s1640_s3 + $0x2c] sm:$0xf] %vm880_vm0, %v1016_v17  ;;  %v737_v22 = vadd.f32 %v1162_v13, %v617_v18  ;;  %v620_v23 = vadd.f32 %v1083_v19, %v1531_v16 }
 0x12e   :  { %v786_v24 = vmax.f32 %v737_v22, 0.0  ;;  %v740_v25 = vadd.f32 %v1165_v21, %v620_v23  ;;  %v1084_v26 = vpop.f32.mrb[28].mxu0 }
 0x12f   :  { %v1166_v27 = vpop.f32.mrb[28].mxu1  ;;  %v1085_v28 = vpop.f32.mrb[29].mxu0 }
 0x130   :  { %v1017_v29 = vpack.c.bf16 %v786_v24, %v786_v24  ;;  %v787_v30 = vmax.f32 %v740_v25, 0.0  ;;  %v1086_v31 = vadd.f32 %v1085_v28, %v1084_v26  ;;  %v1167_v32 = vpop.f32.mrb[29].mxu1  ;;  %v1087_v33 = vpop.f32.mrb[30].mxu0 }
 0x131   :  { %v1168_v34 = vadd.f32 %v1167_v32, %v1166_v27  ;;  %v1169_v35 = vpop.f32.mrb[30].mxu1  ;;  %v1088_v36 = vpop.f32.mrb[31].mxu0 }
 0x132   :  { %893 = vst.msk [vmem:[%s1640_s3 + $0x30] sm:$0xf] %vm880_vm0, %v1017_v29  ;;  %v1018_v37 = vpack.c.bf16 %v787_v30, %v787_v30  ;;  %v625_v38 = vadd.f32 %v1086_v31, %v1531_v16  ;;  %v1089_v39 = vadd.f32 %v1088_v36, %v1087_v33  ;;  %v1170_v40 = vpop.f32.mrb[31].mxu1 }
 0x133   :  { %v1171_v41 = vadd.f32 %v1170_v40, %v1169_v35 }
 0x134   :  { %894 = vst.msk [vmem:[%s1640_s3 + $0x34] sm:$0xf] %vm880_vm0, %v1018_v37  ;;  %v745_v42 = vadd.f32 %v1168_v34, %v625_v38  ;;  %v628_v43 = vadd.f32 %v1089_v39, %v1531_v16 }
 0x136   :  { %v788_v44 = vmax.f32 %v745_v42, 0.0  ;;  %v748_v45 = vadd.f32 %v1171_v41, %v628_v43  ;;  %v1090_v46 = vpop.f32.mrb[32].mxu0 }
 0x137   :  { %v1172_v47 = vpop.f32.mrb[32].mxu1  ;;  %v1091_v48 = vpop.f32.mrb[33].mxu0 }
 0x138   :  { %v1019_v49 = vpack.c.bf16 %v788_v44, %v788_v44  ;;  %v789_v50 = vmax.f32 %v748_v45, 0.0  ;;  %v1092_v51 = vadd.f32 %v1091_v48, %v1090_v46  ;;  %v1173_v52 = vpop.f32.mrb[33].mxu1  ;;  %v1093_v53 = vpop.f32.mrb[34].mxu0 }
 0x139   :  { %v1174_v54 = vadd.f32 %v1173_v52, %v1172_v47  ;;  %v1175_v55 = vpop.f32.mrb[34].mxu1  ;;  %v1094_v56 = vpop.f32.mrb[35].mxu0 }
 0x13a   :  { %895 = vst.msk [vmem:[%s1640_s3 + $0x38] sm:$0xf] %vm880_vm0, %v1019_v49  ;;  %v1020_v57 = vpack.c.bf16 %v789_v50, %v789_v50  ;;  %v633_v58 = vadd.f32 %v1092_v51, %v1531_v16  ;;  %v1095_v59 = vadd.f32 %v1094_v56, %v1093_v53  ;;  %v1176_v60 = vpop.f32.mrb[35].mxu1 }
 0x13b   :  { %v1177_v61 = vadd.f32 %v1176_v60, %v1175_v55 }
 0x13c   :  { %896 = vst.msk [vmem:[%s1640_s3 + $0x3c] sm:$0xf] %vm880_vm0, %v1020_v57  ;;  %v753_v62 = vadd.f32 %v1174_v54, %v633_v58  ;;  %v636_v63 = vadd.f32 %v1095_v59, %v1531_v16 }
 0x13e   :  { %v790_v0 = vmax.f32 %v753_v62, 0.0  ;;  %v756_v1 = vadd.f32 %v1177_v61, %v636_v63  ;;  %v1096_v2 = vpop.f32.mrb[36].mxu0 }
 0x13f   :  { %v1178_v3 = vpop.f32.mrb[36].mxu1  ;;  %v1097_v4 = vpop.f32.mrb[37].mxu0 }
 0x140   :  { %v1021_v5 = vpack.c.bf16 %v790_v0, %v790_v0  ;;  %v791_v6 = vmax.f32 %v756_v1, 0.0  ;;  %v1098_v7 = vadd.f32 %v1097_v4, %v1096_v2  ;;  %v1179_v8 = vpop.f32.mrb[37].mxu1  ;;  %v1099_v9 = vpop.f32.mrb[38].mxu0 }
 0x141   :  { %v1180_v10 = vadd.f32 %v1179_v8, %v1178_v3  ;;  %v1181_v11 = vpop.f32.mrb[38].mxu1  ;;  %v1100_v12 = vpop.f32.mrb[39].mxu0 }
 0x142   :  { %897 = vst.msk [vmem:[%s1640_s3 + $0x40] sm:$0xf] %vm880_vm0, %v1021_v5  ;;  %v1022_v13 = vpack.c.bf16 %v791_v6, %v791_v6  ;;  %v641_v14 = vadd.f32 %v1098_v7, %v1531_v16  ;;  %v1101_v15 = vadd.f32 %v1100_v12, %v1099_v9  ;;  %v1182_v17 = vpop.f32.mrb[39].mxu1 }
 0x143   :  { %v1183_v18 = vadd.f32 %v1182_v17, %v1181_v11 }
 0x144   :  { %898 = vst.msk [vmem:[%s1640_s3 + $0x44] sm:$0xf] %vm880_vm0, %v1022_v13  ;;  %v761_v19 = vadd.f32 %v1180_v10, %v641_v14  ;;  %v644_v20 = vadd.f32 %v1101_v15, %v1531_v16 }
 0x146   :  { %v792_v21 = vmax.f32 %v761_v19, 0.0  ;;  %v764_v22 = vadd.f32 %v1183_v18, %v644_v20  ;;  %v1102_v23 = vpop.f32.mrb[40].mxu0 }
 0x147   :  { %v1184_v24 = vpop.f32.mrb[40].mxu1  ;;  %v1103_v25 = vpop.f32.mrb[41].mxu0 }
 0x148   :  { %v1023_v26 = vpack.c.bf16 %v792_v21, %v792_v21  ;;  %v793_v27 = vmax.f32 %v764_v22, 0.0  ;;  %v1104_v28 = vadd.f32 %v1103_v25, %v1102_v23  ;;  %v1185_v29 = vpop.f32.mrb[41].mxu1  ;;  %v1105_v30 = vpop.f32.mrb[42].mxu0 }
 0x149   :  { %v1186_v31 = vadd.f32 %v1185_v29, %v1184_v24  ;;  %v1187_v32 = vpop.f32.mrb[42].mxu1  ;;  %v1106_v33 = vpop.f32.mrb[43].mxu0 }
 0x14a   :  { %899 = vst.msk [vmem:[%s1640_s3 + $0x48] sm:$0xf] %vm880_vm0, %v1023_v26  ;;  %v1024_v34 = vpack.c.bf16 %v793_v27, %v793_v27  ;;  %v649_v35 = vadd.f32 %v1104_v28, %v1531_v16  ;;  %v1188_v36 = vpop.f32.mrb[43].mxu1 }
 0x14c   :  { %900 = vst.msk [vmem:[%s1640_s3 + $0x4c] sm:$0xf] %vm880_vm0, %v1024_v34  ;;  %v769_v37 = vadd.f32 %v1186_v31, %v649_v35 }
 0x14e   :  { %v794_v38 = vmax.f32 %v769_v37, 0.0 }
 0x150   :  { %v1025_v39 = vpack.c.bf16 %v794_v38, %v794_v38 }
 0x152   :  { %902 = vst.msk [vmem:[%s1640_s3 + $0x50] sm:$0x1] %vm901_vm1, %v1025_v39 }

// kernel: dueling_dqn_forward.6
= control target key start
LH: loop header
LB: loop body
LE: loop exit
PB: predicated region body
PF: predicated region fallthrough
CT: control target
= control target key end

     0   :  { %v1248_v34 = vmov 0.0   ;;  %vm1249_vm0 = vmmov 0   ;;  %vm516_vm1 = vcmask 523264   ;;  %vm868_vm2 = vcmask 519168   ;;  %s1599_s1 = inlined_call_operand.vmem [shape: bf16[576,64], index: 1, kind: input, shape index: {}]   ;;  %s1600_s0 = inlined_call_operand.vmem [shape: bf16[98,576], index: 0, kind: input, shape index: {}]   ;;  %s1601_s2 = inlined_call_operand.vmem [shape: f32[1,64], index: 2, kind: input, shape index: {}]   ;;  %s1602_s3 = inlined_call_operand.vmem [shape: bf16[98,64], index: 3, kind: output, shape index: {}]  }
   0x1   :  { %v1165_v0 = vld [vmem:[%s1599_s1 + $0x40] sm:$0xff]   ;;  %v1169_v4 = vld [vmem:[%s1599_s1 + $0x48] sm:$0xff]   ;;  %v1173_v8 = vld [vmem:[%s1599_s1 + $0x50] sm:$0xff]   ;;  %vm881_vm3 = vcmask 516096  }
   0x2   :  { %v1166_v1 = vld [vmem:[%s1599_s1 + $0xc0] sm:$0xff]   ;;  %992 = vmatprep.subr.bf16.mxu0 %v1165_v0  ;;  %v1170_v5 = vld [vmem:[%s1599_s1 + $0xc8] sm:$0xff]   ;;  %v1174_v9 = vld [vmem:[%s1599_s1 + $0xd0] sm:$0xff]  }
   0x3   :  { %v1167_v2 = vld [vmem:[%s1599_s1] sm:$0xff]   ;;  %1050 = vmatprep.subr.bf16.mxu1 %v1166_v1  ;;  %v1171_v6 = vld [vmem:[%s1599_s1 + $0x8] sm:$0xff]   ;;  %v1175_v10 = vld [vmem:[%s1599_s1 + $0x10] sm:$0xff]  }
   0x4   :  { %v1168_v3 = vld [vmem:[%s1599_s1 + $0x80] sm:$0xff]   ;;  %993 = vmatpush3.bf16.msra.mxu0 %v1167_v2  ;;  %v1172_v7 = vld [vmem:[%s1599_s1 + $0x88] sm:$0xff]   ;;  %v1176_v11 = vld [vmem:[%s1599_s1 + $0x90] sm:$0xff]  }
   0x5   :  { %1051 = vmatpush3.bf16.msra.mxu1 %v1168_v3  ;;  %994 = vmatprep.subr.bf16.mxu0 %v1169_v4  ;;  %v1177_v12 = vld [vmem:[%s1599_s1 + $0x58] sm:$0xff]   ;;  %v1181_v16 = vld [vmem:[%s1599_s1 + $0x60] sm:$0xff]   ;;  %v1185_v20 = vld [vmem:[%s1599_s1 + $0x68] sm:$0xff]  }
   0x6   :  { %1052 = vmatprep.subr.bf16.mxu1 %v1170_v5  ;;  %v1178_v13 = vld [vmem:[%s1599_s1 + $0xd8] sm:$0xff]   ;;  %v1182_v17 = vld [vmem:[%s1599_s1 + $0xe0] sm:$0xff]   ;;  %v1186_v21 = vld [vmem:[%s1599_s1 + $0xe8] sm:$0xff]  }
   0x7   :  { %v1179_v14 = vld [vmem:[%s1599_s1 + $0x18] sm:$0xff]   ;;  %v1183_v18 = vld [vmem:[%s1599_s1 + $0x20] sm:$0xff]   ;;  %v1187_v22 = vld [vmem:[%s1599_s1 + $0x28] sm:$0xff]  }
   0x8   :  { %995 = vmatpush3.bf16.msra.mxu0 %v1171_v6  ;;  %v1180_v15 = vld [vmem:[%s1599_s1 + $0x98] sm:$0xff]   ;;  %v1184_v19 = vld [vmem:[%s1599_s1 + $0xa0] sm:$0xff]   ;;  %v1188_v23 = vld [vmem:[%s1599_s1 + $0xa8] sm:$0xff]  }
   0x9   :  { %1053 = vmatpush3.bf16.msra.mxu1 %v1172_v7  ;;  %996 = vmatprep.subr.bf16.mxu0 %v1173_v8  ;;  %v1189_v24 = vld [vmem:[%s1599_s1 + $0x70] sm:$0xff]   ;;  %v1193_v28 = vld [vmem:[%s1599_s1 + $0x78] sm:$0xff]   ;;  %v1202_v36 = vld [vmem:[%s1600_s0 + $0xc] ss:$20 sps:$4 sm:$0xff]  }
   0xa   :  { %1054 = vmatprep.subr.bf16.mxu1 %v1174_v9  ;;  %v1190_v25 = vld [vmem:[%s1599_s1 + $0xf0] sm:$0xff]   ;;  %v1194_v29 = vld [vmem:[%s1599_s1 + $0xf8] sm:$0xff]   ;;  %v1203_v37 = vld [vmem:[%s1599_s1 + $0x100] sm:$0xff]   ;;  %658 = vmatprep.mubr.bf16.mxu1 %v1202_v36 }
   0xb   :  { %v1191_v26 = vld [vmem:[%s1599_s1 + $0x30] sm:$0xff]   ;;  %v1195_v30 = vld [vmem:[%s1599_s1 + $0x38] sm:$0xff]   ;;  %v1204_v38 = vld [vmem:[%s1600_s0 + $0x2c] ss:$20 sps:$4 sm:$0xff]  }
   0xc   :  { %997 = vmatpush3.bf16.msra.mxu0 %v1175_v10  ;;  %v1192_v27 = vld [vmem:[%s1599_s1 + $0xb0] sm:$0xff]   ;;  %v1196_v31 = vld [vmem:[%s1599_s1 + $0xb8] sm:$0xff]   ;;  %v1214_v43 = vld [vmem:[%s1599_s1 + $0x108] sm:$0xff]  }
   0xd   :  { %1055 = vmatpush3.bf16.msra.mxu1 %v1176_v11  ;;  %998 = vmatprep.subr.bf16.mxu0 %v1177_v12  ;;  %v1197_v32 = vld [vmem:[%s1600_s0] ss:$20 sps:$4 sm:$0xff]   ;;  %v1199_v33 = vld [vmem:[%s1600_s0 + $0x4] ss:$20 sps:$4 sm:$0xff]   ;;  %v1200_v35 = vld [vmem:[%s1600_s0 + $0x8] ss:$20 sps:$4 sm:$0xff]  }
   0xe   :  { %1056 = vmatprep.subr.bf16.mxu1 %v1178_v13  ;;  %570 = vmatprep.mubr.bf16.mxu0 %v1199_v33  ;;  %v1206_v39 = vld [vmem:[%s1600_s0 + $0x34] ss:$20 sps:$4 sm:$0xff]   ;;  %v1209_v41 = vld [vmem:[%s1600_s0 + $0x30] ss:$20 sps:$4 sm:$0xff]   ;;  %v1216_v47 = vld [vmem:[%s1600_s0 + $0x58] ss:$20 sps:$4 sm:$0xff]  }
   0xf   :  { %v1208_v40 = vld [vmem:[%s1600_s0 + $0x28] ss:$20 sps:$4 sm:$0xff]   ;;  %v1223_v45 = vld [vmem:[%s1599_s1 + $0x110] sm:$0xff]   ;;  %v1219_v49 = vld [vmem:[%s1600_s0 + $0x84] ss:$20 sps:$4 sm:$0xff]  }
  0x10   :  { %999 = vmatpush3.bf16.msra.mxu0 %v1179_v14  ;;  %v1210_v42 = vld [vmem:[%s1600_s0 + $0x54] ss:$20 sps:$4 sm:$0xff]   ;;  %v1212_v44 = vld [vmem:[%s1600_s0 + $0x5c] ss:$20 sps:$4 sm:$0xff]   ;;  %v1221_v51 = vld [vmem:[%s1600_s0 + $0x78] ss:$20 sps:$4 sm:$0xff]  }
  0x11   :  { %1057 = vmatpush3.bf16.msra.mxu1 %v1180_v15  ;;  %1000 = vmatprep.subr.bf16.mxu0 %v1181_v16  ;;  %v1215_v46 = vld [vmem:[%s1600_s0 + $0x50] ss:$20 sps:$4 sm:$0xff]   ;;  %v1236_v50 = vld [vmem:[%s1599_s1 + $0x118] sm:$0xff]   ;;  %v1222_v52 = vld [vmem:[%s1600_s0 + $0x80] ss:$20 sps:$4 sm:$0xff]  }
  0x12   :  { %1058 = vmatprep.subr.bf16.mxu1 %v1182_v17  ;;  %v1217_v48 = vld [vmem:[%s1600_s0 + $0x7c] ss:$20 sps:$4 sm:$0xff]   ;;  %v1224_v53 = vld [vmem:[%s1600_s0 + $0xa4] ss:$20 sps:$4 sm:$0xff]   ;;  %v1226_v54 = vld [vmem:[%s1600_s0 + $0xac] ss:$20 sps:$4 sm:$0xff]  }
  0x13   :  { %v1228_v55 = vld [vmem:[%s1600_s0 + $0xa0] ss:$20 sps:$4 sm:$0xff]   ;;  %v1229_v56 = vld [vmem:[%s1600_s0 + $0xa8] ss:$20 sps:$4 sm:$0xff]   ;;  %v1235_v62 = vld [vmem:[%s1600_s0 + $0xd0] ss:$20 sps:$4 sm:$0xff]  }
  0x14   :  { %1001 = vmatpush3.bf16.msra.mxu0 %v1183_v18  ;;  %v1230_v57 = vld [vmem:[%s1600_s0 + $0xcc] ss:$20 sps:$4 sm:$0xff]   ;;  %v1232_v58 = vld [vmem:[%s1600_s0 + $0xd4] ss:$20 sps:$4 sm:$0xff]   ;;  %v52_v60 = vld [vmem:[%s1600_s0 + $0xf8] sm:$0x11] }
  0x15   :  { %1059 = vmatpush3.bf16.msra.mxu1 %v1184_v19  ;;  %1002 = vmatprep.subr.bf16.mxu0 %v1185_v20  ;;  %v51_v59 = vld [vmem:[%s1600_s0 + $0xf0] sm:$0x11]  ;;  %v1234_v61 = vld [vmem:[%s1600_s0 + $0xc8] ss:$20 sps:$4 sm:$0xff]   ;;  %v921_v0 = vcombine.high %v52_v60, %v52_v60  ;;  %v920_v2 = vcombine.low %v52_v60, %v52_v60  ;;  %v1243_v5 = vld [vmem:[%s1600_s0 + $0x38] ss:$20 sps:$4 sm:$0xff]  }
  0x16   :  { %1060 = vmatprep.subr.bf16.mxu1 %v1186_v21  ;;  %v919_v63 = vcombine.high %v51_v59, %v51_v59  ;;  %v918_v1 = vcombine.low %v51_v59, %v51_v59  ;;  %v1241_v3 = vld [vmem:[%s1600_s0 + $0x10] ss:$20 sps:$4 sm:$0xff]   ;;  %v1244_v6 = vld [vmem:[%s1600_s0 + $0xd8] ss:$20 sps:$4 sm:$0xff]   ;;  %v1245_v7 = vld [vmem:[%s1600_s0 + $0x60] ss:$20 sps:$4 sm:$0xff]  }
  0x17   :  { %v1242_v4 = vld [vmem:[%s1600_s0 + $0xb0] ss:$20 sps:$4 sm:$0xff]   ;;  %v1246_v8 = vld [vmem:[%s1600_s0 + $0x100] ss:$0 sps:$4 sm:$0x11]  }
  0x18   :  { %1003 = vmatpush3.bf16.msra.mxu0 %v1187_v22  ;;  %v1247_v9 = vld [vmem:[%s1600_s0 + $0x88] ss:$20 sps:$4 sm:$0xff]   ;;  %v1509_v11 = vld [vmem:[%s1601_s2] ss:$0 sm:$0xff] }
  0x19   :  { %1061 = vmatpush3.bf16.msra.mxu1 %v1188_v23  ;;  %1004 = vmatprep.subr.bf16.mxu0 %v1189_v24 }
  0x1a   :  { %1062 = vmatprep.subr.bf16.mxu1 %v1190_v25 }
  0x1c   :  { %1005 = vmatpush3.bf16.msra.mxu0 %v1191_v26 }
  0x1d   :  { %1063 = vmatpush3.bf16.msra.mxu1 %v1192_v27  ;;  %1006 = vmatprep.subr.bf16.mxu0 %v1193_v28 }
  0x1e   :  { %1064 = vmatprep.subr.bf16.mxu1 %v1194_v29 }
  0x20   :  { %1007 = vmatpush3.bf16.msra.mxu0 %v1195_v30 }
  0x21   :  { %1065 = vmatpush3.bf16.msra.mxu1 %v1196_v31  ;;  %1119 = vmatprep.subr.bf16.mxu0 %v1248_v34 }
  0x22   :  { %1155 = vmatprep.subr.bf16.mxu1 %v1248_v34 }
  0x23   :  { %571 = vmatmul.mubr.bf16.vlgmr.msra.gmra.mrb[0].mxu0 %v1197_v32 }
  0x24   :  { %659 = vmatmul.mubr.bf16.vlgmr.msra.gmra.mrb[0].mxu1 %v1200_v35  ;;  %1120 = vmatpush3.bf16.msra.mxu0 %v1203_v37 }
  0x25   :  { %578 = vmatprep.mubr.bf16.mxu0 %v1204_v38  ;;  %1159 = vmatpush3.bf16.msra.mxu1 %v1203_v37 }
  0x26   :  { %666 = vmatprep.mubr.bf16.mxu1 %v1206_v39  ;;  %1121 = vmatprep.subr.bf16.mxu0 %v1248_v34 }
  0x27   :  { %1156 = vmatprep.subr.bf16.mxu1 %v1248_v34 }
  0x28   :  { %1122 = vmatpush3.bf16.msra.mxu0 %v1214_v43 }
  0x29   :  { %1160 = vmatpush3.bf16.msra.mxu1 %v1214_v43  ;;  %1123 = vmatprep.subr.bf16.mxu0 %v1248_v34 }
  0x2a   :  { %1157 = vmatprep.subr.bf16.mxu1 %v1248_v34 }
  0x2b   :  { %579 = vmatmul.mubr.bf16.gmra.mrb[4].mxu0 %v1208_v40 }
  0x2c   :  { %667 = vmatmul.mubr.bf16.gmra.mrb[4].mxu1 %v1209_v41  ;;  %586 = vmatprep.mubr.bf16.mxu0 %v1210_v42 }
  0x2d   :  { %674 = vmatprep.mubr.bf16.mxu1 %v1212_v44  ;;  %1124 = vmatpush3.bf16.msra.mxu0 %v1223_v45 }
  0x2e   :  { %1161 = vmatpush3.bf16.msra.mxu1 %v1223_v45  ;;  %1125 = vmatprep.subr.bf16.mxu0 %v1248_v34 }
  0x2f   :  { %1158 = vmatprep.subr.bf16.mxu1 %v1248_v34 }
  0x31   :  { %1126 = vmatpush3.bf16.msra.mxu0 %v1236_v50 }
  0x32   :  { %1162 = vmatpush3.bf16.msra.mxu1 %v1236_v50 }
  0x33   :  { %587 = vmatmul.mubr.bf16.gmra.mrb[8].mxu0 %v1215_v46 }
  0x34   :  { %675 = vmatmul.mubr.bf16.gmra.mrb[8].mxu1 %v1216_v47  ;;  %594 = vmatprep.mubr.bf16.mxu0 %v1217_v48 }
  0x35   :  { %682 = vmatprep.mubr.bf16.mxu1 %v1219_v49 }
  0x3b   :  { %595 = vmatmul.mubr.bf16.gmra.mrb[12].mxu0 %v1221_v51 }
  0x3c   :  { %683 = vmatmul.mubr.bf16.gmra.mrb[12].mxu1 %v1222_v52  ;;  %602 = vmatprep.mubr.bf16.mxu0 %v1224_v53 }
  0x3d   :  { %690 = vmatprep.mubr.bf16.mxu1 %v1226_v54 }
  0x43   :  { %603 = vmatmul.mubr.bf16.gmra.mrb[16].mxu0 %v1228_v55 }
  0x44   :  { %691 = vmatmul.mubr.bf16.gmra.mrb[16].mxu1 %v1229_v56  ;;  %610 = vmatprep.mubr.bf16.mxu0 %v1230_v57 }
  0x45   :  { %698 = vmatprep.mubr.bf16.mxu1 %v1232_v58 }
  0x4b   :  { %611 = vmatmul.mubr.bf16.gmra.mrb[20].mxu0 %v1234_v61 }
  0x4c   :  { %699 = vmatmul.mubr.bf16.gmra.mrb[20].mxu1 %v1235_v62  ;;  %618 = vmatprep.mubr.bf16.mxu0 %v919_v63 }
  0x4d   :  { %706 = vmatprep.mubr.bf16.mxu1 %v921_v0 }
  0x53   :  { %619 = vmatmul.mubr.bf16.gmra.mrb[24].mxu0 %v918_v1 }
  0x54   :  { %707 = vmatmul.mubr.bf16.gmra.mrb[24].mxu1 %v920_v2  ;;  %1127 = vmatprep.mubr.msk.bf16.mxu0 %vm1249_vm0, %v1248_v34 }
  0x55   :  { %1143 = vmatprep.mubr.msk.bf16.mxu1 %vm1249_vm0, %v1248_v34 }
  0x5b   :  { %1128 = vmatmul.mubr.msk.bf16.vlgmr.msra.gmra.mrb[28].mxu0 %vm516_vm1, %v1241_v3 }
  0x5c   :  { %1144 = vmatmul.mubr.msk.bf16.vlgmr.msra.gmra.mrb[28].mxu1 %vm516_vm1, %v1242_v4  ;;  %1131 = vmatprep.mubr.msk.bf16.mxu0 %vm1249_vm0, %v1248_v34 }
  0x5d   :  { %1147 = vmatprep.mubr.msk.bf16.mxu1 %vm1249_vm0, %v1248_v34 }
  0x63   :  { %1132 = vmatmul.mubr.msk.bf16.gmra.mrb[32].mxu0 %vm516_vm1, %v1243_v5 }
  0x64   :  { %1148 = vmatmul.mubr.msk.bf16.gmra.mrb[32].mxu1 %vm516_vm1, %v1244_v6  ;;  %1135 = vmatprep.mubr.msk.bf16.mxu0 %vm1249_vm0, %v1248_v34 }
  0x65   :  { %1151 = vmatprep.mubr.msk.bf16.mxu1 %vm1249_vm0, %v1248_v34 }
  0x6b   :  { %1136 = vmatmul.mubr.msk.bf16.gmra.mrb[36].mxu0 %vm516_vm1, %v1245_v7 }
  0x6c   :  { %1152 = vmatmul.mubr.msk.bf16.gmra.mrb[36].mxu1 %vm516_vm1, %v1246_v8  ;;  %1139 = vmatprep.mubr.msk.bf16.mxu0 %vm1249_vm0, %v1248_v34 }
  0x73   :  { %1140 = vmatmul.mubr.msk.bf16.gmra.mrb[40].mxu0 %vm516_vm1, %v1247_v9 }
  0xf6   :  { %v1008_v10 = vpop.f32.mrb[0].mxu0 }
  0xf7   :  { %v1009_v12 = vpop.f32.mrb[1].mxu0  ;;  %v1066_v13 = vpop.f32.mrb[0].mxu1 }
  0xf8   :  { %v1010_v14 = vadd.f32 %v1009_v12, %v1008_v10  ;;  %v1011_v15 = vpop.f32.mrb[2].mxu0  ;;  %v1067_v16 = vpop.f32.mrb[1].mxu1 }
  0xf9   :  { %v1012_v17 = vpop.f32.mrb[3].mxu0  ;;  %v1068_v18 = vadd.f32 %v1067_v16, %v1066_v13  ;;  %v1069_v19 = vpop.f32.mrb[2].mxu1 }
  0xfa   :  { %v573_v20 = vadd.f32 %v1010_v14, %v1509_v11  ;;  %v1013_v21 = vadd.f32 %v1012_v17, %v1011_v15  ;;  %v1070_v22 = vpop.f32.mrb[3].mxu1 }
  0xfb   :  { %v1071_v23 = vadd.f32 %v1070_v22, %v1069_v19 }
  0xfc   :  { %v576_v24 = vadd.f32 %v1013_v21, %v1509_v11  ;;  %v1513_v25 = vadd.f32 %v1068_v18, %v573_v20 }
  0xfe   :  { %v1014_v26 = vpop.f32.mrb[4].mxu0  ;;  %v1515_v27 = vadd.f32 %v1071_v23, %v576_v24 }
  0xff   :  { %v1015_v28 = vpop.f32.mrb[5].mxu0  ;;  %v1072_v29 = vpop.f32.mrb[4].mxu1 }
 0x100   :  { %v1016_v30 = vadd.f32 %v1015_v28, %v1014_v26  ;;  %v1017_v31 = vpop.f32.mrb[6].mxu0  ;;  %v1073_v32 = vpop.f32.mrb[5].mxu1 }
 0x101   :  { %v1018_v33 = vpop.f32.mrb[7].mxu0  ;;  %v1074_v34 = vadd.f32 %v1073_v32, %v1072_v29  ;;  %v1075_v35 = vpop.f32.mrb[6].mxu1 }
 0x102   :  { %v581_v36 = vadd.f32 %v1016_v30, %v1509_v11  ;;  %v1019_v37 = vadd.f32 %v1018_v33, %v1017_v31  ;;  %v1076_v38 = vpop.f32.mrb[7].mxu1 }
 0x103   :  { %v1077_v39 = vadd.f32 %v1076_v38, %v1075_v35 }
 0x104   :  { %v584_v40 = vadd.f32 %v1019_v37, %v1509_v11  ;;  %v1519_v41 = vadd.f32 %v1074_v34, %v581_v36 }
 0x106   :  { %v1020_v42 = vpop.f32.mrb[8].mxu0  ;;  %v1521_v43 = vadd.f32 %v1077_v39, %v584_v40 }
 0x107   :  { %v1021_v44 = vpop.f32.mrb[9].mxu0  ;;  %v1078_v45 = vpop.f32.mrb[8].mxu1 }
 0x108   :  { %v1022_v46 = vadd.f32 %v1021_v44, %v1020_v42  ;;  %v1023_v47 = vpop.f32.mrb[10].mxu0  ;;  %v1079_v48 = vpop.f32.mrb[9].mxu1 }
 0x109   :  { %v1024_v49 = vpop.f32.mrb[11].mxu0  ;;  %v1080_v50 = vadd.f32 %v1079_v48, %v1078_v45  ;;  %v1081_v51 = vpop.f32.mrb[10].mxu1 }
 0x10a   :  { %v589_v52 = vadd.f32 %v1022_v46, %v1509_v11  ;;  %v1025_v53 = vadd.f32 %v1024_v49, %v1023_v47  ;;  %v1082_v54 = vpop.f32.mrb[11].mxu1 }
 0x10b   :  { %v1083_v55 = vadd.f32 %v1082_v54, %v1081_v51 }
 0x10c   :  { %v592_v56 = vadd.f32 %v1025_v53, %v1509_v11  ;;  %v1525_v57 = vadd.f32 %v1080_v50, %v589_v52 }
 0x10e   :  { %v1026_v58 = vpop.f32.mrb[12].mxu0  ;;  %v1527_v59 = vadd.f32 %v1083_v55, %v592_v56 }
 0x10f   :  { %v1027_v60 = vpop.f32.mrb[13].mxu0  ;;  %v1084_v61 = vpop.f32.mrb[12].mxu1 }
 0x110   :  { %v1028_v62 = vadd.f32 %v1027_v60, %v1026_v58  ;;  %v1029_v63 = vpop.f32.mrb[14].mxu0  ;;  %v1085_v0 = vpop.f32.mrb[13].mxu1 }
 0x111   :  { %v1030_v1 = vpop.f32.mrb[15].mxu0  ;;  %v1086_v2 = vadd.f32 %v1085_v0, %v1084_v61  ;;  %v1087_v3 = vpop.f32.mrb[14].mxu1 }
 0x112   :  { %v597_v4 = vadd.f32 %v1028_v62, %v1509_v11  ;;  %v1031_v5 = vadd.f32 %v1030_v1, %v1029_v63  ;;  %v1088_v6 = vpop.f32.mrb[15].mxu1 }
 0x113   :  { %v1089_v7 = vadd.f32 %v1088_v6, %v1087_v3 }
 0x114   :  { %v600_v8 = vadd.f32 %v1031_v5, %v1509_v11  ;;  %v1531_v9 = vadd.f32 %v1086_v2, %v597_v4 }
 0x116   :  { %v1032_v10 = vpop.f32.mrb[16].mxu0  ;;  %v1533_v12 = vadd.f32 %v1089_v7, %v600_v8 }
 0x117   :  { %v1033_v13 = vpop.f32.mrb[17].mxu0  ;;  %v1090_v14 = vpop.f32.mrb[16].mxu1 }
 0x118   :  { %v1034_v15 = vadd.f32 %v1033_v13, %v1032_v10  ;;  %v1035_v16 = vpop.f32.mrb[18].mxu0  ;;  %v1091_v17 = vpop.f32.mrb[17].mxu1 }
 0x119   :  { %v1036_v18 = vpop.f32.mrb[19].mxu0  ;;  %v1092_v19 = vadd.f32 %v1091_v17, %v1090_v14  ;;  %v1093_v20 = vpop.f32.mrb[18].mxu1 }
 0x11a   :  { %v605_v21 = vadd.f32 %v1034_v15, %v1509_v11  ;;  %v1037_v22 = vadd.f32 %v1036_v18, %v1035_v16  ;;  %v1094_v23 = vpop.f32.mrb[19].mxu1 }
 0x11b   :  { %v1095_v24 = vadd.f32 %v1094_v23, %v1093_v20 }
 0x11c   :  { %v608_v26 = vadd.f32 %v1037_v22, %v1509_v11  ;;  %v693_v28 = vadd.f32 %v1092_v19, %v605_v21 }
 0x11e   :  { %v1038_v29 = vpop.f32.mrb[20].mxu0  ;;  %v696_v30 = vadd.f32 %v1095_v24, %v608_v26 }
 0x11f   :  { %v1039_v31 = vpop.f32.mrb[21].mxu0  ;;  %v1096_v32 = vpop.f32.mrb[20].mxu1 }
 0x120   :  { %v1040_v33 = vadd.f32 %v1039_v31, %v1038_v29  ;;  %v1041_v34 = vpop.f32.mrb[22].mxu0  ;;  %v1097_v35 = vpop.f32.mrb[21].mxu1 }
 0x121   :  { %v1042_v36 = vpop.f32.mrb[23].mxu0  ;;  %v1098_v37 = vadd.f32 %v1097_v35, %v1096_v32  ;;  %v1099_v38 = vpop.f32.mrb[22].mxu1 }
 0x122   :  { %v613_v39 = vadd.f32 %v1040_v33, %v1509_v11  ;;  %v1043_v40 = vadd.f32 %v1042_v36, %v1041_v34  ;;  %v1100_v42 = vpop.f32.mrb[23].mxu1 }
 0x123   :  { %v1101_v44 = vadd.f32 %v1100_v42, %v1099_v38 }
 0x124   :  { %v616_v45 = vadd.f32 %v1043_v40, %v1509_v11  ;;  %v701_v46 = vadd.f32 %v1098_v37, %v613_v39 }
 0x126   :  { %v1044_v47 = vpop.f32.mrb[24].mxu0  ;;  %v704_v48 = vadd.f32 %v1101_v44, %v616_v45 }
 0x127   :  { %v1045_v49 = vpop.f32.mrb[25].mxu0  ;;  %v1102_v50 = vpop.f32.mrb[24].mxu1 }
 0x128   :  { %v1046_v51 = vadd.f32 %v1045_v49, %v1044_v47  ;;  %v1047_v52 = vpop.f32.mrb[26].mxu0  ;;  %v1103_v53 = vpop.f32.mrb[25].mxu1 }
 0x129   :  { %v1048_v54 = vpop.f32.mrb[27].mxu0  ;;  %v1104_v55 = vadd.f32 %v1103_v53, %v1102_v50  ;;  %v1105_v56 = vpop.f32.mrb[26].mxu1 }
 0x12a   :  { %v621_v58 = vadd.f32 %v1046_v51, %v1509_v11  ;;  %v1106_v60 = vpop.f32.mrb[27].mxu1 }
 0x12c   :  { %v709_v61 = vadd.f32 %v1104_v55, %v621_v58 }
 0x12e   :  { %v748_v62 = vpop.f32.mrb[28].mxu0 }
 0x12f   :  { %v749_v63 = vadd.f32 %v748_v62, %v1513_v25  ;;  %v780_v0 = vpop.f32.mrb[28].mxu1  ;;  %v1129_v1 = vpop.f32.mrb[29].mxu0 }
 0x130   :  { %v781_v2 = vadd.f32 %v780_v0, %v693_v28  ;;  %v1145_v3 = vpop.f32.mrb[29].mxu1  ;;  %v751_v4 = vpop.f32.mrb[30].mxu0 }
 0x131   :  { %v802_v5 = vmax.f32 %v749_v63, 0.0  ;;  %v752_v6 = vadd.f32 %v751_v4, %v1515_v27  ;;  %v783_v7 = vpop.f32.mrb[30].mxu1  ;;  %v1130_v8 = vpop.f32.mrb[31].mxu0 }
 0x132   :  { %v810_v10 = vmax.f32 %v781_v2, 0.0  ;;  %v784_v13 = vadd.f32 %v783_v7, %v696_v30  ;;  %v1146_v14 = vpop.f32.mrb[31].mxu1 }
 0x133   :  { %v979_v11 = vpack.c.bf16 %v802_v5, %v802_v5  ;;  %v803_v15 = vmax.f32 %v752_v6, 0.0 }
 0x134   :  { %v987_v16 = vpack.c.bf16 %v810_v10, %v810_v10  ;;  %v811_v17 = vmax.f32 %v784_v13, 0.0 }
 0x135   :  { %869 = vst.msk [vmem:[%s1602_s3] sm:$0xf] %vm868_vm2, %v979_v11  ;;  %v980_v25 = vpack.c.bf16 %v803_v15, %v803_v15 }
 0x136   :  { %877 = vst.msk [vmem:[%s1602_s3 + $0x20] sm:$0xf] %vm868_vm2, %v987_v16  ;;  %v988_v27 = vpack.c.bf16 %v811_v17, %v811_v17  ;;  %v756_v18 = vpop.f32.mrb[32].mxu0 }
 0x137   :  { %870 = vst.msk [vmem:[%s1602_s3 + $0x4] sm:$0xf] %vm868_vm2, %v980_v25  ;;  %v757_v19 = vadd.f32 %v756_v18, %v1519_v41  ;;  %v788_v20 = vpop.f32.mrb[32].mxu1  ;;  %v1133_v21 = vpop.f32.mrb[33].mxu0 }
 0x138   :  { %878 = vst.msk [vmem:[%s1602_s3 + $0x24] sm:$0xf] %vm868_vm2, %v988_v27  ;;  %v789_v22 = vadd.f32 %v788_v20, %v701_v46  ;;  %v1149_v23 = vpop.f32.mrb[33].mxu1  ;;  %v759_v24 = vpop.f32.mrb[34].mxu0 }
 0x139   :  { %v804_v26 = vmax.f32 %v757_v19, 0.0  ;;  %v760_v28 = vadd.f32 %v759_v24, %v1521_v43  ;;  %v791_v29 = vpop.f32.mrb[34].mxu1  ;;  %v1134_v30 = vpop.f32.mrb[35].mxu0 }
 0x13a   :  { %v812_v31 = vmax.f32 %v789_v22, 0.0  ;;  %v792_v32 = vadd.f32 %v791_v29, %v704_v48  ;;  %v1150_v33 = vpop.f32.mrb[35].mxu1 }
 0x13b   :  { %v981_v34 = vpack.c.bf16 %v804_v26, %v804_v26  ;;  %v805_v41 = vmax.f32 %v760_v28, 0.0 }
 0x13c   :  { %v989_v35 = vpack.c.bf16 %v812_v31, %v812_v31  ;;  %v813_v36 = vmax.f32 %v792_v32, 0.0 }
 0x13d   :  { %871 = vst.msk [vmem:[%s1602_s3 + $0x8] sm:$0xf] %vm868_vm2, %v981_v34  ;;  %v982_v37 = vpack.c.bf16 %v805_v41, %v805_v41 }
 0x13e   :  { %879 = vst.msk [vmem:[%s1602_s3 + $0x28] sm:$0xf] %vm868_vm2, %v989_v35  ;;  %v990_v43 = vpack.c.bf16 %v813_v36, %v813_v36  ;;  %v764_v38 = vpop.f32.mrb[36].mxu0 }
 0x13f   :  { %872 = vst.msk [vmem:[%s1602_s3 + $0xc] sm:$0xf] %vm868_vm2, %v982_v37  ;;  %v765_v39 = vadd.f32 %v764_v38, %v1525_v57  ;;  %v796_v40 = vpop.f32.mrb[36].mxu1  ;;  %v1137_v42 = vpop.f32.mrb[37].mxu0 }
 0x140   :  { %880 = vst.msk [vmem:[%s1602_s3 + $0x2c] sm:$0xf] %vm868_vm2, %v990_v43  ;;  %v797_v44 = vadd.f32 %v796_v40, %v709_v61  ;;  %v767_v45 = vpop.f32.mrb[38].mxu0  ;;  %v1153_v46 = vpop.f32.mrb[37].mxu1 }
 0x141   :  { %v806_v47 = vmax.f32 %v765_v39, 0.0  ;;  %v768_v48 = vadd.f32 %v767_v45, %v1527_v59  ;;  %v1138_v49 = vpop.f32.mrb[39].mxu0  ;;  %v799_v50 = vpop.f32.mrb[38].mxu1 }
 0x142   :  { %v814_v51 = vmax.f32 %v797_v44, 0.0  ;;  %v1154_v52 = vpop.f32.mrb[39].mxu1 }
 0x143   :  { %v983_v53 = vpack.c.bf16 %v806_v47, %v806_v47  ;;  %v807_v57 = vmax.f32 %v768_v48, 0.0 }
 0x144   :  { %v991_v54 = vpack.c.bf16 %v814_v51, %v814_v51 }
 0x145   :  { %873 = vst.msk [vmem:[%s1602_s3 + $0x10] sm:$0xf] %vm868_vm2, %v983_v53  ;;  %v984_v55 = vpack.c.bf16 %v807_v57, %v807_v57 }
 0x146   :  { %882 = vst.msk [vmem:[%s1602_s3 + $0x30] sm:$0x1] %vm881_vm3, %v991_v54  ;;  %v772_v56 = vpop.f32.mrb[40].mxu0 }
 0x147   :  { %874 = vst.msk [vmem:[%s1602_s3 + $0x14] sm:$0xf] %vm868_vm2, %v984_v55  ;;  %v773_v59 = vadd.f32 %v772_v56, %v1531_v9  ;;  %v1141_v58 = vpop.f32.mrb[41].mxu0 }
 0x148   :  { %v775_v60 = vpop.f32.mrb[42].mxu0 }
 0x149   :  { %v808_v61 = vmax.f32 %v773_v59, 0.0  ;;  %v776_v62 = vadd.f32 %v775_v60, %v1533_v12  ;;  %v1142_v63 = vpop.f32.mrb[43].mxu0 }
 0x14b   :  { %v985_v0 = vpack.c.bf16 %v808_v61, %v808_v61  ;;  %v809_v1 = vmax.f32 %v776_v62, 0.0 }
 0x14d   :  { %875 = vst.msk [vmem:[%s1602_s3 + $0x18] sm:$0xf] %vm868_vm2, %v985_v0  ;;  %v986_v2 = vpack.c.bf16 %v809_v1, %v809_v1 }
 0x14f   :  { %876 = vst.msk [vmem:[%s1602_s3 + $0x1c] sm:$0xf] %vm868_vm2, %v986_v2 }

// kernel: dueling_dqn_forward.7
= control target key start
LH: loop header
LB: loop body
LE: loop exit
PB: predicated region body
PF: predicated region fallthrough
CT: control target
= control target key end

     0   :  { %s19817_s0 = inlined_call_operand.vmem [shape: bf16[2,3136], index: 0, kind: input, shape index: {}]   ;;  %s19818_s1 = inlined_call_operand.vmem [shape: bf16[3136,1024], index: 1, kind: input, shape index: {}]   ;;  %s19819_s2 = inlined_call_operand.vmem [shape: f32[1,1024], index: 2, kind: input, shape index: {}]   ;;  %s19820_s3 = inlined_call_operand.vmem [shape: bf16[512,18], index: 3, kind: input, shape index: {}]   ;;  %s19821_s4 = inlined_call_operand.vmem [shape: f32[1,18], index: 4, kind: input, shape index: {}]   ;;  %s19822_s5 = inlined_call_operand.vmem [shape: bf16[512,1], index: 5, kind: input, shape index: {}]   ;;  %s19823_s6 = inlined_call_operand.<no memory space> [shape: f32[1,1], index: 6, kind: input, shape index: {}]   ;;  %s19824_s7 = inlined_call_operand.hbm [shape: f32[2,18], index: 7, kind: output, shape index: {}]  }
   0x1   :  { %v12_v0 = vstv %s19823_s6 }
   0x2   :  { %13 = vst [vmem:[#allocation2] sm:$0x1] %v12_v0 }
   0x3   :  { %v34_v1 = vld [vmem:[%s19818_s1] sm:$0xff]  ;;  %v35_v3 = vld [vmem:[%s19818_s1 + $0x8] sm:$0xff]  ;;  %v1604_v33 = vlaneseq  ;;  %v14561_v34 = vmov 1966171168  }
   0x4   :  { %v38_v2 = vld [vmem:[%s19818_s1 + $0x20] sm:$0xff]  ;;  %v39_v5 = vld [vmem:[%s19818_s1 + $0x28] sm:$0xff]  ;;  %v1650_v35 = vunpack.c.l.s4 %v14561_v34 }
   0x5   :  { %v12541_v4 = vcombine.high %v34_v1, %v38_v2  ;;  %v12540_v6 = vcombine.low %v34_v1, %v38_v2  ;;  %v42_v7 = vld [vmem:[%s19818_s1 + $0x40] sm:$0xff]  ;;  %v12543_v9 = vcombine.high %v35_v3, %v39_v5  ;;  %v12542_v10 = vcombine.low %v35_v3, %v39_v5  ;;  %v43_v12 = vld [vmem:[%s19818_s1 + $0x48] sm:$0xff] }
   0x6   :  { %v46_v8 = vld [vmem:[%s19818_s1 + $0x60] sm:$0xff]  ;;  %v47_v13 = vld [vmem:[%s19818_s1 + $0x68] sm:$0xff]  ;;  %v14673_v44 = vshrl.u32 %v1604_v33, 7  ;;  %v1651_v45 = vunpack.c.0.s8 %v1650_v35 }
   0x7   :  { %v12549_v11 = vcombine.high %v42_v7, %v46_v8  ;;  %v50_v14 = vld [vmem:[%s19818_s1 + $0x80] sm:$0xff]  ;;  %9677 = vmatprep.subr.bf16.mxu0 %v12541_v4  ;;  %v12551_v15 = vcombine.high %v43_v12, %v47_v13  ;;  %v51_v17 = vld [vmem:[%s19818_s1 + $0x88] sm:$0xff]  ;;  %10210 = vmatprep.subr.bf16.mxu1 %v12543_v9  ;;  %v12548_v19 = vcombine.low %v42_v7, %v46_v8 }
   0x8   :  { %v54_v16 = vld [vmem:[%s19818_s1 + $0xa0] sm:$0xff]  ;;  %v55_v18 = vld [vmem:[%s19818_s1 + $0xa8] sm:$0xff]  ;;  %9678 = vmatpush1.bf16.msra.mxu0 %v12540_v6  ;;  %10211 = vmatpush1.bf16.msra.mxu1 %v12542_v10  ;;  %v12550_v20 = vcombine.low %v43_v12, %v47_v13  ;;  %v14688_v54 = vsub.s32 %v1651_v45, %v14673_v44 }
   0x9   :  { %9679 = vmatprep.subr.bf16.mxu0 %v12549_v11  ;;  %v12557_v21 = vcombine.high %v50_v14, %v54_v16  ;;  %10212 = vmatprep.subr.bf16.mxu1 %v12551_v15  ;;  %v12559_v22 = vcombine.high %v51_v17, %v55_v18  ;;  %v58_v23 = vld [vmem:[%s19818_s1 + $0xc0] sm:$0xff]  ;;  %v59_v25 = vld [vmem:[%s19818_s1 + $0xc8] sm:$0xff]  ;;  %v12556_v27 = vcombine.low %v50_v14, %v54_v16 }
   0xa   :  { %v62_v24 = vld [vmem:[%s19818_s1 + $0xe0] sm:$0xff]  ;;  %v63_v26 = vld [vmem:[%s19818_s1 + $0xe8] sm:$0xff]  ;;  %v12558_v28 = vcombine.low %v51_v17, %v55_v18 }
   0xb   :  { %v12565_v29 = vcombine.high %v58_v23, %v62_v24  ;;  %v12567_v30 = vcombine.high %v59_v25, %v63_v26  ;;  %v66_v31 = vld [vmem:[%s19818_s1 + $0x100] sm:$0xff]  ;;  %v67_v36 = vld [vmem:[%s19818_s1 + $0x108] sm:$0xff]  ;;  %v12564_v38 = vcombine.low %v58_v23, %v62_v24  ;;  %v12566_v39 = vcombine.low %v59_v25, %v63_v26 }
   0xc   :  { %9680 = vmatpush1.bf16.msra.mxu0 %v12548_v19  ;;  %10213 = vmatpush1.bf16.msra.mxu1 %v12550_v20  ;;  %v70_v32 = vld [vmem:[%s19818_s1 + $0x120] sm:$0xff]  ;;  %v71_v37 = vld [vmem:[%s19818_s1 + $0x128] sm:$0xff] }
   0xd   :  { %9681 = vmatprep.subr.bf16.mxu0 %v12557_v21  ;;  %10214 = vmatprep.subr.bf16.mxu1 %v12559_v22  ;;  %v12573_v40 = vcombine.high %v66_v31, %v70_v32  ;;  %v12575_v41 = vcombine.high %v67_v36, %v71_v37  ;;  %v74_v42 = vld [vmem:[%s19818_s1 + $0x140] sm:$0xff]  ;;  %v75_v46 = vld [vmem:[%s19818_s1 + $0x148] sm:$0xff]  ;;  %v12572_v48 = vcombine.low %v66_v31, %v70_v32 }
   0xe   :  { %v78_v43 = vld [vmem:[%s19818_s1 + $0x160] sm:$0xff]  ;;  %v79_v47 = vld [vmem:[%s19818_s1 + $0x168] sm:$0xff]  ;;  %v12574_v49 = vcombine.low %v67_v36, %v71_v37 }
   0xf   :  { %v12581_v50 = vcombine.high %v74_v42, %v78_v43  ;;  %v12583_v51 = vcombine.high %v75_v46, %v79_v47  ;;  %v82_v52 = vld [vmem:[%s19818_s1 + $0x180] sm:$0xff]  ;;  %v83_v55 = vld [vmem:[%s19818_s1 + $0x188] sm:$0xff]  ;;  %v12580_v57 = vcombine.low %v74_v42, %v78_v43  ;;  %v12582_v58 = vcombine.low %v75_v46, %v79_v47 }
  0x10   :  { %9682 = vmatpush1.bf16.msra.mxu0 %v12556_v27  ;;  %10215 = vmatpush1.bf16.msra.mxu1 %v12558_v28  ;;  %v86_v53 = vld [vmem:[%s19818_s1 + $0x1a0] sm:$0xff]  ;;  %v87_v56 = vld [vmem:[%s19818_s1 + $0x1a8] sm:$0xff] }
  0x11   :  { %9683 = vmatprep.subr.bf16.mxu0 %v12565_v29  ;;  %10216 = vmatprep.subr.bf16.mxu1 %v12567_v30  ;;  %v12589_v59 = vcombine.high %v82_v52, %v86_v53  ;;  %v14699_v60 = vld [vmem:[%s19817_s0] sm:$0xff]  ;;  %v12591_v61 = vcombine.high %v83_v55, %v87_v56  ;;  %v91_v1 = vld [vmem:[%s19818_s1 + $0x1c8] sm:$0xff]  ;;  %v12588_v3 = vcombine.low %v82_v52, %v86_v53 }
  0x12   :  { %v90_v62 = vld [vmem:[%s19818_s1 + $0x1c0] sm:$0xff]  ;;  %v14709_v0 = vrot.slane %v14699_v60, %v14688_v54  ;;  %v95_v2 = vld [vmem:[%s19818_s1 + $0x1e8] sm:$0xff]  ;;  %v12590_v5 = vcombine.low %v83_v55, %v87_v56 }
  0x13   :  { %v94_v63 = vld [vmem:[%s19818_s1 + $0x1e0] sm:$0xff]  ;;  %v12599_v7 = vcombine.high %v91_v1, %v95_v2  ;;  %v99_v11 = vld [vmem:[%s19818_s1 + $0x208] sm:$0xff]  ;;  %v12598_v14 = vcombine.low %v91_v1, %v95_v2 }
  0x14   :  { %9684 = vmatpush1.bf16.msra.mxu0 %v12564_v38  ;;  %10217 = vmatpush1.bf16.msra.mxu1 %v12566_v39  ;;  %v1663_v4 = vcombine.high %v14709_v0, %v14709_v0  ;;  %v12597_v6 = vcombine.high %v90_v62, %v94_v63  ;;  %v98_v8 = vld [vmem:[%s19818_s1 + $0x200] sm:$0xff]  ;;  %v103_v12 = vld [vmem:[%s19818_s1 + $0x228] sm:$0xff]  ;;  %v12596_v13 = vcombine.low %v90_v62, %v94_v63 }
  0x15   :  { %9685 = vmatprep.subr.bf16.mxu0 %v12573_v40  ;;  %10218 = vmatprep.subr.bf16.mxu1 %v12575_v41  ;;  %v102_v9 = vld [vmem:[%s19818_s1 + $0x220] sm:$0xff]  ;;  %v12607_v16 = vcombine.high %v99_v11, %v103_v12  ;;  %v107_v19 = vld [vmem:[%s19818_s1 + $0x248] sm:$0xff]  ;;  %v12606_v22 = vcombine.low %v99_v11, %v103_v12 }
  0x16   :  { %v14726_v10 = vrot.slane %v1663_v4, %v14688_v54  ;;  %v12605_v15 = vcombine.high %v98_v8, %v102_v9  ;;  %v106_v17 = vld [vmem:[%s19818_s1 + $0x240] sm:$0xff]  ;;  %v111_v20 = vld [vmem:[%s19818_s1 + $0x268] sm:$0xff]  ;;  %v12604_v21 = vcombine.low %v98_v8, %v102_v9 }
  0x17   :  { %v110_v18 = vld [vmem:[%s19818_s1 + $0x260] sm:$0xff]  ;;  %v12615_v24 = vcombine.high %v107_v19, %v111_v20  ;;  %v115_v27 = vld [vmem:[%s19818_s1 + $0x288] sm:$0xff]  ;;  %v12614_v30 = vcombine.low %v107_v19, %v111_v20 }
  0x18   :  { %9686 = vmatpush1.bf16.msra.mxu0 %v12572_v48  ;;  %10219 = vmatpush1.bf16.msra.mxu1 %v12574_v49  ;;  %v12613_v23 = vcombine.high %v106_v17, %v110_v18  ;;  %v114_v25 = vld [vmem:[%s19818_s1 + $0x280] sm:$0xff]  ;;  %v119_v28 = vld [vmem:[%s19818_s1 + $0x2a8] sm:$0xff]  ;;  %v12612_v29 = vcombine.low %v106_v17, %v110_v18 }
  0x19   :  { %9687 = vmatprep.subr.bf16.mxu0 %v12581_v50  ;;  %10220 = vmatprep.subr.bf16.mxu1 %v12583_v51  ;;  %v118_v26 = vld [vmem:[%s19818_s1 + $0x2a0] sm:$0xff]  ;;  %v12623_v32 = vcombine.high %v115_v27, %v119_v28  ;;  %v123_v35 = vld [vmem:[%s19818_s1 + $0x2c8] sm:$0xff]  ;;  %v12622_v38 = vcombine.low %v115_v27, %v119_v28 }
  0x1a   :  { %9709 = vmatprep.mubr.bf16.mxu0 %v14726_v10  ;;  %10242 = vmatprep.mubr.bf16.mxu1 %v14726_v10  ;;  %v12621_v31 = vcombine.high %v114_v25, %v118_v26  ;;  %v122_v33 = vld [vmem:[%s19818_s1 + $0x2c0] sm:$0xff]  ;;  %v127_v36 = vld [vmem:[%s19818_s1 + $0x2e8] sm:$0xff]  ;;  %v12620_v37 = vcombine.low %v114_v25, %v118_v26 }
  0x1b   :  { %v126_v34 = vld [vmem:[%s19818_s1 + $0x2e0] sm:$0xff]  ;;  %v12631_v40 = vcombine.high %v123_v35, %v127_v36  ;;  %v131_v43 = vld [vmem:[%s19818_s1 + $0x308] sm:$0xff]  ;;  %v12630_v47 = vcombine.low %v123_v35, %v127_v36 }
  0x1c   :  { %9688 = vmatpush1.bf16.msra.mxu0 %v12580_v57  ;;  %10221 = vmatpush1.bf16.msra.mxu1 %v12582_v58  ;;  %v12629_v39 = vcombine.high %v122_v33, %v126_v34  ;;  %v130_v41 = vld [vmem:[%s19818_s1 + $0x300] sm:$0xff]  ;;  %v135_v45 = vld [vmem:[%s19818_s1 + $0x328] sm:$0xff]  ;;  %v12628_v46 = vcombine.low %v122_v33, %v126_v34  ;;  %v14862_v34 = vcombine.high %v14726_v10, %v14726_v10 }
  0x1d   :  { %9689 = vmatprep.subr.bf16.mxu0 %v12589_v59  ;;  %10222 = vmatprep.subr.bf16.mxu1 %v12591_v61  ;;  %v134_v42 = vld [vmem:[%s19818_s1 + $0x320] sm:$0xff]  ;;  %v12639_v49 = vcombine.high %v131_v43, %v135_v45  ;;  %v139_v52 = vld [vmem:[%s19818_s1 + $0x348] sm:$0xff]  ;;  %v12638_v56 = vcombine.low %v131_v43, %v135_v45 }
  0x1e   :  { %v12637_v48 = vcombine.high %v130_v41, %v134_v42  ;;  %v138_v50 = vld [vmem:[%s19818_s1 + $0x340] sm:$0xff]  ;;  %v143_v53 = vld [vmem:[%s19818_s1 + $0x368] sm:$0xff]  ;;  %v12636_v55 = vcombine.low %v130_v41, %v134_v42 }
  0x1f   :  { %v142_v51 = vld [vmem:[%s19818_s1 + $0x360] sm:$0xff]  ;;  %v12647_v58 = vcombine.high %v139_v52, %v143_v53  ;;  %v147_v62 = vld [vmem:[%s19818_s1 + $0x388] sm:$0xff]  ;;  %v12646_v2 = vcombine.low %v139_v52, %v143_v53 }
  0x20   :  { %9690 = vmatpush1.bf16.msra.mxu0 %v12588_v3  ;;  %10223 = vmatpush1.bf16.msra.mxu1 %v12590_v5  ;;  %v12645_v57 = vcombine.high %v138_v50, %v142_v51  ;;  %v146_v59 = vld [vmem:[%s19818_s1 + $0x380] sm:$0xff]  ;;  %v151_v63 = vld [vmem:[%s19818_s1 + $0x3a8] sm:$0xff]  ;;  %v12644_v1 = vcombine.low %v138_v50, %v142_v51 }
  0x21   :  { %9691 = vmatprep.subr.bf16.mxu0 %v12597_v6  ;;  %10224 = vmatprep.subr.bf16.mxu1 %v12599_v7  ;;  %v150_v61 = vld [vmem:[%s19818_s1 + $0x3a0] sm:$0xff]  ;;  %v12655_v4 = vcombine.high %v147_v62, %v151_v63  ;;  %v155_v7 = vld [vmem:[%s19818_s1 + $0x3c8] sm:$0xff]  ;;  %v12654_v11 = vcombine.low %v147_v62, %v151_v63 }
  0x22   :  { %v12653_v3 = vcombine.high %v146_v59, %v150_v61  ;;  %v154_v5 = vld [vmem:[%s19818_s1 + $0x3c0] sm:$0xff]  ;;  %v159_v8 = vld [vmem:[%s19818_s1 + $0x3e8] sm:$0xff]  ;;  %v12652_v9 = vcombine.low %v146_v59, %v150_v61 }
  0x23   :  { %v158_v6 = vld [vmem:[%s19818_s1 + $0x3e0] sm:$0xff]  ;;  %v167_v17 = vld [vmem:[%s19818_s1 + $0x428] sm:$0xff]  ;;  %v12662_v19 = vcombine.low %v155_v7, %v159_v8 }
  0x24   :  { %9692 = vmatpush1.bf16.msra.mxu0 %v12596_v13  ;;  %10225 = vmatpush1.bf16.msra.mxu1 %v12598_v14  ;;  %v12661_v12 = vcombine.high %v154_v5, %v158_v6  ;;  %v12663_v13 = vcombine.high %v155_v7, %v159_v8  ;;  %v162_v14 = vld [vmem:[%s19818_s1 + $0x400] sm:$0xff]  ;;  %v12660_v18 = vcombine.low %v154_v5, %v158_v6  ;;  %v171_v25 = vld [vmem:[%s19818_s1 + $0x448] sm:$0xff] }
  0x25   :  { %9693 = vmatprep.subr.bf16.mxu0 %v12605_v15  ;;  %10226 = vmatprep.subr.bf16.mxu1 %v12607_v16  ;;  %v166_v15 = vld [vmem:[%s19818_s1 + $0x420] sm:$0xff]  ;;  %v163_v16 = vld [vmem:[%s19818_s1 + $0x408] sm:$0xff] }
  0x26   :  { %v12669_v20 = vcombine.high %v162_v14, %v166_v15  ;;  %v175_v26 = vld [vmem:[%s19818_s1 + $0x468] sm:$0xff]  ;;  %v12668_v27 = vcombine.low %v162_v14, %v166_v15  ;;  %v12670_v28 = vcombine.low %v163_v16, %v167_v17 }
  0x27   :  { %v183_v33 = vld [vmem:[%s19818_s1 + $0x4a8] sm:$0xff]  ;;  %v12678_v36 = vcombine.low %v171_v25, %v175_v26 }
  0x28   :  { %9694 = vmatpush1.bf16.msra.mxu0 %v12604_v21  ;;  %10227 = vmatpush1.bf16.msra.mxu1 %v12606_v22  ;;  %v12671_v21 = vcombine.high %v163_v16, %v167_v17  ;;  %v170_v22 = vld [vmem:[%s19818_s1 + $0x440] sm:$0xff]  ;;  %v191_v42 = vld [vmem:[%s19818_s1 + $0x4e8] sm:$0xff] }
  0x29   :  { %9695 = vmatprep.subr.bf16.mxu0 %v12613_v23  ;;  %10228 = vmatprep.subr.bf16.mxu1 %v12615_v24  ;;  %v174_v23 = vld [vmem:[%s19818_s1 + $0x460] sm:$0xff]  ;;  %v14840_v24 = vrot.slane %v14709_v0, %v14688_v54  ;;  %v199_v51 = vld [vmem:[%s19818_s1 + $0x528] sm:$0xff] }
  0x2a   :  { %v182_v0 = vld [vmem:[%s19818_s1 + $0x4a0] sm:$0xff]  ;;  %v12676_v35 = vcombine.low %v170_v22, %v174_v23  ;;  %v207_v61 = vld [vmem:[%s19818_s1 + $0x568] sm:$0xff] }
  0x2b   :  { %v215_v6 = vld [vmem:[%s19818_s1 + $0x5a8] sm:$0xff] }
  0x2c   :  { %9696 = vmatpush1.bf16.msra.mxu0 %v12612_v29  ;;  %10229 = vmatpush1.bf16.msra.mxu1 %v12614_v30  ;;  %v12677_v29 = vcombine.high %v170_v22, %v174_v23  ;;  %v178_v30 = vld [vmem:[%s19818_s1 + $0x480] sm:$0xff]  ;;  %v223_v15 = vld [vmem:[%s19818_s1 + $0x5e8] sm:$0xff] }
  0x2d   :  { %9697 = vmatprep.subr.bf16.mxu0 %v12621_v31  ;;  %10230 = vmatprep.subr.bf16.mxu1 %v12623_v32  ;;  %v179_v31 = vld [vmem:[%s19818_s1 + $0x488] sm:$0xff]  ;;  %v12679_v32 = vcombine.high %v171_v25, %v175_v26  ;;  %v12684_v43 = vcombine.low %v178_v30, %v182_v0 }
  0x2e   :  { %v12687_v41 = vcombine.high %v179_v31, %v183_v33  ;;  %v12686_v45 = vcombine.low %v179_v31, %v183_v33  ;;  %v231_v23 = vld [vmem:[%s19818_s1 + $0x628] sm:$0xff] }
  0x2f   :  { %v239_v31 = vld [vmem:[%s19818_s1 + $0x668] sm:$0xff] }
  0x30   :  { %9698 = vmatpush1.bf16.msra.mxu0 %v12620_v37  ;;  %10231 = vmatpush1.bf16.msra.mxu1 %v12622_v38  ;;  %v12685_v37 = vcombine.high %v178_v30, %v182_v0  ;;  %v186_v38 = vld [vmem:[%s19818_s1 + $0x4c0] sm:$0xff]  ;;  %v235_v30 = vld [vmem:[%s19818_s1 + $0x648] sm:$0xff] }
  0x31   :  { %9699 = vmatprep.subr.bf16.mxu0 %v12629_v39  ;;  %10232 = vmatprep.subr.bf16.mxu1 %v12631_v40  ;;  %v190_v39 = vld [vmem:[%s19818_s1 + $0x4e0] sm:$0xff]  ;;  %v187_v40 = vld [vmem:[%s19818_s1 + $0x4c8] sm:$0xff] }
  0x32   :  { %v12695_v50 = vcombine.high %v187_v40, %v191_v42  ;;  %v12692_v52 = vcombine.low %v186_v38, %v190_v39  ;;  %v12694_v53 = vcombine.low %v187_v40, %v191_v42  ;;  %v247_v40 = vld [vmem:[%s19818_s1 + $0x6a8] sm:$0xff]  ;;  %v12742_v42 = vcombine.low %v235_v30, %v239_v31 }
  0x34   :  { %9700 = vmatpush1.bf16.msra.mxu0 %v12628_v46  ;;  %10233 = vmatpush1.bf16.msra.mxu1 %v12630_v47  ;;  %v12693_v46 = vcombine.high %v186_v38, %v190_v39  ;;  %v194_v47 = vld [vmem:[%s19818_s1 + $0x500] sm:$0xff]  ;;  %v243_v38 = vld [vmem:[%s19818_s1 + $0x688] sm:$0xff]  ;;  %v12743_v39 = vcombine.high %v235_v30, %v239_v31 }
  0x35   :  { %9701 = vmatprep.subr.bf16.mxu0 %v12637_v48  ;;  %10234 = vmatprep.subr.bf16.mxu1 %v12639_v49  ;;  %v198_v48 = vld [vmem:[%s19818_s1 + $0x520] sm:$0xff]  ;;  %v195_v49 = vld [vmem:[%s19818_s1 + $0x508] sm:$0xff] }
  0x36   :  { %v12703_v59 = vcombine.high %v195_v49, %v199_v51  ;;  %v12700_v62 = vcombine.low %v194_v47, %v198_v48  ;;  %v12702_v63 = vcombine.low %v195_v49, %v199_v51  ;;  %v255_v49 = vld [vmem:[%s19818_s1 + $0x6e8] sm:$0xff]  ;;  %v12750_v51 = vcombine.low %v243_v38, %v247_v40 }
  0x37   :  { %v295_v30 = vld [vmem:[%s19818_s1 + $0x828] sm:$0xff] }
  0x38   :  { %9702 = vmatpush1.bf16.msra.mxu0 %v12636_v55  ;;  %10235 = vmatpush1.bf16.msra.mxu1 %v12638_v56  ;;  %v12701_v55 = vcombine.high %v194_v47, %v198_v48  ;;  %v202_v56 = vld [vmem:[%s19818_s1 + $0x540] sm:$0xff]  ;;  %v251_v47 = vld [vmem:[%s19818_s1 + $0x6c8] sm:$0xff]  ;;  %v12751_v48 = vcombine.high %v243_v38, %v247_v40 }
  0x39   :  { %9703 = vmatprep.subr.bf16.mxu0 %v12645_v57  ;;  %10236 = vmatprep.subr.bf16.mxu1 %v12647_v58  ;;  %v206_v57 = vld [vmem:[%s19818_s1 + $0x560] sm:$0xff]  ;;  %v203_v58 = vld [vmem:[%s19818_s1 + $0x548] sm:$0xff] }
  0x3a   :  { %v12711_v5 = vcombine.high %v203_v58, %v207_v61  ;;  %v12708_v7 = vcombine.low %v202_v56, %v206_v57  ;;  %v12710_v8 = vcombine.low %v203_v58, %v207_v61  ;;  %v263_v58 = vld [vmem:[%s19818_s1 + $0x728] sm:$0xff]  ;;  %v12758_v61 = vcombine.low %v251_v47, %v255_v49 }
  0x3c   :  { %9704 = vmatpush1.bf16.msra.mxu0 %v12644_v1  ;;  %10237 = vmatpush1.bf16.msra.mxu1 %v12646_v2  ;;  %v12709_v1 = vcombine.high %v202_v56, %v206_v57  ;;  %v210_v2 = vld [vmem:[%s19818_s1 + $0x580] sm:$0xff]  ;;  %v259_v56 = vld [vmem:[%s19818_s1 + $0x708] sm:$0xff]  ;;  %v12759_v57 = vcombine.high %v251_v47, %v255_v49 }
  0x3d   :  { %9705 = vmatprep.subr.bf16.mxu0 %v12653_v3  ;;  %10238 = vmatprep.subr.bf16.mxu1 %v12655_v4  ;;  %v214_v3 = vld [vmem:[%s19818_s1 + $0x5a0] sm:$0xff]  ;;  %v211_v4 = vld [vmem:[%s19818_s1 + $0x588] sm:$0xff] }
  0x3e   :  { %v12719_v14 = vcombine.high %v211_v4, %v215_v6  ;;  %v12716_v16 = vcombine.low %v210_v2, %v214_v3  ;;  %v12718_v17 = vcombine.low %v211_v4, %v215_v6  ;;  %v271_v4 = vld [vmem:[%s19818_s1 + $0x768] sm:$0xff]  ;;  %v12766_v6 = vcombine.low %v259_v56, %v263_v58 }
  0x40   :  { %9706 = vmatpush1.bf16.msra.mxu0 %v12652_v9  ;;  %10239 = vmatpush1.bf16.msra.mxu1 %v12654_v11  ;;  %v12717_v9 = vcombine.high %v210_v2, %v214_v3  ;;  %v218_v11 = vld [vmem:[%s19818_s1 + $0x5c0] sm:$0xff]  ;;  %v267_v2 = vld [vmem:[%s19818_s1 + $0x748] sm:$0xff]  ;;  %v12767_v3 = vcombine.high %v259_v56, %v263_v58 }
  0x41   :  { %9707 = vmatprep.subr.bf16.mxu0 %v12661_v12  ;;  %10240 = vmatprep.subr.bf16.mxu1 %v12663_v13  ;;  %v222_v12 = vld [vmem:[%s19818_s1 + $0x5e0] sm:$0xff]  ;;  %v219_v13 = vld [vmem:[%s19818_s1 + $0x5c8] sm:$0xff] }
  0x42   :  { %v12727_v22 = vcombine.high %v219_v13, %v223_v15  ;;  %v12724_v25 = vcombine.low %v218_v11, %v222_v12  ;;  %v12726_v26 = vcombine.low %v219_v13, %v223_v15  ;;  %v279_v13 = vld [vmem:[%s19818_s1 + $0x7a8] sm:$0xff]  ;;  %v12774_v15 = vcombine.low %v267_v2, %v271_v4 }
  0x44   :  { %9708 = vmatpush1.bf16.msra.mxu0 %v12660_v18  ;;  %10241 = vmatpush1.bf16.msra.mxu1 %v12662_v19  ;;  %v12725_v18 = vcombine.high %v218_v11, %v222_v12  ;;  %v226_v19 = vld [vmem:[%s19818_s1 + $0x600] sm:$0xff]  ;;  %v275_v11 = vld [vmem:[%s19818_s1 + $0x788] sm:$0xff]  ;;  %v12775_v12 = vcombine.high %v267_v2, %v271_v4 }
  0x45   :  { %9718 = vmatprep.subr.bf16.mxu0 %v12669_v20  ;;  %10251 = vmatprep.subr.bf16.mxu1 %v12671_v21  ;;  %v230_v20 = vld [vmem:[%s19818_s1 + $0x620] sm:$0xff]  ;;  %v227_v21 = vld [vmem:[%s19818_s1 + $0x608] sm:$0xff] }
  0x46   :  { %v12735_v0 = vcombine.high %v227_v21, %v231_v23  ;;  %v12734_v33 = vcombine.low %v227_v21, %v231_v23  ;;  %v287_v21 = vld [vmem:[%s19818_s1 + $0x7e8] sm:$0xff] }
  0x47   :  { %9710 = vmatmul.mubr.bf16.vlgmr.msra.gmra.mrb[0].mxu0 %v14840_v24  ;;  %10243 = vmatmul.mubr.bf16.vlgmr.msra.gmra.mrb[0].mxu1 %v14840_v24 }
  0x48   :  { %9719 = vmatpush1.bf16.msra.mxu0 %v12668_v27  ;;  %10252 = vmatpush1.bf16.msra.mxu1 %v12670_v28  ;;  %v12733_v27 = vcombine.high %v226_v19, %v230_v20  ;;  %v234_v28 = vld [vmem:[%s19818_s1 + $0x640] sm:$0xff] }
  0x49   :  { %9720 = vmatprep.subr.bf16.mxu0 %v12677_v29  ;;  %10253 = vmatprep.subr.bf16.mxu1 %v12679_v32  ;;  %v238_v29 = vld [vmem:[%s19818_s1 + $0x660] sm:$0xff]  ;;  %v12732_v32 = vcombine.low %v226_v19, %v230_v20  ;;  %v283_v19 = vld [vmem:[%s19818_s1 + $0x7c8] sm:$0xff]  ;;  %v12783_v20 = vcombine.high %v275_v11, %v279_v13 }
  0x4a   :  { %9750 = vmatprep.mubr.bf16.mxu0 %v14862_v34  ;;  %10283 = vmatprep.mubr.bf16.mxu1 %v14862_v34 }
  0x4c   :  { %9721 = vmatpush1.bf16.msra.mxu0 %v12676_v35  ;;  %10254 = vmatpush1.bf16.msra.mxu1 %v12678_v36  ;;  %v12741_v35 = vcombine.high %v234_v28, %v238_v29  ;;  %v242_v36 = vld [vmem:[%s19818_s1 + $0x680] sm:$0xff] }
  0x4d   :  { %9722 = vmatprep.subr.bf16.mxu0 %v12685_v37  ;;  %10255 = vmatprep.subr.bf16.mxu1 %v12687_v41  ;;  %v246_v37 = vld [vmem:[%s19818_s1 + $0x6a0] sm:$0xff]  ;;  %v12740_v41 = vcombine.low %v234_v28, %v238_v29  ;;  %v291_v29 = vld [vmem:[%s19818_s1 + $0x808] sm:$0xff] }
  0x4e   :  { %v294_v28 = vld [vmem:[%s19818_s1 + $0x820] sm:$0xff]  ;;  %v12799_v38 = vcombine.high %v291_v29, %v295_v30 }
  0x50   :  { %9723 = vmatpush1.bf16.msra.mxu0 %v12684_v43  ;;  %10256 = vmatpush1.bf16.msra.mxu1 %v12686_v45  ;;  %v12749_v43 = vcombine.high %v242_v36, %v246_v37  ;;  %v250_v45 = vld [vmem:[%s19818_s1 + $0x6c0] sm:$0xff] }
  0x51   :  { %9724 = vmatprep.subr.bf16.mxu0 %v12693_v46  ;;  %10257 = vmatprep.subr.bf16.mxu1 %v12695_v50  ;;  %v254_v46 = vld [vmem:[%s19818_s1 + $0x6e0] sm:$0xff]  ;;  %v12748_v50 = vcombine.low %v242_v36, %v246_v37  ;;  %v299_v37 = vld [vmem:[%s19818_s1 + $0x848] sm:$0xff] }
  0x52   :  { %v302_v36 = vld [vmem:[%s19818_s1 + $0x860] sm:$0xff] }
  0x54   :  { %9725 = vmatpush1.bf16.msra.mxu0 %v12692_v52  ;;  %10258 = vmatpush1.bf16.msra.mxu1 %v12694_v53  ;;  %v12757_v52 = vcombine.high %v250_v45, %v254_v46  ;;  %v258_v53 = vld [vmem:[%s19818_s1 + $0x700] sm:$0xff] }
  0x55   :  { %9726 = vmatprep.subr.bf16.mxu0 %v12701_v55  ;;  %10259 = vmatprep.subr.bf16.mxu1 %v12703_v59  ;;  %v262_v55 = vld [vmem:[%s19818_s1 + $0x720] sm:$0xff]  ;;  %v12756_v59 = vcombine.low %v250_v45, %v254_v46 }
  0x58   :  { %9727 = vmatpush1.bf16.msra.mxu0 %v12700_v62  ;;  %10260 = vmatpush1.bf16.msra.mxu1 %v12702_v63  ;;  %v12765_v62 = vcombine.high %v258_v53, %v262_v55  ;;  %v266_v63 = vld [vmem:[%s19818_s1 + $0x740] sm:$0xff] }
  0x59   :  { %9728 = vmatprep.subr.bf16.mxu0 %v12709_v1  ;;  %10261 = vmatprep.subr.bf16.mxu1 %v12711_v5  ;;  %v270_v1 = vld [vmem:[%s19818_s1 + $0x760] sm:$0xff]  ;;  %v12764_v5 = vcombine.low %v258_v53, %v262_v55 }
  0x5c   :  { %9729 = vmatpush1.bf16.msra.mxu0 %v12708_v7  ;;  %10262 = vmatpush1.bf16.msra.mxu1 %v12710_v8  ;;  %v12773_v7 = vcombine.high %v266_v63, %v270_v1  ;;  %v274_v8 = vld [vmem:[%s19818_s1 + $0x780] sm:$0xff] }
  0x5d   :  { %9730 = vmatprep.subr.bf16.mxu0 %v12717_v9  ;;  %10263 = vmatprep.subr.bf16.mxu1 %v12719_v14  ;;  %v278_v9 = vld [vmem:[%s19818_s1 + $0x7a0] sm:$0xff]  ;;  %v12772_v14 = vcombine.low %v266_v63, %v270_v1 }
  0x5e   :  { %v12780_v23 = vcombine.low %v274_v8, %v278_v9 }
  0x60   :  { %9731 = vmatpush1.bf16.msra.mxu0 %v12716_v16  ;;  %10264 = vmatpush1.bf16.msra.mxu1 %v12718_v17  ;;  %v12781_v16 = vcombine.high %v274_v8, %v278_v9  ;;  %v282_v17 = vld [vmem:[%s19818_s1 + $0x7c0] sm:$0xff] }
  0x61   :  { %9732 = vmatprep.subr.bf16.mxu0 %v12725_v18  ;;  %10265 = vmatprep.subr.bf16.mxu1 %v12727_v22  ;;  %v286_v18 = vld [vmem:[%s19818_s1 + $0x7e0] sm:$0xff]  ;;  %v1648_v22 = vcombine.high %v14699_v60, %v14699_v60  ;;  %v12791_v60 = vcombine.high %v283_v19, %v287_v21 }
  0x62   :  { %v12788_v31 = vcombine.low %v282_v17, %v286_v18 }
  0x64   :  { %9733 = vmatpush1.bf16.msra.mxu0 %v12724_v25  ;;  %10266 = vmatpush1.bf16.msra.mxu1 %v12726_v26  ;;  %v12782_v25 = vcombine.low %v275_v11, %v279_v13  ;;  %v12789_v26 = vcombine.high %v282_v17, %v286_v18 }
  0x65   :  { %9734 = vmatprep.subr.bf16.mxu0 %v12733_v27  ;;  %10267 = vmatprep.subr.bf16.mxu1 %v12735_v0  ;;  %v290_v27 = vld [vmem:[%s19818_s1 + $0x800] sm:$0xff]  ;;  %v15039_v0 = vrot.slane %v1648_v22, %v14688_v54 }
  0x67   :  { %v1664_v40 = vcombine.high %v15039_v0, %v15039_v0 }
  0x68   :  { %9735 = vmatpush1.bf16.msra.mxu0 %v12732_v32  ;;  %10268 = vmatpush1.bf16.msra.mxu1 %v12734_v33  ;;  %v12790_v32 = vcombine.low %v283_v19, %v287_v21  ;;  %v12797_v33 = vcombine.high %v290_v27, %v294_v28 }
  0x69   :  { %9736 = vmatprep.subr.bf16.mxu0 %v12741_v35  ;;  %10269 = vmatprep.subr.bf16.mxu1 %v12743_v39  ;;  %v298_v35 = vld [vmem:[%s19818_s1 + $0x840] sm:$0xff]  ;;  %v303_v39 = vld [vmem:[%s19818_s1 + $0x868] sm:$0xff] }
  0x6c   :  { %9737 = vmatpush1.bf16.msra.mxu0 %v12740_v41  ;;  %10270 = vmatpush1.bf16.msra.mxu1 %v12742_v42  ;;  %v15057_v41 = vcombine.high %v14840_v24, %v14840_v24  ;;  %v12796_v42 = vcombine.low %v290_v27, %v294_v28 }
  0x6d   :  { %9738 = vmatprep.subr.bf16.mxu0 %v12749_v43  ;;  %10271 = vmatprep.subr.bf16.mxu1 %v12751_v48 }
  0x70   :  { %9739 = vmatpush1.bf16.msra.mxu0 %v12748_v50  ;;  %10272 = vmatpush1.bf16.msra.mxu1 %v12750_v51 }
  0x71   :  { %9740 = vmatprep.subr.bf16.mxu0 %v12757_v52  ;;  %10273 = vmatprep.subr.bf16.mxu1 %v12759_v57 }
  0x74   :  { %9741 = vmatpush1.bf16.msra.mxu0 %v12756_v59  ;;  %10274 = vmatpush1.bf16.msra.mxu1 %v12758_v61 }
  0x75   :  { %9742 = vmatprep.subr.bf16.mxu0 %v12765_v62  ;;  %10275 = vmatprep.subr.bf16.mxu1 %v12767_v3 }
  0x78   :  { %9743 = vmatpush1.bf16.msra.mxu0 %v12764_v5  ;;  %10276 = vmatpush1.bf16.msra.mxu1 %v12766_v6 }
  0x79   :  { %9744 = vmatprep.subr.bf16.mxu0 %v12773_v7  ;;  %10277 = vmatprep.subr.bf16.mxu1 %v12775_v12 }
  0x7c   :  { %9745 = vmatpush1.bf16.msra.mxu0 %v12772_v14  ;;  %10278 = vmatpush1.bf16.msra.mxu1 %v12774_v15 }
  0x7d   :  { %9746 = vmatprep.subr.bf16.mxu0 %v12781_v16  ;;  %10279 = vmatprep.subr.bf16.mxu1 %v12783_v20 }
  0x80   :  { %9747 = vmatpush1.bf16.msra.mxu0 %v12780_v23  ;;  %10280 = vmatpush1.bf16.msra.mxu1 %v12782_v25 }
  0x81   :  { %9748 = vmatprep.subr.bf16.mxu0 %v12789_v26  ;;  %10281 = vmatprep.subr.bf16.mxu1 %v12791_v60 }
  0x84   :  { %9749 = vmatpush1.bf16.msra.mxu0 %v12788_v31 }
  0x85   :  { %14 = vsyncpa [#allocation4], 0  ;;  %10282 = vmatpush1.bf16.msra.mxu1 %v12790_v32  ;;  %9759 = vmatprep.subr.bf16.mxu0 %v12797_v33  ;;  %v12798_v43 = vcombine.low %v291_v29, %v295_v30  ;;  %v12805_v45 = vcombine.high %v298_v35, %v302_v36  ;;  %v12807_v46 = vcombine.high %v299_v37, %v303_v39  ;;  %v306_v47 = vld [vmem:[%s19818_s1 + $0x880] sm:$0xff]  ;;  %v307_v50 = vld [vmem:[%s19818_s1 + $0x888] sm:$0xff]  ;;  %vm9673_vm0 = vcmask 523264  }
  0x86   :  { %10292 = vmatprep.subr.bf16.mxu1 %v12799_v38  ;;  %v310_v48 = vld [vmem:[%s19818_s1 + $0x8a0] sm:$0xff]  ;;  %v15066_v49 = vrot.slane %v1664_v40, %v14688_v54  ;;  %v311_v51 = vld [vmem:[%s19818_s1 + $0x8a8] sm:$0xff]  ;;  %v12804_v52 = vcombine.low %v298_v35, %v302_v36  ;;  %v12806_v53 = vcombine.low %v299_v37, %v303_v39  ;;  %vm12511_vm1 = vcmask 140288  }
  0x87   :  { %9751 = vmatmul.mubr.bf16.vlgmr.msra.gmra.mrb[0].mxu0 %v15057_v41  ;;  %v12813_v55 = vcombine.high %v306_v47, %v310_v48  ;;  %v12815_v56 = vcombine.high %v307_v50, %v311_v51  ;;  %v314_v57 = vld [vmem:[%s19818_s1 + $0x8c0] sm:$0xff]  ;;  %v315_v59 = vld [vmem:[%s19818_s1 + $0x8c8] sm:$0xff]  ;;  %v12812_v62 = vcombine.low %v306_v47, %v310_v48  ;;  %v12814_v63 = vcombine.low %v307_v50, %v311_v51 }
  0x88   :  { %9760 = vmatpush1.bf16.msra.mxu0 %v12796_v42  ;;  %10284 = vmatmul.mubr.bf16.vlgmr.msra.gmra.mrb[0].mxu1 %v15057_v41  ;;  %v318_v58 = vld [vmem:[%s19818_s1 + $0x8e0] sm:$0xff]  ;;  %v319_v61 = vld [vmem:[%s19818_s1 + $0x8e8] sm:$0xff] }
  0x89   :  { %10293 = vmatpush1.bf16.msra.mxu1 %v12798_v43  ;;  %9761 = vmatprep.subr.bf16.mxu0 %v12805_v45  ;;  %v12821_v1 = vcombine.high %v314_v57, %v318_v58  ;;  %v12823_v2 = vcombine.high %v315_v59, %v319_v61  ;;  %v322_v3 = vld [vmem:[%s19818_s1 + $0x900] sm:$0xff]  ;;  %v323_v5 = vld [vmem:[%s19818_s1 + $0x908] sm:$0xff]  ;;  %v12820_v7 = vcombine.low %v314_v57, %v318_v58 }
  0x8a   :  { %10294 = vmatprep.subr.bf16.mxu1 %v12807_v46  ;;  %9791 = vmatprep.mubr.bf16.mxu0 %v15066_v49  ;;  %v326_v4 = vld [vmem:[%s19818_s1 + $0x920] sm:$0xff]  ;;  %v327_v6 = vld [vmem:[%s19818_s1 + $0x928] sm:$0xff]  ;;  %v12822_v8 = vcombine.low %v315_v59, %v319_v61 }
  0x8b   :  { %10324 = vmatprep.mubr.bf16.mxu1 %v15066_v49  ;;  %v12829_v9 = vcombine.high %v322_v3, %v326_v4  ;;  %v12831_v11 = vcombine.high %v323_v5, %v327_v6  ;;  %v330_v12 = vld [vmem:[%s19818_s1 + $0x940] sm:$0xff]  ;;  %v331_v14 = vld [vmem:[%s19818_s1 + $0x948] sm:$0xff]  ;;  %v12828_v16 = vcombine.low %v322_v3, %v326_v4  ;;  %v12830_v17 = vcombine.low %v323_v5, %v327_v6 }
  0x8c   :  { %9762 = vmatpush1.bf16.msra.mxu0 %v12804_v52  ;;  %v334_v13 = vld [vmem:[%s19818_s1 + $0x960] sm:$0xff]  ;;  %v335_v15 = vld [vmem:[%s19818_s1 + $0x968] sm:$0xff] }
  0x8d   :  { %10295 = vmatpush1.bf16.msra.mxu1 %v12806_v53  ;;  %9763 = vmatprep.subr.bf16.mxu0 %v12813_v55  ;;  %v12837_v18 = vcombine.high %v330_v12, %v334_v13  ;;  %v12839_v19 = vcombine.high %v331_v14, %v335_v15  ;;  %v338_v20 = vld [vmem:[%s19818_s1 + $0x980] sm:$0xff]  ;;  %v339_v22 = vld [vmem:[%s19818_s1 + $0x988] sm:$0xff]  ;;  %v12836_v25 = vcombine.low %v330_v12, %v334_v13 }
  0x8e   :  { %10296 = vmatprep.subr.bf16.mxu1 %v12815_v56  ;;  %v342_v21 = vld [vmem:[%s19818_s1 + $0x9a0] sm:$0xff]  ;;  %v343_v23 = vld [vmem:[%s19818_s1 + $0x9a8] sm:$0xff]  ;;  %v12838_v26 = vcombine.low %v331_v14, %v335_v15 }
  0x8f   :  { %v12845_v27 = vcombine.high %v338_v20, %v342_v21  ;;  %v12847_v28 = vcombine.high %v339_v22, %v343_v23  ;;  %v346_v29 = vld [vmem:[%s19818_s1 + $0x9c0] sm:$0xff]  ;;  %v347_v30 = vld [vmem:[%s19818_s1 + $0x9c8] sm:$0xff]  ;;  %v12844_v32 = vcombine.low %v338_v20, %v342_v21  ;;  %v12846_v33 = vcombine.low %v339_v22, %v343_v23 }
  0x90   :  { %9764 = vmatpush1.bf16.msra.mxu0 %v12812_v62  ;;  %v350_v60 = vld [vmem:[%s19818_s1 + $0x9e0] sm:$0xff]  ;;  %v351_v31 = vld [vmem:[%s19818_s1 + $0x9e8] sm:$0xff] }
  0x91   :  { %10297 = vmatpush1.bf16.msra.mxu1 %v12814_v63  ;;  %9765 = vmatprep.subr.bf16.mxu0 %v12821_v1  ;;  %v12853_v35 = vcombine.high %v346_v29, %v350_v60  ;;  %v12855_v36 = vcombine.high %v347_v30, %v351_v31  ;;  %v354_v37 = vld [vmem:[%s19818_s1 + $0xa00] sm:$0xff]  ;;  %v355_v39 = vld [vmem:[%s19818_s1 + $0xa08] sm:$0xff]  ;;  %v12852_v42 = vcombine.low %v346_v29, %v350_v60 }
  0x92   :  { %10298 = vmatprep.subr.bf16.mxu1 %v12823_v2  ;;  %v358_v38 = vld [vmem:[%s19818_s1 + $0xa20] sm:$0xff]  ;;  %v359_v40 = vld [vmem:[%s19818_s1 + $0xa28] sm:$0xff]  ;;  %v12854_v43 = vcombine.low %v347_v30, %v351_v31 }
  0x93   :  { %v12861_v45 = vcombine.high %v354_v37, %v358_v38  ;;  %v12863_v46 = vcombine.high %v355_v39, %v359_v40  ;;  %v362_v47 = vld [vmem:[%s19818_s1 + $0xa40] sm:$0xff]  ;;  %v363_v50 = vld [vmem:[%s19818_s1 + $0xa48] sm:$0xff]  ;;  %v12860_v52 = vcombine.low %v354_v37, %v358_v38  ;;  %v12862_v53 = vcombine.low %v355_v39, %v359_v40 }
  0x94   :  { %9766 = vmatpush1.bf16.msra.mxu0 %v12820_v7  ;;  %v366_v48 = vld [vmem:[%s19818_s1 + $0xa60] sm:$0xff]  ;;  %v367_v51 = vld [vmem:[%s19818_s1 + $0xa68] sm:$0xff] }
  0x95   :  { %10299 = vmatpush1.bf16.msra.mxu1 %v12822_v8  ;;  %9767 = vmatprep.subr.bf16.mxu0 %v12829_v9  ;;  %v12869_v55 = vcombine.high %v362_v47, %v366_v48  ;;  %v12871_v56 = vcombine.high %v363_v50, %v367_v51  ;;  %v370_v57 = vld [vmem:[%s19818_s1 + $0xa80] sm:$0xff]  ;;  %v371_v59 = vld [vmem:[%s19818_s1 + $0xa88] sm:$0xff]  ;;  %v12868_v62 = vcombine.low %v362_v47, %v366_v48 }
  0x96   :  { %10300 = vmatprep.subr.bf16.mxu1 %v12831_v11  ;;  %v374_v58 = vld [vmem:[%s19818_s1 + $0xaa0] sm:$0xff]  ;;  %v375_v61 = vld [vmem:[%s19818_s1 + $0xaa8] sm:$0xff]  ;;  %v12870_v63 = vcombine.low %v363_v50, %v367_v51 }
  0x97   :  { %v12877_v1 = vcombine.high %v370_v57, %v374_v58  ;;  %v12879_v2 = vcombine.high %v371_v59, %v375_v61  ;;  %v378_v3 = vld [vmem:[%s19818_s1 + $0xac0] sm:$0xff]  ;;  %v379_v5 = vld [vmem:[%s19818_s1 + $0xac8] sm:$0xff]  ;;  %v12876_v7 = vcombine.low %v370_v57, %v374_v58  ;;  %v12878_v8 = vcombine.low %v371_v59, %v375_v61 }
  0x98   :  { %9768 = vmatpush1.bf16.msra.mxu0 %v12828_v16  ;;  %v382_v4 = vld [vmem:[%s19818_s1 + $0xae0] sm:$0xff]  ;;  %v383_v6 = vld [vmem:[%s19818_s1 + $0xae8] sm:$0xff]  ;;  %v15254_v59 = vrot.slane %v15039_v0, %v14688_v54 }
  0x99   :  { %10301 = vmatpush1.bf16.msra.mxu1 %v12830_v17  ;;  %9769 = vmatprep.subr.bf16.mxu0 %v12837_v18  ;;  %v12885_v9 = vcombine.high %v378_v3, %v382_v4  ;;  %v12887_v11 = vcombine.high %v379_v5, %v383_v6  ;;  %v386_v12 = vld [vmem:[%s19818_s1 + $0xb00] sm:$0xff]  ;;  %v387_v14 = vld [vmem:[%s19818_s1 + $0xb08] sm:$0xff]  ;;  %v12884_v16 = vcombine.low %v378_v3, %v382_v4 }
  0x9a   :  { %10302 = vmatprep.subr.bf16.mxu1 %v12839_v19  ;;  %v390_v13 = vld [vmem:[%s19818_s1 + $0xb20] sm:$0xff]  ;;  %v391_v15 = vld [vmem:[%s19818_s1 + $0xb28] sm:$0xff]  ;;  %v12886_v17 = vcombine.low %v379_v5, %v383_v6  ;;  %v15270_v5 = vcombine.high %v15066_v49, %v15066_v49 }
  0x9b   :  { %v12893_v18 = vcombine.high %v386_v12, %v390_v13  ;;  %v12895_v19 = vcombine.high %v387_v14, %v391_v15  ;;  %v394_v20 = vld [vmem:[%s19818_s1 + $0xb40] sm:$0xff]  ;;  %v395_v22 = vld [vmem:[%s19818_s1 + $0xb48] sm:$0xff] }
  0x9c   :  { %9770 = vmatpush1.bf16.msra.mxu0 %v12836_v25  ;;  %v398_v21 = vld [vmem:[%s19818_s1 + $0xb60] sm:$0xff]  ;;  %v399_v23 = vld [vmem:[%s19818_s1 + $0xb68] sm:$0xff]  ;;  %v12892_v25 = vcombine.low %v386_v12, %v390_v13 }
  0x9d   :  { %10303 = vmatpush1.bf16.msra.mxu1 %v12838_v26  ;;  %9771 = vmatprep.subr.bf16.mxu0 %v12845_v27  ;;  %v12894_v26 = vcombine.low %v387_v14, %v391_v15  ;;  %v12901_v27 = vcombine.high %v394_v20, %v398_v21  ;;  %v402_v29 = vld [vmem:[%s19818_s1 + $0xb80] sm:$0xff]  ;;  %v403_v30 = vld [vmem:[%s19818_s1 + $0xb88] sm:$0xff] }
  0x9e   :  { %10304 = vmatprep.subr.bf16.mxu1 %v12847_v28  ;;  %v12903_v28 = vcombine.high %v395_v22, %v399_v23  ;;  %v406_v60 = vld [vmem:[%s19818_s1 + $0xba0] sm:$0xff]  ;;  %v407_v31 = vld [vmem:[%s19818_s1 + $0xba8] sm:$0xff] }
  0x9f   :  { %v410_v37 = vld [vmem:[%s19818_s1 + $0xbc0] sm:$0xff]  ;;  %v411_v39 = vld [vmem:[%s19818_s1 + $0xbc8] sm:$0xff] }
  0xa0   :  { %9772 = vmatpush1.bf16.msra.mxu0 %v12844_v32  ;;  %v12900_v32 = vcombine.low %v394_v20, %v398_v21  ;;  %v414_v38 = vld [vmem:[%s19818_s1 + $0xbe0] sm:$0xff]  ;;  %v415_v40 = vld [vmem:[%s19818_s1 + $0xbe8] sm:$0xff] }
  0xa1   :  { %10305 = vmatpush1.bf16.msra.mxu1 %v12846_v33  ;;  %9773 = vmatprep.subr.bf16.mxu0 %v12853_v35  ;;  %v12902_v33 = vcombine.low %v395_v22, %v399_v23  ;;  %v12909_v35 = vcombine.high %v402_v29, %v406_v60  ;;  %v418_v47 = vld [vmem:[%s19818_s1 + $0xc00] sm:$0xff]  ;;  %v419_v50 = vld [vmem:[%s19818_s1 + $0xc08] sm:$0xff] }
  0xa2   :  { %10306 = vmatprep.subr.bf16.mxu1 %v12855_v36  ;;  %v12911_v36 = vcombine.high %v403_v30, %v407_v31  ;;  %v422_v48 = vld [vmem:[%s19818_s1 + $0xc20] sm:$0xff]  ;;  %v423_v51 = vld [vmem:[%s19818_s1 + $0xc28] sm:$0xff] }
  0xa3   :  { %v426_v57 = vld [vmem:[%s19818_s1 + $0xc40] sm:$0xff]  ;;  %v427_v61 = vld [vmem:[%s19818_s1 + $0xc48] sm:$0xff] }
  0xa4   :  { %9774 = vmatpush1.bf16.msra.mxu0 %v12852_v42  ;;  %v12908_v42 = vcombine.low %v402_v29, %v406_v60  ;;  %v430_v58 = vld [vmem:[%s19818_s1 + $0xc60] sm:$0xff]  ;;  %v435_v6 = vld [vmem:[%s19818_s1 + $0xc88] sm:$0xff] }
  0xa5   :  { %10307 = vmatpush1.bf16.msra.mxu1 %v12854_v43  ;;  %9775 = vmatprep.subr.bf16.mxu0 %v12861_v45  ;;  %v12910_v43 = vcombine.low %v403_v30, %v407_v31  ;;  %v12917_v45 = vcombine.high %v410_v37, %v414_v38  ;;  %v434_v0 = vld [vmem:[%s19818_s1 + $0xc80] sm:$0xff]  ;;  %v443_v15 = vld [vmem:[%s19818_s1 + $0xcc8] sm:$0xff] }
  0xa6   :  { %10308 = vmatprep.subr.bf16.mxu1 %v12863_v46  ;;  %v12919_v46 = vcombine.high %v411_v39, %v415_v40  ;;  %v438_v4 = vld [vmem:[%s19818_s1 + $0xca0] sm:$0xff]  ;;  %v451_v23 = vld [vmem:[%s19818_s1 + $0xd08] sm:$0xff] }
  0xa7   :  { %v442_v13 = vld [vmem:[%s19818_s1 + $0xcc0] sm:$0xff]  ;;  %v459_v31 = vld [vmem:[%s19818_s1 + $0xd48] sm:$0xff] }
  0xa8   :  { %9776 = vmatpush1.bf16.msra.mxu0 %v12860_v52  ;;  %v12916_v52 = vcombine.low %v410_v37, %v414_v38  ;;  %v446_v14 = vld [vmem:[%s19818_s1 + $0xce0] sm:$0xff] }
  0xa9   :  { %10309 = vmatpush1.bf16.msra.mxu1 %v12862_v53  ;;  %9777 = vmatprep.subr.bf16.mxu0 %v12869_v55  ;;  %v12918_v53 = vcombine.low %v411_v39, %v415_v40  ;;  %v12925_v55 = vcombine.high %v418_v47, %v422_v48  ;;  %v450_v21 = vld [vmem:[%s19818_s1 + $0xd00] sm:$0xff]  ;;  %v467_v40 = vld [vmem:[%s19818_s1 + $0xd88] sm:$0xff] }
  0xaa   :  { %10310 = vmatprep.subr.bf16.mxu1 %v12871_v56  ;;  %v12927_v56 = vcombine.high %v419_v50, %v423_v51  ;;  %v454_v22 = vld [vmem:[%s19818_s1 + $0xd20] sm:$0xff] }
  0xab   :  { %v458_v60 = vld [vmem:[%s19818_s1 + $0xd40] sm:$0xff] }
  0xac   :  { %9778 = vmatpush1.bf16.msra.mxu0 %v12868_v62  ;;  %v431_v62 = vld [vmem:[%s19818_s1 + $0xc68] sm:$0xff]  ;;  %v462_v30 = vld [vmem:[%s19818_s1 + $0xd60] sm:$0xff] }
  0xad   :  { %10311 = vmatpush1.bf16.msra.mxu1 %v12870_v63  ;;  %9779 = vmatprep.subr.bf16.mxu0 %v12877_v1  ;;  %v12924_v63 = vcombine.low %v418_v47, %v422_v48  ;;  %v12926_v1 = vcombine.low %v419_v50, %v423_v51  ;;  %v12935_v3 = vcombine.high %v427_v61, %v431_v62  ;;  %v466_v38 = vld [vmem:[%s19818_s1 + $0xd80] sm:$0xff]  ;;  %v475_v51 = vld [vmem:[%s19818_s1 + $0xdc8] sm:$0xff] }
  0xae   :  { %10312 = vmatprep.subr.bf16.mxu1 %v12879_v2  ;;  %v12933_v2 = vcombine.high %v426_v57, %v430_v58  ;;  %v470_v39 = vld [vmem:[%s19818_s1 + $0xda0] sm:$0xff] }
  0xaf   :  { %v474_v48 = vld [vmem:[%s19818_s1 + $0xdc0] sm:$0xff] }
  0xb0   :  { %9780 = vmatpush1.bf16.msra.mxu0 %v12876_v7  ;;  %v439_v7 = vld [vmem:[%s19818_s1 + $0xca8] sm:$0xff]  ;;  %v478_v50 = vld [vmem:[%s19818_s1 + $0xde0] sm:$0xff] }
  0xb1   :  { %10313 = vmatpush1.bf16.msra.mxu1 %v12878_v8  ;;  %9781 = vmatprep.subr.bf16.mxu0 %v12885_v9  ;;  %v12932_v8 = vcombine.low %v426_v57, %v430_v58  ;;  %v12934_v9 = vcombine.low %v427_v61, %v431_v62  ;;  %v12943_v12 = vcombine.high %v435_v6, %v439_v7  ;;  %v482_v58 = vld [vmem:[%s19818_s1 + $0xe00] sm:$0xff]  ;;  %v483_v62 = vld [vmem:[%s19818_s1 + $0xe08] sm:$0xff] }
  0xb2   :  { %10314 = vmatprep.subr.bf16.mxu1 %v12887_v11  ;;  %v12941_v11 = vcombine.high %v434_v0, %v438_v4  ;;  %v486_v61 = vld [vmem:[%s19818_s1 + $0xe20] sm:$0xff] }
  0xb4   :  { %9782 = vmatpush1.bf16.msra.mxu0 %v12884_v16  ;;  %v447_v16 = vld [vmem:[%s19818_s1 + $0xce8] sm:$0xff] }
  0xb5   :  { %10315 = vmatpush1.bf16.msra.mxu1 %v12886_v17  ;;  %9783 = vmatprep.subr.bf16.mxu0 %v12893_v18  ;;  %v12940_v17 = vcombine.low %v434_v0, %v438_v4  ;;  %v12942_v18 = vcombine.low %v435_v6, %v439_v7  ;;  %v12951_v20 = vcombine.high %v443_v15, %v447_v16  ;;  %v490_v4 = vld [vmem:[%s19818_s1 + $0xe40] sm:$0xff]  ;;  %v491_v7 = vld [vmem:[%s19818_s1 + $0xe48] sm:$0xff] }
  0xb6   :  { %10316 = vmatprep.subr.bf16.mxu1 %v12895_v19  ;;  %v12949_v19 = vcombine.high %v442_v13, %v446_v14  ;;  %v494_v6 = vld [vmem:[%s19818_s1 + $0xe60] sm:$0xff] }
  0xb8   :  { %9784 = vmatpush1.bf16.msra.mxu0 %v12892_v25  ;;  %v455_v25 = vld [vmem:[%s19818_s1 + $0xd28] sm:$0xff] }
  0xb9   :  { %10317 = vmatpush1.bf16.msra.mxu1 %v12894_v26  ;;  %9785 = vmatprep.subr.bf16.mxu0 %v12901_v27  ;;  %v12948_v26 = vcombine.low %v442_v13, %v446_v14  ;;  %v12950_v27 = vcombine.low %v443_v15, %v447_v16  ;;  %v12959_v29 = vcombine.high %v451_v23, %v455_v25  ;;  %v498_v14 = vld [vmem:[%s19818_s1 + $0xe80] sm:$0xff]  ;;  %v499_v16 = vld [vmem:[%s19818_s1 + $0xe88] sm:$0xff] }
  0xba   :  { %10318 = vmatprep.subr.bf16.mxu1 %v12903_v28  ;;  %v12957_v28 = vcombine.high %v450_v21, %v454_v22  ;;  %v502_v15 = vld [vmem:[%s19818_s1 + $0xea0] sm:$0xff] }
  0xbc   :  { %9786 = vmatpush1.bf16.msra.mxu0 %v12900_v32  ;;  %v463_v32 = vld [vmem:[%s19818_s1 + $0xd68] sm:$0xff] }
  0xbd   :  { %10319 = vmatpush1.bf16.msra.mxu1 %v12902_v33  ;;  %9787 = vmatprep.subr.bf16.mxu0 %v12909_v35  ;;  %v12956_v33 = vcombine.low %v450_v21, %v454_v22  ;;  %v12958_v35 = vcombine.low %v451_v23, %v455_v25  ;;  %v12967_v37 = vcombine.high %v459_v31, %v463_v32  ;;  %v506_v22 = vld [vmem:[%s19818_s1 + $0xec0] sm:$0xff]  ;;  %v507_v25 = vld [vmem:[%s19818_s1 + $0xec8] sm:$0xff] }
  0xbe   :  { %10320 = vmatprep.subr.bf16.mxu1 %v12911_v36  ;;  %v12965_v36 = vcombine.high %v458_v60, %v462_v30  ;;  %v510_v23 = vld [vmem:[%s19818_s1 + $0xee0] sm:$0xff] }
  0xc0   :  { %9788 = vmatpush1.bf16.msra.mxu0 %v12908_v42  ;;  %v471_v42 = vld [vmem:[%s19818_s1 + $0xda8] sm:$0xff] }
  0xc1   :  { %10321 = vmatpush1.bf16.msra.mxu1 %v12910_v43  ;;  %9789 = vmatprep.subr.bf16.mxu0 %v12917_v45  ;;  %v12964_v43 = vcombine.low %v458_v60, %v462_v30  ;;  %v12966_v45 = vcombine.low %v459_v31, %v463_v32  ;;  %v12975_v47 = vcombine.high %v467_v40, %v471_v42  ;;  %v514_v30 = vld [vmem:[%s19818_s1 + $0xf00] sm:$0xff]  ;;  %v515_v32 = vld [vmem:[%s19818_s1 + $0xf08] sm:$0xff] }
  0xc2   :  { %10322 = vmatprep.subr.bf16.mxu1 %v12919_v46  ;;  %v12973_v46 = vcombine.high %v466_v38, %v470_v39  ;;  %v518_v31 = vld [vmem:[%s19818_s1 + $0xf20] sm:$0xff] }
  0xc4   :  { %9790 = vmatpush1.bf16.msra.mxu0 %v12916_v52  ;;  %v479_v52 = vld [vmem:[%s19818_s1 + $0xde8] sm:$0xff] }
  0xc5   :  { %10323 = vmatpush1.bf16.msra.mxu1 %v12918_v53  ;;  %9800 = vmatprep.subr.bf16.mxu0 %v12925_v55  ;;  %v12972_v53 = vcombine.low %v466_v38, %v470_v39  ;;  %v12974_v55 = vcombine.low %v467_v40, %v471_v42  ;;  %v12983_v57 = vcombine.high %v475_v51, %v479_v52  ;;  %v522_v39 = vld [vmem:[%s19818_s1 + $0xf40] sm:$0xff]  ;;  %v523_v42 = vld [vmem:[%s19818_s1 + $0xf48] sm:$0xff] }
  0xc6   :  { %10333 = vmatprep.subr.bf16.mxu1 %v12927_v56  ;;  %v12981_v56 = vcombine.high %v474_v48, %v478_v50  ;;  %v526_v40 = vld [vmem:[%s19818_s1 + $0xf60] sm:$0xff] }
  0xc7   :  { %9792 = vmatmul.mubr.bf16.vlgmr.msra.gmra.mrb[0].mxu0 %v15254_v59 }
  0xc8   :  { %9801 = vmatpush1.bf16.msra.mxu0 %v12924_v63  ;;  %10325 = vmatmul.mubr.bf16.vlgmr.msra.gmra.mrb[0].mxu1 %v15254_v59  ;;  %v487_v63 = vld [vmem:[%s19818_s1 + $0xe28] sm:$0xff] }
  0xc9   :  { %10334 = vmatpush1.bf16.msra.mxu1 %v12926_v1  ;;  %9802 = vmatprep.subr.bf16.mxu0 %v12933_v2  ;;  %v12980_v1 = vcombine.low %v474_v48, %v478_v50  ;;  %v12982_v2 = vcombine.low %v475_v51, %v479_v52  ;;  %v12991_v0 = vcombine.high %v483_v62, %v487_v63  ;;  %v530_v50 = vld [vmem:[%s19818_s1 + $0xf80] sm:$0xff]  ;;  %v531_v52 = vld [vmem:[%s19818_s1 + $0xf88] sm:$0xff] }
  0xca   :  { %10335 = vmatprep.subr.bf16.mxu1 %v12935_v3  ;;  %9832 = vmatprep.mubr.bf16.mxu0 %v15270_v5  ;;  %v12989_v3 = vcombine.high %v482_v58, %v486_v61  ;;  %v534_v51 = vld [vmem:[%s19818_s1 + $0xfa0] sm:$0xff] }
  0xcb   :  { %10365 = vmatprep.mubr.bf16.mxu1 %v15270_v5 }
  0xcc   :  { %9803 = vmatpush1.bf16.msra.mxu0 %v12932_v8  ;;  %v495_v8 = vld [vmem:[%s19818_s1 + $0xe68] sm:$0xff] }
  0xcd   :  { %10336 = vmatpush1.bf16.msra.mxu1 %v12934_v9  ;;  %9804 = vmatprep.subr.bf16.mxu0 %v12941_v11  ;;  %v12988_v9 = vcombine.low %v482_v58, %v486_v61  ;;  %v12990_v11 = vcombine.low %v483_v62, %v487_v63  ;;  %v12999_v13 = vcombine.high %v491_v7, %v495_v8  ;;  %v538_v61 = vld [vmem:[%s19818_s1 + $0xfc0] sm:$0xff]  ;;  %v539_v63 = vld [vmem:[%s19818_s1 + $0xfc8] sm:$0xff] }
  0xce   :  { %10337 = vmatprep.subr.bf16.mxu1 %v12943_v12  ;;  %v12997_v12 = vcombine.high %v490_v4, %v494_v6  ;;  %v542_v62 = vld [vmem:[%s19818_s1 + $0xfe0] sm:$0xff] }
  0xd0   :  { %9805 = vmatpush1.bf16.msra.mxu0 %v12940_v17  ;;  %v503_v17 = vld [vmem:[%s19818_s1 + $0xea8] sm:$0xff] }
  0xd1   :  { %10338 = vmatpush1.bf16.msra.mxu1 %v12942_v18  ;;  %9806 = vmatprep.subr.bf16.mxu0 %v12949_v19  ;;  %v12996_v18 = vcombine.low %v490_v4, %v494_v6  ;;  %v12998_v19 = vcombine.low %v491_v7, %v495_v8  ;;  %v13007_v21 = vcombine.high %v499_v16, %v503_v17  ;;  %v546_v7 = vld [vmem:[%s19818_s1 + $0x1000] sm:$0xff] }
  0xd2   :  { %10339 = vmatprep.subr.bf16.mxu1 %v12951_v20  ;;  %v13005_v20 = vcombine.high %v498_v14, %v502_v15  ;;  %v13045_v4 = vcombine.high %v538_v61, %v542_v62  ;;  %v550_v8 = vld [vmem:[%s19818_s1 + $0x1020] sm:$0xff] }
  0xd4   :  { %9807 = vmatpush1.bf16.msra.mxu0 %v12948_v26  ;;  %v511_v26 = vld [vmem:[%s19818_s1 + $0xee8] sm:$0xff] }
  0xd5   :  { %10340 = vmatpush1.bf16.msra.mxu1 %v12950_v27  ;;  %9808 = vmatprep.subr.bf16.mxu0 %v12957_v28  ;;  %v13004_v27 = vcombine.low %v498_v14, %v502_v15  ;;  %v13006_v28 = vcombine.low %v499_v16, %v503_v17  ;;  %v13015_v60 = vcombine.high %v507_v25, %v511_v26  ;;  %v554_v17 = vld [vmem:[%s19818_s1 + $0x1040] sm:$0xff] }
  0xd6   :  { %10341 = vmatprep.subr.bf16.mxu1 %v12959_v29  ;;  %v13013_v29 = vcombine.high %v506_v22, %v510_v23  ;;  %v13053_v15 = vcombine.high %v546_v7, %v550_v8 }
  0xd8   :  { %9809 = vmatpush1.bf16.msra.mxu0 %v12956_v33  ;;  %v519_v33 = vld [vmem:[%s19818_s1 + $0xf28] sm:$0xff] }
  0xd9   :  { %10342 = vmatpush1.bf16.msra.mxu1 %v12958_v35  ;;  %9810 = vmatprep.subr.bf16.mxu0 %v12965_v36  ;;  %v13012_v35 = vcombine.low %v506_v22, %v510_v23  ;;  %v13014_v36 = vcombine.low %v507_v25, %v511_v26  ;;  %v13023_v38 = vcombine.high %v515_v32, %v519_v33  ;;  %v559_v22 = vld [vmem:[%s19818_s1 + $0x1068] sm:$0xff] }
  0xda   :  { %10343 = vmatprep.subr.bf16.mxu1 %v12967_v37  ;;  %v13021_v37 = vcombine.high %v514_v30, %v518_v31  ;;  %v13052_v23 = vcombine.low %v546_v7, %v550_v8  ;;  %v595_v7 = vld [vmem:[%s19818_s1 + $0x1188] sm:$0xff] }
  0xdb   :  { %v599_v8 = vld [vmem:[%s19818_s1 + $0x11a8] sm:$0xff] }
  0xdc   :  { %9811 = vmatpush1.bf16.msra.mxu0 %v12964_v43  ;;  %v527_v43 = vld [vmem:[%s19818_s1 + $0xf68] sm:$0xff] }
  0xdd   :  { %10344 = vmatpush1.bf16.msra.mxu1 %v12966_v45  ;;  %9812 = vmatprep.subr.bf16.mxu0 %v12973_v46  ;;  %v13020_v45 = vcombine.low %v514_v30, %v518_v31  ;;  %v13022_v46 = vcombine.low %v515_v32, %v519_v33  ;;  %v13031_v48 = vcombine.high %v523_v42, %v527_v43  ;;  %v563_v30 = vld [vmem:[%s19818_s1 + $0x1088] sm:$0xff] }
  0xde   :  { %10345 = vmatprep.subr.bf16.mxu1 %v12975_v47  ;;  %v13029_v47 = vcombine.high %v522_v39, %v526_v40  ;;  %v567_v31 = vld [vmem:[%s19818_s1 + $0x10a8] sm:$0xff] }
  0xe0   :  { %9813 = vmatpush1.bf16.msra.mxu0 %v12972_v53  ;;  %v535_v53 = vld [vmem:[%s19818_s1 + $0xfa8] sm:$0xff] }
  0xe1   :  { %10346 = vmatpush1.bf16.msra.mxu1 %v12974_v55  ;;  %9814 = vmatprep.subr.bf16.mxu0 %v12981_v56  ;;  %v13028_v55 = vcombine.low %v522_v39, %v526_v40  ;;  %v13030_v56 = vcombine.low %v523_v42, %v527_v43  ;;  %v13039_v58 = vcombine.high %v531_v52, %v535_v53  ;;  %v571_v39 = vld [vmem:[%s19818_s1 + $0x10c8] sm:$0xff] }
  0xe2   :  { %10347 = vmatprep.subr.bf16.mxu1 %v12983_v57  ;;  %v13037_v57 = vcombine.high %v530_v50, %v534_v51  ;;  %v575_v40 = vld [vmem:[%s19818_s1 + $0x10e8] sm:$0xff]  ;;  %v13070_v43 = vcombine.low %v563_v30, %v567_v31 }
  0xe4   :  { %9815 = vmatpush1.bf16.msra.mxu0 %v12980_v1  ;;  %v543_v1 = vld [vmem:[%s19818_s1 + $0xfe8] sm:$0xff] }
  0xe5   :  { %10348 = vmatpush1.bf16.msra.mxu1 %v12982_v2  ;;  %9816 = vmatprep.subr.bf16.mxu0 %v12989_v3  ;;  %v15441_v2 = vld [vmem:[%s19817_s0 + $0x8] sm:$0xff]  ;;  %v13036_v3 = vcombine.low %v530_v50, %v534_v51  ;;  %v13047_v6 = vcombine.high %v539_v63, %v543_v1  ;;  %v13046_v14 = vcombine.low %v539_v63, %v543_v1 }
  0xe6   :  { %10349 = vmatprep.subr.bf16.mxu1 %v12991_v0  ;;  %v13038_v0 = vcombine.low %v531_v52, %v535_v53  ;;  %v579_v50 = vld [vmem:[%s19818_s1 + $0x1108] sm:$0xff]  ;;  %v13078_v53 = vcombine.low %v571_v39, %v575_v40 }
  0xe7   :  { %v583_v51 = vld [vmem:[%s19818_s1 + $0x1128] sm:$0xff] }
  0xe8   :  { %9817 = vmatpush1.bf16.msra.mxu0 %v12988_v9  ;;  %v15451_v9 = vrot.slane %v15441_v2, %v14688_v54  ;;  %v13086_v1 = vcombine.low %v579_v50, %v583_v51 }
  0xe9   :  { %10350 = vmatpush1.bf16.msra.mxu1 %v12990_v11  ;;  %9818 = vmatprep.subr.bf16.mxu0 %v12997_v12  ;;  %v547_v11 = vld [vmem:[%s19818_s1 + $0x1008] sm:$0xff] }
  0xea   :  { %10351 = vmatprep.subr.bf16.mxu1 %v12999_v13  ;;  %v551_v12 = vld [vmem:[%s19818_s1 + $0x1028] sm:$0xff]  ;;  %v13044_v13 = vcombine.low %v538_v61, %v542_v62 }
  0xeb   :  { %v13055_v16 = vcombine.high %v547_v11, %v551_v12  ;;  %v13054_v25 = vcombine.low %v547_v11, %v551_v12  ;;  %v587_v61 = vld [vmem:[%s19818_s1 + $0x1148] sm:$0xff] }
  0xec   :  { %9819 = vmatpush1.bf16.msra.mxu0 %v12996_v18  ;;  %v558_v18 = vld [vmem:[%s19818_s1 + $0x1060] sm:$0xff]  ;;  %v591_v62 = vld [vmem:[%s19818_s1 + $0x1168] sm:$0xff] }
  0xed   :  { %10352 = vmatpush1.bf16.msra.mxu1 %v12998_v19  ;;  %9820 = vmatprep.subr.bf16.mxu0 %v13005_v20  ;;  %v1712_v19 = vcombine.high %v15451_v9, %v15451_v9  ;;  %v15469_v20 = vcombine.high %v15254_v59, %v15254_v59  ;;  %v13061_v26 = vcombine.high %v554_v17, %v558_v18 }
  0xee   :  { %10353 = vmatprep.subr.bf16.mxu1 %v13007_v21  ;;  %v555_v21 = vld [vmem:[%s19818_s1 + $0x1048] sm:$0xff]  ;;  %v13060_v32 = vcombine.low %v554_v17, %v558_v18  ;;  %v13094_v12 = vcombine.low %v587_v61, %v591_v62 }
  0xef   :  { %v13062_v33 = vcombine.low %v555_v21, %v559_v22  ;;  %v603_v17 = vld [vmem:[%s19818_s1 + $0x11c8] sm:$0xff] }
  0xf0   :  { %9821 = vmatpush1.bf16.msra.mxu0 %v13004_v27  ;;  %v13063_v27 = vcombine.high %v555_v21, %v559_v22  ;;  %v607_v18 = vld [vmem:[%s19818_s1 + $0x11e8] sm:$0xff]  ;;  %v13102_v21 = vcombine.low %v595_v7, %v599_v8 }
  0xf1   :  { %10354 = vmatpush1.bf16.msra.mxu1 %v13006_v28  ;;  %9822 = vmatprep.subr.bf16.mxu0 %v13013_v29  ;;  %v562_v28 = vld [vmem:[%s19818_s1 + $0x1080] sm:$0xff] }
  0xf2   :  { %10355 = vmatprep.subr.bf16.mxu1 %v13015_v60  ;;  %v566_v29 = vld [vmem:[%s19818_s1 + $0x10a0] sm:$0xff]  ;;  %v15484_v60 = vrot.slane %v1712_v19, %v14688_v54 }
  0xf3   :  { %v13068_v42 = vcombine.low %v562_v28, %v566_v29 }
  0xf4   :  { %9823 = vmatpush1.bf16.msra.mxu0 %v13012_v35  ;;  %v13069_v35 = vcombine.high %v562_v28, %v566_v29  ;;  %v615_v28 = vld [vmem:[%s19818_s1 + $0x1228] sm:$0xff] }
  0xf5   :  { %10356 = vmatpush1.bf16.msra.mxu1 %v13014_v36  ;;  %9824 = vmatprep.subr.bf16.mxu0 %v13021_v37  ;;  %v13071_v36 = vcombine.high %v563_v30, %v567_v31  ;;  %v570_v37 = vld [vmem:[%s19818_s1 + $0x10c0] sm:$0xff]  ;;  %v13110_v30 = vcombine.low %v603_v17, %v607_v18 }
  0xf6   :  { %10357 = vmatprep.subr.bf16.mxu1 %v13023_v38  ;;  %v574_v38 = vld [vmem:[%s19818_s1 + $0x10e0] sm:$0xff] }
  0xf7   :  { %v13076_v52 = vcombine.low %v570_v37, %v574_v38 }
  0xf8   :  { %9825 = vmatpush1.bf16.msra.mxu0 %v13020_v45  ;;  %v13077_v45 = vcombine.high %v570_v37, %v574_v38  ;;  %v623_v37 = vld [vmem:[%s19818_s1 + $0x1268] sm:$0xff] }
  0xf9   :  { %10358 = vmatpush1.bf16.msra.mxu1 %v13022_v46  ;;  %9826 = vmatprep.subr.bf16.mxu0 %v13029_v47  ;;  %v13079_v46 = vcombine.high %v571_v39, %v575_v40  ;;  %v578_v47 = vld [vmem:[%s19818_s1 + $0x1100] sm:$0xff] }
  0xfa   :  { %10359 = vmatprep.subr.bf16.mxu1 %v13031_v48  ;;  %v582_v48 = vld [vmem:[%s19818_s1 + $0x1120] sm:$0xff] }
  0xfb   :  { %v13084_v63 = vcombine.low %v578_v47, %v582_v48 }
  0xfc   :  { %9827 = vmatpush1.bf16.msra.mxu0 %v13028_v55  ;;  %v13085_v55 = vcombine.high %v578_v47, %v582_v48  ;;  %v631_v47 = vld [vmem:[%s19818_s1 + $0x12a8] sm:$0xff] }
  0xfd   :  { %10360 = vmatpush1.bf16.msra.mxu1 %v13030_v56  ;;  %9828 = vmatprep.subr.bf16.mxu0 %v13037_v57  ;;  %v13087_v56 = vcombine.high %v579_v50, %v583_v51  ;;  %v586_v57 = vld [vmem:[%s19818_s1 + $0x1140] sm:$0xff] }
  0xfe   :  { %10361 = vmatprep.subr.bf16.mxu1 %v13039_v58  ;;  %v590_v58 = vld [vmem:[%s19818_s1 + $0x1160] sm:$0xff] }
  0xff   :  { %v13092_v11 = vcombine.low %v586_v57, %v590_v58 }
 0x100   :  { %9829 = vmatpush1.bf16.msra.mxu0 %v13036_v3  ;;  %v13093_v3 = vcombine.high %v586_v57, %v590_v58  ;;  %v639_v57 = vld [vmem:[%s19818_s1 + $0x12e8] sm:$0xff] }
 0x101   :  { %10362 = vmatpush1.bf16.msra.mxu1 %v13038_v0  ;;  %9830 = vmatprep.subr.bf16.mxu0 %v13045_v4  ;;  %v13095_v0 = vcombine.high %v587_v61, %v591_v62  ;;  %v594_v4 = vld [vmem:[%s19818_s1 + $0x1180] sm:$0xff] }
 0x102   :  { %10363 = vmatprep.subr.bf16.mxu1 %v13047_v6  ;;  %v598_v6 = vld [vmem:[%s19818_s1 + $0x11a0] sm:$0xff] }
 0x103   :  { %v13100_v19 = vcombine.low %v594_v4, %v598_v6 }
 0x104   :  { %9831 = vmatpush1.bf16.msra.mxu0 %v13044_v13  ;;  %v13101_v13 = vcombine.high %v594_v4, %v598_v6  ;;  %v647_v4 = vld [vmem:[%s19818_s1 + $0x1328] sm:$0xff] }
 0x105   :  { %10364 = vmatpush1.bf16.msra.mxu1 %v13046_v14  ;;  %9841 = vmatprep.subr.bf16.mxu0 %v13053_v15  ;;  %v13103_v14 = vcombine.high %v595_v7, %v599_v8  ;;  %v602_v15 = vld [vmem:[%s19818_s1 + $0x11c0] sm:$0xff] }
 0x106   :  { %10374 = vmatprep.subr.bf16.mxu1 %v13055_v16  ;;  %v606_v16 = vld [vmem:[%s19818_s1 + $0x11e0] sm:$0xff] }
 0x107   :  { %9833 = vmatmul.mubr.bf16.vlgmr.msra.gmra.mrb[0].mxu0 %v15469_v20  ;;  %v13109_v22 = vcombine.high %v602_v15, %v606_v16  ;;  %v13108_v29 = vcombine.low %v602_v15, %v606_v16  ;;  %v655_v15 = vld [vmem:[%s19818_s1 + $0x1368] sm:$0xff] }
 0x108   :  { %9842 = vmatpush1.bf16.msra.mxu0 %v13052_v23  ;;  %10366 = vmatmul.mubr.bf16.vlgmr.msra.gmra.mrb[0].mxu1 %v15469_v20  ;;  %v13111_v23 = vcombine.high %v603_v17, %v607_v18 }
 0x109   :  { %10375 = vmatpush1.bf16.msra.mxu1 %v13054_v25  ;;  %9843 = vmatprep.subr.bf16.mxu0 %v13061_v26  ;;  %v610_v25 = vld [vmem:[%s19818_s1 + $0x1200] sm:$0xff] }
 0x10a   :  { %10376 = vmatprep.subr.bf16.mxu1 %v13063_v27  ;;  %9873 = vmatprep.mubr.bf16.mxu0 %v15484_v60  ;;  %v614_v26 = vld [vmem:[%s19818_s1 + $0x1220] sm:$0xff]  ;;  %v611_v27 = vld [vmem:[%s19818_s1 + $0x1208] sm:$0xff] }
 0x10b   :  { %10406 = vmatprep.mubr.bf16.mxu1 %v15484_v60  ;;  %v13117_v31 = vcombine.high %v610_v25, %v614_v26  ;;  %v13116_v38 = vcombine.low %v610_v25, %v614_v26  ;;  %v13118_v39 = vcombine.low %v611_v27, %v615_v28  ;;  %v663_v25 = vld [vmem:[%s19818_s1 + $0x13a8] sm:$0xff] }
 0x10c   :  { %9844 = vmatpush1.bf16.msra.mxu0 %v13060_v32  ;;  %v13119_v32 = vcombine.high %v611_v27, %v615_v28 }
 0x10d   :  { %10377 = vmatpush1.bf16.msra.mxu1 %v13062_v33  ;;  %9845 = vmatprep.subr.bf16.mxu0 %v13069_v35  ;;  %v618_v33 = vld [vmem:[%s19818_s1 + $0x1240] sm:$0xff] }
 0x10e   :  { %10378 = vmatprep.subr.bf16.mxu1 %v13071_v36  ;;  %v622_v35 = vld [vmem:[%s19818_s1 + $0x1260] sm:$0xff]  ;;  %v619_v36 = vld [vmem:[%s19818_s1 + $0x1248] sm:$0xff] }
 0x10f   :  { %v13125_v40 = vcombine.high %v618_v33, %v622_v35  ;;  %v13124_v48 = vcombine.low %v618_v33, %v622_v35  ;;  %v13126_v50 = vcombine.low %v619_v36, %v623_v37  ;;  %v671_v33 = vld [vmem:[%s19818_s1 + $0x13e8] sm:$0xff] }
 0x110   :  { %9846 = vmatpush1.bf16.msra.mxu0 %v13068_v42  ;;  %v13127_v42 = vcombine.high %v619_v36, %v623_v37 }
 0x111   :  { %10379 = vmatpush1.bf16.msra.mxu1 %v13070_v43  ;;  %9847 = vmatprep.subr.bf16.mxu0 %v13077_v45  ;;  %v626_v43 = vld [vmem:[%s19818_s1 + $0x1280] sm:$0xff] }
 0x112   :  { %10380 = vmatprep.subr.bf16.mxu1 %v13079_v46  ;;  %v630_v45 = vld [vmem:[%s19818_s1 + $0x12a0] sm:$0xff]  ;;  %v627_v46 = vld [vmem:[%s19818_s1 + $0x1288] sm:$0xff] }
 0x113   :  { %v13133_v51 = vcombine.high %v626_v43, %v630_v45  ;;  %v13132_v58 = vcombine.low %v626_v43, %v630_v45  ;;  %v13134_v61 = vcombine.low %v627_v46, %v631_v47  ;;  %v679_v43 = vld [vmem:[%s19818_s1 + $0x1428] sm:$0xff] }
 0x114   :  { %9848 = vmatpush1.bf16.msra.mxu0 %v13076_v52  ;;  %v13135_v52 = vcombine.high %v627_v46, %v631_v47 }
 0x115   :  { %10381 = vmatpush1.bf16.msra.mxu1 %v13078_v53  ;;  %9849 = vmatprep.subr.bf16.mxu0 %v13085_v55  ;;  %v634_v53 = vld [vmem:[%s19818_s1 + $0x12c0] sm:$0xff] }
 0x116   :  { %10382 = vmatprep.subr.bf16.mxu1 %v13087_v56  ;;  %v638_v55 = vld [vmem:[%s19818_s1 + $0x12e0] sm:$0xff]  ;;  %v635_v56 = vld [vmem:[%s19818_s1 + $0x12c8] sm:$0xff] }
 0x117   :  { %v13141_v62 = vcombine.high %v634_v53, %v638_v55  ;;  %v13140_v6 = vcombine.low %v634_v53, %v638_v55  ;;  %v13142_v7 = vcombine.low %v635_v56, %v639_v57  ;;  %v683_v53 = vld [vmem:[%s19818_s1 + $0x1448] sm:$0xff] }
 0x118   :  { %9850 = vmatpush1.bf16.msra.mxu0 %v13084_v63  ;;  %v13143_v63 = vcombine.high %v635_v56, %v639_v57  ;;  %v687_v55 = vld [vmem:[%s19818_s1 + $0x1468] sm:$0xff] }
 0x119   :  { %10383 = vmatpush1.bf16.msra.mxu1 %v13086_v1  ;;  %9851 = vmatprep.subr.bf16.mxu0 %v13093_v3  ;;  %v642_v1 = vld [vmem:[%s19818_s1 + $0x1300] sm:$0xff] }
 0x11a   :  { %10384 = vmatprep.subr.bf16.mxu1 %v13095_v0  ;;  %v646_v3 = vld [vmem:[%s19818_s1 + $0x1320] sm:$0xff]  ;;  %v643_v0 = vld [vmem:[%s19818_s1 + $0x1308] sm:$0xff] }
 0x11b   :  { %v13149_v8 = vcombine.high %v642_v1, %v646_v3  ;;  %v13148_v16 = vcombine.low %v642_v1, %v646_v3  ;;  %v13150_v17 = vcombine.low %v643_v0, %v647_v4  ;;  %v691_v1 = vld [vmem:[%s19818_s1 + $0x1488] sm:$0xff] }
 0x11c   :  { %9852 = vmatpush1.bf16.msra.mxu0 %v13092_v11  ;;  %v13151_v11 = vcombine.high %v643_v0, %v647_v4  ;;  %v695_v3 = vld [vmem:[%s19818_s1 + $0x14a8] sm:$0xff]  ;;  %v13190_v4 = vcombine.low %v683_v53, %v687_v55 }
 0x11d   :  { %10385 = vmatpush1.bf16.msra.mxu1 %v13094_v12  ;;  %9853 = vmatprep.subr.bf16.mxu0 %v13101_v13  ;;  %v650_v12 = vld [vmem:[%s19818_s1 + $0x1340] sm:$0xff] }
 0x11e   :  { %10386 = vmatprep.subr.bf16.mxu1 %v13103_v14  ;;  %v654_v13 = vld [vmem:[%s19818_s1 + $0x1360] sm:$0xff]  ;;  %v651_v14 = vld [vmem:[%s19818_s1 + $0x1348] sm:$0xff] }
 0x11f   :  { %v13157_v18 = vcombine.high %v650_v12, %v654_v13  ;;  %v13156_v26 = vcombine.low %v650_v12, %v654_v13  ;;  %v13158_v27 = vcombine.low %v651_v14, %v655_v15  ;;  %v699_v12 = vld [vmem:[%s19818_s1 + $0x14c8] sm:$0xff] }
 0x120   :  { %9854 = vmatpush1.bf16.msra.mxu0 %v13100_v19  ;;  %v13159_v19 = vcombine.high %v651_v14, %v655_v15  ;;  %v703_v13 = vld [vmem:[%s19818_s1 + $0x14e8] sm:$0xff]  ;;  %v13198_v15 = vcombine.low %v691_v1, %v695_v3 }
 0x121   :  { %10387 = vmatpush1.bf16.msra.mxu1 %v13102_v21  ;;  %9855 = vmatprep.subr.bf16.mxu0 %v13109_v22  ;;  %v658_v21 = vld [vmem:[%s19818_s1 + $0x1380] sm:$0xff] }
 0x122   :  { %10388 = vmatprep.subr.bf16.mxu1 %v13111_v23  ;;  %v662_v22 = vld [vmem:[%s19818_s1 + $0x13a0] sm:$0xff]  ;;  %v659_v23 = vld [vmem:[%s19818_s1 + $0x1388] sm:$0xff] }
 0x123   :  { %v13165_v28 = vcombine.high %v658_v21, %v662_v22  ;;  %v13164_v35 = vcombine.low %v658_v21, %v662_v22  ;;  %v13166_v36 = vcombine.low %v659_v23, %v663_v25  ;;  %v707_v21 = vld [vmem:[%s19818_s1 + $0x1508] sm:$0xff] }
 0x124   :  { %9856 = vmatpush1.bf16.msra.mxu0 %v13108_v29  ;;  %v13167_v29 = vcombine.high %v659_v23, %v663_v25  ;;  %v711_v22 = vld [vmem:[%s19818_s1 + $0x1528] sm:$0xff]  ;;  %v13206_v25 = vcombine.low %v699_v12, %v703_v13 }
 0x125   :  { %10389 = vmatpush1.bf16.msra.mxu1 %v13110_v30  ;;  %9857 = vmatprep.subr.bf16.mxu0 %v13117_v31  ;;  %v666_v30 = vld [vmem:[%s19818_s1 + $0x13c0] sm:$0xff] }
 0x126   :  { %10390 = vmatprep.subr.bf16.mxu1 %v13119_v32  ;;  %v670_v31 = vld [vmem:[%s19818_s1 + $0x13e0] sm:$0xff]  ;;  %v667_v32 = vld [vmem:[%s19818_s1 + $0x13c8] sm:$0xff] }
 0x127   :  { %v13173_v37 = vcombine.high %v666_v30, %v670_v31  ;;  %v13172_v45 = vcombine.low %v666_v30, %v670_v31  ;;  %v13174_v46 = vcombine.low %v667_v32, %v671_v33  ;;  %v715_v30 = vld [vmem:[%s19818_s1 + $0x1548] sm:$0xff] }
 0x128   :  { %9858 = vmatpush1.bf16.msra.mxu0 %v13116_v38  ;;  %v13175_v38 = vcombine.high %v667_v32, %v671_v33  ;;  %v719_v31 = vld [vmem:[%s19818_s1 + $0x1568] sm:$0xff]  ;;  %v13214_v33 = vcombine.low %v707_v21, %v711_v22 }
 0x129   :  { %10391 = vmatpush1.bf16.msra.mxu1 %v13118_v39  ;;  %9859 = vmatprep.subr.bf16.mxu0 %v13125_v40  ;;  %v674_v39 = vld [vmem:[%s19818_s1 + $0x1400] sm:$0xff] }
 0x12a   :  { %10392 = vmatprep.subr.bf16.mxu1 %v13127_v42  ;;  %v678_v40 = vld [vmem:[%s19818_s1 + $0x1420] sm:$0xff]  ;;  %v675_v42 = vld [vmem:[%s19818_s1 + $0x1408] sm:$0xff] }
 0x12b   :  { %v13181_v47 = vcombine.high %v674_v39, %v678_v40  ;;  %v13180_v56 = vcombine.low %v674_v39, %v678_v40  ;;  %v13182_v57 = vcombine.low %v675_v42, %v679_v43  ;;  %v723_v39 = vld [vmem:[%s19818_s1 + $0x1588] sm:$0xff] }
 0x12c   :  { %9860 = vmatpush1.bf16.msra.mxu0 %v13124_v48  ;;  %v13183_v48 = vcombine.high %v675_v42, %v679_v43  ;;  %v727_v40 = vld [vmem:[%s19818_s1 + $0x15a8] sm:$0xff]  ;;  %v13222_v43 = vcombine.low %v715_v30, %v719_v31 }
 0x12d   :  { %10393 = vmatpush1.bf16.msra.mxu1 %v13126_v50  ;;  %9861 = vmatprep.subr.bf16.mxu0 %v13133_v51  ;;  %v682_v50 = vld [vmem:[%s19818_s1 + $0x1440] sm:$0xff] }
 0x12e   :  { %10394 = vmatprep.subr.bf16.mxu1 %v13135_v52  ;;  %v686_v51 = vld [vmem:[%s19818_s1 + $0x1460] sm:$0xff]  ;;  %v15672_v52 = vrot.slane %v15451_v9, %v14688_v54 }
 0x12f   :  { %v690_v9 = vld [vmem:[%s19818_s1 + $0x1480] sm:$0xff]  ;;  %v13188_v0 = vcombine.low %v682_v50, %v686_v51 }
 0x130   :  { %9862 = vmatpush1.bf16.msra.mxu0 %v13132_v58  ;;  %v13189_v58 = vcombine.high %v682_v50, %v686_v51  ;;  %v731_v50 = vld [vmem:[%s19818_s1 + $0x15c8] sm:$0xff] }
 0x131   :  { %10395 = vmatpush1.bf16.msra.mxu1 %v13134_v61  ;;  %9863 = vmatprep.subr.bf16.mxu0 %v13141_v62  ;;  %v13191_v61 = vcombine.high %v683_v53, %v687_v55  ;;  %v694_v62 = vld [vmem:[%s19818_s1 + $0x14a0] sm:$0xff]  ;;  %v735_v51 = vld [vmem:[%s19818_s1 + $0x15e8] sm:$0xff]  ;;  %v13230_v55 = vcombine.low %v723_v39, %v727_v40 }
 0x132   :  { %10396 = vmatprep.subr.bf16.mxu1 %v13143_v63  ;;  %v15688_v63 = vcombine.high %v15484_v60, %v15484_v60  ;;  %v13196_v14 = vcombine.low %v690_v9, %v694_v62 }
 0x134   :  { %9864 = vmatpush1.bf16.msra.mxu0 %v13140_v6  ;;  %v13197_v6 = vcombine.high %v690_v9, %v694_v62  ;;  %v739_v9 = vld [vmem:[%s19818_s1 + $0x1608] sm:$0xff] }
 0x135   :  { %10397 = vmatpush1.bf16.msra.mxu1 %v13142_v7  ;;  %9865 = vmatprep.subr.bf16.mxu0 %v13149_v8  ;;  %v13199_v7 = vcombine.high %v691_v1, %v695_v3  ;;  %v698_v8 = vld [vmem:[%s19818_s1 + $0x14c0] sm:$0xff]  ;;  %v743_v62 = vld [vmem:[%s19818_s1 + $0x1628] sm:$0xff]  ;;  %v13238_v3 = vcombine.low %v731_v50, %v735_v51 }
 0x136   :  { %10398 = vmatprep.subr.bf16.mxu1 %v13151_v11  ;;  %v702_v11 = vld [vmem:[%s19818_s1 + $0x14e0] sm:$0xff] }
 0x137   :  { %v13204_v23 = vcombine.low %v698_v8, %v702_v11 }
 0x138   :  { %9866 = vmatpush1.bf16.msra.mxu0 %v13148_v16  ;;  %v13205_v16 = vcombine.high %v698_v8, %v702_v11  ;;  %v747_v8 = vld [vmem:[%s19818_s1 + $0x1648] sm:$0xff] }
 0x139   :  { %10399 = vmatpush1.bf16.msra.mxu1 %v13150_v17  ;;  %9867 = vmatprep.subr.bf16.mxu0 %v13157_v18  ;;  %v13207_v17 = vcombine.high %v699_v12, %v703_v13  ;;  %v706_v18 = vld [vmem:[%s19818_s1 + $0x1500] sm:$0xff]  ;;  %v751_v11 = vld [vmem:[%s19818_s1 + $0x1668] sm:$0xff]  ;;  %v13246_v13 = vcombine.low %v739_v9, %v743_v62 }
 0x13a   :  { %10400 = vmatprep.subr.bf16.mxu1 %v13159_v19  ;;  %v710_v19 = vld [vmem:[%s19818_s1 + $0x1520] sm:$0xff] }
 0x13b   :  { %v13212_v32 = vcombine.low %v706_v18, %v710_v19 }
 0x13c   :  { %9868 = vmatpush1.bf16.msra.mxu0 %v13156_v26  ;;  %v13213_v26 = vcombine.high %v706_v18, %v710_v19  ;;  %v755_v18 = vld [vmem:[%s19818_s1 + $0x1688] sm:$0xff] }
 0x13d   :  { %10401 = vmatpush1.bf16.msra.mxu1 %v13158_v27  ;;  %9869 = vmatprep.subr.bf16.mxu0 %v13165_v28  ;;  %v13215_v27 = vcombine.high %v707_v21, %v711_v22  ;;  %v714_v28 = vld [vmem:[%s19818_s1 + $0x1540] sm:$0xff]  ;;  %v759_v19 = vld [vmem:[%s19818_s1 + $0x16a8] sm:$0xff]  ;;  %v13254_v22 = vcombine.low %v747_v8, %v751_v11 }
 0x13e   :  { %10402 = vmatprep.subr.bf16.mxu1 %v13167_v29  ;;  %v718_v29 = vld [vmem:[%s19818_s1 + $0x1560] sm:$0xff] }
 0x13f   :  { %v13220_v42 = vcombine.low %v714_v28, %v718_v29 }
 0x140   :  { %9870 = vmatpush1.bf16.msra.mxu0 %v13164_v35  ;;  %v13221_v35 = vcombine.high %v714_v28, %v718_v29  ;;  %v763_v28 = vld [vmem:[%s19818_s1 + $0x16c8] sm:$0xff] }
 0x141   :  { %10403 = vmatpush1.bf16.msra.mxu1 %v13166_v36  ;;  %9871 = vmatprep.subr.bf16.mxu0 %v13173_v37  ;;  %v13223_v36 = vcombine.high %v715_v30, %v719_v31  ;;  %v722_v37 = vld [vmem:[%s19818_s1 + $0x1580] sm:$0xff]  ;;  %v767_v29 = vld [vmem:[%s19818_s1 + $0x16e8] sm:$0xff]  ;;  %v13262_v31 = vcombine.low %v755_v18, %v759_v19 }
 0x142   :  { %10404 = vmatprep.subr.bf16.mxu1 %v13175_v38  ;;  %v726_v38 = vld [vmem:[%s19818_s1 + $0x15a0] sm:$0xff] }
 0x143   :  { %v13228_v53 = vcombine.low %v722_v37, %v726_v38 }
 0x144   :  { %9872 = vmatpush1.bf16.msra.mxu0 %v13172_v45  ;;  %v13229_v45 = vcombine.high %v722_v37, %v726_v38  ;;  %v771_v37 = vld [vmem:[%s19818_s1 + $0x1708] sm:$0xff] }
 0x145   :  { %10405 = vmatpush1.bf16.msra.mxu1 %v13174_v46  ;;  %9882 = vmatprep.subr.bf16.mxu0 %v13181_v47  ;;  %v13231_v46 = vcombine.high %v723_v39, %v727_v40  ;;  %v730_v47 = vld [vmem:[%s19818_s1 + $0x15c0] sm:$0xff]  ;;  %v775_v38 = vld [vmem:[%s19818_s1 + $0x1728] sm:$0xff]  ;;  %v13270_v40 = vcombine.low %v763_v28, %v767_v29 }
 0x146   :  { %10415 = vmatprep.subr.bf16.mxu1 %v13183_v48  ;;  %v734_v48 = vld [vmem:[%s19818_s1 + $0x15e0] sm:$0xff] }
 0x147   :  { %9874 = vmatmul.mubr.bf16.vlgmr.msra.gmra.mrb[0].mxu0 %v15672_v52  ;;  %v13236_v1 = vcombine.low %v730_v47, %v734_v48 }
 0x148   :  { %9883 = vmatpush1.bf16.msra.mxu0 %v13180_v56  ;;  %10407 = vmatmul.mubr.bf16.vlgmr.msra.gmra.mrb[0].mxu1 %v15672_v52  ;;  %v13237_v56 = vcombine.high %v730_v47, %v734_v48  ;;  %v779_v47 = vld [vmem:[%s19818_s1 + $0x1748] sm:$0xff] }
 0x149   :  { %10416 = vmatpush1.bf16.msra.mxu1 %v13182_v57  ;;  %9884 = vmatprep.subr.bf16.mxu0 %v13189_v58  ;;  %v13239_v57 = vcombine.high %v731_v50, %v735_v51  ;;  %v738_v58 = vld [vmem:[%s19818_s1 + $0x1600] sm:$0xff]  ;;  %v783_v48 = vld [vmem:[%s19818_s1 + $0x1768] sm:$0xff]  ;;  %v13278_v51 = vcombine.low %v771_v37, %v775_v38 }
 0x14a   :  { %10417 = vmatprep.subr.bf16.mxu1 %v13191_v61  ;;  %9914 = vmatprep.mubr.bf16.mxu0 %v15688_v63  ;;  %v742_v61 = vld [vmem:[%s19818_s1 + $0x1620] sm:$0xff] }
 0x14b   :  { %10447 = vmatprep.mubr.bf16.mxu1 %v15688_v63  ;;  %v13244_v12 = vcombine.low %v738_v58, %v742_v61 }
 0x14c   :  { %9885 = vmatpush1.bf16.msra.mxu0 %v13188_v0  ;;  %v13245_v0 = vcombine.high %v738_v58, %v742_v61  ;;  %v787_v58 = vld [vmem:[%s19818_s1 + $0x1788] sm:$0xff] }
 0x14d   :  { %10418 = vmatpush1.bf16.msra.mxu1 %v13190_v4  ;;  %9886 = vmatprep.subr.bf16.mxu0 %v13197_v6  ;;  %v13247_v4 = vcombine.high %v739_v9, %v743_v62  ;;  %v746_v6 = vld [vmem:[%s19818_s1 + $0x1640] sm:$0xff]  ;;  %v791_v61 = vld [vmem:[%s19818_s1 + $0x17a8] sm:$0xff]  ;;  %v13286_v62 = vcombine.low %v779_v47, %v783_v48 }
 0x14e   :  { %10419 = vmatprep.subr.bf16.mxu1 %v13199_v7  ;;  %v750_v7 = vld [vmem:[%s19818_s1 + $0x1660] sm:$0xff] }
 0x14f   :  { %v13252_v21 = vcombine.low %v746_v6, %v750_v7 }
 0x150   :  { %9887 = vmatpush1.bf16.msra.mxu0 %v13196_v14  ;;  %v13253_v14 = vcombine.high %v746_v6, %v750_v7  ;;  %v1697_v6 = vcombine.high %v15441_v2, %v15441_v2  ;;  %v795_v7 = vld [vmem:[%s19818_s1 + $0x17c8] sm:$0xff]  ;;  %v802_v2 = vld [vmem:[%s19818_s1 + $0x1800] sm:$0xff] }
 0x151   :  { %10420 = vmatpush1.bf16.msra.mxu1 %v13198_v15  ;;  %9888 = vmatprep.subr.bf16.mxu0 %v13205_v16  ;;  %v13255_v15 = vcombine.high %v747_v8, %v751_v11  ;;  %v754_v16 = vld [vmem:[%s19818_s1 + $0x1680] sm:$0xff]  ;;  %v799_v8 = vld [vmem:[%s19818_s1 + $0x17e8] sm:$0xff] }
 0x152   :  { %10421 = vmatprep.subr.bf16.mxu1 %v13207_v17  ;;  %v758_v17 = vld [vmem:[%s19818_s1 + $0x16a0] sm:$0xff] }
 0x153   :  { %v13260_v30 = vcombine.low %v754_v16, %v758_v17 }
 0x154   :  { %9889 = vmatpush1.bf16.msra.mxu0 %v13204_v23  ;;  %v13261_v23 = vcombine.high %v754_v16, %v758_v17  ;;  %v15865_v16 = vrot.slane %v1697_v6, %v14688_v54  ;;  %v803_v17 = vld [vmem:[%s19818_s1 + $0x1808] sm:$0xff]  ;;  %v842_v6 = vld [vmem:[%s19818_s1 + $0x1940] sm:$0xff] }
 0x155   :  { %10422 = vmatpush1.bf16.msra.mxu1 %v13206_v25  ;;  %9890 = vmatprep.subr.bf16.mxu0 %v13213_v26  ;;  %v13263_v25 = vcombine.high %v755_v18, %v759_v19  ;;  %v762_v26 = vld [vmem:[%s19818_s1 + $0x16c0] sm:$0xff]  ;;  %v807_v18 = vld [vmem:[%s19818_s1 + $0x1828] sm:$0xff] }
 0x156   :  { %10423 = vmatprep.subr.bf16.mxu1 %v13215_v27  ;;  %v766_v27 = vld [vmem:[%s19818_s1 + $0x16e0] sm:$0xff] }
 0x157   :  { %v13268_v39 = vcombine.low %v762_v26, %v766_v27 }
 0x158   :  { %9891 = vmatpush1.bf16.msra.mxu0 %v13212_v32  ;;  %v13269_v32 = vcombine.high %v762_v26, %v766_v27  ;;  %v814_v26 = vld [vmem:[%s19818_s1 + $0x1860] sm:$0xff]  ;;  %v1713_v27 = vcombine.high %v15865_v16, %v15865_v16 }
 0x159   :  { %10424 = vmatpush1.bf16.msra.mxu1 %v13214_v33  ;;  %9892 = vmatprep.subr.bf16.mxu0 %v13221_v35  ;;  %v13271_v33 = vcombine.high %v763_v28, %v767_v29  ;;  %v770_v35 = vld [vmem:[%s19818_s1 + $0x1700] sm:$0xff]  ;;  %v15883_v28 = vcombine.high %v15672_v52, %v15672_v52  ;;  %v811_v29 = vld [vmem:[%s19818_s1 + $0x1848] sm:$0xff] }
 0x15a   :  { %10425 = vmatprep.subr.bf16.mxu1 %v13223_v36  ;;  %v774_v36 = vld [vmem:[%s19818_s1 + $0x1720] sm:$0xff] }
 0x15b   :  { %v13276_v50 = vcombine.low %v770_v35, %v774_v36 }
 0x15c   :  { %9893 = vmatpush1.bf16.msra.mxu0 %v13220_v42  ;;  %v13277_v42 = vcombine.high %v770_v35, %v774_v36  ;;  %v818_v36 = vld [vmem:[%s19818_s1 + $0x1880] sm:$0xff] }
 0x15d   :  { %10426 = vmatpush1.bf16.msra.mxu1 %v13222_v43  ;;  %9894 = vmatprep.subr.bf16.mxu0 %v13229_v45  ;;  %v13279_v43 = vcombine.high %v771_v37, %v775_v38  ;;  %v778_v45 = vld [vmem:[%s19818_s1 + $0x1740] sm:$0xff]  ;;  %v15898_v38 = vrot.slane %v1713_v27, %v14688_v54 }
 0x15e   :  { %10427 = vmatprep.subr.bf16.mxu1 %v13231_v46  ;;  %v782_v46 = vld [vmem:[%s19818_s1 + $0x1760] sm:$0xff] }
 0x15f   :  { %v13284_v9 = vcombine.low %v778_v45, %v782_v46  ;;  %v822_v37 = vld [vmem:[%s19818_s1 + $0x18a0] sm:$0xff] }
 0x160   :  { %9895 = vmatpush1.bf16.msra.mxu0 %v13228_v53  ;;  %v13285_v53 = vcombine.high %v778_v45, %v782_v46  ;;  %v13325_v45 = vcombine.high %v818_v36, %v822_v37  ;;  %v862_v27 = vld [vmem:[%s19818_s1 + $0x19e0] sm:$0xff] }
 0x161   :  { %10428 = vmatpush1.bf16.msra.mxu1 %v13230_v55  ;;  %9896 = vmatprep.subr.bf16.mxu0 %v13237_v56  ;;  %v13287_v55 = vcombine.high %v779_v47, %v783_v48  ;;  %v786_v56 = vld [vmem:[%s19818_s1 + $0x1780] sm:$0xff] }
 0x162   :  { %10429 = vmatprep.subr.bf16.mxu1 %v13239_v57  ;;  %v790_v57 = vld [vmem:[%s19818_s1 + $0x17a0] sm:$0xff] }
 0x163   :  { %v13292_v11 = vcombine.low %v786_v56, %v790_v57  ;;  %v826_v47 = vld [vmem:[%s19818_s1 + $0x18c0] sm:$0xff] }
 0x164   :  { %9897 = vmatpush1.bf16.msra.mxu0 %v13236_v1  ;;  %v13293_v1 = vcombine.high %v786_v56, %v790_v57  ;;  %v830_v48 = vld [vmem:[%s19818_s1 + $0x18e0] sm:$0xff] }
 0x165   :  { %10430 = vmatpush1.bf16.msra.mxu1 %v13238_v3  ;;  %9898 = vmatprep.subr.bf16.mxu0 %v13245_v0  ;;  %v13295_v3 = vcombine.high %v787_v58, %v791_v61  ;;  %v794_v0 = vld [vmem:[%s19818_s1 + $0x17c0] sm:$0xff]  ;;  %v13333_v56 = vcombine.high %v826_v47, %v830_v48 }
 0x166   :  { %10431 = vmatprep.subr.bf16.mxu1 %v13247_v4  ;;  %v798_v4 = vld [vmem:[%s19818_s1 + $0x17e0] sm:$0xff] }
 0x167   :  { %v13300_v19 = vcombine.low %v794_v0, %v798_v4 }
 0x168   :  { %9899 = vmatpush1.bf16.msra.mxu0 %v13244_v12  ;;  %v13294_v12 = vcombine.low %v787_v58, %v791_v61  ;;  %v834_v58 = vld [vmem:[%s19818_s1 + $0x1900] sm:$0xff] }
 0x169   :  { %10432 = vmatpush1.bf16.msra.mxu1 %v13246_v13  ;;  %9900 = vmatprep.subr.bf16.mxu0 %v13253_v14  ;;  %v13301_v13 = vcombine.high %v794_v0, %v798_v4  ;;  %v13303_v14 = vcombine.high %v795_v7, %v799_v8  ;;  %v838_v61 = vld [vmem:[%s19818_s1 + $0x1920] sm:$0xff] }
 0x16a   :  { %10433 = vmatprep.subr.bf16.mxu1 %v13255_v15  ;;  %v806_v15 = vld [vmem:[%s19818_s1 + $0x1820] sm:$0xff]  ;;  %v13341_v0 = vcombine.high %v834_v58, %v838_v61 }
 0x16c   :  { %9901 = vmatpush1.bf16.msra.mxu0 %v13252_v21  ;;  %v13302_v21 = vcombine.low %v795_v7, %v799_v8  ;;  %v846_v7 = vld [vmem:[%s19818_s1 + $0x1960] sm:$0xff]  ;;  %v843_v8 = vld [vmem:[%s19818_s1 + $0x1948] sm:$0xff] }
 0x16d   :  { %10434 = vmatpush1.bf16.msra.mxu1 %v13254_v22  ;;  %9902 = vmatprep.subr.bf16.mxu0 %v13261_v23  ;;  %v13309_v22 = vcombine.high %v802_v2, %v806_v15  ;;  %v13311_v23 = vcombine.high %v803_v17, %v807_v18 }
 0x16e   :  { %10435 = vmatprep.subr.bf16.mxu1 %v13263_v25  ;;  %v810_v25 = vld [vmem:[%s19818_s1 + $0x1840] sm:$0xff] }
 0x170   :  { %9903 = vmatpush1.bf16.msra.mxu0 %v13260_v30  ;;  %v815_v30 = vld [vmem:[%s19818_s1 + $0x1868] sm:$0xff] }
 0x171   :  { %10436 = vmatpush1.bf16.msra.mxu1 %v13262_v31  ;;  %9904 = vmatprep.subr.bf16.mxu0 %v13269_v32  ;;  %v13308_v31 = vcombine.low %v802_v2, %v806_v15  ;;  %v13310_v32 = vcombine.low %v803_v17, %v807_v18  ;;  %v13319_v35 = vcombine.high %v811_v29, %v815_v30  ;;  %v850_v15 = vld [vmem:[%s19818_s1 + $0x1980] sm:$0xff]  ;;  %v851_v18 = vld [vmem:[%s19818_s1 + $0x1988] sm:$0xff] }
 0x172   :  { %10437 = vmatprep.subr.bf16.mxu1 %v13271_v33  ;;  %v13317_v33 = vcombine.high %v810_v25, %v814_v26  ;;  %v854_v17 = vld [vmem:[%s19818_s1 + $0x19a0] sm:$0xff] }
 0x174   :  { %9905 = vmatpush1.bf16.msra.mxu0 %v13268_v39  ;;  %v819_v39 = vld [vmem:[%s19818_s1 + $0x1888] sm:$0xff] }
 0x175   :  { %10438 = vmatpush1.bf16.msra.mxu1 %v13270_v40  ;;  %9906 = vmatprep.subr.bf16.mxu0 %v13277_v42  ;;  %v823_v40 = vld [vmem:[%s19818_s1 + $0x18a8] sm:$0xff]  ;;  %v13316_v42 = vcombine.low %v810_v25, %v814_v26  ;;  %v858_v26 = vld [vmem:[%s19818_s1 + $0x19c0] sm:$0xff] }
 0x176   :  { %10439 = vmatprep.subr.bf16.mxu1 %v13279_v43  ;;  %v13318_v43 = vcombine.low %v811_v29, %v815_v30  ;;  %v13327_v46 = vcombine.high %v819_v39, %v823_v40  ;;  %v859_v29 = vld [vmem:[%s19818_s1 + $0x19c8] sm:$0xff] }
 0x177   :  { %v863_v30 = vld [vmem:[%s19818_s1 + $0x19e8] sm:$0xff] }
 0x178   :  { %9907 = vmatpush1.bf16.msra.mxu0 %v13276_v50  ;;  %v827_v50 = vld [vmem:[%s19818_s1 + $0x18c8] sm:$0xff] }
 0x179   :  { %10440 = vmatpush1.bf16.msra.mxu1 %v13278_v51  ;;  %9908 = vmatprep.subr.bf16.mxu0 %v13285_v53  ;;  %v831_v51 = vld [vmem:[%s19818_s1 + $0x18e8] sm:$0xff]  ;;  %v13324_v53 = vcombine.low %v818_v36, %v822_v37  ;;  %v866_v36 = vld [vmem:[%s19818_s1 + $0x1a00] sm:$0xff] }
 0x17a   :  { %10441 = vmatprep.subr.bf16.mxu1 %v13287_v55  ;;  %v13326_v55 = vcombine.low %v819_v39, %v823_v40  ;;  %v13335_v57 = vcombine.high %v827_v50, %v831_v51  ;;  %v870_v37 = vld [vmem:[%s19818_s1 + $0x1a20] sm:$0xff]  ;;  %v867_v39 = vld [vmem:[%s19818_s1 + $0x1a08] sm:$0xff] }
 0x17b   :  { %v871_v40 = vld [vmem:[%s19818_s1 + $0x1a28] sm:$0xff] }
 0x17c   :  { %9909 = vmatpush1.bf16.msra.mxu0 %v13284_v9  ;;  %v835_v9 = vld [vmem:[%s19818_s1 + $0x1908] sm:$0xff] }
 0x17d   :  { %10442 = vmatpush1.bf16.msra.mxu1 %v13286_v62  ;;  %9910 = vmatprep.subr.bf16.mxu0 %v13293_v1  ;;  %v839_v62 = vld [vmem:[%s19818_s1 + $0x1928] sm:$0xff]  ;;  %v13332_v1 = vcombine.low %v826_v47, %v830_v48  ;;  %v874_v47 = vld [vmem:[%s19818_s1 + $0x1a40] sm:$0xff] }
 0x17e   :  { %10443 = vmatprep.subr.bf16.mxu1 %v13295_v3  ;;  %v13334_v3 = vcombine.low %v827_v50, %v831_v51  ;;  %v13343_v4 = vcombine.high %v835_v9, %v839_v62  ;;  %v878_v48 = vld [vmem:[%s19818_s1 + $0x1a60] sm:$0xff]  ;;  %v875_v50 = vld [vmem:[%s19818_s1 + $0x1a48] sm:$0xff] }
 0x17f   :  { %v879_v51 = vld [vmem:[%s19818_s1 + $0x1a68] sm:$0xff] }
 0x180   :  { %9911 = vmatpush1.bf16.msra.mxu0 %v13292_v11  ;;  %v847_v11 = vld [vmem:[%s19818_s1 + $0x1968] sm:$0xff] }
 0x181   :  { %10444 = vmatpush1.bf16.msra.mxu1 %v13294_v12  ;;  %9912 = vmatprep.subr.bf16.mxu0 %v13301_v13  ;;  %v13340_v12 = vcombine.low %v834_v58, %v838_v61  ;;  %v13342_v13 = vcombine.low %v835_v9, %v839_v62  ;;  %v13351_v2 = vcombine.high %v843_v8, %v847_v11  ;;  %v882_v58 = vld [vmem:[%s19818_s1 + $0x1a80] sm:$0xff]  ;;  %v883_v9 = vld [vmem:[%s19818_s1 + $0x1a88] sm:$0xff] }
 0x182   :  { %10445 = vmatprep.subr.bf16.mxu1 %v13303_v14  ;;  %v13349_v14 = vcombine.high %v842_v6, %v846_v7  ;;  %v886_v61 = vld [vmem:[%s19818_s1 + $0x1aa0] sm:$0xff]  ;;  %v887_v62 = vld [vmem:[%s19818_s1 + $0x1aa8] sm:$0xff] }
 0x184   :  { %9913 = vmatpush1.bf16.msra.mxu0 %v13300_v19  ;;  %v855_v19 = vld [vmem:[%s19818_s1 + $0x19a8] sm:$0xff] }
 0x185   :  { %10446 = vmatpush1.bf16.msra.mxu1 %v13302_v21  ;;  %9923 = vmatprep.subr.bf16.mxu0 %v13309_v22  ;;  %v13348_v21 = vcombine.low %v842_v6, %v846_v7  ;;  %v13350_v22 = vcombine.low %v843_v8, %v847_v11  ;;  %v13359_v25 = vcombine.high %v851_v18, %v855_v19  ;;  %v890_v6 = vld [vmem:[%s19818_s1 + $0x1ac0] sm:$0xff]  ;;  %v891_v8 = vld [vmem:[%s19818_s1 + $0x1ac8] sm:$0xff] }
 0x186   :  { %10456 = vmatprep.subr.bf16.mxu1 %v13311_v23  ;;  %v13357_v23 = vcombine.high %v850_v15, %v854_v17  ;;  %v894_v7 = vld [vmem:[%s19818_s1 + $0x1ae0] sm:$0xff]  ;;  %v895_v11 = vld [vmem:[%s19818_s1 + $0x1ae8] sm:$0xff] }
 0x187   :  { %9915 = vmatmul.mubr.bf16.vlgmr.msra.gmra.mrb[0].mxu0 %v15883_v28 }
 0x188   :  { %9924 = vmatpush1.bf16.msra.mxu0 %v13308_v31  ;;  %10448 = vmatmul.mubr.bf16.vlgmr.msra.gmra.mrb[0].mxu1 %v15883_v28  ;;  %v13356_v31 = vcombine.low %v850_v15, %v854_v17  ;;  %v898_v15 = vld [vmem:[%s19818_s1 + $0x1b00] sm:$0xff] }
 0x189   :  { %10457 = vmatpush1.bf16.msra.mxu1 %v13310_v32  ;;  %9925 = vmatprep.subr.bf16.mxu0 %v13317_v33  ;;  %v13358_v32 = vcombine.low %v851_v18, %v855_v19  ;;  %v13365_v33 = vcombine.high %v858_v26, %v862_v27  ;;  %v902_v17 = vld [vmem:[%s19818_s1 + $0x1b20] sm:$0xff]  ;;  %v899_v18 = vld [vmem:[%s19818_s1 + $0x1b08] sm:$0xff] }
 0x18a   :  { %10458 = vmatprep.subr.bf16.mxu1 %v13319_v35  ;;  %9955 = vmatprep.mubr.bf16.mxu0 %v15898_v38  ;;  %v13367_v35 = vcombine.high %v859_v29, %v863_v30  ;;  %v903_v19 = vld [vmem:[%s19818_s1 + $0x1b28] sm:$0xff] }
 0x18b   :  { %10488 = vmatprep.mubr.bf16.mxu1 %v15898_v38 }
 0x18c   :  { %9926 = vmatpush1.bf16.msra.mxu0 %v13316_v42  ;;  %v13364_v42 = vcombine.low %v858_v26, %v862_v27  ;;  %v906_v26 = vld [vmem:[%s19818_s1 + $0x1b40] sm:$0xff] }
 0x18d   :  { %10459 = vmatpush1.bf16.msra.mxu1 %v13318_v43  ;;  %9927 = vmatprep.subr.bf16.mxu0 %v13325_v45  ;;  %v13366_v43 = vcombine.low %v859_v29, %v863_v30  ;;  %v13373_v45 = vcombine.high %v866_v36, %v870_v37  ;;  %v910_v27 = vld [vmem:[%s19818_s1 + $0x1b60] sm:$0xff]  ;;  %v907_v29 = vld [vmem:[%s19818_s1 + $0x1b48] sm:$0xff] }
 0x18e   :  { %10460 = vmatprep.subr.bf16.mxu1 %v13327_v46  ;;  %v13375_v46 = vcombine.high %v867_v39, %v871_v40  ;;  %v911_v30 = vld [vmem:[%s19818_s1 + $0x1b68] sm:$0xff] }
 0x190   :  { %9928 = vmatpush1.bf16.msra.mxu0 %v13324_v53  ;;  %v13372_v53 = vcombine.low %v866_v36, %v870_v37  ;;  %v914_v36 = vld [vmem:[%s19818_s1 + $0x1b80] sm:$0xff] }
 0x191   :  { %10461 = vmatpush1.bf16.msra.mxu1 %v13326_v55  ;;  %9929 = vmatprep.subr.bf16.mxu0 %v13333_v56  ;;  %v13374_v55 = vcombine.low %v867_v39, %v871_v40  ;;  %v13381_v56 = vcombine.high %v874_v47, %v878_v48  ;;  %v918_v37 = vld [vmem:[%s19818_s1 + $0x1ba0] sm:$0xff]  ;;  %v915_v39 = vld [vmem:[%s19818_s1 + $0x1b88] sm:$0xff] }
 0x192   :  { %10462 = vmatprep.subr.bf16.mxu1 %v13335_v57  ;;  %v13383_v57 = vcombine.high %v875_v50, %v879_v51  ;;  %v919_v40 = vld [vmem:[%s19818_s1 + $0x1ba8] sm:$0xff] }
 0x194   :  { %9930 = vmatpush1.bf16.msra.mxu0 %v13332_v1  ;;  %v13380_v1 = vcombine.low %v874_v47, %v878_v48  ;;  %v922_v47 = vld [vmem:[%s19818_s1 + $0x1bc0] sm:$0xff] }
 0x195   :  { %10463 = vmatpush1.bf16.msra.mxu1 %v13334_v3  ;;  %9931 = vmatprep.subr.bf16.mxu0 %v13341_v0  ;;  %v13382_v3 = vcombine.low %v875_v50, %v879_v51  ;;  %v13389_v0 = vcombine.high %v882_v58, %v886_v61  ;;  %v926_v48 = vld [vmem:[%s19818_s1 + $0x1be0] sm:$0xff]  ;;  %v923_v50 = vld [vmem:[%s19818_s1 + $0x1bc8] sm:$0xff] }
 0x196   :  { %10464 = vmatprep.subr.bf16.mxu1 %v13343_v4  ;;  %v13391_v4 = vcombine.high %v883_v9, %v887_v62  ;;  %v927_v51 = vld [vmem:[%s19818_s1 + $0x1be8] sm:$0xff] }
 0x198   :  { %9932 = vmatpush1.bf16.msra.mxu0 %v13340_v12  ;;  %v13388_v12 = vcombine.low %v882_v58, %v886_v61  ;;  %v930_v58 = vld [vmem:[%s19818_s1 + $0x1c00] sm:$0xff] }
 0x199   :  { %10465 = vmatpush1.bf16.msra.mxu1 %v13342_v13  ;;  %9933 = vmatprep.subr.bf16.mxu0 %v13349_v14  ;;  %v13390_v13 = vcombine.low %v883_v9, %v887_v62  ;;  %v13397_v14 = vcombine.high %v890_v6, %v894_v7  ;;  %v934_v61 = vld [vmem:[%s19818_s1 + $0x1c20] sm:$0xff]  ;;  %v931_v9 = vld [vmem:[%s19818_s1 + $0x1c08] sm:$0xff] }
 0x19a   :  { %10466 = vmatprep.subr.bf16.mxu1 %v13351_v2  ;;  %v13399_v2 = vcombine.high %v891_v8, %v895_v11  ;;  %v935_v62 = vld [vmem:[%s19818_s1 + $0x1c28] sm:$0xff] }
 0x19c   :  { %9934 = vmatpush1.bf16.msra.mxu0 %v13348_v21  ;;  %v13396_v21 = vcombine.low %v890_v6, %v894_v7  ;;  %v938_v6 = vld [vmem:[%s19818_s1 + $0x1c40] sm:$0xff] }
 0x19d   :  { %10467 = vmatpush1.bf16.msra.mxu1 %v13350_v22  ;;  %9935 = vmatprep.subr.bf16.mxu0 %v13357_v23  ;;  %v13398_v22 = vcombine.low %v891_v8, %v895_v11  ;;  %v13405_v23 = vcombine.high %v898_v15, %v902_v17  ;;  %v942_v7 = vld [vmem:[%s19818_s1 + $0x1c60] sm:$0xff]  ;;  %v16086_v8 = vrot.slane %v15865_v16, %v14688_v54  ;;  %v939_v11 = vld [vmem:[%s19818_s1 + $0x1c48] sm:$0xff] }
 0x19e   :  { %10468 = vmatprep.subr.bf16.mxu1 %v13359_v25  ;;  %v13407_v25 = vcombine.high %v899_v18, %v903_v19  ;;  %v946_v16 = vld [vmem:[%s19818_s1 + $0x1c80] sm:$0xff] }
 0x1a0   :  { %9936 = vmatpush1.bf16.msra.mxu0 %v13356_v31  ;;  %v13404_v31 = vcombine.low %v898_v15, %v902_v17  ;;  %v950_v17 = vld [vmem:[%s19818_s1 + $0x1ca0] sm:$0xff] }
 0x1a1   :  { %10469 = vmatpush1.bf16.msra.mxu1 %v13358_v32  ;;  %9937 = vmatprep.subr.bf16.mxu0 %v13365_v33  ;;  %v13406_v32 = vcombine.low %v899_v18, %v903_v19  ;;  %v13413_v33 = vcombine.high %v906_v26, %v910_v27  ;;  %v16102_v18 = vcombine.high %v15898_v38, %v15898_v38  ;;  %v947_v19 = vld [vmem:[%s19818_s1 + $0x1c88] sm:$0xff] }
 0x1a2   :  { %10470 = vmatprep.subr.bf16.mxu1 %v13367_v35  ;;  %v13415_v35 = vcombine.high %v907_v29, %v911_v30 }
 0x1a4   :  { %9938 = vmatpush1.bf16.msra.mxu0 %v13364_v42  ;;  %v13412_v42 = vcombine.low %v906_v26, %v910_v27  ;;  %v954_v27 = vld [vmem:[%s19818_s1 + $0x1cc0] sm:$0xff] }
 0x1a5   :  { %10471 = vmatpush1.bf16.msra.mxu1 %v13366_v43  ;;  %9939 = vmatprep.subr.bf16.mxu0 %v13373_v45  ;;  %v13414_v43 = vcombine.low %v907_v29, %v911_v30  ;;  %v13421_v45 = vcombine.high %v914_v36, %v918_v37  ;;  %v958_v29 = vld [vmem:[%s19818_s1 + $0x1ce0] sm:$0xff]  ;;  %v955_v30 = vld [vmem:[%s19818_s1 + $0x1cc8] sm:$0xff] }
 0x1a6   :  { %10472 = vmatprep.subr.bf16.mxu1 %v13375_v46  ;;  %v13423_v46 = vcombine.high %v915_v39, %v919_v40 }
 0x1a8   :  { %9940 = vmatpush1.bf16.msra.mxu0 %v13372_v53  ;;  %v13420_v53 = vcombine.low %v914_v36, %v918_v37  ;;  %v962_v37 = vld [vmem:[%s19818_s1 + $0x1d00] sm:$0xff] }
 0x1a9   :  { %10473 = vmatpush1.bf16.msra.mxu1 %v13374_v55  ;;  %9941 = vmatprep.subr.bf16.mxu0 %v13381_v56  ;;  %v13422_v55 = vcombine.low %v915_v39, %v919_v40  ;;  %v13429_v56 = vcombine.high %v922_v47, %v926_v48  ;;  %v966_v39 = vld [vmem:[%s19818_s1 + $0x1d20] sm:$0xff]  ;;  %v963_v40 = vld [vmem:[%s19818_s1 + $0x1d08] sm:$0xff] }
 0x1aa   :  { %10474 = vmatprep.subr.bf16.mxu1 %v13383_v57  ;;  %v13431_v57 = vcombine.high %v923_v50, %v927_v51 }
 0x1ac   :  { %9942 = vmatpush1.bf16.msra.mxu0 %v13380_v1  ;;  %v13428_v1 = vcombine.low %v922_v47, %v926_v48  ;;  %v970_v48 = vld [vmem:[%s19818_s1 + $0x1d40] sm:$0xff] }
 0x1ad   :  { %10475 = vmatpush1.bf16.msra.mxu1 %v13382_v3  ;;  %9943 = vmatprep.subr.bf16.mxu0 %v13389_v0  ;;  %v13430_v3 = vcombine.low %v923_v50, %v927_v51  ;;  %v13437_v0 = vcombine.high %v930_v58, %v934_v61  ;;  %v974_v50 = vld [vmem:[%s19818_s1 + $0x1d60] sm:$0xff]  ;;  %v971_v51 = vld [vmem:[%s19818_s1 + $0x1d48] sm:$0xff] }
 0x1ae   :  { %10476 = vmatprep.subr.bf16.mxu1 %v13391_v4  ;;  %v13439_v4 = vcombine.high %v931_v9, %v935_v62 }
 0x1b0   :  { %9944 = vmatpush1.bf16.msra.mxu0 %v13388_v12  ;;  %v943_v12 = vld [vmem:[%s19818_s1 + $0x1c68] sm:$0xff] }
 0x1b1   :  { %10477 = vmatpush1.bf16.msra.mxu1 %v13390_v13  ;;  %9945 = vmatprep.subr.bf16.mxu0 %v13397_v14  ;;  %v13436_v13 = vcombine.low %v930_v58, %v934_v61  ;;  %v13438_v14 = vcombine.low %v931_v9, %v935_v62  ;;  %v13447_v15 = vcombine.high %v939_v11, %v943_v12  ;;  %v978_v61 = vld [vmem:[%s19818_s1 + $0x1d80] sm:$0xff]  ;;  %v979_v62 = vld [vmem:[%s19818_s1 + $0x1d88] sm:$0xff] }
 0x1b2   :  { %10478 = vmatprep.subr.bf16.mxu1 %v13399_v2  ;;  %v13445_v2 = vcombine.high %v938_v6, %v942_v7  ;;  %v982_v9 = vld [vmem:[%s19818_s1 + $0x1da0] sm:$0xff] }
 0x1b4   :  { %9946 = vmatpush1.bf16.msra.mxu0 %v13396_v21  ;;  %v951_v21 = vld [vmem:[%s19818_s1 + $0x1ca8] sm:$0xff] }
 0x1b5   :  { %10479 = vmatpush1.bf16.msra.mxu1 %v13398_v22  ;;  %9947 = vmatprep.subr.bf16.mxu0 %v13405_v23  ;;  %v13444_v22 = vcombine.low %v938_v6, %v942_v7  ;;  %v13446_v23 = vcombine.low %v939_v11, %v943_v12  ;;  %v13455_v26 = vcombine.high %v947_v19, %v951_v21  ;;  %v986_v7 = vld [vmem:[%s19818_s1 + $0x1dc0] sm:$0xff]  ;;  %v987_v12 = vld [vmem:[%s19818_s1 + $0x1dc8] sm:$0xff] }
 0x1b6   :  { %10480 = vmatprep.subr.bf16.mxu1 %v13407_v25  ;;  %v13453_v25 = vcombine.high %v946_v16, %v950_v17  ;;  %v990_v11 = vld [vmem:[%s19818_s1 + $0x1de0] sm:$0xff] }
 0x1b8   :  { %9948 = vmatpush1.bf16.msra.mxu0 %v13404_v31  ;;  %v959_v31 = vld [vmem:[%s19818_s1 + $0x1ce8] sm:$0xff] }
 0x1b9   :  { %10481 = vmatpush1.bf16.msra.mxu1 %v13406_v32  ;;  %9949 = vmatprep.subr.bf16.mxu0 %v13413_v33  ;;  %v13452_v32 = vcombine.low %v946_v16, %v950_v17  ;;  %v13454_v33 = vcombine.low %v947_v19, %v951_v21  ;;  %v13463_v36 = vcombine.high %v955_v30, %v959_v31  ;;  %v994_v17 = vld [vmem:[%s19818_s1 + $0x1e00] sm:$0xff]  ;;  %v995_v21 = vld [vmem:[%s19818_s1 + $0x1e08] sm:$0xff] }
 0x1ba   :  { %10482 = vmatprep.subr.bf16.mxu1 %v13415_v35  ;;  %v13461_v35 = vcombine.high %v954_v27, %v958_v29  ;;  %v998_v19 = vld [vmem:[%s19818_s1 + $0x1e20] sm:$0xff] }
 0x1bc   :  { %9950 = vmatpush1.bf16.msra.mxu0 %v13412_v42  ;;  %v967_v42 = vld [vmem:[%s19818_s1 + $0x1d28] sm:$0xff] }
 0x1bd   :  { %10483 = vmatpush1.bf16.msra.mxu1 %v13414_v43  ;;  %9951 = vmatprep.subr.bf16.mxu0 %v13421_v45  ;;  %v13460_v43 = vcombine.low %v954_v27, %v958_v29  ;;  %v13462_v45 = vcombine.low %v955_v30, %v959_v31  ;;  %v13471_v47 = vcombine.high %v963_v40, %v967_v42  ;;  %v1002_v29 = vld [vmem:[%s19818_s1 + $0x1e40] sm:$0xff]  ;;  %v1003_v31 = vld [vmem:[%s19818_s1 + $0x1e48] sm:$0xff] }
 0x1be   :  { %10484 = vmatprep.subr.bf16.mxu1 %v13423_v46  ;;  %v13469_v46 = vcombine.high %v962_v37, %v966_v39  ;;  %v1006_v30 = vld [vmem:[%s19818_s1 + $0x1e60] sm:$0xff] }
 0x1c0   :  { %9952 = vmatpush1.bf16.msra.mxu0 %v13420_v53  ;;  %v975_v53 = vld [vmem:[%s19818_s1 + $0x1d68] sm:$0xff] }
 0x1c1   :  { %10485 = vmatpush1.bf16.msra.mxu1 %v13422_v55  ;;  %9953 = vmatprep.subr.bf16.mxu0 %v13429_v56  ;;  %v13468_v55 = vcombine.low %v962_v37, %v966_v39  ;;  %v13470_v56 = vcombine.low %v963_v40, %v967_v42  ;;  %v13479_v58 = vcombine.high %v971_v51, %v975_v53  ;;  %v1010_v39 = vld [vmem:[%s19818_s1 + $0x1e80] sm:$0xff]  ;;  %v1011_v42 = vld [vmem:[%s19818_s1 + $0x1e88] sm:$0xff] }
 0x1c2   :  { %10486 = vmatprep.subr.bf16.mxu1 %v13431_v57  ;;  %v13477_v57 = vcombine.high %v970_v48, %v974_v50  ;;  %v1014_v40 = vld [vmem:[%s19818_s1 + $0x1ea0] sm:$0xff] }
 0x1c4   :  { %9954 = vmatpush1.bf16.msra.mxu0 %v13428_v1  ;;  %v983_v1 = vld [vmem:[%s19818_s1 + $0x1da8] sm:$0xff] }
 0x1c5   :  { %10487 = vmatpush1.bf16.msra.mxu1 %v13430_v3  ;;  %9964 = vmatprep.subr.bf16.mxu0 %v13437_v0  ;;  %v13476_v3 = vcombine.low %v970_v48, %v974_v50  ;;  %v13478_v0 = vcombine.low %v971_v51, %v975_v53  ;;  %v13487_v6 = vcombine.high %v979_v62, %v983_v1  ;;  %v1018_v50 = vld [vmem:[%s19818_s1 + $0x1ec0] sm:$0xff]  ;;  %v1019_v53 = vld [vmem:[%s19818_s1 + $0x1ec8] sm:$0xff] }
 0x1c6   :  { %10497 = vmatprep.subr.bf16.mxu1 %v13439_v4  ;;  %v13485_v4 = vcombine.high %v978_v61, %v982_v9  ;;  %v1022_v51 = vld [vmem:[%s19818_s1 + $0x1ee0] sm:$0xff] }
 0x1c7   :  { %9956 = vmatmul.mubr.bf16.vlgmr.msra.gmra.mrb[0].mxu0 %v16086_v8 }
 0x1c8   :  { %9965 = vmatpush1.bf16.msra.mxu0 %v13436_v13  ;;  %10489 = vmatmul.mubr.bf16.vlgmr.msra.gmra.mrb[0].mxu1 %v16086_v8  ;;  %v991_v13 = vld [vmem:[%s19818_s1 + $0x1de8] sm:$0xff] }
 0x1c9   :  { %10498 = vmatpush1.bf16.msra.mxu1 %v13438_v14  ;;  %9966 = vmatprep.subr.bf16.mxu0 %v13445_v2  ;;  %v13484_v14 = vcombine.low %v978_v61, %v982_v9  ;;  %v13486_v2 = vcombine.low %v979_v62, %v983_v1  ;;  %v13495_v16 = vcombine.high %v987_v12, %v991_v13  ;;  %v1026_v9 = vld [vmem:[%s19818_s1 + $0x1f00] sm:$0xff]  ;;  %v1027_v1 = vld [vmem:[%s19818_s1 + $0x1f08] sm:$0xff] }
 0x1ca   :  { %10499 = vmatprep.subr.bf16.mxu1 %v13447_v15  ;;  %9996 = vmatprep.mubr.bf16.mxu0 %v16102_v18  ;;  %v13493_v15 = vcombine.high %v986_v7, %v990_v11  ;;  %v1030_v62 = vld [vmem:[%s19818_s1 + $0x1f20] sm:$0xff] }
 0x1cb   :  { %10529 = vmatprep.mubr.bf16.mxu1 %v16102_v18 }
 0x1cc   :  { %9967 = vmatpush1.bf16.msra.mxu0 %v13444_v22  ;;  %v999_v22 = vld [vmem:[%s19818_s1 + $0x1e28] sm:$0xff] }
 0x1cd   :  { %10500 = vmatpush1.bf16.msra.mxu1 %v13446_v23  ;;  %9968 = vmatprep.subr.bf16.mxu0 %v13453_v25  ;;  %v13492_v23 = vcombine.low %v986_v7, %v990_v11  ;;  %v13494_v25 = vcombine.low %v987_v12, %v991_v13  ;;  %v13503_v27 = vcombine.high %v995_v21, %v999_v22  ;;  %v1034_v11 = vld [vmem:[%s19818_s1 + $0x1f40] sm:$0xff]  ;;  %v1035_v13 = vld [vmem:[%s19818_s1 + $0x1f48] sm:$0xff] }
 0x1ce   :  { %10501 = vmatprep.subr.bf16.mxu1 %v13455_v26  ;;  %v13501_v26 = vcombine.high %v994_v17, %v998_v19  ;;  %v1038_v12 = vld [vmem:[%s19818_s1 + $0x1f60] sm:$0xff] }
 0x1d0   :  { %9969 = vmatpush1.bf16.msra.mxu0 %v13452_v32  ;;  %v1007_v32 = vld [vmem:[%s19818_s1 + $0x1e68] sm:$0xff] }
 0x1d1   :  { %10502 = vmatpush1.bf16.msra.mxu1 %v13454_v33  ;;  %9970 = vmatprep.subr.bf16.mxu0 %v13461_v35  ;;  %v13500_v33 = vcombine.low %v994_v17, %v998_v19  ;;  %v13502_v35 = vcombine.low %v995_v21, %v999_v22  ;;  %v13511_v37 = vcombine.high %v1003_v31, %v1007_v32  ;;  %v1042_v19 = vld [vmem:[%s19818_s1 + $0x1f80] sm:$0xff]  ;;  %v1043_v22 = vld [vmem:[%s19818_s1 + $0x1f88] sm:$0xff] }
 0x1d2   :  { %10503 = vmatprep.subr.bf16.mxu1 %v13463_v36  ;;  %v13509_v36 = vcombine.high %v1002_v29, %v1006_v30  ;;  %v1046_v21 = vld [vmem:[%s19818_s1 + $0x1fa0] sm:$0xff] }
 0x1d4   :  { %9971 = vmatpush1.bf16.msra.mxu0 %v13460_v43  ;;  %v1015_v43 = vld [vmem:[%s19818_s1 + $0x1ea8] sm:$0xff] }
 0x1d5   :  { %10504 = vmatpush1.bf16.msra.mxu1 %v13462_v45  ;;  %9972 = vmatprep.subr.bf16.mxu0 %v13469_v46  ;;  %v13508_v45 = vcombine.low %v1002_v29, %v1006_v30  ;;  %v13510_v46 = vcombine.low %v1003_v31, %v1007_v32  ;;  %v13519_v48 = vcombine.high %v1011_v42, %v1015_v43  ;;  %v1050_v30 = vld [vmem:[%s19818_s1 + $0x1fc0] sm:$0xff]  ;;  %v1051_v32 = vld [vmem:[%s19818_s1 + $0x1fc8] sm:$0xff] }
 0x1d6   :  { %10505 = vmatprep.subr.bf16.mxu1 %v13471_v47  ;;  %v13517_v47 = vcombine.high %v1010_v39, %v1014_v40  ;;  %v1054_v31 = vld [vmem:[%s19818_s1 + $0x1fe0] sm:$0xff] }
 0x1d8   :  { %9973 = vmatpush1.bf16.msra.mxu0 %v13468_v55  ;;  %v1023_v55 = vld [vmem:[%s19818_s1 + $0x1ee8] sm:$0xff] }
 0x1d9   :  { %10506 = vmatpush1.bf16.msra.mxu1 %v13470_v56  ;;  %9974 = vmatprep.subr.bf16.mxu0 %v13477_v57  ;;  %v13516_v56 = vcombine.low %v1010_v39, %v1014_v40  ;;  %v13518_v57 = vcombine.low %v1011_v42, %v1015_v43  ;;  %v13527_v61 = vcombine.high %v1019_v53, %v1023_v55  ;;  %v1058_v42 = vld [vmem:[%s19818_s1 + $0x2000] sm:$0xff] }
 0x1da   :  { %10507 = vmatprep.subr.bf16.mxu1 %v13479_v58  ;;  %v13525_v58 = vcombine.high %v1018_v50, %v1022_v51  ;;  %v13557_v39 = vcombine.high %v1050_v30, %v1054_v31  ;;  %v1062_v43 = vld [vmem:[%s19818_s1 + $0x2020] sm:$0xff] }
 0x1dc   :  { %9975 = vmatpush1.bf16.msra.mxu0 %v13476_v3  ;;  %v1031_v3 = vld [vmem:[%s19818_s1 + $0x1f28] sm:$0xff] }
 0x1dd   :  { %10508 = vmatpush1.bf16.msra.mxu1 %v13478_v0  ;;  %9976 = vmatprep.subr.bf16.mxu0 %v13485_v4  ;;  %v13524_v0 = vcombine.low %v1018_v50, %v1022_v51  ;;  %v13526_v4 = vcombine.low %v1019_v53, %v1023_v55  ;;  %v13535_v7 = vcombine.high %v1027_v1, %v1031_v3  ;;  %v1066_v55 = vld [vmem:[%s19818_s1 + $0x2040] sm:$0xff] }
 0x1de   :  { %10509 = vmatprep.subr.bf16.mxu1 %v13487_v6  ;;  %v13533_v6 = vcombine.high %v1026_v9, %v1030_v62  ;;  %v13565_v51 = vcombine.high %v1058_v42, %v1062_v43 }
 0x1e0   :  { %9977 = vmatpush1.bf16.msra.mxu0 %v13484_v14  ;;  %v1039_v14 = vld [vmem:[%s19818_s1 + $0x1f68] sm:$0xff] }
 0x1e1   :  { %10510 = vmatpush1.bf16.msra.mxu1 %v13486_v2  ;;  %9978 = vmatprep.subr.bf16.mxu0 %v13493_v15  ;;  %v13532_v2 = vcombine.low %v1026_v9, %v1030_v62  ;;  %v13534_v15 = vcombine.low %v1027_v1, %v1031_v3  ;;  %v13543_v17 = vcombine.high %v1035_v13, %v1039_v14  ;;  %v1071_v9 = vld [vmem:[%s19818_s1 + $0x2068] sm:$0xff] }
 0x1e2   :  { %10511 = vmatprep.subr.bf16.mxu1 %v13495_v16  ;;  %v13541_v16 = vcombine.high %v1034_v11, %v1038_v12  ;;  %v13564_v62 = vcombine.low %v1058_v42, %v1062_v43  ;;  %v1099_v42 = vld [vmem:[%s19818_s1 + $0x2148] sm:$0xff] }
 0x1e3   :  { %v1103_v43 = vld [vmem:[%s19818_s1 + $0x2168] sm:$0xff] }
 0x1e4   :  { %9979 = vmatpush1.bf16.msra.mxu0 %v13492_v23  ;;  %v1047_v23 = vld [vmem:[%s19818_s1 + $0x1fa8] sm:$0xff] }
 0x1e5   :  { %10512 = vmatpush1.bf16.msra.mxu1 %v13494_v25  ;;  %9980 = vmatprep.subr.bf16.mxu0 %v13501_v26  ;;  %v13540_v25 = vcombine.low %v1034_v11, %v1038_v12  ;;  %v13542_v26 = vcombine.low %v1035_v13, %v1039_v14  ;;  %v13551_v29 = vcombine.high %v1043_v22, %v1047_v23  ;;  %v1075_v11 = vld [vmem:[%s19818_s1 + $0x2088] sm:$0xff] }
 0x1e6   :  { %10513 = vmatprep.subr.bf16.mxu1 %v13503_v27  ;;  %v13549_v27 = vcombine.high %v1042_v19, %v1046_v21  ;;  %v1079_v12 = vld [vmem:[%s19818_s1 + $0x20a8] sm:$0xff] }
 0x1e8   :  { %9981 = vmatpush1.bf16.msra.mxu0 %v13500_v33  ;;  %v1055_v33 = vld [vmem:[%s19818_s1 + $0x1fe8] sm:$0xff] }
 0x1e9   :  { %10514 = vmatpush1.bf16.msra.mxu1 %v13502_v35  ;;  %9982 = vmatprep.subr.bf16.mxu0 %v13509_v36  ;;  %v16273_v35 = vld [vmem:[%s19817_s0 + $0x10] sm:$0xff]  ;;  %v13548_v36 = vcombine.low %v1042_v19, %v1046_v21  ;;  %v13559_v40 = vcombine.high %v1051_v32, %v1055_v33  ;;  %v13558_v50 = vcombine.low %v1051_v32, %v1055_v33  ;;  %v1083_v19 = vld [vmem:[%s19818_s1 + $0x20c8] sm:$0xff] }
 0x1ea   :  { %10515 = vmatprep.subr.bf16.mxu1 %v13511_v37  ;;  %v13550_v37 = vcombine.low %v1043_v22, %v1047_v23  ;;  %v1087_v21 = vld [vmem:[%s19818_s1 + $0x20e8] sm:$0xff]  ;;  %v13582_v23 = vcombine.low %v1075_v11, %v1079_v12 }
 0x1eb   :  { %v13590_v33 = vcombine.low %v1083_v19, %v1087_v21 }
 0x1ec   :  { %9983 = vmatpush1.bf16.msra.mxu0 %v13508_v45  ;;  %v16283_v45 = vrot.slane %v16273_v35, %v14688_v54 }
 0x1ed   :  { %10516 = vmatpush1.bf16.msra.mxu1 %v13510_v46  ;;  %9984 = vmatprep.subr.bf16.mxu0 %v13517_v47  ;;  %v1059_v46 = vld [vmem:[%s19818_s1 + $0x2008] sm:$0xff] }
 0x1ee   :  { %10517 = vmatprep.subr.bf16.mxu1 %v13519_v48  ;;  %v1063_v47 = vld [vmem:[%s19818_s1 + $0x2028] sm:$0xff]  ;;  %v13556_v48 = vcombine.low %v1050_v30, %v1054_v31 }
 0x1ef   :  { %v13567_v53 = vcombine.high %v1059_v46, %v1063_v47  ;;  %v13566_v1 = vcombine.low %v1059_v46, %v1063_v47  ;;  %v1091_v30 = vld [vmem:[%s19818_s1 + $0x2108] sm:$0xff] }
 0x1f0   :  { %9985 = vmatpush1.bf16.msra.mxu0 %v13516_v56  ;;  %v1070_v56 = vld [vmem:[%s19818_s1 + $0x2060] sm:$0xff]  ;;  %v1095_v31 = vld [vmem:[%s19818_s1 + $0x2128] sm:$0xff] }
 0x1f1   :  { %10518 = vmatpush1.bf16.msra.mxu1 %v13518_v57  ;;  %9986 = vmatprep.subr.bf16.mxu0 %v13525_v58  ;;  %v1761_v57 = vcombine.high %v16283_v45, %v16283_v45  ;;  %v16301_v58 = vcombine.high %v16086_v8, %v16086_v8  ;;  %v13573_v3 = vcombine.high %v1066_v55, %v1070_v56 }
 0x1f2   :  { %10519 = vmatprep.subr.bf16.mxu1 %v13527_v61  ;;  %v1067_v61 = vld [vmem:[%s19818_s1 + $0x2048] sm:$0xff]  ;;  %v13572_v13 = vcombine.low %v1066_v55, %v1070_v56  ;;  %v13598_v47 = vcombine.low %v1091_v30, %v1095_v31 }
 0x1f3   :  { %v13574_v14 = vcombine.low %v1067_v61, %v1071_v9  ;;  %v1107_v55 = vld [vmem:[%s19818_s1 + $0x2188] sm:$0xff] }
 0x1f4   :  { %9987 = vmatpush1.bf16.msra.mxu0 %v13524_v0  ;;  %v13575_v0 = vcombine.high %v1067_v61, %v1071_v9  ;;  %v1111_v56 = vld [vmem:[%s19818_s1 + $0x21a8] sm:$0xff]  ;;  %v13606_v61 = vcombine.low %v1099_v42, %v1103_v43 }
 0x1f5   :  { %10520 = vmatpush1.bf16.msra.mxu1 %v13526_v4  ;;  %9988 = vmatprep.subr.bf16.mxu0 %v13533_v6  ;;  %v1074_v4 = vld [vmem:[%s19818_s1 + $0x2080] sm:$0xff] }
 0x1f6   :  { %10521 = vmatprep.subr.bf16.mxu1 %v13535_v7  ;;  %v1078_v6 = vld [vmem:[%s19818_s1 + $0x20a0] sm:$0xff]  ;;  %v16316_v7 = vrot.slane %v1761_v57, %v14688_v54 }
 0x1f7   :  { %v13580_v22 = vcombine.low %v1074_v4, %v1078_v6 }
 0x1f8   :  { %9989 = vmatpush1.bf16.msra.mxu0 %v13532_v2  ;;  %v13581_v2 = vcombine.high %v1074_v4, %v1078_v6  ;;  %v1119_v4 = vld [vmem:[%s19818_s1 + $0x21e8] sm:$0xff] }
 0x1f9   :  { %10522 = vmatpush1.bf16.msra.mxu1 %v13534_v15  ;;  %9990 = vmatprep.subr.bf16.mxu0 %v13541_v16  ;;  %v13583_v15 = vcombine.high %v1075_v11, %v1079_v12  ;;  %v1082_v16 = vld [vmem:[%s19818_s1 + $0x20c0] sm:$0xff]  ;;  %v13614_v11 = vcombine.low %v1107_v55, %v1111_v56 }
 0x1fa   :  { %10523 = vmatprep.subr.bf16.mxu1 %v13543_v17  ;;  %v1086_v17 = vld [vmem:[%s19818_s1 + $0x20e0] sm:$0xff] }
 0x1fb   :  { %v13588_v32 = vcombine.low %v1082_v16, %v1086_v17 }
 0x1fc   :  { %9991 = vmatpush1.bf16.msra.mxu0 %v13540_v25  ;;  %v13589_v25 = vcombine.high %v1082_v16, %v1086_v17  ;;  %v1127_v16 = vld [vmem:[%s19818_s1 + $0x2228] sm:$0xff] }
 0x1fd   :  { %10524 = vmatpush1.bf16.msra.mxu1 %v13542_v26  ;;  %9992 = vmatprep.subr.bf16.mxu0 %v13549_v27  ;;  %v13591_v26 = vcombine.high %v1083_v19, %v1087_v21  ;;  %v1090_v27 = vld [vmem:[%s19818_s1 + $0x2100] sm:$0xff] }
 0x1fe   :  { %10525 = vmatprep.subr.bf16.mxu1 %v13551_v29  ;;  %v1094_v29 = vld [vmem:[%s19818_s1 + $0x2120] sm:$0xff] }
 0x1ff   :  { %v13596_v46 = vcombine.low %v1090_v27, %v1094_v29 }
 0x200   :  { %9993 = vmatpush1.bf16.msra.mxu0 %v13548_v36  ;;  %v13597_v36 = vcombine.high %v1090_v27, %v1094_v29  ;;  %v1135_v27 = vld [vmem:[%s19818_s1 + $0x2268] sm:$0xff] }
 0x201   :  { %10526 = vmatpush1.bf16.msra.mxu1 %v13550_v37  ;;  %9994 = vmatprep.subr.bf16.mxu0 %v13557_v39  ;;  %v13599_v37 = vcombine.high %v1091_v30, %v1095_v31  ;;  %v1098_v39 = vld [vmem:[%s19818_s1 + $0x2140] sm:$0xff] }
 0x202   :  { %10527 = vmatprep.subr.bf16.mxu1 %v13559_v40  ;;  %v1102_v40 = vld [vmem:[%s19818_s1 + $0x2160] sm:$0xff] }
 0x203   :  { %v13604_v57 = vcombine.low %v1098_v39, %v1102_v40 }
 0x204   :  { %9995 = vmatpush1.bf16.msra.mxu0 %v13556_v48  ;;  %v13605_v48 = vcombine.high %v1098_v39, %v1102_v40  ;;  %v1143_v39 = vld [vmem:[%s19818_s1 + $0x22a8] sm:$0xff] }
 0x205   :  { %10528 = vmatpush1.bf16.msra.mxu1 %v13558_v50  ;;  %10005 = vmatprep.subr.bf16.mxu0 %v13565_v51  ;;  %v13607_v50 = vcombine.high %v1099_v42, %v1103_v43  ;;  %v1106_v51 = vld [vmem:[%s19818_s1 + $0x2180] sm:$0xff] }
 0x206   :  { %10538 = vmatprep.subr.bf16.mxu1 %v13567_v53  ;;  %v1110_v53 = vld [vmem:[%s19818_s1 + $0x21a0] sm:$0xff] }
 0x207   :  { %9997 = vmatmul.mubr.bf16.vlgmr.msra.gmra.mrb[0].mxu0 %v16301_v58  ;;  %v13613_v9 = vcombine.high %v1106_v51, %v1110_v53  ;;  %v13612_v6 = vcombine.low %v1106_v51, %v1110_v53  ;;  %v1151_v51 = vld [vmem:[%s19818_s1 + $0x22e8] sm:$0xff] }
 0x208   :  { %10006 = vmatpush1.bf16.msra.mxu0 %v13564_v62  ;;  %10530 = vmatmul.mubr.bf16.vlgmr.msra.gmra.mrb[0].mxu1 %v16301_v58  ;;  %v13615_v62 = vcombine.high %v1107_v55, %v1111_v56 }
 0x209   :  { %10539 = vmatpush1.bf16.msra.mxu1 %v13566_v1  ;;  %10007 = vmatprep.subr.bf16.mxu0 %v13573_v3  ;;  %v1114_v1 = vld [vmem:[%s19818_s1 + $0x21c0] sm:$0xff] }
 0x20a   :  { %10540 = vmatprep.subr.bf16.mxu1 %v13575_v0  ;;  %10037 = vmatprep.mubr.bf16.mxu0 %v16316_v7  ;;  %v1118_v3 = vld [vmem:[%s19818_s1 + $0x21e0] sm:$0xff]  ;;  %v1115_v0 = vld [vmem:[%s19818_s1 + $0x21c8] sm:$0xff] }
 0x20b   :  { %10570 = vmatprep.mubr.bf16.mxu1 %v16316_v7  ;;  %v13621_v12 = vcombine.high %v1114_v1, %v1118_v3  ;;  %v13620_v17 = vcombine.low %v1114_v1, %v1118_v3  ;;  %v13622_v19 = vcombine.low %v1115_v0, %v1119_v4  ;;  %v1159_v1 = vld [vmem:[%s19818_s1 + $0x2328] sm:$0xff] }
 0x20c   :  { %10008 = vmatpush1.bf16.msra.mxu0 %v13572_v13  ;;  %v13623_v13 = vcombine.high %v1115_v0, %v1119_v4 }
 0x20d   :  { %10541 = vmatpush1.bf16.msra.mxu1 %v13574_v14  ;;  %10009 = vmatprep.subr.bf16.mxu0 %v13581_v2  ;;  %v1122_v14 = vld [vmem:[%s19818_s1 + $0x2200] sm:$0xff] }
 0x20e   :  { %10542 = vmatprep.subr.bf16.mxu1 %v13583_v15  ;;  %v1126_v2 = vld [vmem:[%s19818_s1 + $0x2220] sm:$0xff]  ;;  %v1123_v15 = vld [vmem:[%s19818_s1 + $0x2208] sm:$0xff] }
 0x20f   :  { %v13629_v21 = vcombine.high %v1122_v14, %v1126_v2  ;;  %v13628_v29 = vcombine.low %v1122_v14, %v1126_v2  ;;  %v13630_v30 = vcombine.low %v1123_v15, %v1127_v16  ;;  %v1167_v14 = vld [vmem:[%s19818_s1 + $0x2368] sm:$0xff] }
 0x210   :  { %10010 = vmatpush1.bf16.msra.mxu0 %v13580_v22  ;;  %v13631_v22 = vcombine.high %v1123_v15, %v1127_v16 }
 0x211   :  { %10543 = vmatpush1.bf16.msra.mxu1 %v13582_v23  ;;  %10011 = vmatprep.subr.bf16.mxu0 %v13589_v25  ;;  %v1130_v23 = vld [vmem:[%s19818_s1 + $0x2240] sm:$0xff] }
 0x212   :  { %10544 = vmatprep.subr.bf16.mxu1 %v13591_v26  ;;  %v1134_v25 = vld [vmem:[%s19818_s1 + $0x2260] sm:$0xff]  ;;  %v1131_v26 = vld [vmem:[%s19818_s1 + $0x2248] sm:$0xff] }
 0x213   :  { %v13637_v31 = vcombine.high %v1130_v23, %v1134_v25  ;;  %v13636_v40 = vcombine.low %v1130_v23, %v1134_v25  ;;  %v13638_v42 = vcombine.low %v1131_v26, %v1135_v27  ;;  %v1175_v23 = vld [vmem:[%s19818_s1 + $0x23a8] sm:$0xff] }
 0x214   :  { %10012 = vmatpush1.bf16.msra.mxu0 %v13588_v32  ;;  %v13639_v32 = vcombine.high %v1131_v26, %v1135_v27 }
 0x215   :  { %10545 = vmatpush1.bf16.msra.mxu1 %v13590_v33  ;;  %10013 = vmatprep.subr.bf16.mxu0 %v13597_v36  ;;  %v1138_v33 = vld [vmem:[%s19818_s1 + $0x2280] sm:$0xff] }
 0x216   :  { %10546 = vmatprep.subr.bf16.mxu1 %v13599_v37  ;;  %v1142_v36 = vld [vmem:[%s19818_s1 + $0x22a0] sm:$0xff]  ;;  %v1139_v37 = vld [vmem:[%s19818_s1 + $0x2288] sm:$0xff] }
 0x217   :  { %v13645_v43 = vcombine.high %v1138_v33, %v1142_v36  ;;  %v13644_v53 = vcombine.low %v1138_v33, %v1142_v36  ;;  %v13646_v55 = vcombine.low %v1139_v37, %v1143_v39  ;;  %v1183_v33 = vld [vmem:[%s19818_s1 + $0x23e8] sm:$0xff] }
 0x218   :  { %10014 = vmatpush1.bf16.msra.mxu0 %v13596_v46  ;;  %v13647_v46 = vcombine.high %v1139_v37, %v1143_v39 }
 0x219   :  { %10547 = vmatpush1.bf16.msra.mxu1 %v13598_v47  ;;  %10015 = vmatprep.subr.bf16.mxu0 %v13605_v48  ;;  %v1146_v47 = vld [vmem:[%s19818_s1 + $0x22c0] sm:$0xff] }
 0x21a   :  { %10548 = vmatprep.subr.bf16.mxu1 %v13607_v50  ;;  %v1150_v48 = vld [vmem:[%s19818_s1 + $0x22e0] sm:$0xff]  ;;  %v1147_v50 = vld [vmem:[%s19818_s1 + $0x22c8] sm:$0xff] }
 0x21b   :  { %v13653_v56 = vcombine.high %v1146_v47, %v1150_v48  ;;  %v13652_v3 = vcombine.low %v1146_v47, %v1150_v48  ;;  %v13654_v0 = vcombine.low %v1147_v50, %v1151_v51  ;;  %v1191_v47 = vld [vmem:[%s19818_s1 + $0x2428] sm:$0xff] }
 0x21c   :  { %10016 = vmatpush1.bf16.msra.mxu0 %v13604_v57  ;;  %v13655_v57 = vcombine.high %v1147_v50, %v1151_v51 }
 0x21d   :  { %10549 = vmatpush1.bf16.msra.mxu1 %v13606_v61  ;;  %10017 = vmatprep.subr.bf16.mxu0 %v13613_v9  ;;  %v1154_v61 = vld [vmem:[%s19818_s1 + $0x2300] sm:$0xff] }
 0x21e   :  { %10550 = vmatprep.subr.bf16.mxu1 %v13615_v62  ;;  %v1158_v9 = vld [vmem:[%s19818_s1 + $0x2320] sm:$0xff]  ;;  %v1155_v62 = vld [vmem:[%s19818_s1 + $0x2308] sm:$0xff] }
 0x21f   :  { %v13661_v4 = vcombine.high %v1154_v61, %v1158_v9  ;;  %v13660_v2 = vcombine.low %v1154_v61, %v1158_v9  ;;  %v13662_v15 = vcombine.low %v1155_v62, %v1159_v1  ;;  %v1195_v61 = vld [vmem:[%s19818_s1 + $0x2448] sm:$0xff] }
 0x220   :  { %10018 = vmatpush1.bf16.msra.mxu0 %v13612_v6  ;;  %v13663_v6 = vcombine.high %v1155_v62, %v1159_v1  ;;  %v1199_v9 = vld [vmem:[%s19818_s1 + $0x2468] sm:$0xff] }
 0x221   :  { %10551 = vmatpush1.bf16.msra.mxu1 %v13614_v11  ;;  %10019 = vmatprep.subr.bf16.mxu0 %v13621_v12  ;;  %v1162_v11 = vld [vmem:[%s19818_s1 + $0x2340] sm:$0xff] }
 0x222   :  { %10552 = vmatprep.subr.bf16.mxu1 %v13623_v13  ;;  %v1166_v12 = vld [vmem:[%s19818_s1 + $0x2360] sm:$0xff]  ;;  %v1163_v13 = vld [vmem:[%s19818_s1 + $0x2348] sm:$0xff] }
 0x223   :  { %v13669_v16 = vcombine.high %v1162_v11, %v1166_v12  ;;  %v13668_v25 = vcombine.low %v1162_v11, %v1166_v12  ;;  %v13670_v26 = vcombine.low %v1163_v13, %v1167_v14  ;;  %v1203_v11 = vld [vmem:[%s19818_s1 + $0x2488] sm:$0xff] }
 0x224   :  { %10020 = vmatpush1.bf16.msra.mxu0 %v13620_v17  ;;  %v13671_v17 = vcombine.high %v1163_v13, %v1167_v14  ;;  %v1207_v12 = vld [vmem:[%s19818_s1 + $0x24a8] sm:$0xff]  ;;  %v13702_v14 = vcombine.low %v1195_v61, %v1199_v9 }
 0x225   :  { %10553 = vmatpush1.bf16.msra.mxu1 %v13622_v19  ;;  %10021 = vmatprep.subr.bf16.mxu0 %v13629_v21  ;;  %v1170_v19 = vld [vmem:[%s19818_s1 + $0x2380] sm:$0xff] }
 0x226   :  { %10554 = vmatprep.subr.bf16.mxu1 %v13631_v22  ;;  %v1174_v21 = vld [vmem:[%s19818_s1 + $0x23a0] sm:$0xff]  ;;  %v1171_v22 = vld [vmem:[%s19818_s1 + $0x2388] sm:$0xff] }
 0x227   :  { %v13677_v27 = vcombine.high %v1170_v19, %v1174_v21  ;;  %v13676_v36 = vcombine.low %v1170_v19, %v1174_v21  ;;  %v13678_v37 = vcombine.low %v1171_v22, %v1175_v23  ;;  %v1211_v19 = vld [vmem:[%s19818_s1 + $0x24c8] sm:$0xff] }
 0x228   :  { %10022 = vmatpush1.bf16.msra.mxu0 %v13628_v29  ;;  %v13679_v29 = vcombine.high %v1171_v22, %v1175_v23  ;;  %v1215_v21 = vld [vmem:[%s19818_s1 + $0x24e8] sm:$0xff]  ;;  %v13710_v23 = vcombine.low %v1203_v11, %v1207_v12 }
 0x229   :  { %10555 = vmatpush1.bf16.msra.mxu1 %v13630_v30  ;;  %10023 = vmatprep.subr.bf16.mxu0 %v13637_v31  ;;  %v1178_v30 = vld [vmem:[%s19818_s1 + $0x23c0] sm:$0xff] }
 0x22a   :  { %10556 = vmatprep.subr.bf16.mxu1 %v13639_v32  ;;  %v1182_v31 = vld [vmem:[%s19818_s1 + $0x23e0] sm:$0xff]  ;;  %v1179_v32 = vld [vmem:[%s19818_s1 + $0x23c8] sm:$0xff] }
 0x22b   :  { %v13685_v39 = vcombine.high %v1178_v30, %v1182_v31  ;;  %v13684_v48 = vcombine.low %v1178_v30, %v1182_v31  ;;  %v13686_v50 = vcombine.low %v1179_v32, %v1183_v33  ;;  %v1219_v30 = vld [vmem:[%s19818_s1 + $0x2508] sm:$0xff] }
 0x22c   :  { %10024 = vmatpush1.bf16.msra.mxu0 %v13636_v40  ;;  %v13687_v40 = vcombine.high %v1179_v32, %v1183_v33  ;;  %v1223_v31 = vld [vmem:[%s19818_s1 + $0x2528] sm:$0xff]  ;;  %v13718_v33 = vcombine.low %v1211_v19, %v1215_v21 }
 0x22d   :  { %10557 = vmatpush1.bf16.msra.mxu1 %v13638_v42  ;;  %10025 = vmatprep.subr.bf16.mxu0 %v13645_v43  ;;  %v1186_v42 = vld [vmem:[%s19818_s1 + $0x2400] sm:$0xff] }
 0x22e   :  { %10558 = vmatprep.subr.bf16.mxu1 %v13647_v46  ;;  %v1190_v43 = vld [vmem:[%s19818_s1 + $0x2420] sm:$0xff]  ;;  %v1187_v46 = vld [vmem:[%s19818_s1 + $0x2408] sm:$0xff] }
 0x22f   :  { %v13693_v51 = vcombine.high %v1186_v42, %v1190_v43  ;;  %v13692_v62 = vcombine.low %v1186_v42, %v1190_v43  ;;  %v13694_v1 = vcombine.low %v1187_v46, %v1191_v47  ;;  %v1227_v42 = vld [vmem:[%s19818_s1 + $0x2548] sm:$0xff] }
 0x230   :  { %10026 = vmatpush1.bf16.msra.mxu0 %v13644_v53  ;;  %v13695_v53 = vcombine.high %v1187_v46, %v1191_v47  ;;  %v1231_v43 = vld [vmem:[%s19818_s1 + $0x2568] sm:$0xff]  ;;  %v13726_v47 = vcombine.low %v1219_v30, %v1223_v31 }
 0x231   :  { %10559 = vmatpush1.bf16.msra.mxu1 %v13646_v55  ;;  %10027 = vmatprep.subr.bf16.mxu0 %v13653_v56  ;;  %v1194_v55 = vld [vmem:[%s19818_s1 + $0x2440] sm:$0xff] }
 0x232   :  { %10560 = vmatprep.subr.bf16.mxu1 %v13655_v57  ;;  %v1198_v56 = vld [vmem:[%s19818_s1 + $0x2460] sm:$0xff]  ;;  %v16504_v57 = vrot.slane %v16283_v45, %v14688_v54 }
 0x233   :  { %v1202_v45 = vld [vmem:[%s19818_s1 + $0x2480] sm:$0xff]  ;;  %v13700_v13 = vcombine.low %v1194_v55, %v1198_v56 }
 0x234   :  { %10028 = vmatpush1.bf16.msra.mxu0 %v13652_v3  ;;  %v13701_v3 = vcombine.high %v1194_v55, %v1198_v56  ;;  %v1235_v55 = vld [vmem:[%s19818_s1 + $0x2588] sm:$0xff] }
 0x235   :  { %10561 = vmatpush1.bf16.msra.mxu1 %v13654_v0  ;;  %10029 = vmatprep.subr.bf16.mxu0 %v13661_v4  ;;  %v13703_v0 = vcombine.high %v1195_v61, %v1199_v9  ;;  %v1206_v4 = vld [vmem:[%s19818_s1 + $0x24a0] sm:$0xff]  ;;  %v1239_v56 = vld [vmem:[%s19818_s1 + $0x25a8] sm:$0xff]  ;;  %v13734_v9 = vcombine.low %v1227_v42, %v1231_v43 }
 0x236   :  { %10562 = vmatprep.subr.bf16.mxu1 %v13663_v6  ;;  %v16520_v6 = vcombine.high %v16316_v7, %v16316_v7  ;;  %v13708_v22 = vcombine.low %v1202_v45, %v1206_v4 }
 0x238   :  { %10030 = vmatpush1.bf16.msra.mxu0 %v13660_v2  ;;  %v13709_v2 = vcombine.high %v1202_v45, %v1206_v4  ;;  %v1243_v45 = vld [vmem:[%s19818_s1 + $0x25c8] sm:$0xff] }
 0x239   :  { %10563 = vmatpush1.bf16.msra.mxu1 %v13662_v15  ;;  %10031 = vmatprep.subr.bf16.mxu0 %v13669_v16  ;;  %v13711_v15 = vcombine.high %v1203_v11, %v1207_v12  ;;  %v1210_v16 = vld [vmem:[%s19818_s1 + $0x24c0] sm:$0xff]  ;;  %v1247_v4 = vld [vmem:[%s19818_s1 + $0x25e8] sm:$0xff]  ;;  %v13742_v12 = vcombine.low %v1235_v55, %v1239_v56 }
 0x23a   :  { %10564 = vmatprep.subr.bf16.mxu1 %v13671_v17  ;;  %v1214_v17 = vld [vmem:[%s19818_s1 + $0x24e0] sm:$0xff] }
 0x23b   :  { %v13716_v32 = vcombine.low %v1210_v16, %v1214_v17 }
 0x23c   :  { %10032 = vmatpush1.bf16.msra.mxu0 %v13668_v25  ;;  %v13717_v25 = vcombine.high %v1210_v16, %v1214_v17  ;;  %v1251_v16 = vld [vmem:[%s19818_s1 + $0x2608] sm:$0xff] }
 0x23d   :  { %10565 = vmatpush1.bf16.msra.mxu1 %v13670_v26  ;;  %10033 = vmatprep.subr.bf16.mxu0 %v13677_v27  ;;  %v13719_v26 = vcombine.high %v1211_v19, %v1215_v21  ;;  %v1218_v27 = vld [vmem:[%s19818_s1 + $0x2500] sm:$0xff]  ;;  %v1255_v17 = vld [vmem:[%s19818_s1 + $0x2628] sm:$0xff]  ;;  %v13750_v21 = vcombine.low %v1243_v45, %v1247_v4 }
 0x23e   :  { %10566 = vmatprep.subr.bf16.mxu1 %v13679_v29  ;;  %v1222_v29 = vld [vmem:[%s19818_s1 + $0x2520] sm:$0xff] }
 0x23f   :  { %v13724_v46 = vcombine.low %v1218_v27, %v1222_v29 }
 0x240   :  { %10034 = vmatpush1.bf16.msra.mxu0 %v13676_v36  ;;  %v13725_v36 = vcombine.high %v1218_v27, %v1222_v29  ;;  %v1259_v27 = vld [vmem:[%s19818_s1 + $0x2648] sm:$0xff] }
 0x241   :  { %10567 = vmatpush1.bf16.msra.mxu1 %v13678_v37  ;;  %10035 = vmatprep.subr.bf16.mxu0 %v13685_v39  ;;  %v13727_v37 = vcombine.high %v1219_v30, %v1223_v31  ;;  %v1226_v39 = vld [vmem:[%s19818_s1 + $0x2540] sm:$0xff]  ;;  %v1263_v29 = vld [vmem:[%s19818_s1 + $0x2668] sm:$0xff]  ;;  %v13758_v31 = vcombine.low %v1251_v16, %v1255_v17 }
 0x242   :  { %10568 = vmatprep.subr.bf16.mxu1 %v13687_v40  ;;  %v1230_v40 = vld [vmem:[%s19818_s1 + $0x2560] sm:$0xff] }
 0x243   :  { %v13732_v61 = vcombine.low %v1226_v39, %v1230_v40 }
 0x244   :  { %10036 = vmatpush1.bf16.msra.mxu0 %v13684_v48  ;;  %v13733_v48 = vcombine.high %v1226_v39, %v1230_v40  ;;  %v1267_v39 = vld [vmem:[%s19818_s1 + $0x2688] sm:$0xff] }
 0x245   :  { %10569 = vmatpush1.bf16.msra.mxu1 %v13686_v50  ;;  %10046 = vmatprep.subr.bf16.mxu0 %v13693_v51  ;;  %v13735_v50 = vcombine.high %v1227_v42, %v1231_v43  ;;  %v1234_v51 = vld [vmem:[%s19818_s1 + $0x2580] sm:$0xff]  ;;  %v1271_v40 = vld [vmem:[%s19818_s1 + $0x26a8] sm:$0xff]  ;;  %v13766_v43 = vcombine.low %v1259_v27, %v1263_v29 }
 0x246   :  { %10579 = vmatprep.subr.bf16.mxu1 %v13695_v53  ;;  %v1238_v53 = vld [vmem:[%s19818_s1 + $0x25a0] sm:$0xff] }
 0x247   :  { %10038 = vmatmul.mubr.bf16.vlgmr.msra.gmra.mrb[0].mxu0 %v16504_v57  ;;  %v13740_v11 = vcombine.low %v1234_v51, %v1238_v53 }
 0x248   :  { %10047 = vmatpush1.bf16.msra.mxu0 %v13692_v62  ;;  %10571 = vmatmul.mubr.bf16.vlgmr.msra.gmra.mrb[0].mxu1 %v16504_v57  ;;  %v13741_v62 = vcombine.high %v1234_v51, %v1238_v53  ;;  %v1275_v51 = vld [vmem:[%s19818_s1 + $0x26c8] sm:$0xff] }
 0x249   :  { %10580 = vmatpush1.bf16.msra.mxu1 %v13694_v1  ;;  %10048 = vmatprep.subr.bf16.mxu0 %v13701_v3  ;;  %v13743_v1 = vcombine.high %v1235_v55, %v1239_v56  ;;  %v1242_v3 = vld [vmem:[%s19818_s1 + $0x25c0] sm:$0xff]  ;;  %v1279_v53 = vld [vmem:[%s19818_s1 + $0x26e8] sm:$0xff]  ;;  %v13774_v56 = vcombine.low %v1267_v39, %v1271_v40 }
 0x24a   :  { %10581 = vmatprep.subr.bf16.mxu1 %v13703_v0  ;;  %10078 = vmatprep.mubr.bf16.mxu0 %v16520_v6  ;;  %v1246_v0 = vld [vmem:[%s19818_s1 + $0x25e0] sm:$0xff] }
 0x24b   :  { %10611 = vmatprep.mubr.bf16.mxu1 %v16520_v6  ;;  %v13748_v19 = vcombine.low %v1242_v3, %v1246_v0 }
 0x24c   :  { %10049 = vmatpush1.bf16.msra.mxu0 %v13700_v13  ;;  %v13749_v13 = vcombine.high %v1242_v3, %v1246_v0  ;;  %v1283_v3 = vld [vmem:[%s19818_s1 + $0x2708] sm:$0xff] }
 0x24d   :  { %10582 = vmatpush1.bf16.msra.mxu1 %v13702_v14  ;;  %10050 = vmatprep.subr.bf16.mxu0 %v13709_v2  ;;  %v13751_v14 = vcombine.high %v1243_v45, %v1247_v4  ;;  %v1250_v2 = vld [vmem:[%s19818_s1 + $0x2600] sm:$0xff]  ;;  %v1287_v0 = vld [vmem:[%s19818_s1 + $0x2728] sm:$0xff]  ;;  %v13782_v4 = vcombine.low %v1275_v51, %v1279_v53 }
 0x24e   :  { %10583 = vmatprep.subr.bf16.mxu1 %v13711_v15  ;;  %v1254_v15 = vld [vmem:[%s19818_s1 + $0x2620] sm:$0xff] }
 0x24f   :  { %v13756_v30 = vcombine.low %v1250_v2, %v1254_v15 }
 0x250   :  { %10051 = vmatpush1.bf16.msra.mxu0 %v13708_v22  ;;  %v13757_v22 = vcombine.high %v1250_v2, %v1254_v15  ;;  %v1291_v2 = vld [vmem:[%s19818_s1 + $0x2748] sm:$0xff] }
 0x251   :  { %10584 = vmatpush1.bf16.msra.mxu1 %v13710_v23  ;;  %10052 = vmatprep.subr.bf16.mxu0 %v13717_v25  ;;  %v13759_v23 = vcombine.high %v1251_v16, %v1255_v17  ;;  %v1258_v25 = vld [vmem:[%s19818_s1 + $0x2640] sm:$0xff]  ;;  %v1295_v15 = vld [vmem:[%s19818_s1 + $0x2768] sm:$0xff]  ;;  %v13790_v17 = vcombine.low %v1283_v3, %v1287_v0 }
 0x252   :  { %10585 = vmatprep.subr.bf16.mxu1 %v13719_v26  ;;  %v1262_v26 = vld [vmem:[%s19818_s1 + $0x2660] sm:$0xff] }
 0x253   :  { %v13764_v42 = vcombine.low %v1258_v25, %v1262_v26 }
 0x254   :  { %10053 = vmatpush1.bf16.msra.mxu0 %v13716_v32  ;;  %v13765_v32 = vcombine.high %v1258_v25, %v1262_v26  ;;  %v1299_v25 = vld [vmem:[%s19818_s1 + $0x2788] sm:$0xff] }
 0x255   :  { %10586 = vmatpush1.bf16.msra.mxu1 %v13718_v33  ;;  %10054 = vmatprep.subr.bf16.mxu0 %v13725_v36  ;;  %v13767_v33 = vcombine.high %v1259_v27, %v1263_v29  ;;  %v1266_v36 = vld [vmem:[%s19818_s1 + $0x2680] sm:$0xff]  ;;  %v1303_v26 = vld [vmem:[%s19818_s1 + $0x27a8] sm:$0xff]  ;;  %v13798_v29 = vcombine.low %v1291_v2, %v1295_v15 }
 0x256   :  { %10587 = vmatprep.subr.bf16.mxu1 %v13727_v37  ;;  %v1270_v37 = vld [vmem:[%s19818_s1 + $0x26a0] sm:$0xff] }
 0x257   :  { %v13772_v55 = vcombine.low %v1266_v36, %v1270_v37 }
 0x258   :  { %10055 = vmatpush1.bf16.msra.mxu0 %v13724_v46  ;;  %v13773_v46 = vcombine.high %v1266_v36, %v1270_v37  ;;  %v1746_v36 = vcombine.high %v16273_v35, %v16273_v35  ;;  %v1307_v37 = vld [vmem:[%s19818_s1 + $0x27c8] sm:$0xff]  ;;  %v1314_v35 = vld [vmem:[%s19818_s1 + $0x2800] sm:$0xff] }
 0x259   :  { %10588 = vmatpush1.bf16.msra.mxu1 %v13726_v47  ;;  %10056 = vmatprep.subr.bf16.mxu0 %v13733_v48  ;;  %v13775_v47 = vcombine.high %v1267_v39, %v1271_v40  ;;  %v1274_v48 = vld [vmem:[%s19818_s1 + $0x26c0] sm:$0xff]  ;;  %v1311_v39 = vld [vmem:[%s19818_s1 + $0x27e8] sm:$0xff] }
 0x25a   :  { %10589 = vmatprep.subr.bf16.mxu1 %v13735_v50  ;;  %v1278_v50 = vld [vmem:[%s19818_s1 + $0x26e0] sm:$0xff] }
 0x25b   :  { %v13780_v45 = vcombine.low %v1274_v48, %v1278_v50 }
 0x25c   :  { %10057 = vmatpush1.bf16.msra.mxu0 %v13732_v61  ;;  %v13781_v61 = vcombine.high %v1274_v48, %v1278_v50  ;;  %v16697_v48 = vrot.slane %v1746_v36, %v14688_v54  ;;  %v1315_v50 = vld [vmem:[%s19818_s1 + $0x2808] sm:$0xff]  ;;  %v1346_v36 = vld [vmem:[%s19818_s1 + $0x2900] sm:$0xff] }
 0x25d   :  { %10590 = vmatpush1.bf16.msra.mxu1 %v13734_v9  ;;  %10058 = vmatprep.subr.bf16.mxu0 %v13741_v62  ;;  %v13783_v9 = vcombine.high %v1275_v51, %v1279_v53  ;;  %v1282_v62 = vld [vmem:[%s19818_s1 + $0x2700] sm:$0xff]  ;;  %v1319_v51 = vld [vmem:[%s19818_s1 + $0x2828] sm:$0xff] }
 0x25e   :  { %10591 = vmatprep.subr.bf16.mxu1 %v13743_v1  ;;  %v1286_v1 = vld [vmem:[%s19818_s1 + $0x2720] sm:$0xff] }
 0x25f   :  { %v13788_v16 = vcombine.low %v1282_v62, %v1286_v1 }
 0x260   :  { %10059 = vmatpush1.bf16.msra.mxu0 %v13740_v11  ;;  %v13789_v11 = vcombine.high %v1282_v62, %v1286_v1  ;;  %v1326_v62 = vld [vmem:[%s19818_s1 + $0x2860] sm:$0xff]  ;;  %v1762_v1 = vcombine.high %v16697_v48, %v16697_v48 }
 0x261   :  { %10592 = vmatpush1.bf16.msra.mxu1 %v13742_v12  ;;  %10060 = vmatprep.subr.bf16.mxu0 %v13749_v13  ;;  %v13791_v12 = vcombine.high %v1283_v3, %v1287_v0  ;;  %v1290_v13 = vld [vmem:[%s19818_s1 + $0x2740] sm:$0xff]  ;;  %v16715_v3 = vcombine.high %v16504_v57, %v16504_v57  ;;  %v1323_v0 = vld [vmem:[%s19818_s1 + $0x2848] sm:$0xff] }
 0x262   :  { %10593 = vmatprep.subr.bf16.mxu1 %v13751_v14  ;;  %v1294_v14 = vld [vmem:[%s19818_s1 + $0x2760] sm:$0xff] }
 0x263   :  { %v13796_v27 = vcombine.low %v1290_v13, %v1294_v14 }
 0x264   :  { %10061 = vmatpush1.bf16.msra.mxu0 %v13748_v19  ;;  %v13797_v19 = vcombine.high %v1290_v13, %v1294_v14  ;;  %v1330_v14 = vld [vmem:[%s19818_s1 + $0x2880] sm:$0xff] }
 0x265   :  { %10594 = vmatpush1.bf16.msra.mxu1 %v13750_v21  ;;  %10062 = vmatprep.subr.bf16.mxu0 %v13757_v22  ;;  %v13799_v21 = vcombine.high %v1291_v2, %v1295_v15  ;;  %v1298_v22 = vld [vmem:[%s19818_s1 + $0x2780] sm:$0xff]  ;;  %v16730_v15 = vrot.slane %v1762_v1, %v14688_v54 }
 0x266   :  { %10595 = vmatprep.subr.bf16.mxu1 %v13759_v23  ;;  %v1302_v23 = vld [vmem:[%s19818_s1 + $0x27a0] sm:$0xff] }
 0x267   :  { %v13804_v40 = vcombine.low %v1298_v22, %v1302_v23  ;;  %v1334_v2 = vld [vmem:[%s19818_s1 + $0x28a0] sm:$0xff] }
 0x268   :  { %10063 = vmatpush1.bf16.msra.mxu0 %v13756_v30  ;;  %v13805_v30 = vcombine.high %v1298_v22, %v1302_v23  ;;  %v13837_v22 = vcombine.high %v1330_v14, %v1334_v2  ;;  %v1366_v1 = vld [vmem:[%s19818_s1 + $0x29a0] sm:$0xff] }
 0x269   :  { %10596 = vmatpush1.bf16.msra.mxu1 %v13758_v31  ;;  %10064 = vmatprep.subr.bf16.mxu0 %v13765_v32  ;;  %v13807_v31 = vcombine.high %v1299_v25, %v1303_v26  ;;  %v1306_v32 = vld [vmem:[%s19818_s1 + $0x27c0] sm:$0xff] }
 0x26a   :  { %10597 = vmatprep.subr.bf16.mxu1 %v13767_v33  ;;  %v1310_v33 = vld [vmem:[%s19818_s1 + $0x27e0] sm:$0xff] }
 0x26b   :  { %v13812_v53 = vcombine.low %v1306_v32, %v1310_v33 }
 0x26c   :  { %10065 = vmatpush1.bf16.msra.mxu0 %v13764_v42  ;;  %v13806_v42 = vcombine.low %v1299_v25, %v1303_v26  ;;  %v1338_v25 = vld [vmem:[%s19818_s1 + $0x28c0] sm:$0xff] }
 0x26d   :  { %10598 = vmatpush1.bf16.msra.mxu1 %v13766_v43  ;;  %10066 = vmatprep.subr.bf16.mxu0 %v13773_v46  ;;  %v13813_v43 = vcombine.high %v1306_v32, %v1310_v33  ;;  %v13815_v46 = vcombine.high %v1307_v37, %v1311_v39  ;;  %v1342_v26 = vld [vmem:[%s19818_s1 + $0x28e0] sm:$0xff] }
 0x26e   :  { %10599 = vmatprep.subr.bf16.mxu1 %v13775_v47  ;;  %v1318_v47 = vld [vmem:[%s19818_s1 + $0x2820] sm:$0xff]  ;;  %v13845_v32 = vcombine.high %v1338_v25, %v1342_v26 }
 0x270   :  { %10067 = vmatpush1.bf16.msra.mxu0 %v13772_v55  ;;  %v13814_v55 = vcombine.low %v1307_v37, %v1311_v39  ;;  %v1350_v37 = vld [vmem:[%s19818_s1 + $0x2920] sm:$0xff]  ;;  %v1347_v39 = vld [vmem:[%s19818_s1 + $0x2908] sm:$0xff] }
 0x271   :  { %10600 = vmatpush1.bf16.msra.mxu1 %v13774_v56  ;;  %10068 = vmatprep.subr.bf16.mxu0 %v13781_v61  ;;  %v13821_v56 = vcombine.high %v1314_v35, %v1318_v47  ;;  %v13823_v61 = vcombine.high %v1315_v50, %v1319_v51 }
 0x272   :  { %10601 = vmatprep.subr.bf16.mxu1 %v13783_v9  ;;  %v1322_v9 = vld [vmem:[%s19818_s1 + $0x2840] sm:$0xff] }
 0x274   :  { %10069 = vmatpush1.bf16.msra.mxu0 %v13780_v45  ;;  %v1327_v45 = vld [vmem:[%s19818_s1 + $0x2868] sm:$0xff] }
 0x275   :  { %10602 = vmatpush1.bf16.msra.mxu1 %v13782_v4  ;;  %10070 = vmatprep.subr.bf16.mxu0 %v13789_v11  ;;  %v13820_v4 = vcombine.low %v1314_v35, %v1318_v47  ;;  %v13822_v11 = vcombine.low %v1315_v50, %v1319_v51  ;;  %v13831_v13 = vcombine.high %v1323_v0, %v1327_v45  ;;  %v1354_v47 = vld [vmem:[%s19818_s1 + $0x2940] sm:$0xff]  ;;  %v1355_v51 = vld [vmem:[%s19818_s1 + $0x2948] sm:$0xff] }
 0x276   :  { %10603 = vmatprep.subr.bf16.mxu1 %v13791_v12  ;;  %v13829_v12 = vcombine.high %v1322_v9, %v1326_v62  ;;  %v1358_v50 = vld [vmem:[%s19818_s1 + $0x2960] sm:$0xff] }
 0x278   :  { %10071 = vmatpush1.bf16.msra.mxu0 %v13788_v16  ;;  %v1331_v16 = vld [vmem:[%s19818_s1 + $0x2888] sm:$0xff] }
 0x279   :  { %10604 = vmatpush1.bf16.msra.mxu1 %v13790_v17  ;;  %10072 = vmatprep.subr.bf16.mxu0 %v13797_v19  ;;  %v1335_v17 = vld [vmem:[%s19818_s1 + $0x28a8] sm:$0xff]  ;;  %v13828_v19 = vcombine.low %v1322_v9, %v1326_v62  ;;  %v1362_v62 = vld [vmem:[%s19818_s1 + $0x2980] sm:$0xff] }
 0x27a   :  { %10605 = vmatprep.subr.bf16.mxu1 %v13799_v21  ;;  %v13830_v21 = vcombine.low %v1323_v0, %v1327_v45  ;;  %v13839_v23 = vcombine.high %v1331_v16, %v1335_v17  ;;  %v14562_v0 = vmov 0   ;;  %v1363_v45 = vld [vmem:[%s19818_s1 + $0x2988] sm:$0xff] }
 0x27b   :  { %14469 = vset.pattern.permute.xlu0 %v14562_v0 }
 0x27c   :  { %10073 = vmatpush1.bf16.msra.mxu0 %v13796_v27  ;;  %v1339_v27 = vld [vmem:[%s19818_s1 + $0x28c8] sm:$0xff] }
 0x27d   :  { %10606 = vmatpush1.bf16.msra.mxu1 %v13798_v29  ;;  %10074 = vmatprep.subr.bf16.mxu0 %v13805_v30  ;;  %v1343_v29 = vld [vmem:[%s19818_s1 + $0x28e8] sm:$0xff]  ;;  %v13836_v30 = vcombine.low %v1330_v14, %v1334_v2  ;;  %v1370_v2 = vld [vmem:[%s19818_s1 + $0x29c0] sm:$0xff] }
 0x27e   :  { %10607 = vmatprep.subr.bf16.mxu1 %v13807_v31  ;;  %v13838_v31 = vcombine.low %v1331_v16, %v1335_v17  ;;  %v13847_v33 = vcombine.high %v1339_v27, %v1343_v29  ;;  %v1374_v16 = vld [vmem:[%s19818_s1 + $0x29e0] sm:$0xff]  ;;  %v1371_v17 = vld [vmem:[%s19818_s1 + $0x29c8] sm:$0xff] }
 0x280   :  { %10075 = vmatpush1.bf16.msra.mxu0 %v13804_v40  ;;  %v1351_v40 = vld [vmem:[%s19818_s1 + $0x2928] sm:$0xff] }
 0x281   :  { %10608 = vmatpush1.bf16.msra.mxu1 %v13806_v42  ;;  %10076 = vmatprep.subr.bf16.mxu0 %v13813_v43  ;;  %v13844_v42 = vcombine.low %v1338_v25, %v1342_v26  ;;  %v13846_v43 = vcombine.low %v1339_v27, %v1343_v29  ;;  %v13855_v35 = vcombine.high %v1347_v39, %v1351_v40  ;;  %v1378_v26 = vld [vmem:[%s19818_s1 + $0x2a00] sm:$0xff]  ;;  %v1379_v29 = vld [vmem:[%s19818_s1 + $0x2a08] sm:$0xff] }
 0x282   :  { %10609 = vmatprep.subr.bf16.mxu1 %v13815_v46  ;;  %v13853_v46 = vcombine.high %v1346_v36, %v1350_v37  ;;  %v1382_v27 = vld [vmem:[%s19818_s1 + $0x2a20] sm:$0xff] }
 0x284   :  { %10077 = vmatpush1.bf16.msra.mxu0 %v13812_v53  ;;  %v1359_v53 = vld [vmem:[%s19818_s1 + $0x2968] sm:$0xff] }
 0x285   :  { %10610 = vmatpush1.bf16.msra.mxu1 %v13814_v55  ;;  %10087 = vmatprep.subr.bf16.mxu0 %v13821_v56  ;;  %v13852_v55 = vcombine.low %v1346_v36, %v1350_v37  ;;  %v13854_v56 = vcombine.low %v1347_v39, %v1351_v40  ;;  %v13863_v9 = vcombine.high %v1355_v51, %v1359_v53  ;;  %v1386_v37 = vld [vmem:[%s19818_s1 + $0x2a40] sm:$0xff]  ;;  %v1387_v40 = vld [vmem:[%s19818_s1 + $0x2a48] sm:$0xff] }
 0x286   :  { %10620 = vmatprep.subr.bf16.mxu1 %v13823_v61  ;;  %v13861_v61 = vcombine.high %v1354_v47, %v1358_v50  ;;  %v1390_v39 = vld [vmem:[%s19818_s1 + $0x2a60] sm:$0xff] }
 0x287   :  { %10079 = vmatmul.mubr.bf16.vlgmr.msra.gmra.mrb[0].mxu0 %v16715_v3 }
 0x288   :  { %10088 = vmatpush1.bf16.msra.mxu0 %v13820_v4  ;;  %10612 = vmatmul.mubr.bf16.vlgmr.msra.gmra.mrb[0].mxu1 %v16715_v3  ;;  %v1367_v4 = vld [vmem:[%s19818_s1 + $0x29a8] sm:$0xff] }
 0x289   :  { %10621 = vmatpush1.bf16.msra.mxu1 %v13822_v11  ;;  %10089 = vmatprep.subr.bf16.mxu0 %v13829_v12  ;;  %v13860_v11 = vcombine.low %v1354_v47, %v1358_v50  ;;  %v13862_v12 = vcombine.low %v1355_v51, %v1359_v53  ;;  %v13871_v14 = vcombine.high %v1363_v45, %v1367_v4  ;;  %v1394_v50 = vld [vmem:[%s19818_s1 + $0x2a80] sm:$0xff]  ;;  %v1395_v53 = vld [vmem:[%s19818_s1 + $0x2a88] sm:$0xff] }
 0x28a   :  { %10622 = vmatprep.subr.bf16.mxu1 %v13831_v13  ;;  %10119 = vmatprep.mubr.bf16.mxu0 %v16730_v15  ;;  %v13869_v13 = vcombine.high %v1362_v62, %v1366_v1  ;;  %v1398_v51 = vld [vmem:[%s19818_s1 + $0x2aa0] sm:$0xff] }
 0x28b   :  { %10652 = vmatprep.mubr.bf16.mxu1 %v16730_v15 }
 0x28c   :  { %10090 = vmatpush1.bf16.msra.mxu0 %v13828_v19  ;;  %v1375_v19 = vld [vmem:[%s19818_s1 + $0x29e8] sm:$0xff] }
 0x28d   :  { %10623 = vmatpush1.bf16.msra.mxu1 %v13830_v21  ;;  %10091 = vmatprep.subr.bf16.mxu0 %v13837_v22  ;;  %v13868_v21 = vcombine.low %v1362_v62, %v1366_v1  ;;  %v13870_v22 = vcombine.low %v1363_v45, %v1367_v4  ;;  %v13879_v25 = vcombine.high %v1371_v17, %v1375_v19  ;;  %v1402_v1 = vld [vmem:[%s19818_s1 + $0x2ac0] sm:$0xff]  ;;  %v1403_v4 = vld [vmem:[%s19818_s1 + $0x2ac8] sm:$0xff] }
 0x28e   :  { %10624 = vmatprep.subr.bf16.mxu1 %v13839_v23  ;;  %v13877_v23 = vcombine.high %v1370_v2, %v1374_v16  ;;  %v1406_v45 = vld [vmem:[%s19818_s1 + $0x2ae0] sm:$0xff] }
 0x290   :  { %10092 = vmatpush1.bf16.msra.mxu0 %v13836_v30  ;;  %v1383_v30 = vld [vmem:[%s19818_s1 + $0x2a28] sm:$0xff] }
 0x291   :  { %10625 = vmatpush1.bf16.msra.mxu1 %v13838_v31  ;;  %10093 = vmatprep.subr.bf16.mxu0 %v13845_v32  ;;  %v13876_v31 = vcombine.low %v1370_v2, %v1374_v16  ;;  %v13878_v32 = vcombine.low %v1371_v17, %v1375_v19  ;;  %v13887_v36 = vcombine.high %v1379_v29, %v1383_v30  ;;  %v1410_v16 = vld [vmem:[%s19818_s1 + $0x2b00] sm:$0xff]  ;;  %v1411_v19 = vld [vmem:[%s19818_s1 + $0x2b08] sm:$0xff] }
 0x292   :  { %10626 = vmatprep.subr.bf16.mxu1 %v13847_v33  ;;  %v13885_v33 = vcombine.high %v1378_v26, %v1382_v27  ;;  %v1414_v17 = vld [vmem:[%s19818_s1 + $0x2b20] sm:$0xff] }
 0x294   :  { %10094 = vmatpush1.bf16.msra.mxu0 %v13844_v42  ;;  %v1391_v42 = vld [vmem:[%s19818_s1 + $0x2a68] sm:$0xff] }
 0x295   :  { %10627 = vmatpush1.bf16.msra.mxu1 %v13846_v43  ;;  %10095 = vmatprep.subr.bf16.mxu0 %v13853_v46  ;;  %v13884_v43 = vcombine.low %v1378_v26, %v1382_v27  ;;  %v13886_v46 = vcombine.low %v1379_v29, %v1383_v30  ;;  %v13895_v47 = vcombine.high %v1387_v40, %v1391_v42  ;;  %v1418_v27 = vld [vmem:[%s19818_s1 + $0x2b40] sm:$0xff]  ;;  %v1419_v30 = vld [vmem:[%s19818_s1 + $0x2b48] sm:$0xff] }
 0x296   :  { %10628 = vmatprep.subr.bf16.mxu1 %v13855_v35  ;;  %v13893_v35 = vcombine.high %v1386_v37, %v1390_v39  ;;  %v1422_v29 = vld [vmem:[%s19818_s1 + $0x2b60] sm:$0xff] }
 0x298   :  { %10096 = vmatpush1.bf16.msra.mxu0 %v13852_v55  ;;  %v1399_v55 = vld [vmem:[%s19818_s1 + $0x2aa8] sm:$0xff] }
 0x299   :  { %10629 = vmatpush1.bf16.msra.mxu1 %v13854_v56  ;;  %10097 = vmatprep.subr.bf16.mxu0 %v13861_v61  ;;  %v13892_v56 = vcombine.low %v1386_v37, %v1390_v39  ;;  %v13894_v61 = vcombine.low %v1387_v40, %v1391_v42  ;;  %v13903_v62 = vcombine.high %v1395_v53, %v1399_v55  ;;  %v1426_v39 = vld [vmem:[%s19818_s1 + $0x2b80] sm:$0xff]  ;;  %v1427_v42 = vld [vmem:[%s19818_s1 + $0x2b88] sm:$0xff] }
 0x29a   :  { %10630 = vmatprep.subr.bf16.mxu1 %v13863_v9  ;;  %v13901_v9 = vcombine.high %v1394_v50, %v1398_v51  ;;  %v1430_v40 = vld [vmem:[%s19818_s1 + $0x2ba0] sm:$0xff] }
 0x29c   :  { %10098 = vmatpush1.bf16.msra.mxu0 %v13860_v11  ;;  %v1407_v11 = vld [vmem:[%s19818_s1 + $0x2ae8] sm:$0xff] }
 0x29d   :  { %10631 = vmatpush1.bf16.msra.mxu1 %v13862_v12  ;;  %10099 = vmatprep.subr.bf16.mxu0 %v13869_v13  ;;  %v13900_v12 = vcombine.low %v1394_v50, %v1398_v51  ;;  %v13902_v13 = vcombine.low %v1395_v53, %v1399_v55  ;;  %v13911_v2 = vcombine.high %v1403_v4, %v1407_v11  ;;  %v1434_v51 = vld [vmem:[%s19818_s1 + $0x2bc0] sm:$0xff]  ;;  %v1435_v55 = vld [vmem:[%s19818_s1 + $0x2bc8] sm:$0xff] }
 0x29e   :  { %10632 = vmatprep.subr.bf16.mxu1 %v13871_v14  ;;  %v13909_v14 = vcombine.high %v1402_v1, %v1406_v45  ;;  %v1438_v53 = vld [vmem:[%s19818_s1 + $0x2be0] sm:$0xff] }
 0x2a0   :  { %10100 = vmatpush1.bf16.msra.mxu0 %v13868_v21  ;;  %v1415_v21 = vld [vmem:[%s19818_s1 + $0x2b28] sm:$0xff] }
 0x2a1   :  { %10633 = vmatpush1.bf16.msra.mxu1 %v13870_v22  ;;  %10101 = vmatprep.subr.bf16.mxu0 %v13877_v23  ;;  %v13908_v22 = vcombine.low %v1402_v1, %v1406_v45  ;;  %v13910_v23 = vcombine.low %v1403_v4, %v1407_v11  ;;  %v13919_v26 = vcombine.high %v1411_v19, %v1415_v21  ;;  %v1442_v45 = vld [vmem:[%s19818_s1 + $0x2c00] sm:$0xff]  ;;  %v1443_v11 = vld [vmem:[%s19818_s1 + $0x2c08] sm:$0xff] }
 0x2a2   :  { %10634 = vmatprep.subr.bf16.mxu1 %v13879_v25  ;;  %v13917_v25 = vcombine.high %v1410_v16, %v1414_v17  ;;  %v1446_v4 = vld [vmem:[%s19818_s1 + $0x2c20] sm:$0xff] }
 0x2a4   :  { %10102 = vmatpush1.bf16.msra.mxu0 %v13876_v31  ;;  %v1423_v31 = vld [vmem:[%s19818_s1 + $0x2b68] sm:$0xff] }
 0x2a5   :  { %10635 = vmatpush1.bf16.msra.mxu1 %v13878_v32  ;;  %10103 = vmatprep.subr.bf16.mxu0 %v13885_v33  ;;  %v13916_v32 = vcombine.low %v1410_v16, %v1414_v17  ;;  %v13918_v33 = vcombine.low %v1411_v19, %v1415_v21  ;;  %v13927_v37 = vcombine.high %v1419_v30, %v1423_v31  ;;  %v1450_v17 = vld [vmem:[%s19818_s1 + $0x2c40] sm:$0xff] }
 0x2a6   :  { %10636 = vmatprep.subr.bf16.mxu1 %v13887_v36  ;;  %v13925_v36 = vcombine.high %v1418_v27, %v1422_v29  ;;  %v1454_v19 = vld [vmem:[%s19818_s1 + $0x2c60] sm:$0xff]  ;;  %v16919_v21 = vrot.slane %v16697_v48, %v14688_v54 }
 0x2a7   :  { %v1458_v48 = vld [vmem:[%s19818_s1 + $0x2c80] sm:$0xff] }
 0x2a8   :  { %10104 = vmatpush1.bf16.msra.mxu0 %v13884_v43  ;;  %v1431_v43 = vld [vmem:[%s19818_s1 + $0x2ba8] sm:$0xff] }
 0x2a9   :  { %10637 = vmatpush1.bf16.msra.mxu1 %v13886_v46  ;;  %10105 = vmatprep.subr.bf16.mxu0 %v13893_v35  ;;  %v13924_v46 = vcombine.low %v1418_v27, %v1422_v29  ;;  %v13926_v35 = vcombine.low %v1419_v30, %v1423_v31  ;;  %v13935_v50 = vcombine.high %v1427_v42, %v1431_v43  ;;  %v1462_v30 = vld [vmem:[%s19818_s1 + $0x2ca0] sm:$0xff] }
 0x2aa   :  { %10638 = vmatprep.subr.bf16.mxu1 %v13895_v47  ;;  %v13933_v47 = vcombine.high %v1426_v39, %v1430_v40  ;;  %v13957_v27 = vcombine.high %v1450_v17, %v1454_v19  ;;  %v16935_v31 = vcombine.high %v16730_v15, %v16730_v15 }
 0x2ac   :  { %10106 = vmatpush1.bf16.msra.mxu0 %v13892_v56  ;;  %v1439_v56 = vld [vmem:[%s19818_s1 + $0x2be8] sm:$0xff] }
 0x2ad   :  { %10639 = vmatpush1.bf16.msra.mxu1 %v13894_v61  ;;  %10107 = vmatprep.subr.bf16.mxu0 %v13901_v9  ;;  %v13932_v61 = vcombine.low %v1426_v39, %v1430_v40  ;;  %v13934_v9 = vcombine.low %v1427_v42, %v1431_v43  ;;  %v13943_v1 = vcombine.high %v1435_v55, %v1439_v56  ;;  %v1466_v42 = vld [vmem:[%s19818_s1 + $0x2cc0] sm:$0xff] }
 0x2ae   :  { %10640 = vmatprep.subr.bf16.mxu1 %v13903_v62  ;;  %v13941_v62 = vcombine.high %v1434_v51, %v1438_v53  ;;  %v13965_v39 = vcombine.high %v1458_v48, %v1462_v30  ;;  %v1470_v43 = vld [vmem:[%s19818_s1 + $0x2ce0] sm:$0xff] }
 0x2b0   :  { %10108 = vmatpush1.bf16.msra.mxu0 %v13900_v12  ;;  %v1447_v12 = vld [vmem:[%s19818_s1 + $0x2c28] sm:$0xff] }
 0x2b1   :  { %10641 = vmatpush1.bf16.msra.mxu1 %v13902_v13  ;;  %10109 = vmatprep.subr.bf16.mxu0 %v13909_v14  ;;  %v13940_v13 = vcombine.low %v1434_v51, %v1438_v53  ;;  %v13942_v14 = vcombine.low %v1435_v55, %v1439_v56  ;;  %v13951_v16 = vcombine.high %v1443_v11, %v1447_v12  ;;  %v1474_v55 = vld [vmem:[%s19818_s1 + $0x2d00] sm:$0xff] }
 0x2b2   :  { %10642 = vmatprep.subr.bf16.mxu1 %v13911_v2  ;;  %v13949_v2 = vcombine.high %v1442_v45, %v1446_v4  ;;  %v13973_v51 = vcombine.high %v1466_v42, %v1470_v43  ;;  %v1478_v56 = vld [vmem:[%s19818_s1 + $0x2d20] sm:$0xff] }
 0x2b4   :  { %10110 = vmatpush1.bf16.msra.mxu0 %v13908_v22  ;;  %v1451_v22 = vld [vmem:[%s19818_s1 + $0x2c48] sm:$0xff] }
 0x2b5   :  { %10643 = vmatpush1.bf16.msra.mxu1 %v13910_v23  ;;  %10111 = vmatprep.subr.bf16.mxu0 %v13917_v25  ;;  %v1455_v23 = vld [vmem:[%s19818_s1 + $0x2c68] sm:$0xff]  ;;  %v13948_v25 = vcombine.low %v1442_v45, %v1446_v4  ;;  %v13981_v45 = vcombine.high %v1474_v55, %v1478_v56 }
 0x2b6   :  { %10644 = vmatprep.subr.bf16.mxu1 %v13919_v26  ;;  %v13950_v26 = vcombine.low %v1443_v11, %v1447_v12  ;;  %v13959_v29 = vcombine.high %v1451_v22, %v1455_v23  ;;  %v1482_v11 = vld [vmem:[%s19818_s1 + $0x2d40] sm:$0xff] }
 0x2b7   :  { %v1486_v12 = vld [vmem:[%s19818_s1 + $0x2d60] sm:$0xff] }
 0x2b8   :  { %10112 = vmatpush1.bf16.msra.mxu0 %v13916_v32  ;;  %v1459_v32 = vld [vmem:[%s19818_s1 + $0x2c88] sm:$0xff] }
 0x2b9   :  { %10645 = vmatpush1.bf16.msra.mxu1 %v13918_v33  ;;  %10113 = vmatprep.subr.bf16.mxu0 %v13925_v36  ;;  %v1463_v33 = vld [vmem:[%s19818_s1 + $0x2ca8] sm:$0xff]  ;;  %v13956_v36 = vcombine.low %v1450_v17, %v1454_v19  ;;  %v13989_v17 = vcombine.high %v1482_v11, %v1486_v12 }
 0x2ba   :  { %10646 = vmatprep.subr.bf16.mxu1 %v13927_v37  ;;  %v13958_v37 = vcombine.low %v1451_v22, %v1455_v23  ;;  %v13967_v40 = vcombine.high %v1459_v32, %v1463_v33  ;;  %v1490_v22 = vld [vmem:[%s19818_s1 + $0x2d80] sm:$0xff] }
 0x2bb   :  { %v1494_v23 = vld [vmem:[%s19818_s1 + $0x2da0] sm:$0xff] }
 0x2bc   :  { %10114 = vmatpush1.bf16.msra.mxu0 %v13924_v46  ;;  %v1467_v46 = vld [vmem:[%s19818_s1 + $0x2cc8] sm:$0xff] }
 0x2bd   :  { %10647 = vmatpush1.bf16.msra.mxu1 %v13926_v35  ;;  %10115 = vmatprep.subr.bf16.mxu0 %v13933_v47  ;;  %v1471_v35 = vld [vmem:[%s19818_s1 + $0x2ce8] sm:$0xff]  ;;  %v13964_v47 = vcombine.low %v1458_v48, %v1462_v30  ;;  %v13997_v48 = vcombine.high %v1490_v22, %v1494_v23 }
 0x2be   :  { %10648 = vmatprep.subr.bf16.mxu1 %v13935_v50  ;;  %v13966_v50 = vcombine.low %v1459_v32, %v1463_v33  ;;  %v13975_v53 = vcombine.high %v1467_v46, %v1471_v35  ;;  %v1498_v32 = vld [vmem:[%s19818_s1 + $0x2dc0] sm:$0xff] }
 0x2bf   :  { %v1502_v33 = vld [vmem:[%s19818_s1 + $0x2de0] sm:$0xff] }
 0x2c0   :  { %10116 = vmatpush1.bf16.msra.mxu0 %v13932_v61  ;;  %v1475_v61 = vld [vmem:[%s19818_s1 + $0x2d08] sm:$0xff] }
 0x2c1   :  { %10649 = vmatpush1.bf16.msra.mxu1 %v13934_v9  ;;  %10117 = vmatprep.subr.bf16.mxu0 %v13941_v62  ;;  %v1479_v9 = vld [vmem:[%s19818_s1 + $0x2d28] sm:$0xff]  ;;  %v13972_v62 = vcombine.low %v1466_v42, %v1470_v43  ;;  %v14005_v42 = vcombine.high %v1498_v32, %v1502_v33 }
 0x2c2   :  { %10650 = vmatprep.subr.bf16.mxu1 %v13943_v1  ;;  %v13974_v1 = vcombine.low %v1467_v46, %v1471_v35  ;;  %v13983_v4 = vcombine.high %v1475_v61, %v1479_v9  ;;  %v1506_v46 = vld [vmem:[%s19818_s1 + $0x2e00] sm:$0xff] }
 0x2c3   :  { %v1510_v35 = vld [vmem:[%s19818_s1 + $0x2e20] sm:$0xff] }
 0x2c4   :  { %10118 = vmatpush1.bf16.msra.mxu0 %v13940_v13  ;;  %v1483_v13 = vld [vmem:[%s19818_s1 + $0x2d48] sm:$0xff] }
 0x2c5   :  { %10651 = vmatpush1.bf16.msra.mxu1 %v13942_v14  ;;  %10128 = vmatprep.subr.bf16.mxu0 %v13949_v2  ;;  %v1487_v14 = vld [vmem:[%s19818_s1 + $0x2d68] sm:$0xff]  ;;  %v13980_v2 = vcombine.low %v1474_v55, %v1478_v56  ;;  %v14013_v55 = vcombine.high %v1506_v46, %v1510_v35 }
 0x2c6   :  { %10661 = vmatprep.subr.bf16.mxu1 %v13951_v16  ;;  %v13982_v16 = vcombine.low %v1475_v61, %v1479_v9  ;;  %v13991_v19 = vcombine.high %v1483_v13, %v1487_v14  ;;  %v1514_v61 = vld [vmem:[%s19818_s1 + $0x2e40] sm:$0xff] }
 0x2c7   :  { %10120 = vmatmul.mubr.bf16.vlgmr.msra.gmra.mrb[0].mxu0 %v16919_v21  ;;  %v1518_v9 = vld [vmem:[%s19818_s1 + $0x2e60] sm:$0xff] }
 0x2c8   :  { %10129 = vmatpush1.bf16.msra.mxu0 %v13948_v25  ;;  %10653 = vmatmul.mubr.bf16.vlgmr.msra.gmra.mrb[0].mxu1 %v16919_v21  ;;  %v1491_v25 = vld [vmem:[%s19818_s1 + $0x2d88] sm:$0xff] }
 0x2c9   :  { %10662 = vmatpush1.bf16.msra.mxu1 %v13950_v26  ;;  %10130 = vmatprep.subr.bf16.mxu0 %v13957_v27  ;;  %v1495_v26 = vld [vmem:[%s19818_s1 + $0x2da8] sm:$0xff]  ;;  %v13988_v27 = vcombine.low %v1482_v11, %v1486_v12  ;;  %v14021_v11 = vcombine.high %v1514_v61, %v1518_v9 }
 0x2ca   :  { %10663 = vmatprep.subr.bf16.mxu1 %v13959_v29  ;;  %10160 = vmatprep.mubr.bf16.mxu0 %v16935_v31  ;;  %v13990_v29 = vcombine.low %v1483_v13, %v1487_v14  ;;  %v13999_v30 = vcombine.high %v1491_v25, %v1495_v26  ;;  %v1522_v13 = vld [vmem:[%s19818_s1 + $0x2e80] sm:$0xff] }
 0x2cb   :  { %10693 = vmatprep.mubr.bf16.mxu1 %v16935_v31  ;;  %v1526_v14 = vld [vmem:[%s19818_s1 + $0x2ea0] sm:$0xff] }
 0x2cc   :  { %10131 = vmatpush1.bf16.msra.mxu0 %v13956_v36  ;;  %v1499_v36 = vld [vmem:[%s19818_s1 + $0x2dc8] sm:$0xff] }
 0x2cd   :  { %10664 = vmatpush1.bf16.msra.mxu1 %v13958_v37  ;;  %10132 = vmatprep.subr.bf16.mxu0 %v13965_v39  ;;  %v1503_v37 = vld [vmem:[%s19818_s1 + $0x2de8] sm:$0xff]  ;;  %v13996_v39 = vcombine.low %v1490_v22, %v1494_v23  ;;  %v14029_v22 = vcombine.high %v1522_v13, %v1526_v14 }
 0x2ce   :  { %10665 = vmatprep.subr.bf16.mxu1 %v13967_v40  ;;  %v13998_v40 = vcombine.low %v1491_v25, %v1495_v26  ;;  %v14007_v43 = vcombine.high %v1499_v36, %v1503_v37  ;;  %v1530_v25 = vld [vmem:[%s19818_s1 + $0x2ec0] sm:$0xff] }
 0x2cf   :  { %v1534_v26 = vld [vmem:[%s19818_s1 + $0x2ee0] sm:$0xff] }
 0x2d0   :  { %10133 = vmatpush1.bf16.msra.mxu0 %v13964_v47  ;;  %v1507_v47 = vld [vmem:[%s19818_s1 + $0x2e08] sm:$0xff] }
 0x2d1   :  { %10666 = vmatpush1.bf16.msra.mxu1 %v13966_v50  ;;  %10134 = vmatprep.subr.bf16.mxu0 %v13973_v51  ;;  %v1511_v50 = vld [vmem:[%s19818_s1 + $0x2e28] sm:$0xff]  ;;  %v14004_v51 = vcombine.low %v1498_v32, %v1502_v33  ;;  %v14037_v32 = vcombine.high %v1530_v25, %v1534_v26 }
 0x2d2   :  { %10667 = vmatprep.subr.bf16.mxu1 %v13975_v53  ;;  %v14006_v53 = vcombine.low %v1499_v36, %v1503_v37  ;;  %v14015_v56 = vcombine.high %v1507_v47, %v1511_v50  ;;  %v1538_v36 = vld [vmem:[%s19818_s1 + $0x2f00] sm:$0xff] }
 0x2d3   :  { %v1542_v37 = vld [vmem:[%s19818_s1 + $0x2f20] sm:$0xff] }
 0x2d4   :  { %10135 = vmatpush1.bf16.msra.mxu0 %v13972_v62  ;;  %v1515_v62 = vld [vmem:[%s19818_s1 + $0x2e48] sm:$0xff] }
 0x2d5   :  { %10668 = vmatpush1.bf16.msra.mxu1 %v13974_v1  ;;  %10136 = vmatprep.subr.bf16.mxu0 %v13981_v45  ;;  %v1519_v1 = vld [vmem:[%s19818_s1 + $0x2e68] sm:$0xff]  ;;  %v14012_v45 = vcombine.low %v1506_v46, %v1510_v35  ;;  %v14045_v46 = vcombine.high %v1538_v36, %v1542_v37 }
 0x2d6   :  { %10669 = vmatprep.subr.bf16.mxu1 %v13983_v4  ;;  %v14014_v4 = vcombine.low %v1507_v47, %v1511_v50  ;;  %v14023_v12 = vcombine.high %v1515_v62, %v1519_v1  ;;  %v1546_v47 = vld [vmem:[%s19818_s1 + $0x2f40] sm:$0xff] }
 0x2d7   :  { %v1550_v50 = vld [vmem:[%s19818_s1 + $0x2f60] sm:$0xff] }
 0x2d8   :  { %10137 = vmatpush1.bf16.msra.mxu0 %v13980_v2  ;;  %v1523_v2 = vld [vmem:[%s19818_s1 + $0x2e88] sm:$0xff] }
 0x2d9   :  { %10670 = vmatpush1.bf16.msra.mxu1 %v13982_v16  ;;  %10138 = vmatprep.subr.bf16.mxu0 %v13989_v17  ;;  %v1527_v16 = vld [vmem:[%s19818_s1 + $0x2ea8] sm:$0xff]  ;;  %v14020_v17 = vcombine.low %v1514_v61, %v1518_v9  ;;  %v14053_v61 = vcombine.high %v1546_v47, %v1550_v50 }
 0x2da   :  { %10671 = vmatprep.subr.bf16.mxu1 %v13991_v19  ;;  %v14022_v19 = vcombine.low %v1515_v62, %v1519_v1  ;;  %v14031_v23 = vcombine.high %v1523_v2, %v1527_v16  ;;  %v1554_v62 = vld [vmem:[%s19818_s1 + $0x2f80] sm:$0xff] }
 0x2db   :  { %v1558_v1 = vld [vmem:[%s19818_s1 + $0x2fa0] sm:$0xff] }
 0x2dc   :  { %10139 = vmatpush1.bf16.msra.mxu0 %v13988_v27  ;;  %v1531_v27 = vld [vmem:[%s19818_s1 + $0x2ec8] sm:$0xff] }
 0x2dd   :  { %10672 = vmatpush1.bf16.msra.mxu1 %v13990_v29  ;;  %10140 = vmatprep.subr.bf16.mxu0 %v13997_v48  ;;  %v1535_v29 = vld [vmem:[%s19818_s1 + $0x2ee8] sm:$0xff]  ;;  %v14028_v48 = vcombine.low %v1522_v13, %v1526_v14  ;;  %v14061_v13 = vcombine.high %v1554_v62, %v1558_v1 }
 0x2de   :  { %10673 = vmatprep.subr.bf16.mxu1 %v13999_v30  ;;  %v14030_v30 = vcombine.low %v1523_v2, %v1527_v16  ;;  %v14039_v33 = vcombine.high %v1531_v27, %v1535_v29  ;;  %v1562_v2 = vld [vmem:[%s19818_s1 + $0x2fc0] sm:$0xff] }
 0x2df   :  { %v1566_v16 = vld [vmem:[%s19818_s1 + $0x2fe0] sm:$0xff] }
 0x2e0   :  { %10141 = vmatpush1.bf16.msra.mxu0 %v13996_v39  ;;  %v1539_v39 = vld [vmem:[%s19818_s1 + $0x2f08] sm:$0xff] }
 0x2e1   :  { %10674 = vmatpush1.bf16.msra.mxu1 %v13998_v40  ;;  %10142 = vmatprep.subr.bf16.mxu0 %v14005_v42  ;;  %v1543_v40 = vld [vmem:[%s19818_s1 + $0x2f28] sm:$0xff]  ;;  %v14036_v42 = vcombine.low %v1530_v25, %v1534_v26  ;;  %v14069_v25 = vcombine.high %v1562_v2, %v1566_v16 }
 0x2e2   :  { %10675 = vmatprep.subr.bf16.mxu1 %v14007_v43  ;;  %v14038_v43 = vcombine.low %v1531_v27, %v1535_v29  ;;  %v14047_v35 = vcombine.high %v1539_v39, %v1543_v40  ;;  %v1570_v27 = vld [vmem:[%s19818_s1 + $0x3000] sm:$0xff] }
 0x2e3   :  { %v1574_v29 = vld [vmem:[%s19818_s1 + $0x3020] sm:$0xff] }
 0x2e4   :  { %10143 = vmatpush1.bf16.msra.mxu0 %v14004_v51  ;;  %v1547_v51 = vld [vmem:[%s19818_s1 + $0x2f48] sm:$0xff] }
 0x2e5   :  { %10676 = vmatpush1.bf16.msra.mxu1 %v14006_v53  ;;  %10144 = vmatprep.subr.bf16.mxu0 %v14013_v55  ;;  %v1551_v53 = vld [vmem:[%s19818_s1 + $0x2f68] sm:$0xff]  ;;  %v14044_v55 = vcombine.low %v1538_v36, %v1542_v37  ;;  %v14077_v36 = vcombine.high %v1570_v27, %v1574_v29 }
 0x2e6   :  { %10677 = vmatprep.subr.bf16.mxu1 %v14015_v56  ;;  %v14046_v56 = vcombine.low %v1539_v39, %v1543_v40  ;;  %v14055_v9 = vcombine.high %v1547_v51, %v1551_v53  ;;  %v1578_v39 = vld [vmem:[%s19818_s1 + $0x3040] sm:$0xff] }
 0x2e7   :  { %v1582_v40 = vld [vmem:[%s19818_s1 + $0x3060] sm:$0xff] }
 0x2e8   :  { %10145 = vmatpush1.bf16.msra.mxu0 %v14012_v45  ;;  %v1555_v45 = vld [vmem:[%s19818_s1 + $0x2f88] sm:$0xff] }
 0x2e9   :  { %10678 = vmatpush1.bf16.msra.mxu1 %v14014_v4  ;;  %10146 = vmatprep.subr.bf16.mxu0 %v14021_v11  ;;  %v1559_v4 = vld [vmem:[%s19818_s1 + $0x2fa8] sm:$0xff]  ;;  %v14052_v11 = vcombine.low %v1546_v47, %v1550_v50  ;;  %v14085_v50 = vcombine.high %v1578_v39, %v1582_v40 }
 0x2ea   :  { %10679 = vmatprep.subr.bf16.mxu1 %v14023_v12  ;;  %v14054_v12 = vcombine.low %v1547_v51, %v1551_v53  ;;  %v14063_v14 = vcombine.high %v1555_v45, %v1559_v4  ;;  %v1586_v53 = vld [vmem:[%s19818_s1 + $0x3080] sm:$0xff] }
 0x2ec   :  { %10147 = vmatpush1.bf16.msra.mxu0 %v14020_v17  ;;  %v1563_v17 = vld [vmem:[%s19818_s1 + $0x2fc8] sm:$0xff] }
 0x2ed   :  { %10680 = vmatpush1.bf16.msra.mxu1 %v14022_v19  ;;  %10148 = vmatprep.subr.bf16.mxu0 %v14029_v22  ;;  %v1567_v19 = vld [vmem:[%s19818_s1 + $0x2fe8] sm:$0xff]  ;;  %v14060_v22 = vcombine.low %v1554_v62, %v1558_v1 }
 0x2ee   :  { %10681 = vmatprep.subr.bf16.mxu1 %v14031_v23  ;;  %v14062_v23 = vcombine.low %v1555_v45, %v1559_v4  ;;  %v14071_v26 = vcombine.high %v1563_v17, %v1567_v19  ;;  %v1594_v4 = vld [vmem:[%s19818_s1 + $0x30c0] sm:$0xff] }
 0x2f0   :  { %10149 = vmatpush1.bf16.msra.mxu0 %v14028_v48  ;;  %v1571_v48 = vld [vmem:[%s19818_s1 + $0x3008] sm:$0xff] }
 0x2f1   :  { %10682 = vmatpush1.bf16.msra.mxu1 %v14030_v30  ;;  %10150 = vmatprep.subr.bf16.mxu0 %v14037_v32  ;;  %v1575_v30 = vld [vmem:[%s19818_s1 + $0x3028] sm:$0xff]  ;;  %v14068_v32 = vcombine.low %v1562_v2, %v1566_v16 }
 0x2f2   :  { %10683 = vmatprep.subr.bf16.mxu1 %v14039_v33  ;;  %v14070_v33 = vcombine.low %v1563_v17, %v1567_v19  ;;  %v14079_v37 = vcombine.high %v1571_v48, %v1575_v30  ;;  %v14078_v47 = vcombine.low %v1571_v48, %v1575_v30  ;;  %v36_v19 = vld [vmem:[%s19818_s1 + $0x10] sm:$0xff] }
 0x2f4   :  { %10151 = vmatpush1.bf16.msra.mxu0 %v14036_v42  ;;  %v17123_v42 = vcombine.high %v16919_v21, %v16919_v21 }
 0x2f5   :  { %10684 = vmatpush1.bf16.msra.mxu1 %v14038_v43  ;;  %10152 = vmatprep.subr.bf16.mxu0 %v14045_v46  ;;  %v1579_v43 = vld [vmem:[%s19818_s1 + $0x3048] sm:$0xff] }
 0x2f6   :  { %10685 = vmatprep.subr.bf16.mxu1 %v14047_v35  ;;  %v1583_v46 = vld [vmem:[%s19818_s1 + $0x3068] sm:$0xff]  ;;  %v14076_v35 = vcombine.low %v1570_v27, %v1574_v29  ;;  %v12539_v27 = vld.sshfl [vmem:[%s19817_s0 + $0x18] sm:$0x1 pattern:$0x75316420] }
 0x2f7   :  { %v14087_v51 = vcombine.high %v1579_v43, %v1583_v46  ;;  %v14086_v62 = vcombine.low %v1579_v43, %v1583_v46 }
 0x2f8   :  { %10153 = vmatpush1.bf16.msra.mxu0 %v14044_v55  ;;  %v1590_v55 = vld [vmem:[%s19818_s1 + $0x30a0] sm:$0xff] }
 0x2f9   :  { %10686 = vmatpush1.bf16.msra.mxu1 %v14046_v56  ;;  %10154 = vmatprep.subr.bf16.mxu0 %v14053_v61  ;;  %v1587_v56 = vld [vmem:[%s19818_s1 + $0x3088] sm:$0xff]  ;;  %v14093_v1 = vcombine.high %v1586_v53, %v1590_v55 }
 0x2fa   :  { %10687 = vmatprep.subr.bf16.mxu1 %v14055_v9  ;;  %v1591_v61 = vld [vmem:[%s19818_s1 + $0x30a8] sm:$0xff]  ;;  %v14084_v9 = vcombine.low %v1578_v39, %v1582_v40  ;;  %v49_v39 = vld [vmem:[%s19818_s1 + $0x78] sm:$0xff] }
 0x2fb   :  { %v14095_v45 = vcombine.high %v1587_v56, %v1591_v61  ;;  %v14094_v2 = vcombine.low %v1587_v56, %v1591_v61 }
 0x2fc   :  { %10155 = vmatpush1.bf16.msra.mxu0 %v14052_v11  ;;  %v1598_v11 = vld [vmem:[%s19818_s1 + $0x30e0] sm:$0xff] }
 0x2fd   :  { %10688 = vmatpush1.bf16.msra.mxu1 %v14054_v12  ;;  %10156 = vmatprep.subr.bf16.mxu0 %v14061_v13  ;;  %v1595_v12 = vld [vmem:[%s19818_s1 + $0x30c8] sm:$0xff]  ;;  %v14101_v16 = vcombine.high %v1594_v4, %v1598_v11 }
 0x2fe   :  { %10689 = vmatprep.subr.bf16.mxu1 %v14063_v14  ;;  %v1599_v13 = vld [vmem:[%s19818_s1 + $0x30e8] sm:$0xff]  ;;  %v14092_v14 = vcombine.low %v1586_v53, %v1590_v55 }
 0x2ff   :  { %v14103_v17 = vcombine.high %v1595_v12, %v1599_v13  ;;  %v14102_v29 = vcombine.low %v1595_v12, %v1599_v13 }
 0x300   :  { %10157 = vmatpush1.bf16.msra.mxu0 %v14060_v22  ;;  %v40_v22 = vld [vmem:[%s19818_s1 + $0x30] sm:$0xff] }
 0x301   :  { %10690 = vmatpush1.bf16.msra.mxu1 %v14062_v23  ;;  %10158 = vmatprep.subr.bf16.mxu0 %v14069_v25  ;;  %v37_v23 = vld [vmem:[%s19818_s1 + $0x18] sm:$0xff]  ;;  %v12545_v48 = vcombine.high %v36_v19, %v40_v22  ;;  %v12544_v40 = vcombine.low %v36_v19, %v40_v22 }
 0x302   :  { %10691 = vmatprep.subr.bf16.mxu1 %v14071_v26  ;;  %v41_v25 = vld [vmem:[%s19818_s1 + $0x38] sm:$0xff]  ;;  %v14100_v26 = vcombine.low %v1594_v4, %v1598_v11 }
 0x303   :  { %v12547_v30 = vcombine.high %v37_v23, %v41_v25  ;;  %v12546_v43 = vcombine.low %v37_v23, %v41_v25  ;;  %v76_v25 = vld [vmem:[%s19818_s1 + $0x150] sm:$0xff] }
 0x304   :  { %10159 = vmatpush1.bf16.msra.mxu0 %v14068_v32  ;;  %v44_v32 = vld [vmem:[%s19818_s1 + $0x50] sm:$0xff] }
 0x305   :  { %10692 = vmatpush1.bf16.msra.mxu1 %v14070_v33  ;;  %10169 = vmatprep.subr.bf16.mxu0 %v14077_v36  ;;  %v48_v33 = vld [vmem:[%s19818_s1 + $0x70] sm:$0xff]  ;;  %v17181_v36 = vrot.slane %v12539_v27, %v14688_v54  ;;  %v77_v27 = vld [vmem:[%s19818_s1 + $0x158] sm:$0xff] }
 0x306   :  { %10702 = vmatprep.subr.bf16.mxu1 %v14079_v37  ;;  %v45_v37 = vld [vmem:[%s19818_s1 + $0x58] sm:$0xff]  ;;  %v12553_v46 = vcombine.high %v44_v32, %v48_v33  ;;  %v52_v54 = vld [vmem:[%s19818_s1 + $0x90] sm:$0xff]  ;;  %v12552_v53 = vcombine.low %v44_v32, %v48_v33 }
 0x307   :  { %10161 = vmatmul.mubr.bf16.vlgmr.msra.gmra.mrb[0].mxu0 %v17123_v42  ;;  %v12554_v55 = vcombine.low %v45_v37, %v49_v39 }
 0x308   :  { %10170 = vmatpush1.bf16.msra.mxu0 %v14076_v35  ;;  %10694 = vmatmul.mubr.bf16.vlgmr.msra.gmra.mrb[0].mxu1 %v17123_v42  ;;  %v12555_v35 = vcombine.high %v45_v37, %v49_v39  ;;  %v84_v37 = vld [vmem:[%s19818_s1 + $0x190] sm:$0xff] }
 0x309   :  { %10703 = vmatpush1.bf16.msra.mxu1 %v14078_v47  ;;  %10171 = vmatprep.subr.bf16.mxu0 %v14085_v50  ;;  %v56_v47 = vld [vmem:[%s19818_s1 + $0xb0] sm:$0xff]  ;;  %v53_v50 = vld [vmem:[%s19818_s1 + $0x98] sm:$0xff] }
 0x30a   :  { %10704 = vmatprep.subr.bf16.mxu1 %v14087_v51  ;;  %10201 = vmatprep.mubr.bf16.mxu0 %v14562_v0  ;;  %v57_v51 = vld [vmem:[%s19818_s1 + $0xb8] sm:$0xff]  ;;  %v12561_v56 = vcombine.high %v52_v54, %v56_v47  ;;  %v12560_v4 = vcombine.low %v52_v54, %v56_v47  ;;  %v88_v39 = vld [vmem:[%s19818_s1 + $0x1b0] sm:$0xff] }
 0x30b   :  { %10734 = vmatprep.mubr.bf16.mxu1 %v14562_v0  ;;  %v12563_v61 = vcombine.high %v53_v50, %v57_v51  ;;  %v12562_v11 = vcombine.low %v53_v50, %v57_v51  ;;  %v12593_v54 = vcombine.high %v84_v37, %v88_v39  ;;  %v92_v50 = vld [vmem:[%s19818_s1 + $0x1d0] sm:$0xff] }
 0x30c   :  { %10172 = vmatpush1.bf16.msra.mxu0 %v14084_v9  ;;  %v60_v9 = vld [vmem:[%s19818_s1 + $0xd0] sm:$0xff] }
 0x30d   :  { %10705 = vmatpush1.bf16.msra.mxu1 %v14086_v62  ;;  %10173 = vmatprep.subr.bf16.mxu0 %v14093_v1  ;;  %v64_v62 = vld [vmem:[%s19818_s1 + $0xf0] sm:$0xff]  ;;  %v61_v1 = vld [vmem:[%s19818_s1 + $0xd8] sm:$0xff] }
 0x30e   :  { %10706 = vmatprep.subr.bf16.mxu1 %v14095_v45  ;;  %v65_v45 = vld [vmem:[%s19818_s1 + $0xf8] sm:$0xff]  ;;  %v12569_v12 = vcombine.high %v60_v9, %v64_v62  ;;  %v96_v51 = vld [vmem:[%s19818_s1 + $0x1f0] sm:$0xff] }
 0x30f   :  { %v12571_v13 = vcombine.high %v61_v1, %v65_v45  ;;  %v12570_v19 = vcombine.low %v61_v1, %v65_v45  ;;  %v100_v1 = vld [vmem:[%s19818_s1 + $0x210] sm:$0xff] }
 0x310   :  { %10174 = vmatpush1.bf16.msra.mxu0 %v14092_v14  ;;  %v68_v14 = vld [vmem:[%s19818_s1 + $0x110] sm:$0xff] }
 0x311   :  { %10707 = vmatpush1.bf16.msra.mxu1 %v14094_v2  ;;  %10175 = vmatprep.subr.bf16.mxu0 %v14101_v16  ;;  %v72_v2 = vld [vmem:[%s19818_s1 + $0x130] sm:$0xff]  ;;  %v73_v16 = vld [vmem:[%s19818_s1 + $0x138] sm:$0xff] }
 0x312   :  { %10708 = vmatprep.subr.bf16.mxu1 %v14103_v17  ;;  %v12568_v17 = vcombine.low %v60_v9, %v64_v62  ;;  %v12577_v22 = vcombine.high %v68_v14, %v72_v2  ;;  %v12601_v9 = vcombine.high %v92_v50, %v96_v51  ;;  %v104_v45 = vld [vmem:[%s19818_s1 + $0x230] sm:$0xff] }
 0x314   :  { %10176 = vmatpush1.bf16.msra.mxu0 %v14100_v26  ;;  %v80_v26 = vld [vmem:[%s19818_s1 + $0x170] sm:$0xff] }
 0x315   :  { %10709 = vmatpush1.bf16.msra.mxu1 %v14102_v29  ;;  %10743 = vmatprep.subr.bf16.mxu0 %v12545_v48  ;;  %v81_v29 = vld [vmem:[%s19818_s1 + $0x178] sm:$0xff]  ;;  %v12576_v48 = vcombine.low %v68_v14, %v72_v2  ;;  %v12585_v32 = vcombine.high %v76_v25, %v80_v26  ;;  %v12609_v14 = vcombine.high %v100_v1, %v104_v45 }
 0x316   :  { %11276 = vmatprep.subr.bf16.mxu1 %v12547_v30  ;;  %v12587_v33 = vcombine.high %v77_v27, %v81_v29 }
 0x317   :  { %14108 = vmatmul.mubr.msk.bf16.vlgmr.msra.gmra.mrb[0].mxu0 %vm9673_vm0, %v17181_v36 }
 0x318   :  { %14109 = vmatmul.mubr.msk.bf16.vlgmr.msra.gmra.mrb[0].mxu1 %vm9673_vm0, %v17181_v36  ;;  %10744 = vmatpush1.bf16.msra.mxu0 %v12544_v40  ;;  %v85_v40 = vld [vmem:[%s19818_s1 + $0x198] sm:$0xff] }
 0x319   :  { %11277 = vmatpush1.bf16.msra.mxu1 %v12546_v43  ;;  %10745 = vmatprep.subr.bf16.mxu0 %v12553_v46  ;;  %v89_v43 = vld [vmem:[%s19818_s1 + $0x1b8] sm:$0xff]  ;;  %v12584_v46 = vcombine.low %v76_v25, %v80_v26 }
 0x31a   :  { %11278 = vmatprep.subr.bf16.mxu1 %v12555_v35  ;;  %10775 = vmatprep.mubr.bf16.mxu0 %v14726_v10  ;;  %v12586_v35 = vcombine.low %v77_v27, %v81_v29  ;;  %v12595_v47 = vcombine.high %v85_v40, %v89_v43  ;;  %v116_v27 = vld [vmem:[%s19818_s1 + $0x290] sm:$0xff] }
 0x31b   :  { %11308 = vmatprep.mubr.bf16.mxu1 %v14726_v10  ;;  %v69_v10 = vld [vmem:[%s19818_s1 + $0x118] sm:$0xff]  ;;  %v120_v29 = vld [vmem:[%s19818_s1 + $0x2b0] sm:$0xff] }
 0x31c   :  { %10746 = vmatpush1.bf16.msra.mxu0 %v12552_v53  ;;  %v12579_v23 = vcombine.high %v69_v10, %v73_v16  ;;  %v12578_v30 = vcombine.low %v69_v10, %v73_v16  ;;  %v93_v53 = vld [vmem:[%s19818_s1 + $0x1d8] sm:$0xff]  ;;  %v108_v10 = vld [vmem:[%s19818_s1 + $0x250] sm:$0xff] }
 0x31d   :  { %11279 = vmatpush1.bf16.msra.mxu1 %v12554_v55  ;;  %10747 = vmatprep.subr.bf16.mxu0 %v12561_v56  ;;  %v97_v55 = vld [vmem:[%s19818_s1 + $0x1f8] sm:$0xff]  ;;  %v12592_v56 = vcombine.low %v84_v37, %v88_v39  ;;  %v112_v16 = vld [vmem:[%s19818_s1 + $0x270] sm:$0xff]  ;;  %v12625_v37 = vcombine.high %v116_v27, %v120_v29 }
 0x31e   :  { %11280 = vmatprep.subr.bf16.mxu1 %v12563_v61  ;;  %v12594_v61 = vcombine.low %v85_v40, %v89_v43  ;;  %v12603_v62 = vcombine.high %v93_v53, %v97_v55  ;;  %v12617_v25 = vcombine.high %v108_v10, %v112_v16  ;;  %v124_v40 = vld [vmem:[%s19818_s1 + $0x2d0] sm:$0xff] }
 0x31f   :  { %v128_v43 = vld [vmem:[%s19818_s1 + $0x2f0] sm:$0xff] }
 0x320   :  { %10748 = vmatpush1.bf16.msra.mxu0 %v12560_v4  ;;  %v101_v4 = vld [vmem:[%s19818_s1 + $0x218] sm:$0xff] }
 0x321   :  { %11281 = vmatpush1.bf16.msra.mxu1 %v12562_v11  ;;  %10749 = vmatprep.subr.bf16.mxu0 %v12569_v12  ;;  %v105_v11 = vld [vmem:[%s19818_s1 + $0x238] sm:$0xff]  ;;  %v12600_v12 = vcombine.low %v92_v50, %v96_v51  ;;  %v12633_v50 = vcombine.high %v124_v40, %v128_v43 }
 0x322   :  { %11282 = vmatprep.subr.bf16.mxu1 %v12571_v13  ;;  %v12602_v13 = vcombine.low %v93_v53, %v97_v55  ;;  %v12611_v2 = vcombine.high %v101_v4, %v105_v11  ;;  %v132_v53 = vld [vmem:[%s19818_s1 + $0x310] sm:$0xff] }
 0x323   :  { %v136_v55 = vld [vmem:[%s19818_s1 + $0x330] sm:$0xff] }
 0x324   :  { %10750 = vmatpush1.bf16.msra.mxu0 %v12568_v17  ;;  %v109_v17 = vld [vmem:[%s19818_s1 + $0x258] sm:$0xff] }
 0x325   :  { %11283 = vmatpush1.bf16.msra.mxu1 %v12570_v19  ;;  %10751 = vmatprep.subr.bf16.mxu0 %v12577_v22  ;;  %v113_v19 = vld [vmem:[%s19818_s1 + $0x278] sm:$0xff]  ;;  %v12608_v22 = vcombine.low %v100_v1, %v104_v45  ;;  %v12641_v1 = vcombine.high %v132_v53, %v136_v55 }
 0x326   :  { %11284 = vmatprep.subr.bf16.mxu1 %v12579_v23  ;;  %v12610_v23 = vcombine.low %v101_v4, %v105_v11  ;;  %v12619_v26 = vcombine.high %v109_v17, %v113_v19  ;;  %v140_v4 = vld [vmem:[%s19818_s1 + $0x350] sm:$0xff] }
 0x327   :  { %v144_v11 = vld [vmem:[%s19818_s1 + $0x370] sm:$0xff] }
 0x328   :  { %10752 = vmatpush1.bf16.msra.mxu0 %v12576_v48  ;;  %v117_v48 = vld [vmem:[%s19818_s1 + $0x298] sm:$0xff] }
 0x329   :  { %11285 = vmatpush1.bf16.msra.mxu1 %v12578_v30  ;;  %10753 = vmatprep.subr.bf16.mxu0 %v12585_v32  ;;  %v121_v30 = vld [vmem:[%s19818_s1 + $0x2b8] sm:$0xff]  ;;  %v12616_v32 = vcombine.low %v108_v10, %v112_v16  ;;  %v12649_v10 = vcombine.high %v140_v4, %v144_v11 }
 0x32a   :  { %11286 = vmatprep.subr.bf16.mxu1 %v12587_v33  ;;  %v12618_v33 = vcombine.low %v109_v17, %v113_v19  ;;  %v12627_v39 = vcombine.high %v117_v48, %v121_v30  ;;  %v148_v17 = vld [vmem:[%s19818_s1 + $0x390] sm:$0xff] }
 0x32b   :  { %v152_v19 = vld [vmem:[%s19818_s1 + $0x3b0] sm:$0xff] }
 0x32c   :  { %10754 = vmatpush1.bf16.msra.mxu0 %v12584_v46  ;;  %v125_v46 = vld [vmem:[%s19818_s1 + $0x2d8] sm:$0xff] }
 0x32d   :  { %11287 = vmatpush1.bf16.msra.mxu1 %v12586_v35  ;;  %10755 = vmatprep.subr.bf16.mxu0 %v12593_v54  ;;  %v129_v35 = vld [vmem:[%s19818_s1 + $0x2f8] sm:$0xff]  ;;  %v12624_v54 = vcombine.low %v116_v27, %v120_v29  ;;  %v12657_v27 = vcombine.high %v148_v17, %v152_v19 }
 0x32e   :  { %11288 = vmatprep.subr.bf16.mxu1 %v12595_v47  ;;  %v12626_v47 = vcombine.low %v117_v48, %v121_v30  ;;  %v12635_v51 = vcombine.high %v125_v46, %v129_v35  ;;  %v156_v48 = vld [vmem:[%s19818_s1 + $0x3d0] sm:$0xff] }
 0x32f   :  { %v160_v30 = vld [vmem:[%s19818_s1 + $0x3f0] sm:$0xff] }
 0x330   :  { %10756 = vmatpush1.bf16.msra.mxu0 %v12592_v56  ;;  %v133_v56 = vld [vmem:[%s19818_s1 + $0x318] sm:$0xff] }
 0x331   :  { %11289 = vmatpush1.bf16.msra.mxu1 %v12594_v61  ;;  %10757 = vmatprep.subr.bf16.mxu0 %v12601_v9  ;;  %v137_v61 = vld [vmem:[%s19818_s1 + $0x338] sm:$0xff]  ;;  %v12632_v9 = vcombine.low %v124_v40, %v128_v43  ;;  %v12665_v40 = vcombine.high %v156_v48, %v160_v30 }
 0x332   :  { %11290 = vmatprep.subr.bf16.mxu1 %v12603_v62  ;;  %v12634_v62 = vcombine.low %v125_v46, %v129_v35  ;;  %v12643_v45 = vcombine.high %v133_v56, %v137_v61  ;;  %v164_v46 = vld [vmem:[%s19818_s1 + $0x410] sm:$0xff] }
 0x333   :  { %v168_v35 = vld [vmem:[%s19818_s1 + $0x430] sm:$0xff] }
 0x334   :  { %10758 = vmatpush1.bf16.msra.mxu0 %v12600_v12  ;;  %v141_v12 = vld [vmem:[%s19818_s1 + $0x358] sm:$0xff] }
 0x335   :  { %11291 = vmatpush1.bf16.msra.mxu1 %v12602_v13  ;;  %10759 = vmatprep.subr.bf16.mxu0 %v12609_v14  ;;  %v145_v13 = vld [vmem:[%s19818_s1 + $0x378] sm:$0xff]  ;;  %v12640_v14 = vcombine.low %v132_v53, %v136_v55  ;;  %v12673_v53 = vcombine.high %v164_v46, %v168_v35 }
 0x336   :  { %11292 = vmatprep.subr.bf16.mxu1 %v12611_v2  ;;  %v12642_v2 = vcombine.low %v133_v56, %v137_v61  ;;  %v12651_v16 = vcombine.high %v141_v12, %v145_v13  ;;  %v172_v56 = vld [vmem:[%s19818_s1 + $0x450] sm:$0xff] }
 0x337   :  { %v176_v61 = vld [vmem:[%s19818_s1 + $0x470] sm:$0xff] }
 0x338   :  { %10760 = vmatpush1.bf16.msra.mxu0 %v12608_v22  ;;  %v149_v22 = vld [vmem:[%s19818_s1 + $0x398] sm:$0xff] }
 0x339   :  { %11293 = vmatpush1.bf16.msra.mxu1 %v12610_v23  ;;  %10761 = vmatprep.subr.bf16.mxu0 %v12617_v25  ;;  %v153_v23 = vld [vmem:[%s19818_s1 + $0x3b8] sm:$0xff]  ;;  %v12648_v25 = vcombine.low %v140_v4, %v144_v11  ;;  %v12681_v4 = vcombine.high %v172_v56, %v176_v61 }
 0x33a   :  { %11294 = vmatprep.subr.bf16.mxu1 %v12619_v26  ;;  %v12650_v26 = vcombine.low %v141_v12, %v145_v13  ;;  %v12659_v29 = vcombine.high %v149_v22, %v153_v23  ;;  %v180_v12 = vld [vmem:[%s19818_s1 + $0x490] sm:$0xff] }
 0x33b   :  { %v184_v13 = vld [vmem:[%s19818_s1 + $0x4b0] sm:$0xff] }
 0x33c   :  { %10762 = vmatpush1.bf16.msra.mxu0 %v12616_v32  ;;  %v157_v32 = vld [vmem:[%s19818_s1 + $0x3d8] sm:$0xff] }
 0x33d   :  { %11295 = vmatpush1.bf16.msra.mxu1 %v12618_v33  ;;  %10763 = vmatprep.subr.bf16.mxu0 %v12625_v37  ;;  %v161_v33 = vld [vmem:[%s19818_s1 + $0x3f8] sm:$0xff]  ;;  %v12656_v37 = vcombine.low %v148_v17, %v152_v19  ;;  %v12689_v17 = vcombine.high %v180_v12, %v184_v13 }
 0x33e   :  { %11296 = vmatprep.subr.bf16.mxu1 %v12627_v39  ;;  %v12658_v39 = vcombine.low %v149_v22, %v153_v23  ;;  %v12667_v43 = vcombine.high %v157_v32, %v161_v33  ;;  %v188_v22 = vld [vmem:[%s19818_s1 + $0x4d0] sm:$0xff] }
 0x33f   :  { %v192_v23 = vld [vmem:[%s19818_s1 + $0x4f0] sm:$0xff] }
 0x340   :  { %10764 = vmatpush1.bf16.msra.mxu0 %v12624_v54  ;;  %v165_v54 = vld [vmem:[%s19818_s1 + $0x418] sm:$0xff] }
 0x341   :  { %11297 = vmatpush1.bf16.msra.mxu1 %v12626_v47  ;;  %10765 = vmatprep.subr.bf16.mxu0 %v12633_v50  ;;  %v169_v47 = vld [vmem:[%s19818_s1 + $0x438] sm:$0xff]  ;;  %v12664_v50 = vcombine.low %v156_v48, %v160_v30  ;;  %v196_v30 = vld [vmem:[%s19818_s1 + $0x510] sm:$0xff] }
 0x342   :  { %11298 = vmatprep.subr.bf16.mxu1 %v12635_v51  ;;  %v12666_v51 = vcombine.low %v157_v32, %v161_v33  ;;  %v12675_v55 = vcombine.high %v165_v54, %v169_v47  ;;  %v200_v32 = vld [vmem:[%s19818_s1 + $0x530] sm:$0xff]  ;;  %v201_v33 = vld [vmem:[%s19818_s1 + $0x538] sm:$0xff] }
 0x344   :  { %10766 = vmatpush1.bf16.msra.mxu0 %v12632_v9  ;;  %v173_v9 = vld [vmem:[%s19818_s1 + $0x458] sm:$0xff] }
 0x345   :  { %11299 = vmatpush1.bf16.msra.mxu1 %v12634_v62  ;;  %10767 = vmatprep.subr.bf16.mxu0 %v12641_v1  ;;  %v177_v62 = vld [vmem:[%s19818_s1 + $0x478] sm:$0xff]  ;;  %v12672_v1 = vcombine.low %v164_v46, %v168_v35  ;;  %v204_v46 = vld [vmem:[%s19818_s1 + $0x550] sm:$0xff] }
 0x346   :  { %11300 = vmatprep.subr.bf16.mxu1 %v12643_v45  ;;  %v12674_v45 = vcombine.low %v165_v54, %v169_v47  ;;  %v12683_v11 = vcombine.high %v173_v9, %v177_v62  ;;  %v208_v35 = vld [vmem:[%s19818_s1 + $0x570] sm:$0xff]  ;;  %v205_v54 = vld [vmem:[%s19818_s1 + $0x558] sm:$0xff] }
 0x347   :  { %v209_v47 = vld [vmem:[%s19818_s1 + $0x578] sm:$0xff] }
 0x348   :  { %10768 = vmatpush1.bf16.msra.mxu0 %v12640_v14  ;;  %v181_v14 = vld [vmem:[%s19818_s1 + $0x498] sm:$0xff] }
 0x349   :  { %11301 = vmatpush1.bf16.msra.mxu1 %v12642_v2  ;;  %10769 = vmatprep.subr.bf16.mxu0 %v12649_v10  ;;  %v185_v2 = vld [vmem:[%s19818_s1 + $0x4b8] sm:$0xff]  ;;  %v12680_v10 = vcombine.low %v172_v56, %v176_v61  ;;  %v212_v56 = vld [vmem:[%s19818_s1 + $0x590] sm:$0xff] }
 0x34a   :  { %11302 = vmatprep.subr.bf16.mxu1 %v12651_v16  ;;  %v12682_v16 = vcombine.low %v173_v9, %v177_v62  ;;  %v12691_v19 = vcombine.high %v181_v14, %v185_v2  ;;  %v216_v61 = vld [vmem:[%s19818_s1 + $0x5b0] sm:$0xff]  ;;  %v213_v9 = vld [vmem:[%s19818_s1 + $0x598] sm:$0xff] }
 0x34b   :  { %v217_v62 = vld [vmem:[%s19818_s1 + $0x5b8] sm:$0xff] }
 0x34c   :  { %10770 = vmatpush1.bf16.msra.mxu0 %v12648_v25  ;;  %v193_v25 = vld [vmem:[%s19818_s1 + $0x4f8] sm:$0xff] }
 0x34d   :  { %11303 = vmatpush1.bf16.msra.mxu1 %v12650_v26  ;;  %10771 = vmatprep.subr.bf16.mxu0 %v12657_v27  ;;  %v12688_v26 = vcombine.low %v180_v12, %v184_v13  ;;  %v12690_v27 = vcombine.low %v181_v14, %v185_v2  ;;  %v220_v12 = vld [vmem:[%s19818_s1 + $0x5d0] sm:$0xff]  ;;  %v221_v14 = vld [vmem:[%s19818_s1 + $0x5d8] sm:$0xff] }
 0x34e   :  { %11304 = vmatprep.subr.bf16.mxu1 %v12659_v29  ;;  %v12697_v29 = vcombine.high %v188_v22, %v192_v23  ;;  %v224_v13 = vld [vmem:[%s19818_s1 + $0x5f0] sm:$0xff]  ;;  %v225_v2 = vld [vmem:[%s19818_s1 + $0x5f8] sm:$0xff] }
 0x350   :  { %10772 = vmatpush1.bf16.msra.mxu0 %v12656_v37  ;;  %v12696_v37 = vcombine.low %v188_v22, %v192_v23  ;;  %v228_v22 = vld [vmem:[%s19818_s1 + $0x610] sm:$0xff] }
 0x351   :  { %11305 = vmatpush1.bf16.msra.mxu1 %v12658_v39  ;;  %10773 = vmatprep.subr.bf16.mxu0 %v12665_v40  ;;  %v12705_v40 = vcombine.high %v196_v30, %v200_v32  ;;  %v232_v23 = vld [vmem:[%s19818_s1 + $0x630] sm:$0xff] }
 0x352   :  { %11306 = vmatprep.subr.bf16.mxu1 %v12667_v43 }
 0x354   :  { %10774 = vmatpush1.bf16.msra.mxu0 %v12664_v50  ;;  %v12704_v50 = vcombine.low %v196_v30, %v200_v32  ;;  %v236_v30 = vld [vmem:[%s19818_s1 + $0x650] sm:$0xff] }
 0x355   :  { %11307 = vmatpush1.bf16.msra.mxu1 %v12666_v51  ;;  %10784 = vmatprep.subr.bf16.mxu0 %v12673_v53  ;;  %v12713_v53 = vcombine.high %v204_v46, %v208_v35  ;;  %v240_v32 = vld [vmem:[%s19818_s1 + $0x670] sm:$0xff] }
 0x356   :  { %11317 = vmatprep.subr.bf16.mxu1 %v12675_v55  ;;  %v12715_v55 = vcombine.high %v205_v54, %v209_v47 }
 0x357   :  { %10776 = vmatmul.mubr.bf16.vlgmr.msra.gmra.mrb[4].mxu0 %v14840_v24 }
 0x358   :  { %10785 = vmatpush1.bf16.msra.mxu0 %v12672_v1  ;;  %11309 = vmatmul.mubr.bf16.vlgmr.msra.gmra.mrb[4].mxu1 %v14840_v24  ;;  %v189_v24 = vld [vmem:[%s19818_s1 + $0x4d8] sm:$0xff]  ;;  %v12712_v1 = vcombine.low %v204_v46, %v208_v35  ;;  %v244_v46 = vld [vmem:[%s19818_s1 + $0x690] sm:$0xff] }
 0x359   :  { %11318 = vmatpush1.bf16.msra.mxu1 %v12674_v45  ;;  %10786 = vmatprep.subr.bf16.mxu0 %v12681_v4  ;;  %v12699_v48 = vcombine.high %v189_v24, %v193_v25  ;;  %v12698_v39 = vcombine.low %v189_v24, %v193_v25  ;;  %v12714_v45 = vcombine.low %v205_v54, %v209_v47  ;;  %v229_v24 = vld [vmem:[%s19818_s1 + $0x618] sm:$0xff]  ;;  %v248_v35 = vld [vmem:[%s19818_s1 + $0x6b0] sm:$0xff] }
 0x35a   :  { %11319 = vmatprep.subr.bf16.mxu1 %v12683_v11  ;;  %10816 = vmatprep.mubr.bf16.mxu0 %v14862_v34  ;;  %v12721_v4 = vcombine.high %v212_v56, %v216_v61  ;;  %v12723_v11 = vcombine.high %v213_v9, %v217_v62  ;;  %v233_v25 = vld [vmem:[%s19818_s1 + $0x638] sm:$0xff] }
 0x35b   :  { %11349 = vmatprep.mubr.bf16.mxu1 %v14862_v34  ;;  %v197_v34 = vld [vmem:[%s19818_s1 + $0x518] sm:$0xff] }
 0x35c   :  { %10787 = vmatpush1.bf16.msra.mxu0 %v12680_v10  ;;  %v12707_v43 = vcombine.high %v197_v34, %v201_v33  ;;  %v12706_v51 = vcombine.low %v197_v34, %v201_v33  ;;  %v12720_v10 = vcombine.low %v212_v56, %v216_v61  ;;  %v237_v34 = vld [vmem:[%s19818_s1 + $0x658] sm:$0xff]  ;;  %v252_v56 = vld [vmem:[%s19818_s1 + $0x6d0] sm:$0xff] }
 0x35d   :  { %11320 = vmatpush1.bf16.msra.mxu1 %v12682_v16  ;;  %10788 = vmatprep.subr.bf16.mxu0 %v12689_v17  ;;  %v12722_v16 = vcombine.low %v213_v9, %v217_v62  ;;  %v12729_v17 = vcombine.high %v220_v12, %v224_v13  ;;  %v241_v33 = vld [vmem:[%s19818_s1 + $0x678] sm:$0xff]  ;;  %v256_v61 = vld [vmem:[%s19818_s1 + $0x6f0] sm:$0xff] }
 0x35e   :  { %11321 = vmatprep.subr.bf16.mxu1 %v12691_v19  ;;  %v12731_v19 = vcombine.high %v221_v14, %v225_v2  ;;  %v245_v54 = vld [vmem:[%s19818_s1 + $0x698] sm:$0xff] }
 0x35f   :  { %v249_v47 = vld [vmem:[%s19818_s1 + $0x6b8] sm:$0xff] }
 0x360   :  { %10789 = vmatpush1.bf16.msra.mxu0 %v12688_v26  ;;  %v12728_v26 = vcombine.low %v220_v12, %v224_v13  ;;  %v253_v9 = vld [vmem:[%s19818_s1 + $0x6d8] sm:$0xff]  ;;  %v260_v12 = vld [vmem:[%s19818_s1 + $0x710] sm:$0xff] }
 0x361   :  { %11322 = vmatpush1.bf16.msra.mxu1 %v12690_v27  ;;  %10790 = vmatprep.subr.bf16.mxu0 %v12697_v29  ;;  %v12730_v27 = vcombine.low %v221_v14, %v225_v2  ;;  %v12737_v29 = vcombine.high %v228_v22, %v232_v23  ;;  %v257_v62 = vld [vmem:[%s19818_s1 + $0x6f8] sm:$0xff]  ;;  %v264_v13 = vld [vmem:[%s19818_s1 + $0x730] sm:$0xff] }
 0x362   :  { %11323 = vmatprep.subr.bf16.mxu1 %v12699_v48  ;;  %v12739_v48 = vcombine.high %v229_v24, %v233_v25  ;;  %v261_v14 = vld [vmem:[%s19818_s1 + $0x718] sm:$0xff] }
 0x363   :  { %v265_v2 = vld [vmem:[%s19818_s1 + $0x738] sm:$0xff] }
 0x364   :  { %10791 = vmatpush1.bf16.msra.mxu0 %v12696_v37  ;;  %v12736_v37 = vcombine.low %v228_v22, %v232_v23  ;;  %v268_v22 = vld [vmem:[%s19818_s1 + $0x750] sm:$0xff] }
 0x365   :  { %11324 = vmatpush1.bf16.msra.mxu1 %v12698_v39  ;;  %10792 = vmatprep.subr.bf16.mxu0 %v12705_v40  ;;  %v12738_v39 = vcombine.low %v229_v24, %v233_v25  ;;  %v12745_v40 = vcombine.high %v236_v30, %v240_v32  ;;  %v272_v23 = vld [vmem:[%s19818_s1 + $0x770] sm:$0xff]  ;;  %v269_v24 = vld [vmem:[%s19818_s1 + $0x758] sm:$0xff] }
 0x366   :  { %11325 = vmatprep.subr.bf16.mxu1 %v12707_v43  ;;  %v12747_v43 = vcombine.high %v237_v34, %v241_v33  ;;  %v273_v25 = vld [vmem:[%s19818_s1 + $0x778] sm:$0xff] }
 0x368   :  { %10793 = vmatpush1.bf16.msra.mxu0 %v12704_v50  ;;  %v12744_v50 = vcombine.low %v236_v30, %v240_v32  ;;  %v276_v30 = vld [vmem:[%s19818_s1 + $0x790] sm:$0xff] }
 0x369   :  { %11326 = vmatpush1.bf16.msra.mxu1 %v12706_v51  ;;  %10794 = vmatprep.subr.bf16.mxu0 %v12713_v53  ;;  %v12746_v51 = vcombine.low %v237_v34, %v241_v33  ;;  %v12753_v53 = vcombine.high %v244_v46, %v248_v35  ;;  %v280_v32 = vld [vmem:[%s19818_s1 + $0x7b0] sm:$0xff]  ;;  %v277_v34 = vld [vmem:[%s19818_s1 + $0x798] sm:$0xff] }
 0x36a   :  { %11327 = vmatprep.subr.bf16.mxu1 %v12715_v55  ;;  %v12755_v55 = vcombine.high %v245_v54, %v249_v47  ;;  %v281_v33 = vld [vmem:[%s19818_s1 + $0x7b8] sm:$0xff] }
 0x36c   :  { %10795 = vmatpush1.bf16.msra.mxu0 %v12712_v1  ;;  %v12752_v1 = vcombine.low %v244_v46, %v248_v35  ;;  %v284_v46 = vld [vmem:[%s19818_s1 + $0x7d0] sm:$0xff] }
 0x36d   :  { %11328 = vmatpush1.bf16.msra.mxu1 %v12714_v45  ;;  %10796 = vmatprep.subr.bf16.mxu0 %v12721_v4  ;;  %v12754_v45 = vcombine.low %v245_v54, %v249_v47  ;;  %v12761_v4 = vcombine.high %v252_v56, %v256_v61  ;;  %v288_v35 = vld [vmem:[%s19818_s1 + $0x7f0] sm:$0xff]  ;;  %v285_v54 = vld [vmem:[%s19818_s1 + $0x7d8] sm:$0xff] }
 0x36e   :  { %11329 = vmatprep.subr.bf16.mxu1 %v12723_v11  ;;  %v12763_v11 = vcombine.high %v253_v9, %v257_v62  ;;  %v289_v47 = vld [vmem:[%s19818_s1 + $0x7f8] sm:$0xff] }
 0x370   :  { %10797 = vmatpush1.bf16.msra.mxu0 %v12720_v10  ;;  %v12760_v10 = vcombine.low %v252_v56, %v256_v61  ;;  %v292_v56 = vld [vmem:[%s19818_s1 + $0x810] sm:$0xff] }
 0x371   :  { %11330 = vmatpush1.bf16.msra.mxu1 %v12722_v16  ;;  %10798 = vmatprep.subr.bf16.mxu0 %v12729_v17  ;;  %v12762_v16 = vcombine.low %v253_v9, %v257_v62  ;;  %v12769_v17 = vcombine.high %v260_v12, %v264_v13  ;;  %v296_v61 = vld [vmem:[%s19818_s1 + $0x830] sm:$0xff]  ;;  %v293_v9 = vld [vmem:[%s19818_s1 + $0x818] sm:$0xff] }
 0x372   :  { %11331 = vmatprep.subr.bf16.mxu1 %v12731_v19  ;;  %v12771_v19 = vcombine.high %v261_v14, %v265_v2  ;;  %v297_v62 = vld [vmem:[%s19818_s1 + $0x838] sm:$0xff] }
 0x374   :  { %10799 = vmatpush1.bf16.msra.mxu0 %v12728_v26  ;;  %v12768_v26 = vcombine.low %v260_v12, %v264_v13  ;;  %v300_v12 = vld [vmem:[%s19818_s1 + $0x850] sm:$0xff] }
 0x375   :  { %11332 = vmatpush1.bf16.msra.mxu1 %v12730_v27  ;;  %10800 = vmatprep.subr.bf16.mxu0 %v12737_v29  ;;  %v12770_v27 = vcombine.low %v261_v14, %v265_v2  ;;  %v12777_v29 = vcombine.high %v268_v22, %v272_v23  ;;  %v304_v13 = vld [vmem:[%s19818_s1 + $0x870] sm:$0xff]  ;;  %v301_v14 = vld [vmem:[%s19818_s1 + $0x858] sm:$0xff] }
 0x376   :  { %11333 = vmatprep.subr.bf16.mxu1 %v12739_v48  ;;  %v12779_v48 = vcombine.high %v269_v24, %v273_v25  ;;  %v305_v2 = vld [vmem:[%s19818_s1 + $0x878] sm:$0xff] }
 0x378   :  { %10801 = vmatpush1.bf16.msra.mxu0 %v12736_v37  ;;  %v12776_v37 = vcombine.low %v268_v22, %v272_v23  ;;  %v308_v22 = vld [vmem:[%s19818_s1 + $0x890] sm:$0xff] }
 0x379   :  { %11334 = vmatpush1.bf16.msra.mxu1 %v12738_v39  ;;  %10802 = vmatprep.subr.bf16.mxu0 %v12745_v40  ;;  %v12778_v39 = vcombine.low %v269_v24, %v273_v25  ;;  %v12785_v40 = vcombine.high %v276_v30, %v280_v32  ;;  %v312_v23 = vld [vmem:[%s19818_s1 + $0x8b0] sm:$0xff]  ;;  %v309_v24 = vld [vmem:[%s19818_s1 + $0x898] sm:$0xff] }
 0x37a   :  { %11335 = vmatprep.subr.bf16.mxu1 %v12747_v43  ;;  %v12787_v43 = vcombine.high %v277_v34, %v281_v33  ;;  %v313_v25 = vld [vmem:[%s19818_s1 + $0x8b8] sm:$0xff] }
 0x37c   :  { %10803 = vmatpush1.bf16.msra.mxu0 %v12744_v50  ;;  %v12784_v50 = vcombine.low %v276_v30, %v280_v32  ;;  %v316_v30 = vld [vmem:[%s19818_s1 + $0x8d0] sm:$0xff] }
 0x37d   :  { %11336 = vmatpush1.bf16.msra.mxu1 %v12746_v51  ;;  %10804 = vmatprep.subr.bf16.mxu0 %v12753_v53  ;;  %v12786_v51 = vcombine.low %v277_v34, %v281_v33  ;;  %v12793_v53 = vcombine.high %v284_v46, %v288_v35  ;;  %v320_v32 = vld [vmem:[%s19818_s1 + $0x8f0] sm:$0xff]  ;;  %v321_v34 = vld [vmem:[%s19818_s1 + $0x8f8] sm:$0xff]  ;;  %v12816_v33 = vcombine.low %v308_v22, %v312_v23 }
 0x37e   :  { %11337 = vmatprep.subr.bf16.mxu1 %v12755_v55  ;;  %v12795_v55 = vcombine.high %v285_v54, %v289_v47 }
 0x380   :  { %10805 = vmatpush1.bf16.msra.mxu0 %v12752_v1  ;;  %v12792_v1 = vcombine.low %v284_v46, %v288_v35  ;;  %v328_v46 = vld [vmem:[%s19818_s1 + $0x930] sm:$0xff]  ;;  %v329_v35 = vld [vmem:[%s19818_s1 + $0x938] sm:$0xff] }
 0x381   :  { %11338 = vmatpush1.bf16.msra.mxu1 %v12754_v45  ;;  %10806 = vmatprep.subr.bf16.mxu0 %v12761_v4  ;;  %v12794_v45 = vcombine.low %v285_v54, %v289_v47  ;;  %v12801_v4 = vcombine.high %v292_v56, %v296_v61  ;;  %v12824_v54 = vcombine.low %v316_v30, %v320_v32 }
 0x382   :  { %11339 = vmatprep.subr.bf16.mxu1 %v12763_v11  ;;  %v12803_v11 = vcombine.high %v293_v9, %v297_v62 }
 0x384   :  { %10807 = vmatpush1.bf16.msra.mxu0 %v12760_v10  ;;  %v12800_v10 = vcombine.low %v292_v56, %v296_v61  ;;  %v333_v56 = vld [vmem:[%s19818_s1 + $0x958] sm:$0xff] }
 0x385   :  { %11340 = vmatpush1.bf16.msra.mxu1 %v12762_v16  ;;  %10808 = vmatprep.subr.bf16.mxu0 %v12769_v17  ;;  %v12802_v16 = vcombine.low %v293_v9, %v297_v62  ;;  %v12809_v17 = vcombine.high %v300_v12, %v304_v13  ;;  %v337_v61 = vld [vmem:[%s19818_s1 + $0x978] sm:$0xff] }
 0x386   :  { %11341 = vmatprep.subr.bf16.mxu1 %v12771_v19  ;;  %v12811_v19 = vcombine.high %v301_v14, %v305_v2 }
 0x388   :  { %10809 = vmatpush1.bf16.msra.mxu0 %v12768_v26  ;;  %v12808_v26 = vcombine.low %v300_v12, %v304_v13  ;;  %v341_v12 = vld [vmem:[%s19818_s1 + $0x998] sm:$0xff] }
 0x389   :  { %11342 = vmatpush1.bf16.msra.mxu1 %v12770_v27  ;;  %10810 = vmatprep.subr.bf16.mxu0 %v12777_v29  ;;  %v12810_v27 = vcombine.low %v301_v14, %v305_v2  ;;  %v12817_v29 = vcombine.high %v308_v22, %v312_v23  ;;  %v345_v13 = vld [vmem:[%s19818_s1 + $0x9b8] sm:$0xff]  ;;  %v12842_v2 = vcombine.low %v333_v56, %v337_v61 }
 0x38a   :  { %11343 = vmatprep.subr.bf16.mxu1 %v12779_v48  ;;  %v12819_v48 = vcombine.high %v309_v24, %v313_v25  ;;  %v349_v22 = vld [vmem:[%s19818_s1 + $0x9d8] sm:$0xff] }
 0x38b   :  { %v353_v23 = vld [vmem:[%s19818_s1 + $0x9f8] sm:$0xff] }
 0x38c   :  { %10811 = vmatpush1.bf16.msra.mxu0 %v12776_v37  ;;  %v12818_v37 = vcombine.low %v309_v24, %v313_v25  ;;  %v12850_v25 = vcombine.low %v341_v12, %v345_v13 }
 0x38d   :  { %11344 = vmatpush1.bf16.msra.mxu1 %v12778_v39  ;;  %10812 = vmatprep.subr.bf16.mxu0 %v12785_v40  ;;  %v12825_v39 = vcombine.high %v316_v30, %v320_v32  ;;  %v357_v30 = vld [vmem:[%s19818_s1 + $0xa18] sm:$0xff] }
 0x38e   :  { %11345 = vmatprep.subr.bf16.mxu1 %v12787_v43  ;;  %v324_v43 = vld [vmem:[%s19818_s1 + $0x910] sm:$0xff]  ;;  %v361_v32 = vld [vmem:[%s19818_s1 + $0xa38] sm:$0xff] }
 0x38f   :  { %v12832_v9 = vcombine.low %v324_v43, %v328_v46 }
 0x390   :  { %10813 = vmatpush1.bf16.msra.mxu0 %v12784_v50  ;;  %v12833_v50 = vcombine.high %v324_v43, %v328_v46  ;;  %v365_v43 = vld [vmem:[%s19818_s1 + $0xa58] sm:$0xff] }
 0x391   :  { %11346 = vmatpush1.bf16.msra.mxu1 %v12786_v51  ;;  %10814 = vmatprep.subr.bf16.mxu0 %v12793_v53  ;;  %v332_v53 = vld [vmem:[%s19818_s1 + $0x950] sm:$0xff]  ;;  %v369_v46 = vld [vmem:[%s19818_s1 + $0xa78] sm:$0xff] }
 0x392   :  { %11347 = vmatprep.subr.bf16.mxu1 %v12795_v55  ;;  %v336_v55 = vld [vmem:[%s19818_s1 + $0x970] sm:$0xff] }
 0x393   :  { %v12840_v14 = vcombine.low %v332_v53, %v336_v55 }
 0x394   :  { %10815 = vmatpush1.bf16.msra.mxu0 %v12792_v1  ;;  %v12841_v1 = vcombine.high %v332_v53, %v336_v55  ;;  %v373_v53 = vld [vmem:[%s19818_s1 + $0xa98] sm:$0xff] }
 0x395   :  { %11348 = vmatpush1.bf16.msra.mxu1 %v12794_v45  ;;  %10825 = vmatprep.subr.bf16.mxu0 %v12801_v4  ;;  %v12843_v45 = vcombine.high %v333_v56, %v337_v61  ;;  %v340_v4 = vld [vmem:[%s19818_s1 + $0x990] sm:$0xff]  ;;  %v377_v55 = vld [vmem:[%s19818_s1 + $0xab8] sm:$0xff]  ;;  %v12874_v61 = vcombine.low %v365_v43, %v369_v46 }
 0x396   :  { %11358 = vmatprep.subr.bf16.mxu1 %v12803_v11  ;;  %v344_v11 = vld [vmem:[%s19818_s1 + $0x9b0] sm:$0xff] }
 0x397   :  { %10817 = vmatmul.mubr.bf16.vlgmr.msra.gmra.mrb[4].mxu0 %v15057_v41  ;;  %v12848_v24 = vcombine.low %v340_v4, %v344_v11 }
 0x398   :  { %10826 = vmatpush1.bf16.msra.mxu0 %v12800_v10  ;;  %11350 = vmatmul.mubr.bf16.vlgmr.msra.gmra.mrb[4].mxu1 %v15057_v41  ;;  %v317_v41 = vld [vmem:[%s19818_s1 + $0x8d8] sm:$0xff]  ;;  %v12849_v10 = vcombine.high %v340_v4, %v344_v11 }
 0x399   :  { %11359 = vmatpush1.bf16.msra.mxu1 %v12802_v16  ;;  %10827 = vmatprep.subr.bf16.mxu0 %v12809_v17  ;;  %v12827_v40 = vcombine.high %v317_v41, %v321_v34  ;;  %v12826_v47 = vcombine.low %v317_v41, %v321_v34  ;;  %v12851_v16 = vcombine.high %v341_v12, %v345_v13  ;;  %v348_v17 = vld [vmem:[%s19818_s1 + $0x9d0] sm:$0xff]  ;;  %v381_v4 = vld [vmem:[%s19818_s1 + $0xad8] sm:$0xff] }
 0x39a   :  { %11360 = vmatprep.subr.bf16.mxu1 %v12811_v19  ;;  %10857 = vmatprep.mubr.bf16.mxu0 %v15066_v49  ;;  %v352_v19 = vld [vmem:[%s19818_s1 + $0x9f0] sm:$0xff]  ;;  %v12858_v34 = vcombine.low %v349_v22, %v353_v23  ;;  %v385_v11 = vld [vmem:[%s19818_s1 + $0xaf8] sm:$0xff]  ;;  %v12882_v13 = vcombine.low %v373_v53, %v377_v55 }
 0x39b   :  { %11390 = vmatprep.mubr.bf16.mxu1 %v15066_v49  ;;  %v325_v49 = vld [vmem:[%s19818_s1 + $0x918] sm:$0xff]  ;;  %v12856_v41 = vcombine.low %v348_v17, %v352_v19 }
 0x39c   :  { %10828 = vmatpush1.bf16.msra.mxu0 %v12808_v26  ;;  %v12835_v51 = vcombine.high %v325_v49, %v329_v35  ;;  %v12834_v62 = vcombine.low %v325_v49, %v329_v35  ;;  %v12857_v26 = vcombine.high %v348_v17, %v352_v19  ;;  %v12866_v35 = vcombine.low %v357_v30, %v361_v32  ;;  %v389_v17 = vld [vmem:[%s19818_s1 + $0xb18] sm:$0xff] }
 0x39d   :  { %11361 = vmatpush1.bf16.msra.mxu1 %v12810_v27  ;;  %10829 = vmatprep.subr.bf16.mxu0 %v12817_v29  ;;  %v12859_v27 = vcombine.high %v349_v22, %v353_v23  ;;  %v356_v29 = vld [vmem:[%s19818_s1 + $0xa10] sm:$0xff]  ;;  %v393_v19 = vld [vmem:[%s19818_s1 + $0xb38] sm:$0xff]  ;;  %v12890_v23 = vcombine.low %v381_v4, %v385_v11 }
 0x39e   :  { %11362 = vmatprep.subr.bf16.mxu1 %v12819_v48  ;;  %v360_v48 = vld [vmem:[%s19818_s1 + $0xa30] sm:$0xff] }
 0x39f   :  { %v12864_v49 = vcombine.low %v356_v29, %v360_v48 }
 0x3a0   :  { %10830 = vmatpush1.bf16.msra.mxu0 %v12816_v33  ;;  %v12865_v33 = vcombine.high %v356_v29, %v360_v48  ;;  %v397_v29 = vld [vmem:[%s19818_s1 + $0xb58] sm:$0xff] }
 0x3a1   :  { %11363 = vmatpush1.bf16.msra.mxu1 %v12818_v37  ;;  %10831 = vmatprep.subr.bf16.mxu0 %v12825_v39  ;;  %v12867_v37 = vcombine.high %v357_v30, %v361_v32  ;;  %v364_v39 = vld [vmem:[%s19818_s1 + $0xa50] sm:$0xff]  ;;  %v401_v48 = vld [vmem:[%s19818_s1 + $0xb78] sm:$0xff]  ;;  %v12898_v32 = vcombine.low %v389_v17, %v393_v19 }
 0x3a2   :  { %11364 = vmatprep.subr.bf16.mxu1 %v12827_v40  ;;  %v368_v40 = vld [vmem:[%s19818_s1 + $0xa70] sm:$0xff] }
 0x3a3   :  { %v12872_v56 = vcombine.low %v364_v39, %v368_v40 }
 0x3a4   :  { %10832 = vmatpush1.bf16.msra.mxu0 %v12824_v54  ;;  %v12873_v54 = vcombine.high %v364_v39, %v368_v40  ;;  %v405_v39 = vld [vmem:[%s19818_s1 + $0xb98] sm:$0xff] }
 0x3a5   :  { %11365 = vmatpush1.bf16.msra.mxu1 %v12826_v47  ;;  %10833 = vmatprep.subr.bf16.mxu0 %v12833_v50  ;;  %v12875_v47 = vcombine.high %v365_v43, %v369_v46  ;;  %v372_v50 = vld [vmem:[%s19818_s1 + $0xa90] sm:$0xff]  ;;  %v409_v40 = vld [vmem:[%s19818_s1 + $0xbb8] sm:$0xff]  ;;  %v12906_v46 = vcombine.low %v397_v29, %v401_v48 }
 0x3a6   :  { %11366 = vmatprep.subr.bf16.mxu1 %v12835_v51  ;;  %v376_v51 = vld [vmem:[%s19818_s1 + $0xab0] sm:$0xff] }
 0x3a7   :  { %v12880_v12 = vcombine.low %v372_v50, %v376_v51 }
 0x3a8   :  { %10834 = vmatpush1.bf16.msra.mxu0 %v12832_v9  ;;  %v12881_v9 = vcombine.high %v372_v50, %v376_v51  ;;  %v413_v50 = vld [vmem:[%s19818_s1 + $0xbd8] sm:$0xff] }
 0x3a9   :  { %11367 = vmatpush1.bf16.msra.mxu1 %v12834_v62  ;;  %10835 = vmatprep.subr.bf16.mxu0 %v12841_v1  ;;  %v12883_v62 = vcombine.high %v373_v53, %v377_v55  ;;  %v380_v1 = vld [vmem:[%s19818_s1 + $0xad0] sm:$0xff]  ;;  %v417_v51 = vld [vmem:[%s19818_s1 + $0xbf8] sm:$0xff]  ;;  %v12914_v55 = vcombine.low %v405_v39, %v409_v40 }
 0x3aa   :  { %11368 = vmatprep.subr.bf16.mxu1 %v12843_v45  ;;  %v384_v45 = vld [vmem:[%s19818_s1 + $0xaf0] sm:$0xff] }
 0x3ab   :  { %v12888_v22 = vcombine.low %v380_v1, %v384_v45 }
 0x3ac   :  { %10836 = vmatpush1.bf16.msra.mxu0 %v12840_v14  ;;  %v12889_v14 = vcombine.high %v380_v1, %v384_v45  ;;  %v421_v1 = vld [vmem:[%s19818_s1 + $0xc18] sm:$0xff] }
 0x3ad   :  { %11369 = vmatpush1.bf16.msra.mxu1 %v12842_v2  ;;  %10837 = vmatprep.subr.bf16.mxu0 %v12849_v10  ;;  %v12891_v2 = vcombine.high %v381_v4, %v385_v11  ;;  %v388_v10 = vld [vmem:[%s19818_s1 + $0xb10] sm:$0xff]  ;;  %v425_v45 = vld [vmem:[%s19818_s1 + $0xc38] sm:$0xff]  ;;  %v12922_v11 = vcombine.low %v413_v50, %v417_v51 }
 0x3ae   :  { %11370 = vmatprep.subr.bf16.mxu1 %v12851_v16  ;;  %v392_v16 = vld [vmem:[%s19818_s1 + $0xb30] sm:$0xff] }
 0x3af   :  { %v12896_v30 = vcombine.low %v388_v10, %v392_v16 }
 0x3b0   :  { %10838 = vmatpush1.bf16.msra.mxu0 %v12848_v24  ;;  %v12897_v24 = vcombine.high %v388_v10, %v392_v16  ;;  %v429_v10 = vld [vmem:[%s19818_s1 + $0xc58] sm:$0xff] }
 0x3b1   :  { %11371 = vmatpush1.bf16.msra.mxu1 %v12850_v25  ;;  %10839 = vmatprep.subr.bf16.mxu0 %v12857_v26  ;;  %v12899_v25 = vcombine.high %v389_v17, %v393_v19  ;;  %v396_v26 = vld [vmem:[%s19818_s1 + $0xb50] sm:$0xff]  ;;  %v433_v16 = vld [vmem:[%s19818_s1 + $0xc78] sm:$0xff]  ;;  %v12930_v19 = vcombine.low %v421_v1, %v425_v45 }
 0x3b2   :  { %11372 = vmatprep.subr.bf16.mxu1 %v12859_v27  ;;  %v400_v27 = vld [vmem:[%s19818_s1 + $0xb70] sm:$0xff] }
 0x3b3   :  { %v12904_v43 = vcombine.low %v396_v26, %v400_v27 }
 0x3b4   :  { %10840 = vmatpush1.bf16.msra.mxu0 %v12856_v41  ;;  %v12905_v41 = vcombine.high %v396_v26, %v400_v27  ;;  %v437_v26 = vld [vmem:[%s19818_s1 + $0xc98] sm:$0xff] }
 0x3b5   :  { %11373 = vmatpush1.bf16.msra.mxu1 %v12858_v34  ;;  %10841 = vmatprep.subr.bf16.mxu0 %v12865_v33  ;;  %v12907_v34 = vcombine.high %v397_v29, %v401_v48  ;;  %v404_v33 = vld [vmem:[%s19818_s1 + $0xb90] sm:$0xff]  ;;  %v441_v27 = vld [vmem:[%s19818_s1 + $0xcb8] sm:$0xff]  ;;  %v12938_v48 = vcombine.low %v429_v10, %v433_v16 }
 0x3b6   :  { %11374 = vmatprep.subr.bf16.mxu1 %v12867_v37  ;;  %v408_v37 = vld [vmem:[%s19818_s1 + $0xbb0] sm:$0xff] }
 0x3b7   :  { %v12912_v53 = vcombine.low %v404_v33, %v408_v37 }
 0x3b8   :  { %10842 = vmatpush1.bf16.msra.mxu0 %v12864_v49  ;;  %v12913_v49 = vcombine.high %v404_v33, %v408_v37  ;;  %v449_v33 = vld [vmem:[%s19818_s1 + $0xcf8] sm:$0xff] }
 0x3b9   :  { %11375 = vmatpush1.bf16.msra.mxu1 %v12866_v35  ;;  %10843 = vmatprep.subr.bf16.mxu0 %v12873_v54  ;;  %v12915_v35 = vcombine.high %v405_v39, %v409_v40  ;;  %v412_v54 = vld [vmem:[%s19818_s1 + $0xbd0] sm:$0xff]  ;;  %v12946_v39 = vcombine.low %v437_v26, %v441_v27 }
 0x3ba   :  { %11376 = vmatprep.subr.bf16.mxu1 %v12875_v47  ;;  %v416_v47 = vld [vmem:[%s19818_s1 + $0xbf0] sm:$0xff] }
 0x3bb   :  { %v12920_v4 = vcombine.low %v412_v54, %v416_v47 }
 0x3bc   :  { %10844 = vmatpush1.bf16.msra.mxu0 %v12872_v56  ;;  %v12921_v56 = vcombine.high %v412_v54, %v416_v47 }
 0x3bd   :  { %11377 = vmatpush1.bf16.msra.mxu1 %v12874_v61  ;;  %10845 = vmatprep.subr.bf16.mxu0 %v12881_v9  ;;  %v12923_v61 = vcombine.high %v413_v50, %v417_v51  ;;  %v420_v9 = vld [vmem:[%s19818_s1 + $0xc10] sm:$0xff] }
 0x3be   :  { %11378 = vmatprep.subr.bf16.mxu1 %v12883_v62  ;;  %v424_v62 = vld [vmem:[%s19818_s1 + $0xc30] sm:$0xff] }
 0x3bf   :  { %v12928_v17 = vcombine.low %v420_v9, %v424_v62 }
 0x3c0   :  { %10846 = vmatpush1.bf16.msra.mxu0 %v12880_v12  ;;  %v12929_v12 = vcombine.high %v420_v9, %v424_v62 }
 0x3c1   :  { %11379 = vmatpush1.bf16.msra.mxu1 %v12882_v13  ;;  %10847 = vmatprep.subr.bf16.mxu0 %v12889_v14  ;;  %v12931_v13 = vcombine.high %v421_v1, %v425_v45  ;;  %v428_v14 = vld [vmem:[%s19818_s1 + $0xc50] sm:$0xff] }
 0x3c2   :  { %11380 = vmatprep.subr.bf16.mxu1 %v12891_v2  ;;  %v432_v2 = vld [vmem:[%s19818_s1 + $0xc70] sm:$0xff] }
 0x3c3   :  { %v12936_v29 = vcombine.low %v428_v14, %v432_v2 }
 0x3c4   :  { %10848 = vmatpush1.bf16.msra.mxu0 %v12888_v22  ;;  %v12937_v22 = vcombine.high %v428_v14, %v432_v2 }
 0x3c5   :  { %11381 = vmatpush1.bf16.msra.mxu1 %v12890_v23  ;;  %10849 = vmatprep.subr.bf16.mxu0 %v12897_v24  ;;  %v12939_v23 = vcombine.high %v429_v10, %v433_v16  ;;  %v436_v24 = vld [vmem:[%s19818_s1 + $0xc90] sm:$0xff] }
 0x3c6   :  { %11382 = vmatprep.subr.bf16.mxu1 %v12899_v25  ;;  %v440_v25 = vld [vmem:[%s19818_s1 + $0xcb0] sm:$0xff] }
 0x3c7   :  { %v12944_v37 = vcombine.low %v436_v24, %v440_v25 }
 0x3c8   :  { %10850 = vmatpush1.bf16.msra.mxu0 %v12896_v30  ;;  %v12945_v30 = vcombine.high %v436_v24, %v440_v25  ;;  %v477_v25 = vld [vmem:[%s19818_s1 + $0xdd8] sm:$0xff] }
 0x3c9   :  { %11383 = vmatpush1.bf16.msra.mxu1 %v12898_v32  ;;  %10851 = vmatprep.subr.bf16.mxu0 %v12905_v41  ;;  %v12947_v32 = vcombine.high %v437_v26, %v441_v27  ;;  %v444_v41 = vld [vmem:[%s19818_s1 + $0xcd0] sm:$0xff]  ;;  %v481_v26 = vld [vmem:[%s19818_s1 + $0xdf8] sm:$0xff] }
 0x3ca   :  { %11384 = vmatprep.subr.bf16.mxu1 %v12907_v34  ;;  %v448_v34 = vld [vmem:[%s19818_s1 + $0xcf0] sm:$0xff] }
 0x3cb   :  { %v12953_v40 = vcombine.high %v444_v41, %v448_v34  ;;  %v12952_v54 = vcombine.low %v444_v41, %v448_v34 }
 0x3cc   :  { %10852 = vmatpush1.bf16.msra.mxu0 %v12904_v43 }
 0x3cd   :  { %11385 = vmatpush1.bf16.msra.mxu1 %v12906_v46  ;;  %10853 = vmatprep.subr.bf16.mxu0 %v12913_v49  ;;  %v452_v46 = vld [vmem:[%s19818_s1 + $0xd10] sm:$0xff] }
 0x3ce   :  { %11386 = vmatprep.subr.bf16.mxu1 %v12915_v35  ;;  %v456_v49 = vld [vmem:[%s19818_s1 + $0xd30] sm:$0xff]  ;;  %v457_v35 = vld [vmem:[%s19818_s1 + $0xd38] sm:$0xff] }
 0x3cf   :  { %v12961_v50 = vcombine.high %v452_v46, %v456_v49  ;;  %v12960_v9 = vcombine.low %v452_v46, %v456_v49  ;;  %v12986_v49 = vcombine.low %v477_v25, %v481_v26 }
 0x3d0   :  { %10854 = vmatpush1.bf16.msra.mxu0 %v12912_v53  ;;  %v460_v53 = vld [vmem:[%s19818_s1 + $0xd50] sm:$0xff] }
 0x3d1   :  { %11387 = vmatpush1.bf16.msra.mxu1 %v12914_v55  ;;  %10855 = vmatprep.subr.bf16.mxu0 %v12921_v56  ;;  %v464_v55 = vld [vmem:[%s19818_s1 + $0xd70] sm:$0xff]  ;;  %v461_v56 = vld [vmem:[%s19818_s1 + $0xd58] sm:$0xff] }
 0x3d2   :  { %11388 = vmatprep.subr.bf16.mxu1 %v12923_v61  ;;  %v465_v61 = vld [vmem:[%s19818_s1 + $0xd78] sm:$0xff]  ;;  %v12969_v1 = vcombine.high %v460_v53, %v464_v55  ;;  %v12968_v14 = vcombine.low %v460_v53, %v464_v55 }
 0x3d3   :  { %v12971_v45 = vcombine.high %v461_v56, %v465_v61  ;;  %v12970_v2 = vcombine.low %v461_v56, %v465_v61 }
 0x3d4   :  { %10856 = vmatpush1.bf16.msra.mxu0 %v12920_v4  ;;  %v468_v4 = vld [vmem:[%s19818_s1 + $0xd90] sm:$0xff] }
 0x3d5   :  { %11389 = vmatpush1.bf16.msra.mxu1 %v12922_v11  ;;  %10866 = vmatprep.subr.bf16.mxu0 %v12929_v12  ;;  %v472_v11 = vld [vmem:[%s19818_s1 + $0xdb0] sm:$0xff]  ;;  %v469_v12 = vld [vmem:[%s19818_s1 + $0xd98] sm:$0xff] }
 0x3d6   :  { %11399 = vmatprep.subr.bf16.mxu1 %v12931_v13  ;;  %v473_v13 = vld [vmem:[%s19818_s1 + $0xdb8] sm:$0xff]  ;;  %v12977_v10 = vcombine.high %v468_v4, %v472_v11 }
 0x3d7   :  { %10858 = vmatmul.mubr.bf16.vlgmr.msra.gmra.mrb[4].mxu0 %v15254_v59  ;;  %v12978_v41 = vcombine.low %v469_v12, %v473_v13 }
 0x3d8   :  { %10867 = vmatpush1.bf16.msra.mxu0 %v12928_v17  ;;  %11391 = vmatmul.mubr.bf16.vlgmr.msra.gmra.mrb[4].mxu1 %v15254_v59  ;;  %v445_v59 = vld [vmem:[%s19818_s1 + $0xcd8] sm:$0xff]  ;;  %v12979_v17 = vcombine.high %v469_v12, %v473_v13 }
 0x3d9   :  { %11400 = vmatpush1.bf16.msra.mxu1 %v12930_v19  ;;  %10868 = vmatprep.subr.bf16.mxu0 %v12937_v22  ;;  %v12955_v43 = vcombine.high %v445_v59, %v449_v33  ;;  %v12954_v47 = vcombine.low %v445_v59, %v449_v33  ;;  %v476_v19 = vld [vmem:[%s19818_s1 + $0xdd0] sm:$0xff]  ;;  %v12987_v33 = vcombine.high %v477_v25, %v481_v26 }
 0x3da   :  { %11401 = vmatprep.subr.bf16.mxu1 %v12939_v23  ;;  %10898 = vmatprep.mubr.bf16.mxu0 %v15270_v5  ;;  %v480_v22 = vld [vmem:[%s19818_s1 + $0xdf0] sm:$0xff] }
 0x3db   :  { %11431 = vmatprep.mubr.bf16.mxu1 %v15270_v5  ;;  %v453_v5 = vld [vmem:[%s19818_s1 + $0xd18] sm:$0xff]  ;;  %v12985_v34 = vcombine.high %v476_v19, %v480_v22  ;;  %v12984_v46 = vcombine.low %v476_v19, %v480_v22 }
 0x3dc   :  { %10869 = vmatpush1.bf16.msra.mxu0 %v12936_v29  ;;  %v12963_v51 = vcombine.high %v453_v5, %v457_v35  ;;  %v12962_v62 = vcombine.low %v453_v5, %v457_v35 }
 0x3dd   :  { %11402 = vmatpush1.bf16.msra.mxu1 %v12938_v48  ;;  %10870 = vmatprep.subr.bf16.mxu0 %v12945_v30  ;;  %v12976_v48 = vcombine.low %v468_v4, %v472_v11 }
 0x3de   :  { %11403 = vmatprep.subr.bf16.mxu1 %v12947_v32 }
 0x3e0   :  { %10871 = vmatpush1.bf16.msra.mxu0 %v12944_v37  ;;  %v484_v37 = vld [vmem:[%s19818_s1 + $0xe10] sm:$0xff] }
 0x3e1   :  { %11404 = vmatpush1.bf16.msra.mxu1 %v12946_v39  ;;  %10872 = vmatprep.subr.bf16.mxu0 %v12953_v40  ;;  %v488_v39 = vld [vmem:[%s19818_s1 + $0xe30] sm:$0xff]  ;;  %v485_v40 = vld [vmem:[%s19818_s1 + $0xe18] sm:$0xff] }
 0x3e2   :  { %11405 = vmatprep.subr.bf16.mxu1 %v12955_v43  ;;  %v489_v43 = vld [vmem:[%s19818_s1 + $0xe38] sm:$0xff]  ;;  %v12993_v5 = vcombine.high %v484_v37, %v488_v39  ;;  %v12992_v53 = vcombine.low %v484_v37, %v488_v39  ;;  %v524_v37 = vld [vmem:[%s19818_s1 + $0xf50] sm:$0xff] }
 0x3e3   :  { %v12995_v35 = vcombine.high %v485_v40, %v489_v43  ;;  %v12994_v55 = vcombine.low %v485_v40, %v489_v43  ;;  %v528_v39 = vld [vmem:[%s19818_s1 + $0xf70] sm:$0xff]  ;;  %v525_v40 = vld [vmem:[%s19818_s1 + $0xf58] sm:$0xff] }
 0x3e4   :  { %10873 = vmatpush1.bf16.msra.mxu0 %v12952_v54  ;;  %v492_v54 = vld [vmem:[%s19818_s1 + $0xe50] sm:$0xff]  ;;  %v529_v43 = vld [vmem:[%s19818_s1 + $0xf78] sm:$0xff] }
 0x3e5   :  { %11406 = vmatpush1.bf16.msra.mxu1 %v12954_v47  ;;  %10874 = vmatprep.subr.bf16.mxu0 %v12961_v50  ;;  %v496_v47 = vld [vmem:[%s19818_s1 + $0xe70] sm:$0xff]  ;;  %v493_v50 = vld [vmem:[%s19818_s1 + $0xe58] sm:$0xff] }
 0x3e6   :  { %11407 = vmatprep.subr.bf16.mxu1 %v12963_v51  ;;  %v497_v51 = vld [vmem:[%s19818_s1 + $0xe78] sm:$0xff]  ;;  %v13001_v56 = vcombine.high %v492_v54, %v496_v47  ;;  %v13000_v4 = vcombine.low %v492_v54, %v496_v47  ;;  %v532_v54 = vld [vmem:[%s19818_s1 + $0xf90] sm:$0xff] }
 0x3e7   :  { %v13003_v61 = vcombine.high %v493_v50, %v497_v51  ;;  %v13002_v11 = vcombine.low %v493_v50, %v497_v51  ;;  %v536_v47 = vld [vmem:[%s19818_s1 + $0xfb0] sm:$0xff]  ;;  %v533_v50 = vld [vmem:[%s19818_s1 + $0xf98] sm:$0xff] }
 0x3e8   :  { %10875 = vmatpush1.bf16.msra.mxu0 %v12960_v9  ;;  %v500_v9 = vld [vmem:[%s19818_s1 + $0xe90] sm:$0xff]  ;;  %v537_v51 = vld [vmem:[%s19818_s1 + $0xfb8] sm:$0xff] }
 0x3e9   :  { %11408 = vmatpush1.bf16.msra.mxu1 %v12962_v62  ;;  %10876 = vmatprep.subr.bf16.mxu0 %v12969_v1  ;;  %v504_v62 = vld [vmem:[%s19818_s1 + $0xeb0] sm:$0xff]  ;;  %v501_v1 = vld [vmem:[%s19818_s1 + $0xe98] sm:$0xff] }
 0x3ea   :  { %v17843_v16 = vpop.f32.mrb[0].mxu0  ;;  %11409 = vmatprep.subr.bf16.mxu1 %v12971_v45  ;;  %v505_v45 = vld [vmem:[%s19818_s1 + $0xeb8] sm:$0xff]  ;;  %v13009_v12 = vcombine.high %v500_v9, %v504_v62  ;;  %v13008_v19 = vcombine.low %v500_v9, %v504_v62  ;;  %v540_v9 = vld [vmem:[%s19818_s1 + $0xfd0] sm:$0xff] }
 0x3eb   :  { %v17851_v23 = vpop.f32.mrb[0].mxu1  ;;  %v17853_v24 = vpop.f32.mrb[1].mxu0  ;;  %v13011_v13 = vcombine.high %v501_v1, %v505_v45  ;;  %v13010_v22 = vcombine.low %v501_v1, %v505_v45  ;;  %v544_v62 = vld [vmem:[%s19818_s1 + $0xff0] sm:$0xff]  ;;  %v541_v1 = vld [vmem:[%s19818_s1 + $0xfd8] sm:$0xff] }
 0x3ec   :  { %v17861_v27 = vpop.f32.mrb[1].mxu1  ;;  %v10207_v29 = vpop.f32.mrb[2].mxu0  ;;  %10877 = vmatpush1.bf16.msra.mxu0 %v12968_v14  ;;  %v508_v14 = vld [vmem:[%s19818_s1 + $0xed0] sm:$0xff]  ;;  %v545_v45 = vld [vmem:[%s19818_s1 + $0xff8] sm:$0xff] }
 0x3ed   :  { %v10740_v30 = vpop.f32.mrb[2].mxu1  ;;  %11410 = vmatpush1.bf16.msra.mxu1 %v12970_v2  ;;  %v10208_v32 = vpop.f32.mrb[3].mxu0  ;;  %10878 = vmatprep.subr.bf16.mxu0 %v12977_v10  ;;  %v512_v2 = vld [vmem:[%s19818_s1 + $0xef0] sm:$0xff]  ;;  %v509_v10 = vld [vmem:[%s19818_s1 + $0xed8] sm:$0xff] }
 0x3ee   :  { %v10741_v59 = vpop.f32.mrb[3].mxu1  ;;  %11411 = vmatprep.subr.bf16.mxu1 %v12979_v17  ;;  %v513_v17 = vld [vmem:[%s19818_s1 + $0xef8] sm:$0xff]  ;;  %v13017_v25 = vcombine.high %v508_v14, %v512_v2  ;;  %v516_v29 = vld [vmem:[%s19818_s1 + $0xf10] sm:$0xff] }
 0x3ef   :  { %v13019_v26 = vcombine.high %v509_v10, %v513_v17  ;;  %v517_v30 = vld [vmem:[%s19818_s1 + $0xf18] sm:$0xff] }
 0x3f0   :  { %10879 = vmatpush1.bf16.msra.mxu0 %v12976_v48  ;;  %v520_v48 = vld [vmem:[%s19818_s1 + $0xf30] sm:$0xff]  ;;  %v521_v32 = vld [vmem:[%s19818_s1 + $0xf38] sm:$0xff] }
 0x3f1   :  { %11412 = vmatpush1.bf16.msra.mxu1 %v12978_v41  ;;  %10880 = vmatprep.subr.bf16.mxu0 %v12985_v34  ;;  %v13016_v41 = vcombine.low %v508_v14, %v512_v2  ;;  %v13018_v34 = vcombine.low %v509_v10, %v513_v17  ;;  %v13025_v59 = vcombine.high %v516_v29, %v520_v48  ;;  %v548_v14 = vld [vmem:[%s19818_s1 + $0x1010] sm:$0xff]  ;;  %v549_v10 = vld [vmem:[%s19818_s1 + $0x1018] sm:$0xff] }
 0x3f2   :  { %11413 = vmatprep.subr.bf16.mxu1 %v12987_v33  ;;  %v13027_v33 = vcombine.high %v517_v30, %v521_v32  ;;  %v552_v2 = vld [vmem:[%s19818_s1 + $0x1030] sm:$0xff]  ;;  %v553_v17 = vld [vmem:[%s19818_s1 + $0x1038] sm:$0xff] }
 0x3f4   :  { %10881 = vmatpush1.bf16.msra.mxu0 %v12984_v46  ;;  %v13024_v46 = vcombine.low %v516_v29, %v520_v48  ;;  %v556_v29 = vld [vmem:[%s19818_s1 + $0x1050] sm:$0xff] }
 0x3f5   :  { %11414 = vmatpush1.bf16.msra.mxu1 %v12986_v49  ;;  %10882 = vmatprep.subr.bf16.mxu0 %v12993_v5  ;;  %v13026_v49 = vcombine.low %v517_v30, %v521_v32  ;;  %v13033_v5 = vcombine.high %v524_v37, %v528_v39  ;;  %v560_v48 = vld [vmem:[%s19818_s1 + $0x1070] sm:$0xff]  ;;  %v557_v30 = vld [vmem:[%s19818_s1 + $0x1058] sm:$0xff] }
 0x3f6   :  { %11415 = vmatprep.subr.bf16.mxu1 %v12995_v35  ;;  %v13035_v35 = vcombine.high %v525_v40, %v529_v43  ;;  %v561_v32 = vld [vmem:[%s19818_s1 + $0x1078] sm:$0xff] }
 0x3f8   :  { %10883 = vmatpush1.bf16.msra.mxu0 %v12992_v53  ;;  %v13032_v53 = vcombine.low %v524_v37, %v528_v39  ;;  %v564_v37 = vld [vmem:[%s19818_s1 + $0x1090] sm:$0xff] }
 0x3f9   :  { %11416 = vmatpush1.bf16.msra.mxu1 %v12994_v55  ;;  %10884 = vmatprep.subr.bf16.mxu0 %v13001_v56  ;;  %v13034_v55 = vcombine.low %v525_v40, %v529_v43  ;;  %v13041_v56 = vcombine.high %v532_v54, %v536_v47  ;;  %v568_v39 = vld [vmem:[%s19818_s1 + $0x10b0] sm:$0xff]  ;;  %v565_v40 = vld [vmem:[%s19818_s1 + $0x1098] sm:$0xff] }
 0x3fa   :  { %11417 = vmatprep.subr.bf16.mxu1 %v13003_v61  ;;  %v13043_v61 = vcombine.high %v533_v50, %v537_v51  ;;  %v569_v43 = vld [vmem:[%s19818_s1 + $0x10b8] sm:$0xff] }
 0x3fc   :  { %10885 = vmatpush1.bf16.msra.mxu0 %v13000_v4  ;;  %v13040_v4 = vcombine.low %v532_v54, %v536_v47  ;;  %v572_v54 = vld [vmem:[%s19818_s1 + $0x10d0] sm:$0xff] }
 0x3fd   :  { %11418 = vmatpush1.bf16.msra.mxu1 %v13002_v11  ;;  %10886 = vmatprep.subr.bf16.mxu0 %v13009_v12  ;;  %v13042_v11 = vcombine.low %v533_v50, %v537_v51  ;;  %v13049_v12 = vcombine.high %v540_v9, %v544_v62  ;;  %v576_v47 = vld [vmem:[%s19818_s1 + $0x10f0] sm:$0xff]  ;;  %v577_v50 = vld [vmem:[%s19818_s1 + $0x10f8] sm:$0xff]  ;;  %v13072_v51 = vcombine.low %v564_v37, %v568_v39 }
 0x3fe   :  { %11419 = vmatprep.subr.bf16.mxu1 %v13011_v13  ;;  %v13051_v13 = vcombine.high %v541_v1, %v545_v45 }
 0x400   :  { %10887 = vmatpush1.bf16.msra.mxu0 %v13008_v19  ;;  %v13048_v19 = vcombine.low %v540_v9, %v544_v62  ;;  %v584_v9 = vld [vmem:[%s19818_s1 + $0x1130] sm:$0xff]  ;;  %v585_v62 = vld [vmem:[%s19818_s1 + $0x1138] sm:$0xff] }
 0x401   :  { %11420 = vmatpush1.bf16.msra.mxu1 %v13010_v22  ;;  %10888 = vmatprep.subr.bf16.mxu0 %v13017_v25  ;;  %v13050_v22 = vcombine.low %v541_v1, %v545_v45  ;;  %v13057_v25 = vcombine.high %v548_v14, %v552_v2  ;;  %v13080_v1 = vcombine.low %v572_v54, %v576_v47 }
 0x402   :  { %11421 = vmatprep.subr.bf16.mxu1 %v13019_v26  ;;  %v13059_v26 = vcombine.high %v549_v10, %v553_v17 }
 0x404   :  { %10889 = vmatpush1.bf16.msra.mxu0 %v13016_v41  ;;  %v13056_v41 = vcombine.low %v548_v14, %v552_v2  ;;  %v589_v14 = vld [vmem:[%s19818_s1 + $0x1158] sm:$0xff] }
 0x405   :  { %11422 = vmatpush1.bf16.msra.mxu1 %v13018_v34  ;;  %10890 = vmatprep.subr.bf16.mxu0 %v13025_v59  ;;  %v13058_v34 = vcombine.low %v549_v10, %v553_v17  ;;  %v13065_v59 = vcombine.high %v556_v29, %v560_v48  ;;  %v593_v2 = vld [vmem:[%s19818_s1 + $0x1178] sm:$0xff] }
 0x406   :  { %11423 = vmatprep.subr.bf16.mxu1 %v13027_v33  ;;  %v13067_v33 = vcombine.high %v557_v30, %v561_v32 }
 0x408   :  { %10891 = vmatpush1.bf16.msra.mxu0 %v13024_v46  ;;  %v13064_v46 = vcombine.low %v556_v29, %v560_v48  ;;  %v597_v29 = vld [vmem:[%s19818_s1 + $0x1198] sm:$0xff] }
 0x409   :  { %11424 = vmatpush1.bf16.msra.mxu1 %v13026_v49  ;;  %10892 = vmatprep.subr.bf16.mxu0 %v13033_v5  ;;  %v13066_v49 = vcombine.low %v557_v30, %v561_v32  ;;  %v13073_v5 = vcombine.high %v564_v37, %v568_v39  ;;  %v601_v48 = vld [vmem:[%s19818_s1 + $0x11b8] sm:$0xff]  ;;  %v13098_v32 = vcombine.low %v589_v14, %v593_v2 }
 0x40a   :  { %11425 = vmatprep.subr.bf16.mxu1 %v13035_v35  ;;  %v13075_v35 = vcombine.high %v565_v40, %v569_v43  ;;  %v605_v37 = vld [vmem:[%s19818_s1 + $0x11d8] sm:$0xff] }
 0x40b   :  { %v609_v39 = vld [vmem:[%s19818_s1 + $0x11f8] sm:$0xff] }
 0x40c   :  { %10893 = vmatpush1.bf16.msra.mxu0 %v13032_v53  ;;  %v13074_v53 = vcombine.low %v565_v40, %v569_v43  ;;  %v13106_v43 = vcombine.low %v597_v29, %v601_v48 }
 0x40d   :  { %11426 = vmatpush1.bf16.msra.mxu1 %v13034_v55  ;;  %10894 = vmatprep.subr.bf16.mxu0 %v13041_v56  ;;  %v13081_v55 = vcombine.high %v572_v54, %v576_v47  ;;  %v613_v54 = vld [vmem:[%s19818_s1 + $0x1218] sm:$0xff] }
 0x40e   :  { %11427 = vmatprep.subr.bf16.mxu1 %v13043_v61  ;;  %v580_v61 = vld [vmem:[%s19818_s1 + $0x1110] sm:$0xff]  ;;  %v617_v47 = vld [vmem:[%s19818_s1 + $0x1238] sm:$0xff] }
 0x40f   :  { %v13088_v10 = vcombine.low %v580_v61, %v584_v9 }
 0x410   :  { %10895 = vmatpush1.bf16.msra.mxu0 %v13040_v4  ;;  %v13089_v4 = vcombine.high %v580_v61, %v584_v9  ;;  %v621_v61 = vld [vmem:[%s19818_s1 + $0x1258] sm:$0xff] }
 0x411   :  { %11428 = vmatpush1.bf16.msra.mxu1 %v13042_v11  ;;  %10896 = vmatprep.subr.bf16.mxu0 %v13049_v12  ;;  %v588_v12 = vld [vmem:[%s19818_s1 + $0x1150] sm:$0xff]  ;;  %v625_v9 = vld [vmem:[%s19818_s1 + $0x1278] sm:$0xff] }
 0x412   :  { %11429 = vmatprep.subr.bf16.mxu1 %v13051_v13  ;;  %v592_v13 = vld [vmem:[%s19818_s1 + $0x1170] sm:$0xff] }
 0x413   :  { %v13096_v30 = vcombine.low %v588_v12, %v592_v13 }
 0x414   :  { %10897 = vmatpush1.bf16.msra.mxu0 %v13048_v19  ;;  %v13097_v19 = vcombine.high %v588_v12, %v592_v13  ;;  %v629_v12 = vld [vmem:[%s19818_s1 + $0x1298] sm:$0xff] }
 0x415   :  { %11430 = vmatpush1.bf16.msra.mxu1 %v13050_v22  ;;  %10907 = vmatprep.subr.bf16.mxu0 %v13057_v25  ;;  %v13099_v22 = vcombine.high %v589_v14, %v593_v2  ;;  %v596_v25 = vld [vmem:[%s19818_s1 + $0x1190] sm:$0xff]  ;;  %v633_v13 = vld [vmem:[%s19818_s1 + $0x12b8] sm:$0xff]  ;;  %v13130_v2 = vcombine.low %v621_v61, %v625_v9 }
 0x416   :  { %11440 = vmatprep.subr.bf16.mxu1 %v13059_v26  ;;  %v600_v26 = vld [vmem:[%s19818_s1 + $0x11b0] sm:$0xff] }
 0x417   :  { %10899 = vmatmul.mubr.bf16.vlgmr.msra.gmra.mrb[4].mxu0 %v15469_v20  ;;  %v13104_v40 = vcombine.low %v596_v25, %v600_v26 }
 0x418   :  { %10908 = vmatpush1.bf16.msra.mxu0 %v13056_v41  ;;  %11432 = vmatmul.mubr.bf16.vlgmr.msra.gmra.mrb[4].mxu1 %v15469_v20  ;;  %v573_v20 = vld [vmem:[%s19818_s1 + $0x10d8] sm:$0xff]  ;;  %v13105_v41 = vcombine.high %v596_v25, %v600_v26 }
 0x419   :  { %11441 = vmatpush1.bf16.msra.mxu1 %v13058_v34  ;;  %10909 = vmatprep.subr.bf16.mxu0 %v13065_v59  ;;  %v13083_v56 = vcombine.high %v573_v20, %v577_v50  ;;  %v13082_v45 = vcombine.low %v573_v20, %v577_v50  ;;  %v13107_v34 = vcombine.high %v597_v29, %v601_v48  ;;  %v604_v59 = vld [vmem:[%s19818_s1 + $0x11d0] sm:$0xff]  ;;  %v637_v25 = vld [vmem:[%s19818_s1 + $0x12d8] sm:$0xff] }
 0x41a   :  { %11442 = vmatprep.subr.bf16.mxu1 %v13067_v33  ;;  %10939 = vmatprep.mubr.bf16.mxu0 %v15484_v60  ;;  %v608_v33 = vld [vmem:[%s19818_s1 + $0x11f0] sm:$0xff]  ;;  %v13114_v50 = vcombine.low %v605_v37, %v609_v39  ;;  %v641_v26 = vld [vmem:[%s19818_s1 + $0x12f8] sm:$0xff]  ;;  %v13138_v48 = vcombine.low %v629_v12, %v633_v13 }
 0x41b   :  { %11472 = vmatprep.mubr.bf16.mxu1 %v15484_v60  ;;  %v581_v60 = vld [vmem:[%s19818_s1 + $0x1118] sm:$0xff]  ;;  %v13112_v20 = vcombine.low %v604_v59, %v608_v33 }
 0x41c   :  { %10910 = vmatpush1.bf16.msra.mxu0 %v13064_v46  ;;  %v13091_v11 = vcombine.high %v581_v60, %v585_v62  ;;  %v13090_v17 = vcombine.low %v581_v60, %v585_v62  ;;  %v13113_v46 = vcombine.high %v604_v59, %v608_v33  ;;  %v13122_v62 = vcombine.low %v613_v54, %v617_v47  ;;  %v645_v59 = vld [vmem:[%s19818_s1 + $0x1318] sm:$0xff] }
 0x41d   :  { %11443 = vmatpush1.bf16.msra.mxu1 %v13066_v49  ;;  %10911 = vmatprep.subr.bf16.mxu0 %v13073_v5  ;;  %v13115_v49 = vcombine.high %v605_v37, %v609_v39  ;;  %v612_v5 = vld [vmem:[%s19818_s1 + $0x1210] sm:$0xff]  ;;  %v649_v33 = vld [vmem:[%s19818_s1 + $0x1338] sm:$0xff]  ;;  %v13146_v39 = vcombine.low %v637_v25, %v641_v26 }
 0x41e   :  { %11444 = vmatprep.subr.bf16.mxu1 %v13075_v35  ;;  %v616_v35 = vld [vmem:[%s19818_s1 + $0x1230] sm:$0xff] }
 0x41f   :  { %v13120_v60 = vcombine.low %v612_v5, %v616_v35 }
 0x420   :  { %10912 = vmatpush1.bf16.msra.mxu0 %v13072_v51  ;;  %v13121_v51 = vcombine.high %v612_v5, %v616_v35  ;;  %v653_v5 = vld [vmem:[%s19818_s1 + $0x1358] sm:$0xff] }
 0x421   :  { %11445 = vmatpush1.bf16.msra.mxu1 %v13074_v53  ;;  %10913 = vmatprep.subr.bf16.mxu0 %v13081_v55  ;;  %v13123_v53 = vcombine.high %v613_v54, %v617_v47  ;;  %v620_v55 = vld [vmem:[%s19818_s1 + $0x1250] sm:$0xff]  ;;  %v657_v35 = vld [vmem:[%s19818_s1 + $0x1378] sm:$0xff]  ;;  %v13154_v47 = vcombine.low %v645_v59, %v649_v33 }
 0x422   :  { %11446 = vmatprep.subr.bf16.mxu1 %v13083_v56  ;;  %v624_v56 = vld [vmem:[%s19818_s1 + $0x1270] sm:$0xff] }
 0x423   :  { %v13128_v14 = vcombine.low %v620_v55, %v624_v56 }
 0x424   :  { %10914 = vmatpush1.bf16.msra.mxu0 %v13080_v1  ;;  %v13129_v1 = vcombine.high %v620_v55, %v624_v56  ;;  %v661_v55 = vld [vmem:[%s19818_s1 + $0x1398] sm:$0xff] }
 0x425   :  { %11447 = vmatpush1.bf16.msra.mxu1 %v13082_v45  ;;  %10915 = vmatprep.subr.bf16.mxu0 %v13089_v4  ;;  %v13131_v45 = vcombine.high %v621_v61, %v625_v9  ;;  %v628_v4 = vld [vmem:[%s19818_s1 + $0x1290] sm:$0xff]  ;;  %v665_v56 = vld [vmem:[%s19818_s1 + $0x13b8] sm:$0xff]  ;;  %v13162_v9 = vcombine.low %v653_v5, %v657_v35 }
 0x426   :  { %11448 = vmatprep.subr.bf16.mxu1 %v13091_v11  ;;  %v632_v11 = vld [vmem:[%s19818_s1 + $0x12b0] sm:$0xff] }
 0x427   :  { %v13136_v29 = vcombine.low %v628_v4, %v632_v11 }
 0x428   :  { %10916 = vmatpush1.bf16.msra.mxu0 %v13088_v10  ;;  %v13137_v10 = vcombine.high %v628_v4, %v632_v11  ;;  %v669_v4 = vld [vmem:[%s19818_s1 + $0x13d8] sm:$0xff] }
 0x429   :  { %11449 = vmatpush1.bf16.msra.mxu1 %v13090_v17  ;;  %10917 = vmatprep.subr.bf16.mxu0 %v13097_v19  ;;  %v13139_v17 = vcombine.high %v629_v12, %v633_v13  ;;  %v636_v19 = vld [vmem:[%s19818_s1 + $0x12d0] sm:$0xff]  ;;  %v673_v11 = vld [vmem:[%s19818_s1 + $0x13f8] sm:$0xff]  ;;  %v13170_v13 = vcombine.low %v661_v55, %v665_v56 }
 0x42a   :  { %11450 = vmatprep.subr.bf16.mxu1 %v13099_v22  ;;  %v640_v22 = vld [vmem:[%s19818_s1 + $0x12f0] sm:$0xff] }
 0x42b   :  { %v13144_v37 = vcombine.low %v636_v19, %v640_v22 }
 0x42c   :  { %10918 = vmatpush1.bf16.msra.mxu0 %v13096_v30  ;;  %v13145_v30 = vcombine.high %v636_v19, %v640_v22  ;;  %v677_v19 = vld [vmem:[%s19818_s1 + $0x1418] sm:$0xff] }
 0x42d   :  { %11451 = vmatpush1.bf16.msra.mxu1 %v13098_v32  ;;  %10919 = vmatprep.subr.bf16.mxu0 %v13105_v41  ;;  %v13147_v32 = vcombine.high %v637_v25, %v641_v26  ;;  %v644_v41 = vld [vmem:[%s19818_s1 + $0x1310] sm:$0xff]  ;;  %v681_v22 = vld [vmem:[%s19818_s1 + $0x1438] sm:$0xff]  ;;  %v13178_v26 = vcombine.low %v669_v4, %v673_v11 }
 0x42e   :  { %11452 = vmatprep.subr.bf16.mxu1 %v13107_v34  ;;  %v648_v34 = vld [vmem:[%s19818_s1 + $0x1330] sm:$0xff] }
 0x42f   :  { %v13152_v54 = vcombine.low %v644_v41, %v648_v34 }
 0x430   :  { %10920 = vmatpush1.bf16.msra.mxu0 %v13104_v40  ;;  %v13153_v40 = vcombine.high %v644_v41, %v648_v34  ;;  %v685_v41 = vld [vmem:[%s19818_s1 + $0x1458] sm:$0xff] }
 0x431   :  { %11453 = vmatpush1.bf16.msra.mxu1 %v13106_v43  ;;  %10921 = vmatprep.subr.bf16.mxu0 %v13113_v46  ;;  %v13155_v43 = vcombine.high %v645_v59, %v649_v33  ;;  %v652_v46 = vld [vmem:[%s19818_s1 + $0x1350] sm:$0xff]  ;;  %v689_v34 = vld [vmem:[%s19818_s1 + $0x1478] sm:$0xff]  ;;  %v13186_v33 = vcombine.low %v677_v19, %v681_v22 }
 0x432   :  { %11454 = vmatprep.subr.bf16.mxu1 %v13115_v49  ;;  %v656_v49 = vld [vmem:[%s19818_s1 + $0x1370] sm:$0xff] }
 0x433   :  { %v13160_v61 = vcombine.low %v652_v46, %v656_v49 }
 0x434   :  { %10922 = vmatpush1.bf16.msra.mxu0 %v13112_v20  ;;  %v13161_v20 = vcombine.high %v652_v46, %v656_v49  ;;  %v693_v46 = vld [vmem:[%s19818_s1 + $0x1498] sm:$0xff] }
 0x435   :  { %11455 = vmatpush1.bf16.msra.mxu1 %v13114_v50  ;;  %10923 = vmatprep.subr.bf16.mxu0 %v13121_v51  ;;  %v13163_v50 = vcombine.high %v653_v5, %v657_v35  ;;  %v660_v51 = vld [vmem:[%s19818_s1 + $0x1390] sm:$0xff]  ;;  %v697_v49 = vld [vmem:[%s19818_s1 + $0x14b8] sm:$0xff]  ;;  %v13194_v35 = vcombine.low %v685_v41, %v689_v34 }
 0x436   :  { %11456 = vmatprep.subr.bf16.mxu1 %v13123_v53  ;;  %v664_v53 = vld [vmem:[%s19818_s1 + $0x13b0] sm:$0xff] }
 0x437   :  { %v13168_v12 = vcombine.low %v660_v51, %v664_v53 }
 0x438   :  { %10924 = vmatpush1.bf16.msra.mxu0 %v13120_v60  ;;  %v13169_v60 = vcombine.high %v660_v51, %v664_v53  ;;  %v705_v51 = vld [vmem:[%s19818_s1 + $0x14f8] sm:$0xff] }
 0x439   :  { %11457 = vmatpush1.bf16.msra.mxu1 %v13122_v62  ;;  %10925 = vmatprep.subr.bf16.mxu0 %v13129_v1  ;;  %v13171_v62 = vcombine.high %v661_v55, %v665_v56  ;;  %v668_v1 = vld [vmem:[%s19818_s1 + $0x13d0] sm:$0xff]  ;;  %v13202_v55 = vcombine.low %v693_v46, %v697_v49 }
 0x43a   :  { %11458 = vmatprep.subr.bf16.mxu1 %v13131_v45  ;;  %v672_v45 = vld [vmem:[%s19818_s1 + $0x13f0] sm:$0xff] }
 0x43b   :  { %v13176_v25 = vcombine.low %v668_v1, %v672_v45 }
 0x43c   :  { %10926 = vmatpush1.bf16.msra.mxu0 %v13128_v14  ;;  %v13177_v14 = vcombine.high %v668_v1, %v672_v45 }
 0x43d   :  { %11459 = vmatpush1.bf16.msra.mxu1 %v13130_v2  ;;  %10927 = vmatprep.subr.bf16.mxu0 %v13137_v10  ;;  %v13179_v2 = vcombine.high %v669_v4, %v673_v11  ;;  %v676_v10 = vld [vmem:[%s19818_s1 + $0x1410] sm:$0xff] }
 0x43e   :  { %11460 = vmatprep.subr.bf16.mxu1 %v13139_v17  ;;  %v680_v17 = vld [vmem:[%s19818_s1 + $0x1430] sm:$0xff] }
 0x43f   :  { %v13184_v59 = vcombine.low %v676_v10, %v680_v17 }
 0x440   :  { %10928 = vmatpush1.bf16.msra.mxu0 %v13136_v29  ;;  %v13185_v29 = vcombine.high %v676_v10, %v680_v17 }
 0x441   :  { %11461 = vmatpush1.bf16.msra.mxu1 %v13138_v48  ;;  %10929 = vmatprep.subr.bf16.mxu0 %v13145_v30  ;;  %v13187_v48 = vcombine.high %v677_v19, %v681_v22  ;;  %v684_v30 = vld [vmem:[%s19818_s1 + $0x1450] sm:$0xff] }
 0x442   :  { %11462 = vmatprep.subr.bf16.mxu1 %v13147_v32  ;;  %v688_v32 = vld [vmem:[%s19818_s1 + $0x1470] sm:$0xff] }
 0x443   :  { %v13192_v5 = vcombine.low %v684_v30, %v688_v32 }
 0x444   :  { %10930 = vmatpush1.bf16.msra.mxu0 %v13144_v37  ;;  %v13193_v37 = vcombine.high %v684_v30, %v688_v32 }
 0x445   :  { %11463 = vmatpush1.bf16.msra.mxu1 %v13146_v39  ;;  %10931 = vmatprep.subr.bf16.mxu0 %v13153_v40  ;;  %v13195_v39 = vcombine.high %v685_v41, %v689_v34  ;;  %v692_v40 = vld [vmem:[%s19818_s1 + $0x1490] sm:$0xff] }
 0x446   :  { %11464 = vmatprep.subr.bf16.mxu1 %v13155_v43  ;;  %v696_v43 = vld [vmem:[%s19818_s1 + $0x14b0] sm:$0xff] }
 0x447   :  { %v13200_v53 = vcombine.low %v692_v40, %v696_v43 }
 0x448   :  { %10932 = vmatpush1.bf16.msra.mxu0 %v13152_v54  ;;  %v13201_v54 = vcombine.high %v692_v40, %v696_v43 }
 0x449   :  { %11465 = vmatpush1.bf16.msra.mxu1 %v13154_v47  ;;  %10933 = vmatprep.subr.bf16.mxu0 %v13161_v20  ;;  %v13203_v47 = vcombine.high %v693_v46, %v697_v49  ;;  %v700_v20 = vld [vmem:[%s19818_s1 + $0x14d0] sm:$0xff] }
 0x44a   :  { %11466 = vmatprep.subr.bf16.mxu1 %v13163_v50  ;;  %v704_v50 = vld [vmem:[%s19818_s1 + $0x14f0] sm:$0xff] }
 0x44b   :  { %v13209_v56 = vcombine.high %v700_v20, %v704_v50  ;;  %v13208_v1 = vcombine.low %v700_v20, %v704_v50 }
 0x44c   :  { %10934 = vmatpush1.bf16.msra.mxu0 %v13160_v61 }
 0x44d   :  { %11467 = vmatpush1.bf16.msra.mxu1 %v13162_v9  ;;  %10935 = vmatprep.subr.bf16.mxu0 %v13169_v60  ;;  %v708_v9 = vld [vmem:[%s19818_s1 + $0x1510] sm:$0xff] }
 0x44e   :  { %11468 = vmatprep.subr.bf16.mxu1 %v13171_v62  ;;  %v712_v60 = vld [vmem:[%s19818_s1 + $0x1530] sm:$0xff]  ;;  %v713_v62 = vld [vmem:[%s19818_s1 + $0x1538] sm:$0xff] }
 0x44f   :  { %v13217_v4 = vcombine.high %v708_v9, %v712_v60  ;;  %v13216_v10 = vcombine.low %v708_v9, %v712_v60 }
 0x450   :  { %10936 = vmatpush1.bf16.msra.mxu0 %v13168_v12  ;;  %v716_v12 = vld [vmem:[%s19818_s1 + $0x1550] sm:$0xff] }
 0x451   :  { %11469 = vmatpush1.bf16.msra.mxu1 %v13170_v13  ;;  %10937 = vmatprep.subr.bf16.mxu0 %v13177_v14  ;;  %v720_v13 = vld [vmem:[%s19818_s1 + $0x1570] sm:$0xff]  ;;  %v717_v14 = vld [vmem:[%s19818_s1 + $0x1558] sm:$0xff] }
 0x452   :  { %11470 = vmatprep.subr.bf16.mxu1 %v13179_v2  ;;  %v721_v2 = vld [vmem:[%s19818_s1 + $0x1578] sm:$0xff]  ;;  %v13225_v19 = vcombine.high %v716_v12, %v720_v13  ;;  %v13224_v30 = vcombine.low %v716_v12, %v720_v13 }
 0x453   :  { %v13227_v22 = vcombine.high %v717_v14, %v721_v2  ;;  %v13226_v32 = vcombine.low %v717_v14, %v721_v2 }
 0x454   :  { %10938 = vmatpush1.bf16.msra.mxu0 %v13176_v25  ;;  %v724_v25 = vld [vmem:[%s19818_s1 + $0x1590] sm:$0xff] }
 0x455   :  { %11471 = vmatpush1.bf16.msra.mxu1 %v13178_v26  ;;  %10948 = vmatprep.subr.bf16.mxu0 %v13185_v29  ;;  %v728_v26 = vld [vmem:[%s19818_s1 + $0x15b0] sm:$0xff]  ;;  %v725_v29 = vld [vmem:[%s19818_s1 + $0x1598] sm:$0xff] }
 0x456   :  { %11481 = vmatprep.subr.bf16.mxu1 %v13187_v48  ;;  %v729_v48 = vld [vmem:[%s19818_s1 + $0x15b8] sm:$0xff]  ;;  %v13233_v41 = vcombine.high %v724_v25, %v728_v26  ;;  %v13232_v40 = vcombine.low %v724_v25, %v728_v26 }
 0x457   :  { %10940 = vmatmul.mubr.bf16.vlgmr.msra.gmra.mrb[4].mxu0 %v15672_v52  ;;  %v13235_v34 = vcombine.high %v725_v29, %v729_v48  ;;  %v13234_v43 = vcombine.low %v725_v29, %v729_v48 }
 0x458   :  { %10949 = vmatpush1.bf16.msra.mxu0 %v13184_v59  ;;  %11473 = vmatmul.mubr.bf16.vlgmr.msra.gmra.mrb[4].mxu1 %v15672_v52  ;;  %v701_v52 = vld [vmem:[%s19818_s1 + $0x14d8] sm:$0xff]  ;;  %v732_v59 = vld [vmem:[%s19818_s1 + $0x15d0] sm:$0xff] }
 0x459   :  { %11482 = vmatpush1.bf16.msra.mxu1 %v13186_v33  ;;  %10950 = vmatprep.subr.bf16.mxu0 %v13193_v37  ;;  %v13211_v61 = vcombine.high %v701_v52, %v705_v51  ;;  %v13210_v45 = vcombine.low %v701_v52, %v705_v51  ;;  %v736_v33 = vld [vmem:[%s19818_s1 + $0x15f0] sm:$0xff]  ;;  %v733_v37 = vld [vmem:[%s19818_s1 + $0x15d8] sm:$0xff] }
 0x45a   :  { %11483 = vmatprep.subr.bf16.mxu1 %v13195_v39  ;;  %10980 = vmatprep.mubr.bf16.mxu0 %v15688_v63  ;;  %v737_v39 = vld [vmem:[%s19818_s1 + $0x15f8] sm:$0xff]  ;;  %v13241_v46 = vcombine.high %v732_v59, %v736_v33  ;;  %v13240_v20 = vcombine.low %v732_v59, %v736_v33 }
 0x45b   :  { %11513 = vmatprep.mubr.bf16.mxu1 %v15688_v63  ;;  %v709_v63 = vld [vmem:[%s19818_s1 + $0x1518] sm:$0xff]  ;;  %v13243_v49 = vcombine.high %v733_v37, %v737_v39  ;;  %v13242_v50 = vcombine.low %v733_v37, %v737_v39 }
 0x45c   :  { %10951 = vmatpush1.bf16.msra.mxu0 %v13192_v5  ;;  %v13219_v11 = vcombine.high %v709_v63, %v713_v62  ;;  %v13218_v17 = vcombine.low %v709_v63, %v713_v62  ;;  %v740_v5 = vld [vmem:[%s19818_s1 + $0x1610] sm:$0xff] }
 0x45d   :  { %11484 = vmatpush1.bf16.msra.mxu1 %v13194_v35  ;;  %10952 = vmatprep.subr.bf16.mxu0 %v13201_v54  ;;  %v744_v35 = vld [vmem:[%s19818_s1 + $0x1630] sm:$0xff]  ;;  %v741_v54 = vld [vmem:[%s19818_s1 + $0x1618] sm:$0xff] }
 0x45e   :  { %11485 = vmatprep.subr.bf16.mxu1 %v13203_v47  ;;  %v745_v47 = vld [vmem:[%s19818_s1 + $0x1638] sm:$0xff]  ;;  %v13249_v52 = vcombine.high %v740_v5, %v744_v35  ;;  %v13248_v9 = vcombine.low %v740_v5, %v744_v35 }
 0x45f   :  { %v13251_v51 = vcombine.high %v741_v54, %v745_v47  ;;  %v13250_v60 = vcombine.low %v741_v54, %v745_v47 }
 0x460   :  { %10953 = vmatpush1.bf16.msra.mxu0 %v13200_v53  ;;  %v748_v53 = vld [vmem:[%s19818_s1 + $0x1650] sm:$0xff] }
 0x461   :  { %11486 = vmatpush1.bf16.msra.mxu1 %v13202_v55  ;;  %10954 = vmatprep.subr.bf16.mxu0 %v13209_v56  ;;  %v752_v55 = vld [vmem:[%s19818_s1 + $0x1670] sm:$0xff]  ;;  %v749_v56 = vld [vmem:[%s19818_s1 + $0x1658] sm:$0xff] }
 0x462   :  { %11487 = vmatprep.subr.bf16.mxu1 %v13211_v61  ;;  %v753_v61 = vld [vmem:[%s19818_s1 + $0x1678] sm:$0xff]  ;;  %v13257_v63 = vcombine.high %v748_v53, %v752_v55  ;;  %v13256_v12 = vcombine.low %v748_v53, %v752_v55 }
 0x463   :  { %v13259_v62 = vcombine.high %v749_v56, %v753_v61  ;;  %v13258_v13 = vcombine.low %v749_v56, %v753_v61 }
 0x464   :  { %10955 = vmatpush1.bf16.msra.mxu0 %v13208_v1  ;;  %v756_v1 = vld [vmem:[%s19818_s1 + $0x1690] sm:$0xff] }
 0x465   :  { %11488 = vmatpush1.bf16.msra.mxu1 %v13210_v45  ;;  %10956 = vmatprep.subr.bf16.mxu0 %v13217_v4  ;;  %v760_v45 = vld [vmem:[%s19818_s1 + $0x16b0] sm:$0xff]  ;;  %v757_v4 = vld [vmem:[%s19818_s1 + $0x1698] sm:$0xff] }
 0x466   :  { %11489 = vmatprep.subr.bf16.mxu1 %v13219_v11  ;;  %v761_v11 = vld [vmem:[%s19818_s1 + $0x16b8] sm:$0xff]  ;;  %v13265_v14 = vcombine.high %v756_v1, %v760_v45  ;;  %v13264_v25 = vcombine.low %v756_v1, %v760_v45 }
 0x467   :  { %v13267_v2 = vcombine.high %v757_v4, %v761_v11  ;;  %v13266_v26 = vcombine.low %v757_v4, %v761_v11 }
 0x468   :  { %10957 = vmatpush1.bf16.msra.mxu0 %v13216_v10  ;;  %v764_v10 = vld [vmem:[%s19818_s1 + $0x16d0] sm:$0xff] }
 0x469   :  { %11490 = vmatpush1.bf16.msra.mxu1 %v13218_v17  ;;  %10958 = vmatprep.subr.bf16.mxu0 %v13225_v19  ;;  %v768_v17 = vld [vmem:[%s19818_s1 + $0x16f0] sm:$0xff]  ;;  %v765_v19 = vld [vmem:[%s19818_s1 + $0x16d8] sm:$0xff] }
 0x46a   :  { %11491 = vmatprep.subr.bf16.mxu1 %v13227_v22  ;;  %v769_v22 = vld [vmem:[%s19818_s1 + $0x16f8] sm:$0xff]  ;;  %v13273_v29 = vcombine.high %v764_v10, %v768_v17  ;;  %v13272_v59 = vcombine.low %v764_v10, %v768_v17 }
 0x46b   :  { %v13275_v48 = vcombine.high %v765_v19, %v769_v22  ;;  %v13274_v33 = vcombine.low %v765_v19, %v769_v22 }
 0x46c   :  { %10959 = vmatpush1.bf16.msra.mxu0 %v13224_v30  ;;  %v772_v30 = vld [vmem:[%s19818_s1 + $0x1710] sm:$0xff] }
 0x46d   :  { %11492 = vmatpush1.bf16.msra.mxu1 %v13226_v32  ;;  %10960 = vmatprep.subr.bf16.mxu0 %v13233_v41  ;;  %v776_v32 = vld [vmem:[%s19818_s1 + $0x1730] sm:$0xff]  ;;  %v773_v41 = vld [vmem:[%s19818_s1 + $0x1718] sm:$0xff] }
 0x46e   :  { %11493 = vmatprep.subr.bf16.mxu1 %v13235_v34  ;;  %v777_v34 = vld [vmem:[%s19818_s1 + $0x1738] sm:$0xff]  ;;  %v13281_v37 = vcombine.high %v772_v30, %v776_v32  ;;  %v13280_v5 = vcombine.low %v772_v30, %v776_v32 }
 0x46f   :  { %v13283_v39 = vcombine.high %v773_v41, %v777_v34  ;;  %v13282_v35 = vcombine.low %v773_v41, %v777_v34 }
 0x470   :  { %10961 = vmatpush1.bf16.msra.mxu0 %v13232_v40  ;;  %v780_v40 = vld [vmem:[%s19818_s1 + $0x1750] sm:$0xff] }
 0x471   :  { %11494 = vmatpush1.bf16.msra.mxu1 %v13234_v43  ;;  %10962 = vmatprep.subr.bf16.mxu0 %v13241_v46  ;;  %v784_v43 = vld [vmem:[%s19818_s1 + $0x1770] sm:$0xff]  ;;  %v781_v46 = vld [vmem:[%s19818_s1 + $0x1758] sm:$0xff] }
 0x472   :  { %11495 = vmatprep.subr.bf16.mxu1 %v13243_v49  ;;  %v785_v49 = vld [vmem:[%s19818_s1 + $0x1778] sm:$0xff]  ;;  %v13289_v54 = vcombine.high %v780_v40, %v784_v43  ;;  %v13288_v53 = vcombine.low %v780_v40, %v784_v43 }
 0x473   :  { %v13291_v47 = vcombine.high %v781_v46, %v785_v49  ;;  %v13290_v55 = vcombine.low %v781_v46, %v785_v49 }
 0x474   :  { %10963 = vmatpush1.bf16.msra.mxu0 %v13240_v20  ;;  %v788_v20 = vld [vmem:[%s19818_s1 + $0x1790] sm:$0xff] }
 0x475   :  { %11496 = vmatpush1.bf16.msra.mxu1 %v13242_v50  ;;  %10964 = vmatprep.subr.bf16.mxu0 %v13249_v52  ;;  %v792_v50 = vld [vmem:[%s19818_s1 + $0x17b0] sm:$0xff]  ;;  %v789_v52 = vld [vmem:[%s19818_s1 + $0x1798] sm:$0xff] }
 0x476   :  { %11497 = vmatprep.subr.bf16.mxu1 %v13251_v51  ;;  %v793_v51 = vld [vmem:[%s19818_s1 + $0x17b8] sm:$0xff]  ;;  %v13297_v56 = vcombine.high %v788_v20, %v792_v50  ;;  %v13296_v1 = vcombine.low %v788_v20, %v792_v50 }
 0x477   :  { %v13299_v61 = vcombine.high %v789_v52, %v793_v51  ;;  %v13298_v45 = vcombine.low %v789_v52, %v793_v51  ;;  %v836_v51 = vld [vmem:[%s19818_s1 + $0x1910] sm:$0xff] }
 0x478   :  { %10965 = vmatpush1.bf16.msra.mxu0 %v13248_v9  ;;  %v796_v9 = vld [vmem:[%s19818_s1 + $0x17d0] sm:$0xff] }
 0x479   :  { %11498 = vmatpush1.bf16.msra.mxu1 %v13250_v60  ;;  %10966 = vmatprep.subr.bf16.mxu0 %v13257_v63  ;;  %v800_v60 = vld [vmem:[%s19818_s1 + $0x17f0] sm:$0xff]  ;;  %v797_v63 = vld [vmem:[%s19818_s1 + $0x17d8] sm:$0xff] }
 0x47a   :  { %11499 = vmatprep.subr.bf16.mxu1 %v13259_v62  ;;  %v801_v62 = vld [vmem:[%s19818_s1 + $0x17f8] sm:$0xff]  ;;  %v13305_v4 = vcombine.high %v796_v9, %v800_v60  ;;  %v13304_v10 = vcombine.low %v796_v9, %v800_v60 }
 0x47b   :  { %v13307_v11 = vcombine.high %v797_v63, %v801_v62  ;;  %v13306_v17 = vcombine.low %v797_v63, %v801_v62  ;;  %v844_v63 = vld [vmem:[%s19818_s1 + $0x1950] sm:$0xff] }
 0x47c   :  { %10967 = vmatpush1.bf16.msra.mxu0 %v13256_v12  ;;  %v804_v12 = vld [vmem:[%s19818_s1 + $0x1810] sm:$0xff] }
 0x47d   :  { %11500 = vmatpush1.bf16.msra.mxu1 %v13258_v13  ;;  %10968 = vmatprep.subr.bf16.mxu0 %v13265_v14  ;;  %v808_v13 = vld [vmem:[%s19818_s1 + $0x1830] sm:$0xff]  ;;  %v805_v14 = vld [vmem:[%s19818_s1 + $0x1818] sm:$0xff] }
 0x47e   :  { %11501 = vmatprep.subr.bf16.mxu1 %v13267_v2  ;;  %v809_v2 = vld [vmem:[%s19818_s1 + $0x1838] sm:$0xff]  ;;  %v13313_v19 = vcombine.high %v804_v12, %v808_v13  ;;  %v13312_v30 = vcombine.low %v804_v12, %v808_v13  ;;  %v848_v62 = vld [vmem:[%s19818_s1 + $0x1970] sm:$0xff] }
 0x47f   :  { %v13315_v22 = vcombine.high %v805_v14, %v809_v2  ;;  %v13314_v32 = vcombine.low %v805_v14, %v809_v2  ;;  %v13353_v12 = vcombine.high %v844_v63, %v848_v62  ;;  %v852_v14 = vld [vmem:[%s19818_s1 + $0x1990] sm:$0xff] }
 0x480   :  { %10969 = vmatpush1.bf16.msra.mxu0 %v13264_v25  ;;  %v812_v25 = vld [vmem:[%s19818_s1 + $0x1850] sm:$0xff] }
 0x481   :  { %11502 = vmatpush1.bf16.msra.mxu1 %v13266_v26  ;;  %10970 = vmatprep.subr.bf16.mxu0 %v13273_v29  ;;  %v816_v26 = vld [vmem:[%s19818_s1 + $0x1870] sm:$0xff]  ;;  %v813_v29 = vld [vmem:[%s19818_s1 + $0x1858] sm:$0xff] }
 0x482   :  { %11503 = vmatprep.subr.bf16.mxu1 %v13275_v48  ;;  %v817_v48 = vld [vmem:[%s19818_s1 + $0x1878] sm:$0xff]  ;;  %v13321_v41 = vcombine.high %v812_v25, %v816_v26  ;;  %v13320_v40 = vcombine.low %v812_v25, %v816_v26  ;;  %v856_v2 = vld [vmem:[%s19818_s1 + $0x19b0] sm:$0xff] }
 0x483   :  { %v13323_v34 = vcombine.high %v813_v29, %v817_v48  ;;  %v13322_v43 = vcombine.low %v813_v29, %v817_v48  ;;  %v13361_v25 = vcombine.high %v852_v14, %v856_v2  ;;  %v860_v29 = vld [vmem:[%s19818_s1 + $0x19d0] sm:$0xff] }
 0x484   :  { %10971 = vmatpush1.bf16.msra.mxu0 %v13272_v59  ;;  %v820_v59 = vld [vmem:[%s19818_s1 + $0x1890] sm:$0xff] }
 0x485   :  { %11504 = vmatpush1.bf16.msra.mxu1 %v13274_v33  ;;  %10972 = vmatprep.subr.bf16.mxu0 %v13281_v37  ;;  %v824_v33 = vld [vmem:[%s19818_s1 + $0x18b0] sm:$0xff]  ;;  %v821_v37 = vld [vmem:[%s19818_s1 + $0x1898] sm:$0xff] }
 0x486   :  { %11505 = vmatprep.subr.bf16.mxu1 %v13283_v39  ;;  %v825_v39 = vld [vmem:[%s19818_s1 + $0x18b8] sm:$0xff]  ;;  %v13329_v46 = vcombine.high %v820_v59, %v824_v33  ;;  %v864_v48 = vld [vmem:[%s19818_s1 + $0x19f0] sm:$0xff] }
 0x487   :  { %v13331_v49 = vcombine.high %v821_v37, %v825_v39  ;;  %v13330_v20 = vcombine.low %v821_v37, %v825_v39  ;;  %v868_v37 = vld [vmem:[%s19818_s1 + $0x1a10] sm:$0xff] }
 0x488   :  { %10973 = vmatpush1.bf16.msra.mxu0 %v13280_v5  ;;  %v828_v5 = vld [vmem:[%s19818_s1 + $0x18d0] sm:$0xff] }
 0x489   :  { %11506 = vmatpush1.bf16.msra.mxu1 %v13282_v35  ;;  %10974 = vmatprep.subr.bf16.mxu0 %v13289_v54  ;;  %v832_v35 = vld [vmem:[%s19818_s1 + $0x18f0] sm:$0xff]  ;;  %v833_v54 = vld [vmem:[%s19818_s1 + $0x18f8] sm:$0xff] }
 0x48a   :  { %11507 = vmatprep.subr.bf16.mxu1 %v13291_v47  ;;  %v13328_v47 = vcombine.low %v820_v59, %v824_v33  ;;  %v13337_v50 = vcombine.high %v828_v5, %v832_v35  ;;  %v13369_v59 = vcombine.high %v860_v29, %v864_v48  ;;  %v872_v39 = vld [vmem:[%s19818_s1 + $0x1a30] sm:$0xff] }
 0x48c   :  { %10975 = vmatpush1.bf16.msra.mxu0 %v13288_v53  ;;  %v840_v53 = vld [vmem:[%s19818_s1 + $0x1930] sm:$0xff] }
 0x48d   :  { %11508 = vmatpush1.bf16.msra.mxu1 %v13290_v55  ;;  %10976 = vmatprep.subr.bf16.mxu0 %v13297_v56  ;;  %v841_v55 = vld [vmem:[%s19818_s1 + $0x1938] sm:$0xff]  ;;  %v13336_v56 = vcombine.low %v828_v5, %v832_v35  ;;  %v13345_v9 = vcombine.high %v836_v51, %v840_v53  ;;  %v13377_v5 = vcombine.high %v868_v37, %v872_v39 }
 0x48e   :  { %11509 = vmatprep.subr.bf16.mxu1 %v13299_v61 }
 0x490   :  { %10977 = vmatpush1.bf16.msra.mxu0 %v13296_v1  ;;  %v845_v1 = vld [vmem:[%s19818_s1 + $0x1958] sm:$0xff] }
 0x491   :  { %11510 = vmatpush1.bf16.msra.mxu1 %v13298_v45  ;;  %10978 = vmatprep.subr.bf16.mxu0 %v13305_v4  ;;  %v849_v45 = vld [vmem:[%s19818_s1 + $0x1978] sm:$0xff]  ;;  %v13344_v4 = vcombine.low %v836_v51, %v840_v53 }
 0x492   :  { %11511 = vmatprep.subr.bf16.mxu1 %v13307_v11  ;;  %v13355_v13 = vcombine.high %v845_v1, %v849_v45 }
 0x494   :  { %10979 = vmatpush1.bf16.msra.mxu0 %v13304_v10  ;;  %v853_v10 = vld [vmem:[%s19818_s1 + $0x1998] sm:$0xff] }
 0x495   :  { %11512 = vmatpush1.bf16.msra.mxu1 %v13306_v17  ;;  %10989 = vmatprep.subr.bf16.mxu0 %v13313_v19  ;;  %v857_v17 = vld [vmem:[%s19818_s1 + $0x19b8] sm:$0xff]  ;;  %v13352_v19 = vcombine.low %v844_v63, %v848_v62 }
 0x496   :  { %11522 = vmatprep.subr.bf16.mxu1 %v13315_v22  ;;  %v13354_v22 = vcombine.low %v845_v1, %v849_v45  ;;  %v13363_v26 = vcombine.high %v853_v10, %v857_v17  ;;  %v892_v1 = vld [vmem:[%s19818_s1 + $0x1ad0] sm:$0xff] }
 0x497   :  { %10981 = vmatmul.mubr.bf16.vlgmr.msra.gmra.mrb[4].mxu0 %v15883_v28  ;;  %v896_v45 = vld [vmem:[%s19818_s1 + $0x1af0] sm:$0xff] }
 0x498   :  { %10990 = vmatpush1.bf16.msra.mxu0 %v13312_v30  ;;  %11514 = vmatmul.mubr.bf16.vlgmr.msra.gmra.mrb[4].mxu1 %v15883_v28  ;;  %v829_v28 = vld [vmem:[%s19818_s1 + $0x18d8] sm:$0xff] }
 0x499   :  { %11523 = vmatpush1.bf16.msra.mxu1 %v13314_v32  ;;  %10991 = vmatprep.subr.bf16.mxu0 %v13321_v41  ;;  %v13339_v52 = vcombine.high %v829_v28, %v833_v54  ;;  %v13338_v61 = vcombine.low %v829_v28, %v833_v54  ;;  %v861_v30 = vld [vmem:[%s19818_s1 + $0x19d8] sm:$0xff]  ;;  %v13360_v41 = vcombine.low %v852_v14, %v856_v2  ;;  %v876_v28 = vld [vmem:[%s19818_s1 + $0x1a50] sm:$0xff] }
 0x49a   :  { %11524 = vmatprep.subr.bf16.mxu1 %v13323_v34  ;;  %11021 = vmatprep.mubr.bf16.mxu0 %v15898_v38  ;;  %v865_v32 = vld [vmem:[%s19818_s1 + $0x19f8] sm:$0xff]  ;;  %v13362_v34 = vcombine.low %v853_v10, %v857_v17  ;;  %v880_v54 = vld [vmem:[%s19818_s1 + $0x1a70] sm:$0xff]  ;;  %v13401_v14 = vcombine.high %v892_v1, %v896_v45 }
 0x49b   :  { %11554 = vmatprep.mubr.bf16.mxu1 %v15898_v38  ;;  %v837_v38 = vld [vmem:[%s19818_s1 + $0x1918] sm:$0xff]  ;;  %v13371_v33 = vcombine.high %v861_v30, %v865_v32  ;;  %v13385_v51 = vcombine.high %v876_v28, %v880_v54  ;;  %v900_v10 = vld [vmem:[%s19818_s1 + $0x1b10] sm:$0xff] }
 0x49c   :  { %10992 = vmatpush1.bf16.msra.mxu0 %v13320_v40  ;;  %v13347_v60 = vcombine.high %v837_v38, %v841_v55  ;;  %v13346_v11 = vcombine.low %v837_v38, %v841_v55  ;;  %v869_v40 = vld [vmem:[%s19818_s1 + $0x1a18] sm:$0xff]  ;;  %v884_v38 = vld [vmem:[%s19818_s1 + $0x1a90] sm:$0xff] }
 0x49d   :  { %11525 = vmatpush1.bf16.msra.mxu1 %v13322_v43  ;;  %10993 = vmatprep.subr.bf16.mxu0 %v13329_v46  ;;  %v873_v43 = vld [vmem:[%s19818_s1 + $0x1a38] sm:$0xff]  ;;  %v13368_v46 = vcombine.low %v860_v29, %v864_v48  ;;  %v888_v55 = vld [vmem:[%s19818_s1 + $0x1ab0] sm:$0xff] }
 0x49e   :  { %11526 = vmatprep.subr.bf16.mxu1 %v13331_v49  ;;  %v13370_v49 = vcombine.low %v861_v30, %v865_v32  ;;  %v13379_v35 = vcombine.high %v869_v40, %v873_v43  ;;  %v13393_v63 = vcombine.high %v884_v38, %v888_v55  ;;  %v904_v17 = vld [vmem:[%s19818_s1 + $0x1b30] sm:$0xff] }
 0x49f   :  { %v13409_v29 = vcombine.high %v900_v10, %v904_v17  ;;  %v908_v30 = vld [vmem:[%s19818_s1 + $0x1b50] sm:$0xff] }
 0x4a0   :  { %10994 = vmatpush1.bf16.msra.mxu0 %v13328_v47  ;;  %v877_v47 = vld [vmem:[%s19818_s1 + $0x1a58] sm:$0xff]  ;;  %v912_v32 = vld [vmem:[%s19818_s1 + $0x1b70] sm:$0xff] }
 0x4a1   :  { %11527 = vmatpush1.bf16.msra.mxu1 %v13330_v20  ;;  %10995 = vmatprep.subr.bf16.mxu0 %v13337_v50  ;;  %v881_v20 = vld [vmem:[%s19818_s1 + $0x1a78] sm:$0xff]  ;;  %v13376_v50 = vcombine.low %v868_v37, %v872_v39  ;;  %v13417_v37 = vcombine.high %v908_v30, %v912_v32 }
 0x4a2   :  { %11528 = vmatprep.subr.bf16.mxu1 %v13339_v52  ;;  %v13378_v52 = vcombine.low %v869_v40, %v873_v43  ;;  %v13387_v53 = vcombine.high %v877_v47, %v881_v20  ;;  %v916_v40 = vld [vmem:[%s19818_s1 + $0x1b90] sm:$0xff] }
 0x4a3   :  { %v920_v43 = vld [vmem:[%s19818_s1 + $0x1bb0] sm:$0xff] }
 0x4a4   :  { %10996 = vmatpush1.bf16.msra.mxu0 %v13336_v56  ;;  %v885_v56 = vld [vmem:[%s19818_s1 + $0x1a98] sm:$0xff] }
 0x4a5   :  { %11529 = vmatpush1.bf16.msra.mxu1 %v13338_v61  ;;  %10997 = vmatprep.subr.bf16.mxu0 %v13345_v9  ;;  %v889_v61 = vld [vmem:[%s19818_s1 + $0x1ab8] sm:$0xff]  ;;  %v13384_v9 = vcombine.low %v876_v28, %v880_v54  ;;  %v13425_v28 = vcombine.high %v916_v40, %v920_v43 }
 0x4a6   :  { %11530 = vmatprep.subr.bf16.mxu1 %v13347_v60  ;;  %v13386_v60 = vcombine.low %v877_v47, %v881_v20  ;;  %v13395_v62 = vcombine.high %v885_v56, %v889_v61  ;;  %v924_v47 = vld [vmem:[%s19818_s1 + $0x1bd0] sm:$0xff] }
 0x4a7   :  { %v928_v20 = vld [vmem:[%s19818_s1 + $0x1bf0] sm:$0xff] }
 0x4a8   :  { %10998 = vmatpush1.bf16.msra.mxu0 %v13344_v4  ;;  %v893_v4 = vld [vmem:[%s19818_s1 + $0x1ad8] sm:$0xff] }
 0x4a9   :  { %11531 = vmatpush1.bf16.msra.mxu1 %v13346_v11  ;;  %10999 = vmatprep.subr.bf16.mxu0 %v13353_v12  ;;  %v897_v11 = vld [vmem:[%s19818_s1 + $0x1af8] sm:$0xff]  ;;  %v13392_v12 = vcombine.low %v884_v38, %v888_v55  ;;  %v13433_v38 = vcombine.high %v924_v47, %v928_v20 }
 0x4aa   :  { %11532 = vmatprep.subr.bf16.mxu1 %v13355_v13  ;;  %v13394_v13 = vcombine.low %v885_v56, %v889_v61  ;;  %v13403_v2 = vcombine.high %v893_v4, %v897_v11  ;;  %v932_v56 = vld [vmem:[%s19818_s1 + $0x1c10] sm:$0xff] }
 0x4ab   :  { %v936_v61 = vld [vmem:[%s19818_s1 + $0x1c30] sm:$0xff] }
 0x4ac   :  { %11000 = vmatpush1.bf16.msra.mxu0 %v13352_v19  ;;  %v901_v19 = vld [vmem:[%s19818_s1 + $0x1b18] sm:$0xff] }
 0x4ad   :  { %11533 = vmatpush1.bf16.msra.mxu1 %v13354_v22  ;;  %11001 = vmatprep.subr.bf16.mxu0 %v13361_v25  ;;  %v905_v22 = vld [vmem:[%s19818_s1 + $0x1b38] sm:$0xff]  ;;  %v13400_v25 = vcombine.low %v892_v1, %v896_v45  ;;  %v13441_v1 = vcombine.high %v932_v56, %v936_v61 }
 0x4ae   :  { %11534 = vmatprep.subr.bf16.mxu1 %v13363_v26  ;;  %v13402_v26 = vcombine.low %v893_v4, %v897_v11  ;;  %v13411_v48 = vcombine.high %v901_v19, %v905_v22  ;;  %v940_v4 = vld [vmem:[%s19818_s1 + $0x1c50] sm:$0xff] }
 0x4af   :  { %v944_v11 = vld [vmem:[%s19818_s1 + $0x1c70] sm:$0xff] }
 0x4b0   :  { %11002 = vmatpush1.bf16.msra.mxu0 %v13360_v41  ;;  %v909_v41 = vld [vmem:[%s19818_s1 + $0x1b58] sm:$0xff] }
 0x4b1   :  { %11535 = vmatpush1.bf16.msra.mxu1 %v13362_v34  ;;  %11003 = vmatprep.subr.bf16.mxu0 %v13369_v59  ;;  %v913_v34 = vld [vmem:[%s19818_s1 + $0x1b78] sm:$0xff]  ;;  %v13408_v59 = vcombine.low %v900_v10, %v904_v17  ;;  %v13449_v10 = vcombine.high %v940_v4, %v944_v11 }
 0x4b2   :  { %11536 = vmatprep.subr.bf16.mxu1 %v13371_v33  ;;  %v13410_v33 = vcombine.low %v901_v19, %v905_v22  ;;  %v13419_v39 = vcombine.high %v909_v41, %v913_v34  ;;  %v948_v19 = vld [vmem:[%s19818_s1 + $0x1c90] sm:$0xff] }
 0x4b3   :  { %v952_v22 = vld [vmem:[%s19818_s1 + $0x1cb0] sm:$0xff] }
 0x4b4   :  { %11004 = vmatpush1.bf16.msra.mxu0 %v13368_v46  ;;  %v917_v46 = vld [vmem:[%s19818_s1 + $0x1b98] sm:$0xff] }
 0x4b5   :  { %11537 = vmatpush1.bf16.msra.mxu1 %v13370_v49  ;;  %11005 = vmatprep.subr.bf16.mxu0 %v13377_v5  ;;  %v921_v49 = vld [vmem:[%s19818_s1 + $0x1bb8] sm:$0xff]  ;;  %v13416_v5 = vcombine.low %v908_v30, %v912_v32  ;;  %v13457_v30 = vcombine.high %v948_v19, %v952_v22 }
 0x4b6   :  { %11538 = vmatprep.subr.bf16.mxu1 %v13379_v35  ;;  %v13418_v35 = vcombine.low %v909_v41, %v913_v34  ;;  %v13427_v54 = vcombine.high %v917_v46, %v921_v49  ;;  %v956_v41 = vld [vmem:[%s19818_s1 + $0x1cd0] sm:$0xff] }
 0x4b7   :  { %v960_v34 = vld [vmem:[%s19818_s1 + $0x1cf0] sm:$0xff] }
 0x4b8   :  { %11006 = vmatpush1.bf16.msra.mxu0 %v13376_v50  ;;  %v925_v50 = vld [vmem:[%s19818_s1 + $0x1bd8] sm:$0xff] }
 0x4b9   :  { %11539 = vmatpush1.bf16.msra.mxu1 %v13378_v52  ;;  %11007 = vmatprep.subr.bf16.mxu0 %v13385_v51  ;;  %v929_v52 = vld [vmem:[%s19818_s1 + $0x1bf8] sm:$0xff]  ;;  %v13424_v51 = vcombine.low %v916_v40, %v920_v43  ;;  %v964_v43 = vld [vmem:[%s19818_s1 + $0x1d10] sm:$0xff] }
 0x4ba   :  { %11540 = vmatprep.subr.bf16.mxu1 %v13387_v53  ;;  %v13426_v53 = vcombine.low %v917_v46, %v921_v49  ;;  %v13435_v55 = vcombine.high %v925_v50, %v929_v52  ;;  %v968_v46 = vld [vmem:[%s19818_s1 + $0x1d30] sm:$0xff]  ;;  %v969_v49 = vld [vmem:[%s19818_s1 + $0x1d38] sm:$0xff] }
 0x4bc   :  { %11008 = vmatpush1.bf16.msra.mxu0 %v13384_v9  ;;  %v933_v9 = vld [vmem:[%s19818_s1 + $0x1c18] sm:$0xff] }
 0x4bd   :  { %11541 = vmatpush1.bf16.msra.mxu1 %v13386_v60  ;;  %11009 = vmatprep.subr.bf16.mxu0 %v13393_v63  ;;  %v937_v60 = vld [vmem:[%s19818_s1 + $0x1c38] sm:$0xff]  ;;  %v13432_v63 = vcombine.low %v924_v47, %v928_v20  ;;  %v972_v47 = vld [vmem:[%s19818_s1 + $0x1d50] sm:$0xff] }
 0x4be   :  { %11542 = vmatprep.subr.bf16.mxu1 %v13395_v62  ;;  %v13434_v62 = vcombine.low %v925_v50, %v929_v52  ;;  %v13443_v45 = vcombine.high %v933_v9, %v937_v60  ;;  %v976_v20 = vld [vmem:[%s19818_s1 + $0x1d70] sm:$0xff]  ;;  %v973_v50 = vld [vmem:[%s19818_s1 + $0x1d58] sm:$0xff] }
 0x4bf   :  { %v977_v52 = vld [vmem:[%s19818_s1 + $0x1d78] sm:$0xff] }
 0x4c0   :  { %11010 = vmatpush1.bf16.msra.mxu0 %v13392_v12  ;;  %v941_v12 = vld [vmem:[%s19818_s1 + $0x1c58] sm:$0xff] }
 0x4c1   :  { %11543 = vmatpush1.bf16.msra.mxu1 %v13394_v13  ;;  %11011 = vmatprep.subr.bf16.mxu0 %v13401_v14  ;;  %v945_v13 = vld [vmem:[%s19818_s1 + $0x1c78] sm:$0xff]  ;;  %v13440_v14 = vcombine.low %v932_v56, %v936_v61  ;;  %v980_v56 = vld [vmem:[%s19818_s1 + $0x1d90] sm:$0xff] }
 0x4c2   :  { %11544 = vmatprep.subr.bf16.mxu1 %v13403_v2  ;;  %v13442_v2 = vcombine.low %v933_v9, %v937_v60  ;;  %v13451_v17 = vcombine.high %v941_v12, %v945_v13  ;;  %v984_v61 = vld [vmem:[%s19818_s1 + $0x1db0] sm:$0xff]  ;;  %v981_v9 = vld [vmem:[%s19818_s1 + $0x1d98] sm:$0xff] }
 0x4c3   :  { %v985_v60 = vld [vmem:[%s19818_s1 + $0x1db8] sm:$0xff] }
 0x4c4   :  { %11012 = vmatpush1.bf16.msra.mxu0 %v13400_v25  ;;  %v949_v25 = vld [vmem:[%s19818_s1 + $0x1c98] sm:$0xff] }
 0x4c5   :  { %11545 = vmatpush1.bf16.msra.mxu1 %v13402_v26  ;;  %11013 = vmatprep.subr.bf16.mxu0 %v13409_v29  ;;  %v953_v26 = vld [vmem:[%s19818_s1 + $0x1cb8] sm:$0xff]  ;;  %v13448_v29 = vcombine.low %v940_v4, %v944_v11  ;;  %v988_v4 = vld [vmem:[%s19818_s1 + $0x1dd0] sm:$0xff] }
 0x4c6   :  { %11546 = vmatprep.subr.bf16.mxu1 %v13411_v48  ;;  %v13450_v48 = vcombine.low %v941_v12, %v945_v13  ;;  %v13459_v32 = vcombine.high %v949_v25, %v953_v26  ;;  %v992_v11 = vld [vmem:[%s19818_s1 + $0x1df0] sm:$0xff]  ;;  %v989_v12 = vld [vmem:[%s19818_s1 + $0x1dd8] sm:$0xff] }
 0x4c7   :  { %v993_v13 = vld [vmem:[%s19818_s1 + $0x1df8] sm:$0xff] }
 0x4c8   :  { %11014 = vmatpush1.bf16.msra.mxu0 %v13408_v59  ;;  %v961_v59 = vld [vmem:[%s19818_s1 + $0x1cf8] sm:$0xff] }
 0x4c9   :  { %11547 = vmatpush1.bf16.msra.mxu1 %v13410_v33  ;;  %11015 = vmatprep.subr.bf16.mxu0 %v13417_v37  ;;  %v13456_v33 = vcombine.low %v948_v19, %v952_v22  ;;  %v13458_v37 = vcombine.low %v949_v25, %v953_v26  ;;  %v996_v19 = vld [vmem:[%s19818_s1 + $0x1e10] sm:$0xff]  ;;  %v997_v25 = vld [vmem:[%s19818_s1 + $0x1e18] sm:$0xff] }
 0x4ca   :  { %11548 = vmatprep.subr.bf16.mxu1 %v13419_v39  ;;  %v13465_v39 = vcombine.high %v956_v41, %v960_v34  ;;  %v1000_v22 = vld [vmem:[%s19818_s1 + $0x1e30] sm:$0xff]  ;;  %v1001_v26 = vld [vmem:[%s19818_s1 + $0x1e38] sm:$0xff] }
 0x4cc   :  { %11016 = vmatpush1.bf16.msra.mxu0 %v13416_v5  ;;  %v13464_v5 = vcombine.low %v956_v41, %v960_v34  ;;  %v1004_v41 = vld [vmem:[%s19818_s1 + $0x1e50] sm:$0xff] }
 0x4cd   :  { %11549 = vmatpush1.bf16.msra.mxu1 %v13418_v35  ;;  %11017 = vmatprep.subr.bf16.mxu0 %v13425_v28  ;;  %v13473_v28 = vcombine.high %v964_v43, %v968_v46  ;;  %v1008_v34 = vld [vmem:[%s19818_s1 + $0x1e70] sm:$0xff] }
 0x4ce   :  { %11550 = vmatprep.subr.bf16.mxu1 %v13427_v54 }
 0x4d0   :  { %11018 = vmatpush1.bf16.msra.mxu0 %v13424_v51  ;;  %v13472_v51 = vcombine.low %v964_v43, %v968_v46  ;;  %v1012_v43 = vld [vmem:[%s19818_s1 + $0x1e90] sm:$0xff] }
 0x4d1   :  { %11551 = vmatpush1.bf16.msra.mxu1 %v13426_v53  ;;  %11019 = vmatprep.subr.bf16.mxu0 %v13433_v38  ;;  %v13481_v38 = vcombine.high %v972_v47, %v976_v20  ;;  %v1016_v46 = vld [vmem:[%s19818_s1 + $0x1eb0] sm:$0xff] }
 0x4d2   :  { %11552 = vmatprep.subr.bf16.mxu1 %v13435_v55  ;;  %v13483_v55 = vcombine.high %v973_v50, %v977_v52 }
 0x4d4   :  { %11020 = vmatpush1.bf16.msra.mxu0 %v13432_v63  ;;  %v13480_v63 = vcombine.low %v972_v47, %v976_v20  ;;  %v1020_v47 = vld [vmem:[%s19818_s1 + $0x1ed0] sm:$0xff] }
 0x4d5   :  { %11553 = vmatpush1.bf16.msra.mxu1 %v13434_v62  ;;  %11030 = vmatprep.subr.bf16.mxu0 %v13441_v1  ;;  %v13482_v62 = vcombine.low %v973_v50, %v977_v52  ;;  %v13489_v1 = vcombine.high %v980_v56, %v984_v61  ;;  %v1024_v20 = vld [vmem:[%s19818_s1 + $0x1ef0] sm:$0xff]  ;;  %v1021_v50 = vld [vmem:[%s19818_s1 + $0x1ed8] sm:$0xff] }
 0x4d6   :  { %11563 = vmatprep.subr.bf16.mxu1 %v13443_v45  ;;  %v13491_v45 = vcombine.high %v981_v9, %v985_v60  ;;  %v1025_v52 = vld [vmem:[%s19818_s1 + $0x1ef8] sm:$0xff] }
 0x4d7   :  { %11022 = vmatmul.mubr.bf16.vlgmr.msra.gmra.mrb[4].mxu0 %v16086_v8 }
 0x4d8   :  { %11031 = vmatpush1.bf16.msra.mxu0 %v13440_v14  ;;  %11555 = vmatmul.mubr.bf16.vlgmr.msra.gmra.mrb[4].mxu1 %v16086_v8  ;;  %v957_v8 = vld [vmem:[%s19818_s1 + $0x1cd8] sm:$0xff]  ;;  %v13488_v14 = vcombine.low %v980_v56, %v984_v61  ;;  %v1028_v56 = vld [vmem:[%s19818_s1 + $0x1f10] sm:$0xff] }
 0x4d9   :  { %11564 = vmatpush1.bf16.msra.mxu1 %v13442_v2  ;;  %11032 = vmatprep.subr.bf16.mxu0 %v13449_v10  ;;  %v13467_v40 = vcombine.high %v957_v8, %v961_v59  ;;  %v13466_v35 = vcombine.low %v957_v8, %v961_v59  ;;  %v13490_v2 = vcombine.low %v981_v9, %v985_v60  ;;  %v1005_v8 = vld [vmem:[%s19818_s1 + $0x1e58] sm:$0xff]  ;;  %v1032_v61 = vld [vmem:[%s19818_s1 + $0x1f30] sm:$0xff] }
 0x4da   :  { %11565 = vmatprep.subr.bf16.mxu1 %v13451_v17  ;;  %11062 = vmatprep.mubr.bf16.mxu0 %v16102_v18  ;;  %v13497_v10 = vcombine.high %v988_v4, %v992_v11  ;;  %v13499_v17 = vcombine.high %v989_v12, %v993_v13  ;;  %v1009_v59 = vld [vmem:[%s19818_s1 + $0x1e78] sm:$0xff] }
 0x4db   :  { %11595 = vmatprep.mubr.bf16.mxu1 %v16102_v18  ;;  %v965_v18 = vld [vmem:[%s19818_s1 + $0x1d18] sm:$0xff] }
 0x4dc   :  { %11033 = vmatpush1.bf16.msra.mxu0 %v13448_v29  ;;  %v13475_v54 = vcombine.high %v965_v18, %v969_v49  ;;  %v13474_v53 = vcombine.low %v965_v18, %v969_v49  ;;  %v13496_v29 = vcombine.low %v988_v4, %v992_v11  ;;  %v1013_v18 = vld [vmem:[%s19818_s1 + $0x1e98] sm:$0xff]  ;;  %v1036_v4 = vld [vmem:[%s19818_s1 + $0x1f50] sm:$0xff] }
 0x4dd   :  { %11566 = vmatpush1.bf16.msra.mxu1 %v13450_v48  ;;  %11034 = vmatprep.subr.bf16.mxu0 %v13457_v30  ;;  %v13498_v48 = vcombine.low %v989_v12, %v993_v13  ;;  %v13505_v30 = vcombine.high %v996_v19, %v1000_v22  ;;  %v1017_v49 = vld [vmem:[%s19818_s1 + $0x1eb8] sm:$0xff]  ;;  %v1040_v11 = vld [vmem:[%s19818_s1 + $0x1f70] sm:$0xff] }
 0x4de   :  { %11567 = vmatprep.subr.bf16.mxu1 %v13459_v32  ;;  %v13507_v32 = vcombine.high %v997_v25, %v1001_v26  ;;  %v1029_v9 = vld [vmem:[%s19818_s1 + $0x1f18] sm:$0xff] }
 0x4df   :  { %v1033_v60 = vld [vmem:[%s19818_s1 + $0x1f38] sm:$0xff] }
 0x4e0   :  { %11035 = vmatpush1.bf16.msra.mxu0 %v13456_v33  ;;  %v13504_v33 = vcombine.low %v996_v19, %v1000_v22  ;;  %v1037_v12 = vld [vmem:[%s19818_s1 + $0x1f58] sm:$0xff]  ;;  %v1044_v19 = vld [vmem:[%s19818_s1 + $0x1f90] sm:$0xff] }
 0x4e1   :  { %11568 = vmatpush1.bf16.msra.mxu1 %v13458_v37  ;;  %11036 = vmatprep.subr.bf16.mxu0 %v13465_v39  ;;  %v13506_v37 = vcombine.low %v997_v25, %v1001_v26  ;;  %v13513_v39 = vcombine.high %v1004_v41, %v1008_v34  ;;  %v1041_v13 = vld [vmem:[%s19818_s1 + $0x1f78] sm:$0xff]  ;;  %v1048_v22 = vld [vmem:[%s19818_s1 + $0x1fb0] sm:$0xff] }
 0x4e2   :  { %11569 = vmatprep.subr.bf16.mxu1 %v13467_v40  ;;  %v13515_v40 = vcombine.high %v1005_v8, %v1009_v59  ;;  %v1045_v25 = vld [vmem:[%s19818_s1 + $0x1f98] sm:$0xff] }
 0x4e3   :  { %v1049_v26 = vld [vmem:[%s19818_s1 + $0x1fb8] sm:$0xff] }
 0x4e4   :  { %11037 = vmatpush1.bf16.msra.mxu0 %v13464_v5  ;;  %v13512_v5 = vcombine.low %v1004_v41, %v1008_v34  ;;  %v1052_v41 = vld [vmem:[%s19818_s1 + $0x1fd0] sm:$0xff] }
 0x4e5   :  { %11570 = vmatpush1.bf16.msra.mxu1 %v13466_v35  ;;  %11038 = vmatprep.subr.bf16.mxu0 %v13473_v28  ;;  %v13514_v35 = vcombine.low %v1005_v8, %v1009_v59  ;;  %v13521_v28 = vcombine.high %v1012_v43, %v1016_v46  ;;  %v1056_v34 = vld [vmem:[%s19818_s1 + $0x1ff0] sm:$0xff]  ;;  %v1053_v8 = vld [vmem:[%s19818_s1 + $0x1fd8] sm:$0xff] }
 0x4e6   :  { %11571 = vmatprep.subr.bf16.mxu1 %v13475_v54  ;;  %v13523_v54 = vcombine.high %v1013_v18, %v1017_v49  ;;  %v1057_v59 = vld [vmem:[%s19818_s1 + $0x1ff8] sm:$0xff] }
 0x4e8   :  { %11039 = vmatpush1.bf16.msra.mxu0 %v13472_v51  ;;  %v13520_v51 = vcombine.low %v1012_v43, %v1016_v46  ;;  %v1060_v43 = vld [vmem:[%s19818_s1 + $0x2010] sm:$0xff] }
 0x4e9   :  { %11572 = vmatpush1.bf16.msra.mxu1 %v13474_v53  ;;  %11040 = vmatprep.subr.bf16.mxu0 %v13481_v38  ;;  %v13522_v53 = vcombine.low %v1013_v18, %v1017_v49  ;;  %v13529_v38 = vcombine.high %v1020_v47, %v1024_v20  ;;  %v1064_v46 = vld [vmem:[%s19818_s1 + $0x2030] sm:$0xff]  ;;  %v1061_v18 = vld [vmem:[%s19818_s1 + $0x2018] sm:$0xff] }
 0x4ea   :  { %11573 = vmatprep.subr.bf16.mxu1 %v13483_v55  ;;  %v13531_v55 = vcombine.high %v1021_v50, %v1025_v52  ;;  %v1065_v49 = vld [vmem:[%s19818_s1 + $0x2038] sm:$0xff] }
 0x4ec   :  { %11041 = vmatpush1.bf16.msra.mxu0 %v13480_v63  ;;  %v13528_v63 = vcombine.low %v1020_v47, %v1024_v20  ;;  %v1068_v47 = vld [vmem:[%s19818_s1 + $0x2050] sm:$0xff] }
 0x4ed   :  { %11574 = vmatpush1.bf16.msra.mxu1 %v13482_v62  ;;  %11042 = vmatprep.subr.bf16.mxu0 %v13489_v1  ;;  %v13530_v62 = vcombine.low %v1021_v50, %v1025_v52  ;;  %v13537_v1 = vcombine.high %v1028_v56, %v1032_v61  ;;  %v1072_v20 = vld [vmem:[%s19818_s1 + $0x2070] sm:$0xff]  ;;  %v1069_v50 = vld [vmem:[%s19818_s1 + $0x2058] sm:$0xff] }
 0x4ee   :  { %11575 = vmatprep.subr.bf16.mxu1 %v13491_v45  ;;  %v13539_v45 = vcombine.high %v1029_v9, %v1033_v60  ;;  %v1073_v52 = vld [vmem:[%s19818_s1 + $0x2078] sm:$0xff] }
 0x4f0   :  { %11043 = vmatpush1.bf16.msra.mxu0 %v13488_v14  ;;  %v13536_v14 = vcombine.low %v1028_v56, %v1032_v61  ;;  %v1076_v56 = vld [vmem:[%s19818_s1 + $0x2090] sm:$0xff] }
 0x4f1   :  { %11576 = vmatpush1.bf16.msra.mxu1 %v13490_v2  ;;  %11044 = vmatprep.subr.bf16.mxu0 %v13497_v10  ;;  %v13538_v2 = vcombine.low %v1029_v9, %v1033_v60  ;;  %v13545_v10 = vcombine.high %v1036_v4, %v1040_v11  ;;  %v1080_v61 = vld [vmem:[%s19818_s1 + $0x20b0] sm:$0xff]  ;;  %v1077_v9 = vld [vmem:[%s19818_s1 + $0x2098] sm:$0xff] }
 0x4f2   :  { %11577 = vmatprep.subr.bf16.mxu1 %v13499_v17  ;;  %v13547_v17 = vcombine.high %v1037_v12, %v1041_v13  ;;  %v1081_v60 = vld [vmem:[%s19818_s1 + $0x20b8] sm:$0xff] }
 0x4f4   :  { %11045 = vmatpush1.bf16.msra.mxu0 %v13496_v29  ;;  %v13544_v29 = vcombine.low %v1036_v4, %v1040_v11  ;;  %v1084_v4 = vld [vmem:[%s19818_s1 + $0x20d0] sm:$0xff] }
 0x4f5   :  { %11578 = vmatpush1.bf16.msra.mxu1 %v13498_v48  ;;  %11046 = vmatprep.subr.bf16.mxu0 %v13505_v30  ;;  %v13546_v48 = vcombine.low %v1037_v12, %v1041_v13  ;;  %v13553_v30 = vcombine.high %v1044_v19, %v1048_v22  ;;  %v1088_v11 = vld [vmem:[%s19818_s1 + $0x20f0] sm:$0xff]  ;;  %v1089_v12 = vld [vmem:[%s19818_s1 + $0x20f8] sm:$0xff]  ;;  %v13584_v13 = vcombine.low %v1076_v56, %v1080_v61 }
 0x4f6   :  { %11579 = vmatprep.subr.bf16.mxu1 %v13507_v32  ;;  %v13555_v32 = vcombine.high %v1045_v25, %v1049_v26 }
 0x4f8   :  { %11047 = vmatpush1.bf16.msra.mxu0 %v13504_v33  ;;  %v13552_v33 = vcombine.low %v1044_v19, %v1048_v22  ;;  %v1096_v19 = vld [vmem:[%s19818_s1 + $0x2130] sm:$0xff]  ;;  %v1097_v22 = vld [vmem:[%s19818_s1 + $0x2138] sm:$0xff] }
 0x4f9   :  { %11580 = vmatpush1.bf16.msra.mxu1 %v13506_v37  ;;  %11048 = vmatprep.subr.bf16.mxu0 %v13513_v39  ;;  %v13554_v37 = vcombine.low %v1045_v25, %v1049_v26  ;;  %v13561_v39 = vcombine.high %v1052_v41, %v1056_v34  ;;  %v13592_v25 = vcombine.low %v1084_v4, %v1088_v11 }
 0x4fa   :  { %11581 = vmatprep.subr.bf16.mxu1 %v13515_v40  ;;  %v13563_v40 = vcombine.high %v1053_v8, %v1057_v59 }
 0x4fc   :  { %11049 = vmatpush1.bf16.msra.mxu0 %v13512_v5  ;;  %v13560_v5 = vcombine.low %v1052_v41, %v1056_v34  ;;  %v1101_v41 = vld [vmem:[%s19818_s1 + $0x2158] sm:$0xff] }
 0x4fd   :  { %11582 = vmatpush1.bf16.msra.mxu1 %v13514_v35  ;;  %11050 = vmatprep.subr.bf16.mxu0 %v13521_v28  ;;  %v13562_v35 = vcombine.low %v1053_v8, %v1057_v59  ;;  %v13569_v28 = vcombine.high %v1060_v43, %v1064_v46  ;;  %v1105_v34 = vld [vmem:[%s19818_s1 + $0x2178] sm:$0xff] }
 0x4fe   :  { %11583 = vmatprep.subr.bf16.mxu1 %v13523_v54  ;;  %v13571_v54 = vcombine.high %v1061_v18, %v1065_v49 }
 0x500   :  { %11051 = vmatpush1.bf16.msra.mxu0 %v13520_v51  ;;  %v13568_v51 = vcombine.low %v1060_v43, %v1064_v46  ;;  %v1109_v43 = vld [vmem:[%s19818_s1 + $0x2198] sm:$0xff] }
 0x501   :  { %11584 = vmatpush1.bf16.msra.mxu1 %v13522_v53  ;;  %11052 = vmatprep.subr.bf16.mxu0 %v13529_v38  ;;  %v13570_v53 = vcombine.low %v1061_v18, %v1065_v49  ;;  %v13577_v38 = vcombine.high %v1068_v47, %v1072_v20  ;;  %v1113_v46 = vld [vmem:[%s19818_s1 + $0x21b8] sm:$0xff]  ;;  %v13610_v49 = vcombine.low %v1101_v41, %v1105_v34 }
 0x502   :  { %11585 = vmatprep.subr.bf16.mxu1 %v13531_v55  ;;  %v13579_v55 = vcombine.high %v1069_v50, %v1073_v52 }
 0x504   :  { %11053 = vmatpush1.bf16.msra.mxu0 %v13528_v63  ;;  %v13576_v63 = vcombine.low %v1068_v47, %v1072_v20  ;;  %v1117_v47 = vld [vmem:[%s19818_s1 + $0x21d8] sm:$0xff] }
 0x505   :  { %11586 = vmatpush1.bf16.msra.mxu1 %v13530_v62  ;;  %11054 = vmatprep.subr.bf16.mxu0 %v13537_v1  ;;  %v13578_v62 = vcombine.low %v1069_v50, %v1073_v52  ;;  %v13585_v1 = vcombine.high %v1076_v56, %v1080_v61  ;;  %v1121_v20 = vld [vmem:[%s19818_s1 + $0x21f8] sm:$0xff]  ;;  %v13618_v52 = vcombine.low %v1109_v43, %v1113_v46 }
 0x506   :  { %11587 = vmatprep.subr.bf16.mxu1 %v13539_v45  ;;  %v13587_v45 = vcombine.high %v1077_v9, %v1081_v60  ;;  %v1125_v56 = vld [vmem:[%s19818_s1 + $0x2218] sm:$0xff] }
 0x507   :  { %v1129_v61 = vld [vmem:[%s19818_s1 + $0x2238] sm:$0xff] }
 0x508   :  { %11055 = vmatpush1.bf16.msra.mxu0 %v13536_v14  ;;  %v13586_v14 = vcombine.low %v1077_v9, %v1081_v60  ;;  %v13626_v60 = vcombine.low %v1117_v47, %v1121_v20 }
 0x509   :  { %11588 = vmatpush1.bf16.msra.mxu1 %v13538_v2  ;;  %11056 = vmatprep.subr.bf16.mxu0 %v13545_v10  ;;  %v13593_v2 = vcombine.high %v1084_v4, %v1088_v11  ;;  %v1133_v4 = vld [vmem:[%s19818_s1 + $0x2258] sm:$0xff] }
 0x50a   :  { %11589 = vmatprep.subr.bf16.mxu1 %v13547_v17  ;;  %v1092_v17 = vld [vmem:[%s19818_s1 + $0x2110] sm:$0xff]  ;;  %v1137_v11 = vld [vmem:[%s19818_s1 + $0x2278] sm:$0xff] }
 0x50b   :  { %v13600_v8 = vcombine.low %v1092_v17, %v1096_v19 }
 0x50c   :  { %11057 = vmatpush1.bf16.msra.mxu0 %v13544_v29  ;;  %v13601_v29 = vcombine.high %v1092_v17, %v1096_v19  ;;  %v1141_v17 = vld [vmem:[%s19818_s1 + $0x2298] sm:$0xff] }
 0x50d   :  { %11590 = vmatpush1.bf16.msra.mxu1 %v13546_v48  ;;  %11058 = vmatprep.subr.bf16.mxu0 %v13553_v30  ;;  %v1100_v30 = vld [vmem:[%s19818_s1 + $0x2150] sm:$0xff]  ;;  %v1145_v19 = vld [vmem:[%s19818_s1 + $0x22b8] sm:$0xff] }
 0x50e   :  { %11591 = vmatprep.subr.bf16.mxu1 %v13555_v32  ;;  %v1104_v32 = vld [vmem:[%s19818_s1 + $0x2170] sm:$0xff] }
 0x50f   :  { %v13608_v18 = vcombine.low %v1100_v30, %v1104_v32 }
 0x510   :  { %11059 = vmatpush1.bf16.msra.mxu0 %v13552_v33  ;;  %v13609_v33 = vcombine.high %v1100_v30, %v1104_v32  ;;  %v1149_v30 = vld [vmem:[%s19818_s1 + $0x22d8] sm:$0xff] }
 0x511   :  { %11592 = vmatpush1.bf16.msra.mxu1 %v13554_v37  ;;  %11060 = vmatprep.subr.bf16.mxu0 %v13561_v39  ;;  %v13611_v37 = vcombine.high %v1101_v41, %v1105_v34  ;;  %v1108_v39 = vld [vmem:[%s19818_s1 + $0x2190] sm:$0xff]  ;;  %v1153_v32 = vld [vmem:[%s19818_s1 + $0x22f8] sm:$0xff]  ;;  %v13650_v34 = vcombine.low %v1141_v17, %v1145_v19 }
 0x512   :  { %11593 = vmatprep.subr.bf16.mxu1 %v13563_v40  ;;  %v1112_v40 = vld [vmem:[%s19818_s1 + $0x21b0] sm:$0xff] }
 0x513   :  { %v13616_v50 = vcombine.low %v1108_v39, %v1112_v40 }
 0x514   :  { %11061 = vmatpush1.bf16.msra.mxu0 %v13560_v5  ;;  %v13617_v5 = vcombine.high %v1108_v39, %v1112_v40  ;;  %v1157_v39 = vld [vmem:[%s19818_s1 + $0x2318] sm:$0xff] }
 0x515   :  { %11594 = vmatpush1.bf16.msra.mxu1 %v13562_v35  ;;  %11071 = vmatprep.subr.bf16.mxu0 %v13569_v28  ;;  %v13619_v35 = vcombine.high %v1109_v43, %v1113_v46  ;;  %v1116_v28 = vld [vmem:[%s19818_s1 + $0x21d0] sm:$0xff]  ;;  %v1161_v40 = vld [vmem:[%s19818_s1 + $0x2338] sm:$0xff]  ;;  %v13658_v46 = vcombine.low %v1149_v30, %v1153_v32 }
 0x516   :  { %11604 = vmatprep.subr.bf16.mxu1 %v13571_v54  ;;  %v1120_v54 = vld [vmem:[%s19818_s1 + $0x21f0] sm:$0xff] }
 0x517   :  { %11063 = vmatmul.mubr.bf16.vlgmr.msra.gmra.mrb[4].mxu0 %v16301_v58  ;;  %v13624_v9 = vcombine.low %v1116_v28, %v1120_v54 }
 0x518   :  { %11072 = vmatpush1.bf16.msra.mxu0 %v13568_v51  ;;  %11596 = vmatmul.mubr.bf16.vlgmr.msra.gmra.mrb[4].mxu1 %v16301_v58  ;;  %v1085_v58 = vld [vmem:[%s19818_s1 + $0x20d8] sm:$0xff]  ;;  %v13625_v51 = vcombine.high %v1116_v28, %v1120_v54 }
 0x519   :  { %11605 = vmatpush1.bf16.msra.mxu1 %v13570_v53  ;;  %11073 = vmatprep.subr.bf16.mxu0 %v13577_v38  ;;  %v13595_v10 = vcombine.high %v1085_v58, %v1089_v12  ;;  %v13594_v26 = vcombine.low %v1085_v58, %v1089_v12  ;;  %v13627_v53 = vcombine.high %v1117_v47, %v1121_v20  ;;  %v1124_v38 = vld [vmem:[%s19818_s1 + $0x2210] sm:$0xff]  ;;  %v1165_v28 = vld [vmem:[%s19818_s1 + $0x2358] sm:$0xff] }
 0x51a   :  { %11606 = vmatprep.subr.bf16.mxu1 %v13579_v55  ;;  %11103 = vmatprep.mubr.bf16.mxu0 %v16316_v7  ;;  %v1128_v55 = vld [vmem:[%s19818_s1 + $0x2230] sm:$0xff]  ;;  %v13634_v12 = vcombine.low %v1125_v56, %v1129_v61  ;;  %v1169_v54 = vld [vmem:[%s19818_s1 + $0x2378] sm:$0xff]  ;;  %v13666_v20 = vcombine.low %v1157_v39, %v1161_v40 }
 0x51b   :  { %11636 = vmatprep.mubr.bf16.mxu1 %v16316_v7  ;;  %v1093_v7 = vld [vmem:[%s19818_s1 + $0x2118] sm:$0xff]  ;;  %v13632_v58 = vcombine.low %v1124_v38, %v1128_v55 }
 0x51c   :  { %11074 = vmatpush1.bf16.msra.mxu0 %v13576_v63  ;;  %v13603_v48 = vcombine.high %v1093_v7, %v1097_v22  ;;  %v13602_v59 = vcombine.low %v1093_v7, %v1097_v22  ;;  %v13633_v63 = vcombine.high %v1124_v38, %v1128_v55  ;;  %v13642_v22 = vcombine.low %v1133_v4, %v1137_v11  ;;  %v1173_v38 = vld [vmem:[%s19818_s1 + $0x2398] sm:$0xff] }
 0x51d   :  { %11607 = vmatpush1.bf16.msra.mxu1 %v13578_v62  ;;  %11075 = vmatprep.subr.bf16.mxu0 %v13585_v1  ;;  %v13635_v62 = vcombine.high %v1125_v56, %v1129_v61  ;;  %v1132_v1 = vld [vmem:[%s19818_s1 + $0x2250] sm:$0xff]  ;;  %v1177_v55 = vld [vmem:[%s19818_s1 + $0x23b8] sm:$0xff]  ;;  %v13674_v61 = vcombine.low %v1165_v28, %v1169_v54 }
 0x51e   :  { %11608 = vmatprep.subr.bf16.mxu1 %v13587_v45  ;;  %v1136_v45 = vld [vmem:[%s19818_s1 + $0x2270] sm:$0xff] }
 0x51f   :  { %v13640_v7 = vcombine.low %v1132_v1, %v1136_v45 }
 0x520   :  { %11076 = vmatpush1.bf16.msra.mxu0 %v13584_v13  ;;  %v13641_v13 = vcombine.high %v1132_v1, %v1136_v45  ;;  %v1181_v1 = vld [vmem:[%s19818_s1 + $0x23d8] sm:$0xff] }
 0x521   :  { %11609 = vmatpush1.bf16.msra.mxu1 %v13586_v14  ;;  %11077 = vmatprep.subr.bf16.mxu0 %v13593_v2  ;;  %v13643_v14 = vcombine.high %v1133_v4, %v1137_v11  ;;  %v1140_v2 = vld [vmem:[%s19818_s1 + $0x2290] sm:$0xff]  ;;  %v1185_v45 = vld [vmem:[%s19818_s1 + $0x23f8] sm:$0xff]  ;;  %v13682_v11 = vcombine.low %v1173_v38, %v1177_v55 }
 0x522   :  { %11610 = vmatprep.subr.bf16.mxu1 %v13595_v10  ;;  %v1144_v10 = vld [vmem:[%s19818_s1 + $0x22b0] sm:$0xff] }
 0x523   :  { %v13648_v41 = vcombine.low %v1140_v2, %v1144_v10 }
 0x524   :  { %11078 = vmatpush1.bf16.msra.mxu0 %v13592_v25  ;;  %v13649_v25 = vcombine.high %v1140_v2, %v1144_v10  ;;  %v1189_v2 = vld [vmem:[%s19818_s1 + $0x2418] sm:$0xff] }
 0x525   :  { %11611 = vmatpush1.bf16.msra.mxu1 %v13594_v26  ;;  %11079 = vmatprep.subr.bf16.mxu0 %v13601_v29  ;;  %v13651_v26 = vcombine.high %v1141_v17, %v1145_v19  ;;  %v1148_v29 = vld [vmem:[%s19818_s1 + $0x22d0] sm:$0xff]  ;;  %v1193_v10 = vld [vmem:[%s19818_s1 + $0x2438] sm:$0xff]  ;;  %v13690_v19 = vcombine.low %v1181_v1, %v1185_v45 }
 0x526   :  { %11612 = vmatprep.subr.bf16.mxu1 %v13603_v48  ;;  %v1152_v48 = vld [vmem:[%s19818_s1 + $0x22f0] sm:$0xff] }
 0x527   :  { %v13656_v43 = vcombine.low %v1148_v29, %v1152_v48 }
 0x528   :  { %11080 = vmatpush1.bf16.msra.mxu0 %v13600_v8  ;;  %v13657_v8 = vcombine.high %v1148_v29, %v1152_v48  ;;  %v1197_v29 = vld [vmem:[%s19818_s1 + $0x2458] sm:$0xff] }
 0x529   :  { %11613 = vmatpush1.bf16.msra.mxu1 %v13602_v59  ;;  %11081 = vmatprep.subr.bf16.mxu0 %v13609_v33  ;;  %v13659_v59 = vcombine.high %v1149_v30, %v1153_v32  ;;  %v1156_v33 = vld [vmem:[%s19818_s1 + $0x2310] sm:$0xff]  ;;  %v1201_v48 = vld [vmem:[%s19818_s1 + $0x2478] sm:$0xff]  ;;  %v13698_v32 = vcombine.low %v1189_v2, %v1193_v10 }
 0x52a   :  { %11614 = vmatprep.subr.bf16.mxu1 %v13611_v37  ;;  %v1160_v37 = vld [vmem:[%s19818_s1 + $0x2330] sm:$0xff] }
 0x52b   :  { %v13664_v47 = vcombine.low %v1156_v33, %v1160_v37 }
 0x52c   :  { %11082 = vmatpush1.bf16.msra.mxu0 %v13608_v18  ;;  %v13665_v18 = vcombine.high %v1156_v33, %v1160_v37  ;;  %v1205_v33 = vld [vmem:[%s19818_s1 + $0x2498] sm:$0xff] }
 0x52d   :  { %11615 = vmatpush1.bf16.msra.mxu1 %v13610_v49  ;;  %11083 = vmatprep.subr.bf16.mxu0 %v13617_v5  ;;  %v13667_v49 = vcombine.high %v1157_v39, %v1161_v40  ;;  %v1164_v5 = vld [vmem:[%s19818_s1 + $0x2350] sm:$0xff]  ;;  %v1209_v37 = vld [vmem:[%s19818_s1 + $0x24b8] sm:$0xff]  ;;  %v13706_v40 = vcombine.low %v1197_v29, %v1201_v48 }
 0x52e   :  { %11616 = vmatprep.subr.bf16.mxu1 %v13619_v35  ;;  %v1168_v35 = vld [vmem:[%s19818_s1 + $0x2370] sm:$0xff] }
 0x52f   :  { %v13672_v56 = vcombine.low %v1164_v5, %v1168_v35 }
 0x530   :  { %11084 = vmatpush1.bf16.msra.mxu0 %v13616_v50  ;;  %v13673_v50 = vcombine.high %v1164_v5, %v1168_v35  ;;  %v1217_v5 = vld [vmem:[%s19818_s1 + $0x24f8] sm:$0xff] }
 0x531   :  { %11617 = vmatpush1.bf16.msra.mxu1 %v13618_v52  ;;  %11085 = vmatprep.subr.bf16.mxu0 %v13625_v51  ;;  %v13675_v52 = vcombine.high %v1165_v28, %v1169_v54  ;;  %v1172_v51 = vld [vmem:[%s19818_s1 + $0x2390] sm:$0xff]  ;;  %v13714_v28 = vcombine.low %v1205_v33, %v1209_v37 }
 0x532   :  { %11618 = vmatprep.subr.bf16.mxu1 %v13627_v53  ;;  %v1176_v53 = vld [vmem:[%s19818_s1 + $0x23b0] sm:$0xff] }
 0x533   :  { %v13680_v4 = vcombine.low %v1172_v51, %v1176_v53 }
 0x534   :  { %11086 = vmatpush1.bf16.msra.mxu0 %v13624_v9  ;;  %v13681_v9 = vcombine.high %v1172_v51, %v1176_v53 }
 0x535   :  { %11619 = vmatpush1.bf16.msra.mxu1 %v13626_v60  ;;  %11087 = vmatprep.subr.bf16.mxu0 %v13633_v63  ;;  %v13683_v60 = vcombine.high %v1173_v38, %v1177_v55  ;;  %v1180_v63 = vld [vmem:[%s19818_s1 + $0x23d0] sm:$0xff] }
 0x536   :  { %11620 = vmatprep.subr.bf16.mxu1 %v13635_v62  ;;  %v1184_v62 = vld [vmem:[%s19818_s1 + $0x23f0] sm:$0xff] }
 0x537   :  { %v13688_v17 = vcombine.low %v1180_v63, %v1184_v62 }
 0x538   :  { %11088 = vmatpush1.bf16.msra.mxu0 %v13632_v58  ;;  %v13689_v58 = vcombine.high %v1180_v63, %v1184_v62 }
 0x539   :  { %11621 = vmatpush1.bf16.msra.mxu1 %v13634_v12  ;;  %11089 = vmatprep.subr.bf16.mxu0 %v13641_v13  ;;  %v13691_v12 = vcombine.high %v1181_v1, %v1185_v45  ;;  %v1188_v13 = vld [vmem:[%s19818_s1 + $0x2410] sm:$0xff] }
 0x53a   :  { %11622 = vmatprep.subr.bf16.mxu1 %v13643_v14  ;;  %v1192_v14 = vld [vmem:[%s19818_s1 + $0x2430] sm:$0xff] }
 0x53b   :  { %v13696_v30 = vcombine.low %v1188_v13, %v1192_v14 }
 0x53c   :  { %11090 = vmatpush1.bf16.msra.mxu0 %v13640_v7  ;;  %v13697_v7 = vcombine.high %v1188_v13, %v1192_v14 }
 0x53d   :  { %11623 = vmatpush1.bf16.msra.mxu1 %v13642_v22  ;;  %11091 = vmatprep.subr.bf16.mxu0 %v13649_v25  ;;  %v13699_v22 = vcombine.high %v1189_v2, %v1193_v10  ;;  %v1196_v25 = vld [vmem:[%s19818_s1 + $0x2450] sm:$0xff] }
 0x53e   :  { %11624 = vmatprep.subr.bf16.mxu1 %v13651_v26  ;;  %v1200_v26 = vld [vmem:[%s19818_s1 + $0x2470] sm:$0xff] }
 0x53f   :  { %v13704_v39 = vcombine.low %v1196_v25, %v1200_v26 }
 0x540   :  { %11092 = vmatpush1.bf16.msra.mxu0 %v13648_v41  ;;  %v13705_v41 = vcombine.high %v1196_v25, %v1200_v26 }
 0x541   :  { %11625 = vmatpush1.bf16.msra.mxu1 %v13650_v34  ;;  %11093 = vmatprep.subr.bf16.mxu0 %v13657_v8  ;;  %v13707_v34 = vcombine.high %v1197_v29, %v1201_v48  ;;  %v1204_v8 = vld [vmem:[%s19818_s1 + $0x2490] sm:$0xff] }
 0x542   :  { %11626 = vmatprep.subr.bf16.mxu1 %v13659_v59  ;;  %v1208_v59 = vld [vmem:[%s19818_s1 + $0x24b0] sm:$0xff] }
 0x543   :  { %v13712_v35 = vcombine.low %v1204_v8, %v1208_v59 }
 0x544   :  { %11094 = vmatpush1.bf16.msra.mxu0 %v13656_v43  ;;  %v13713_v43 = vcombine.high %v1204_v8, %v1208_v59 }
 0x545   :  { %11627 = vmatpush1.bf16.msra.mxu1 %v13658_v46  ;;  %11095 = vmatprep.subr.bf16.mxu0 %v13665_v18  ;;  %v13715_v46 = vcombine.high %v1205_v33, %v1209_v37  ;;  %v1212_v18 = vld [vmem:[%s19818_s1 + $0x24d0] sm:$0xff] }
 0x546   :  { %11628 = vmatprep.subr.bf16.mxu1 %v13667_v49  ;;  %v1216_v49 = vld [vmem:[%s19818_s1 + $0x24f0] sm:$0xff] }
 0x547   :  { %v13721_v54 = vcombine.high %v1212_v18, %v1216_v49  ;;  %v13720_v51 = vcombine.low %v1212_v18, %v1216_v49 }
 0x548   :  { %11096 = vmatpush1.bf16.msra.mxu0 %v13664_v47 }
 0x549   :  { %11629 = vmatpush1.bf16.msra.mxu1 %v13666_v20  ;;  %11097 = vmatprep.subr.bf16.mxu0 %v13673_v50  ;;  %v1220_v20 = vld [vmem:[%s19818_s1 + $0x2510] sm:$0xff] }
 0x54a   :  { %11630 = vmatprep.subr.bf16.mxu1 %v13675_v52  ;;  %v1224_v50 = vld [vmem:[%s19818_s1 + $0x2530] sm:$0xff]  ;;  %v1225_v52 = vld [vmem:[%s19818_s1 + $0x2538] sm:$0xff] }
 0x54b   :  { %v13729_v38 = vcombine.high %v1220_v20, %v1224_v50  ;;  %v13728_v63 = vcombine.low %v1220_v20, %v1224_v50 }
 0x54c   :  { %11098 = vmatpush1.bf16.msra.mxu0 %v13672_v56  ;;  %v1228_v56 = vld [vmem:[%s19818_s1 + $0x2550] sm:$0xff] }
 0x54d   :  { %11631 = vmatpush1.bf16.msra.mxu1 %v13674_v61  ;;  %11099 = vmatprep.subr.bf16.mxu0 %v13681_v9  ;;  %v1232_v61 = vld [vmem:[%s19818_s1 + $0x2570] sm:$0xff]  ;;  %v1229_v9 = vld [vmem:[%s19818_s1 + $0x2558] sm:$0xff] }
 0x54e   :  { %11632 = vmatprep.subr.bf16.mxu1 %v13683_v60  ;;  %v1233_v60 = vld [vmem:[%s19818_s1 + $0x2578] sm:$0xff]  ;;  %v13737_v1 = vcombine.high %v1228_v56, %v1232_v61  ;;  %v13736_v13 = vcombine.low %v1228_v56, %v1232_v61 }
 0x54f   :  { %v13739_v45 = vcombine.high %v1229_v9, %v1233_v60  ;;  %v13738_v14 = vcombine.low %v1229_v9, %v1233_v60 }
 0x550   :  { %11100 = vmatpush1.bf16.msra.mxu0 %v13680_v4  ;;  %v1236_v4 = vld [vmem:[%s19818_s1 + $0x2590] sm:$0xff] }
 0x551   :  { %11633 = vmatpush1.bf16.msra.mxu1 %v13682_v11  ;;  %11101 = vmatprep.subr.bf16.mxu0 %v13689_v58  ;;  %v1240_v11 = vld [vmem:[%s19818_s1 + $0x25b0] sm:$0xff]  ;;  %v1237_v58 = vld [vmem:[%s19818_s1 + $0x2598] sm:$0xff] }
 0x552   :  { %11634 = vmatprep.subr.bf16.mxu1 %v13691_v12  ;;  %v1241_v12 = vld [vmem:[%s19818_s1 + $0x25b8] sm:$0xff]  ;;  %v13745_v2 = vcombine.high %v1236_v4, %v1240_v11  ;;  %v13744_v25 = vcombine.low %v1236_v4, %v1240_v11 }
 0x553   :  { %v13747_v10 = vcombine.high %v1237_v58, %v1241_v12  ;;  %v13746_v26 = vcombine.low %v1237_v58, %v1241_v12 }
 0x554   :  { %11102 = vmatpush1.bf16.msra.mxu0 %v13688_v17  ;;  %v1244_v17 = vld [vmem:[%s19818_s1 + $0x25d0] sm:$0xff] }
 0x555   :  { %11635 = vmatpush1.bf16.msra.mxu1 %v13690_v19  ;;  %11112 = vmatprep.subr.bf16.mxu0 %v13697_v7  ;;  %v1248_v19 = vld [vmem:[%s19818_s1 + $0x25f0] sm:$0xff]  ;;  %v1245_v7 = vld [vmem:[%s19818_s1 + $0x25d8] sm:$0xff] }
 0x556   :  { %11645 = vmatprep.subr.bf16.mxu1 %v13699_v22  ;;  %v1249_v22 = vld [vmem:[%s19818_s1 + $0x25f8] sm:$0xff]  ;;  %v13753_v29 = vcombine.high %v1244_v17, %v1248_v19  ;;  %v13752_v8 = vcombine.low %v1244_v17, %v1248_v19 }
 0x557   :  { %11104 = vmatmul.mubr.bf16.vlgmr.msra.gmra.mrb[4].mxu0 %v16504_v57  ;;  %v13755_v48 = vcombine.high %v1245_v7, %v1249_v22  ;;  %v13754_v59 = vcombine.low %v1245_v7, %v1249_v22 }
 0x558   :  { %11113 = vmatpush1.bf16.msra.mxu0 %v13696_v30  ;;  %11637 = vmatmul.mubr.bf16.vlgmr.msra.gmra.mrb[4].mxu1 %v16504_v57  ;;  %v1213_v57 = vld [vmem:[%s19818_s1 + $0x24d8] sm:$0xff]  ;;  %v1252_v30 = vld [vmem:[%s19818_s1 + $0x2610] sm:$0xff] }
 0x559   :  { %11646 = vmatpush1.bf16.msra.mxu1 %v13698_v32  ;;  %11114 = vmatprep.subr.bf16.mxu0 %v13705_v41  ;;  %v13723_v47 = vcombine.high %v1213_v57, %v1217_v5  ;;  %v13722_v53 = vcombine.low %v1213_v57, %v1217_v5  ;;  %v1256_v32 = vld [vmem:[%s19818_s1 + $0x2630] sm:$0xff]  ;;  %v1253_v41 = vld [vmem:[%s19818_s1 + $0x2618] sm:$0xff] }
 0x55a   :  { %11647 = vmatprep.subr.bf16.mxu1 %v13707_v34  ;;  %11144 = vmatprep.mubr.bf16.mxu0 %v16520_v6  ;;  %v1257_v34 = vld [vmem:[%s19818_s1 + $0x2638] sm:$0xff]  ;;  %v13761_v33 = vcombine.high %v1252_v30, %v1256_v32  ;;  %v13760_v18 = vcombine.low %v1252_v30, %v1256_v32 }
 0x55b   :  { %11677 = vmatprep.mubr.bf16.mxu1 %v16520_v6  ;;  %v1221_v6 = vld [vmem:[%s19818_s1 + $0x2518] sm:$0xff]  ;;  %v13763_v37 = vcombine.high %v1253_v41, %v1257_v34  ;;  %v13762_v49 = vcombine.low %v1253_v41, %v1257_v34 }
 0x55c   :  { %11115 = vmatpush1.bf16.msra.mxu0 %v13704_v39  ;;  %v13731_v55 = vcombine.high %v1221_v6, %v1225_v52  ;;  %v13730_v62 = vcombine.low %v1221_v6, %v1225_v52  ;;  %v1260_v39 = vld [vmem:[%s19818_s1 + $0x2650] sm:$0xff] }
 0x55d   :  { %11648 = vmatpush1.bf16.msra.mxu1 %v13706_v40  ;;  %11116 = vmatprep.subr.bf16.mxu0 %v13713_v43  ;;  %v1264_v40 = vld [vmem:[%s19818_s1 + $0x2670] sm:$0xff]  ;;  %v1261_v43 = vld [vmem:[%s19818_s1 + $0x2658] sm:$0xff] }
 0x55e   :  { %11649 = vmatprep.subr.bf16.mxu1 %v13715_v46  ;;  %v1265_v46 = vld [vmem:[%s19818_s1 + $0x2678] sm:$0xff]  ;;  %v13769_v57 = vcombine.high %v1260_v39, %v1264_v40  ;;  %v13768_v20 = vcombine.low %v1260_v39, %v1264_v40 }
 0x55f   :  { %v13771_v5 = vcombine.high %v1261_v43, %v1265_v46  ;;  %v13770_v50 = vcombine.low %v1261_v43, %v1265_v46 }
 0x560   :  { %11117 = vmatpush1.bf16.msra.mxu0 %v13712_v35  ;;  %v1268_v35 = vld [vmem:[%s19818_s1 + $0x2690] sm:$0xff] }
 0x561   :  { %11650 = vmatpush1.bf16.msra.mxu1 %v13714_v28  ;;  %11118 = vmatprep.subr.bf16.mxu0 %v13721_v54  ;;  %v1272_v28 = vld [vmem:[%s19818_s1 + $0x26b0] sm:$0xff]  ;;  %v1269_v54 = vld [vmem:[%s19818_s1 + $0x2698] sm:$0xff] }
 0x562   :  { %11651 = vmatprep.subr.bf16.mxu1 %v13723_v47  ;;  %v1273_v47 = vld [vmem:[%s19818_s1 + $0x26b8] sm:$0xff]  ;;  %v13777_v6 = vcombine.high %v1268_v35, %v1272_v28  ;;  %v13776_v56 = vcombine.low %v1268_v35, %v1272_v28 }
 0x563   :  { %v13779_v52 = vcombine.high %v1269_v54, %v1273_v47  ;;  %v13778_v61 = vcombine.low %v1269_v54, %v1273_v47 }
 0x564   :  { %11119 = vmatpush1.bf16.msra.mxu0 %v13720_v51  ;;  %v1276_v51 = vld [vmem:[%s19818_s1 + $0x26d0] sm:$0xff] }
 0x565   :  { %11652 = vmatpush1.bf16.msra.mxu1 %v13722_v53  ;;  %11120 = vmatprep.subr.bf16.mxu0 %v13729_v38  ;;  %v1280_v53 = vld [vmem:[%s19818_s1 + $0x26f0] sm:$0xff]  ;;  %v1277_v38 = vld [vmem:[%s19818_s1 + $0x26d8] sm:$0xff] }
 0x566   :  { %11653 = vmatprep.subr.bf16.mxu1 %v13731_v55  ;;  %v1281_v55 = vld [vmem:[%s19818_s1 + $0x26f8] sm:$0xff]  ;;  %v13785_v9 = vcombine.high %v1276_v51, %v1280_v53  ;;  %v13784_v4 = vcombine.low %v1276_v51, %v1280_v53 }
 0x567   :  { %v13787_v60 = vcombine.high %v1277_v38, %v1281_v55  ;;  %v13786_v11 = vcombine.low %v1277_v38, %v1281_v55 }
 0x568   :  { %11121 = vmatpush1.bf16.msra.mxu0 %v13728_v63  ;;  %v1284_v63 = vld [vmem:[%s19818_s1 + $0x2710] sm:$0xff] }
 0x569   :  { %11654 = vmatpush1.bf16.msra.mxu1 %v13730_v62  ;;  %11122 = vmatprep.subr.bf16.mxu0 %v13737_v1  ;;  %v1288_v62 = vld [vmem:[%s19818_s1 + $0x2730] sm:$0xff]  ;;  %v1285_v1 = vld [vmem:[%s19818_s1 + $0x2718] sm:$0xff] }
 0x56a   :  { %11655 = vmatprep.subr.bf16.mxu1 %v13739_v45  ;;  %v1289_v45 = vld [vmem:[%s19818_s1 + $0x2738] sm:$0xff]  ;;  %v13793_v58 = vcombine.high %v1284_v63, %v1288_v62  ;;  %v13792_v17 = vcombine.low %v1284_v63, %v1288_v62 }
 0x56b   :  { %v13795_v12 = vcombine.high %v1285_v1, %v1289_v45  ;;  %v13794_v19 = vcombine.low %v1285_v1, %v1289_v45 }
 0x56c   :  { %11123 = vmatpush1.bf16.msra.mxu0 %v13736_v13  ;;  %v1292_v13 = vld [vmem:[%s19818_s1 + $0x2750] sm:$0xff] }
 0x56d   :  { %11656 = vmatpush1.bf16.msra.mxu1 %v13738_v14  ;;  %11124 = vmatprep.subr.bf16.mxu0 %v13745_v2  ;;  %v1296_v14 = vld [vmem:[%s19818_s1 + $0x2770] sm:$0xff]  ;;  %v1293_v2 = vld [vmem:[%s19818_s1 + $0x2758] sm:$0xff] }
 0x56e   :  { %11657 = vmatprep.subr.bf16.mxu1 %v13747_v10  ;;  %v1297_v10 = vld [vmem:[%s19818_s1 + $0x2778] sm:$0xff]  ;;  %v13801_v7 = vcombine.high %v1292_v13, %v1296_v14  ;;  %v13800_v30 = vcombine.low %v1292_v13, %v1296_v14 }
 0x56f   :  { %v13803_v22 = vcombine.high %v1293_v2, %v1297_v10  ;;  %v13802_v32 = vcombine.low %v1293_v2, %v1297_v10  ;;  %v1348_v10 = vld [vmem:[%s19818_s1 + $0x2910] sm:$0xff] }
 0x570   :  { %11125 = vmatpush1.bf16.msra.mxu0 %v13744_v25  ;;  %v1300_v25 = vld [vmem:[%s19818_s1 + $0x2790] sm:$0xff] }
 0x571   :  { %11658 = vmatpush1.bf16.msra.mxu1 %v13746_v26  ;;  %11126 = vmatprep.subr.bf16.mxu0 %v13753_v29  ;;  %v1304_v26 = vld [vmem:[%s19818_s1 + $0x27b0] sm:$0xff]  ;;  %v1301_v29 = vld [vmem:[%s19818_s1 + $0x2798] sm:$0xff] }
 0x572   :  { %11659 = vmatprep.subr.bf16.mxu1 %v13755_v48  ;;  %v1305_v48 = vld [vmem:[%s19818_s1 + $0x27b8] sm:$0xff]  ;;  %v13809_v41 = vcombine.high %v1300_v25, %v1304_v26  ;;  %v13808_v39 = vcombine.low %v1300_v25, %v1304_v26 }
 0x573   :  { %v13811_v34 = vcombine.high %v1301_v29, %v1305_v48  ;;  %v13810_v40 = vcombine.low %v1301_v29, %v1305_v48  ;;  %v1356_v29 = vld [vmem:[%s19818_s1 + $0x2950] sm:$0xff] }
 0x574   :  { %11127 = vmatpush1.bf16.msra.mxu0 %v13752_v8  ;;  %v1308_v8 = vld [vmem:[%s19818_s1 + $0x27d0] sm:$0xff] }
 0x575   :  { %11660 = vmatpush1.bf16.msra.mxu1 %v13754_v59  ;;  %11128 = vmatprep.subr.bf16.mxu0 %v13761_v33  ;;  %v1312_v59 = vld [vmem:[%s19818_s1 + $0x27f0] sm:$0xff]  ;;  %v1309_v33 = vld [vmem:[%s19818_s1 + $0x27d8] sm:$0xff] }
 0x576   :  { %11661 = vmatprep.subr.bf16.mxu1 %v13763_v37  ;;  %v1313_v37 = vld [vmem:[%s19818_s1 + $0x27f8] sm:$0xff]  ;;  %v13817_v43 = vcombine.high %v1308_v8, %v1312_v59  ;;  %v13816_v35 = vcombine.low %v1308_v8, %v1312_v59  ;;  %v1360_v48 = vld [vmem:[%s19818_s1 + $0x2970] sm:$0xff] }
 0x577   :  { %v13819_v46 = vcombine.high %v1309_v33, %v1313_v37  ;;  %v13818_v28 = vcombine.low %v1309_v33, %v1313_v37  ;;  %v13865_v8 = vcombine.high %v1356_v29, %v1360_v48  ;;  %v1364_v33 = vld [vmem:[%s19818_s1 + $0x2990] sm:$0xff] }
 0x578   :  { %11129 = vmatpush1.bf16.msra.mxu0 %v13760_v18  ;;  %v1316_v18 = vld [vmem:[%s19818_s1 + $0x2810] sm:$0xff] }
 0x579   :  { %11662 = vmatpush1.bf16.msra.mxu1 %v13762_v49  ;;  %11130 = vmatprep.subr.bf16.mxu0 %v13769_v57  ;;  %v1320_v49 = vld [vmem:[%s19818_s1 + $0x2830] sm:$0xff]  ;;  %v1317_v57 = vld [vmem:[%s19818_s1 + $0x2818] sm:$0xff] }
 0x57a   :  { %11663 = vmatprep.subr.bf16.mxu1 %v13771_v5  ;;  %v1321_v5 = vld [vmem:[%s19818_s1 + $0x2838] sm:$0xff]  ;;  %v13825_v54 = vcombine.high %v1316_v18, %v1320_v49  ;;  %v13824_v51 = vcombine.low %v1316_v18, %v1320_v49  ;;  %v1368_v37 = vld [vmem:[%s19818_s1 + $0x29b0] sm:$0xff] }
 0x57b   :  { %v13827_v47 = vcombine.high %v1317_v57, %v1321_v5  ;;  %v13826_v53 = vcombine.low %v1317_v57, %v1321_v5  ;;  %v13873_v18 = vcombine.high %v1364_v33, %v1368_v37  ;;  %v1372_v57 = vld [vmem:[%s19818_s1 + $0x29d0] sm:$0xff] }
 0x57c   :  { %11131 = vmatpush1.bf16.msra.mxu0 %v13768_v20  ;;  %v1324_v20 = vld [vmem:[%s19818_s1 + $0x2850] sm:$0xff] }
 0x57d   :  { %11664 = vmatpush1.bf16.msra.mxu1 %v13770_v50  ;;  %11132 = vmatprep.subr.bf16.mxu0 %v13777_v6  ;;  %v1328_v50 = vld [vmem:[%s19818_s1 + $0x2870] sm:$0xff]  ;;  %v1325_v6 = vld [vmem:[%s19818_s1 + $0x2858] sm:$0xff] }
 0x57e   :  { %11665 = vmatprep.subr.bf16.mxu1 %v13779_v52  ;;  %v1329_v52 = vld [vmem:[%s19818_s1 + $0x2878] sm:$0xff]  ;;  %v13833_v38 = vcombine.high %v1324_v20, %v1328_v50  ;;  %v13832_v63 = vcombine.low %v1324_v20, %v1328_v50  ;;  %v1376_v5 = vld [vmem:[%s19818_s1 + $0x29f0] sm:$0xff] }
 0x57f   :  { %v13835_v55 = vcombine.high %v1325_v6, %v1329_v52  ;;  %v13834_v62 = vcombine.low %v1325_v6, %v1329_v52  ;;  %v13881_v20 = vcombine.high %v1372_v57, %v1376_v5  ;;  %v1380_v6 = vld [vmem:[%s19818_s1 + $0x2a10] sm:$0xff] }
 0x580   :  { %11133 = vmatpush1.bf16.msra.mxu0 %v13776_v56  ;;  %v1332_v56 = vld [vmem:[%s19818_s1 + $0x2890] sm:$0xff] }
 0x581   :  { %11666 = vmatpush1.bf16.msra.mxu1 %v13778_v61  ;;  %11134 = vmatprep.subr.bf16.mxu0 %v13785_v9  ;;  %v1336_v61 = vld [vmem:[%s19818_s1 + $0x28b0] sm:$0xff]  ;;  %v1333_v9 = vld [vmem:[%s19818_s1 + $0x2898] sm:$0xff] }
 0x582   :  { %11667 = vmatprep.subr.bf16.mxu1 %v13787_v60  ;;  %v1337_v60 = vld [vmem:[%s19818_s1 + $0x28b8] sm:$0xff]  ;;  %v13841_v1 = vcombine.high %v1332_v56, %v1336_v61  ;;  %v1384_v52 = vld [vmem:[%s19818_s1 + $0x2a30] sm:$0xff] }
 0x583   :  { %v13843_v45 = vcombine.high %v1333_v9, %v1337_v60  ;;  %v13842_v13 = vcombine.low %v1333_v9, %v1337_v60  ;;  %v1388_v9 = vld [vmem:[%s19818_s1 + $0x2a50] sm:$0xff] }
 0x584   :  { %11135 = vmatpush1.bf16.msra.mxu0 %v13784_v4  ;;  %v1340_v4 = vld [vmem:[%s19818_s1 + $0x28d0] sm:$0xff] }
 0x585   :  { %11668 = vmatpush1.bf16.msra.mxu1 %v13786_v11  ;;  %11136 = vmatprep.subr.bf16.mxu0 %v13793_v58  ;;  %v1344_v11 = vld [vmem:[%s19818_s1 + $0x28f0] sm:$0xff]  ;;  %v1345_v58 = vld [vmem:[%s19818_s1 + $0x28f8] sm:$0xff] }
 0x586   :  { %11669 = vmatprep.subr.bf16.mxu1 %v13795_v12  ;;  %v13840_v12 = vcombine.low %v1332_v56, %v1336_v61  ;;  %v13849_v14 = vcombine.high %v1340_v4, %v1344_v11  ;;  %v13889_v56 = vcombine.high %v1380_v6, %v1384_v52  ;;  %v1392_v60 = vld [vmem:[%s19818_s1 + $0x2a70] sm:$0xff] }
 0x588   :  { %11137 = vmatpush1.bf16.msra.mxu0 %v13792_v17  ;;  %v1352_v17 = vld [vmem:[%s19818_s1 + $0x2930] sm:$0xff] }
 0x589   :  { %11670 = vmatpush1.bf16.msra.mxu1 %v13794_v19  ;;  %11138 = vmatprep.subr.bf16.mxu0 %v13801_v7  ;;  %v1353_v19 = vld [vmem:[%s19818_s1 + $0x2938] sm:$0xff]  ;;  %v13848_v7 = vcombine.low %v1340_v4, %v1344_v11  ;;  %v13857_v25 = vcombine.high %v1348_v10, %v1352_v17  ;;  %v13897_v4 = vcombine.high %v1388_v9, %v1392_v60 }
 0x58a   :  { %11671 = vmatprep.subr.bf16.mxu1 %v13803_v22 }
 0x58c   :  { %11139 = vmatpush1.bf16.msra.mxu0 %v13800_v30  ;;  %v1357_v30 = vld [vmem:[%s19818_s1 + $0x2958] sm:$0xff] }
 0x58d   :  { %11672 = vmatpush1.bf16.msra.mxu1 %v13802_v32  ;;  %11140 = vmatprep.subr.bf16.mxu0 %v13809_v41  ;;  %v1361_v32 = vld [vmem:[%s19818_s1 + $0x2978] sm:$0xff]  ;;  %v13856_v41 = vcombine.low %v1348_v10, %v1352_v17 }
 0x58e   :  { %11673 = vmatprep.subr.bf16.mxu1 %v13811_v34  ;;  %v13867_v59 = vcombine.high %v1357_v30, %v1361_v32 }
 0x590   :  { %11141 = vmatpush1.bf16.msra.mxu0 %v13808_v39  ;;  %v1365_v39 = vld [vmem:[%s19818_s1 + $0x2998] sm:$0xff] }
 0x591   :  { %11674 = vmatpush1.bf16.msra.mxu1 %v13810_v40  ;;  %11142 = vmatprep.subr.bf16.mxu0 %v13817_v43  ;;  %v1369_v40 = vld [vmem:[%s19818_s1 + $0x29b8] sm:$0xff]  ;;  %v13864_v43 = vcombine.low %v1356_v29, %v1360_v48 }
 0x592   :  { %11675 = vmatprep.subr.bf16.mxu1 %v13819_v46  ;;  %v13866_v46 = vcombine.low %v1357_v30, %v1361_v32  ;;  %v13875_v49 = vcombine.high %v1365_v39, %v1369_v40  ;;  %v1412_v30 = vld [vmem:[%s19818_s1 + $0x2b10] sm:$0xff] }
 0x593   :  { %v1416_v32 = vld [vmem:[%s19818_s1 + $0x2b30] sm:$0xff] }
 0x594   :  { %11143 = vmatpush1.bf16.msra.mxu0 %v13816_v35  ;;  %v1373_v35 = vld [vmem:[%s19818_s1 + $0x29d8] sm:$0xff] }
 0x595   :  { %11676 = vmatpush1.bf16.msra.mxu1 %v13818_v28  ;;  %11153 = vmatprep.subr.bf16.mxu0 %v13825_v54  ;;  %v1377_v28 = vld [vmem:[%s19818_s1 + $0x29f8] sm:$0xff]  ;;  %v13872_v54 = vcombine.low %v1364_v33, %v1368_v37  ;;  %v13921_v33 = vcombine.high %v1412_v30, %v1416_v32 }
 0x596   :  { %11686 = vmatprep.subr.bf16.mxu1 %v13827_v47  ;;  %v13874_v47 = vcombine.low %v1365_v39, %v1369_v40  ;;  %v13883_v50 = vcombine.high %v1373_v35, %v1377_v28  ;;  %v1420_v39 = vld [vmem:[%s19818_s1 + $0x2b50] sm:$0xff] }
 0x597   :  { %11145 = vmatmul.mubr.bf16.vlgmr.msra.gmra.mrb[4].mxu0 %v16715_v3  ;;  %v1424_v40 = vld [vmem:[%s19818_s1 + $0x2b70] sm:$0xff] }
 0x598   :  { %11154 = vmatpush1.bf16.msra.mxu0 %v13824_v51  ;;  %11678 = vmatmul.mubr.bf16.vlgmr.msra.gmra.mrb[4].mxu1 %v16715_v3  ;;  %v1341_v3 = vld [vmem:[%s19818_s1 + $0x28d8] sm:$0xff] }
 0x599   :  { %11687 = vmatpush1.bf16.msra.mxu1 %v13826_v53  ;;  %11155 = vmatprep.subr.bf16.mxu0 %v13833_v38  ;;  %v13851_v2 = vcombine.high %v1341_v3, %v1345_v58  ;;  %v13850_v22 = vcombine.low %v1341_v3, %v1345_v58  ;;  %v1381_v51 = vld [vmem:[%s19818_s1 + $0x2a18] sm:$0xff]  ;;  %v13880_v38 = vcombine.low %v1372_v57, %v1376_v5  ;;  %v1396_v3 = vld [vmem:[%s19818_s1 + $0x2a90] sm:$0xff] }
 0x59a   :  { %11688 = vmatprep.subr.bf16.mxu1 %v13835_v55  ;;  %11185 = vmatprep.mubr.bf16.mxu0 %v16730_v15  ;;  %v1385_v53 = vld [vmem:[%s19818_s1 + $0x2a38] sm:$0xff]  ;;  %v13882_v55 = vcombine.low %v1373_v35, %v1377_v28  ;;  %v1400_v58 = vld [vmem:[%s19818_s1 + $0x2ab0] sm:$0xff]  ;;  %v13929_v57 = vcombine.high %v1420_v39, %v1424_v40 }
 0x59b   :  { %11718 = vmatprep.mubr.bf16.mxu1 %v16730_v15  ;;  %v1349_v15 = vld [vmem:[%s19818_s1 + $0x2918] sm:$0xff]  ;;  %v13891_v61 = vcombine.high %v1381_v51, %v1385_v53  ;;  %v13905_v10 = vcombine.high %v1396_v3, %v1400_v58  ;;  %v1428_v35 = vld [vmem:[%s19818_s1 + $0x2b90] sm:$0xff] }
 0x59c   :  { %11156 = vmatpush1.bf16.msra.mxu0 %v13832_v63  ;;  %v13859_v26 = vcombine.high %v1349_v15, %v1353_v19  ;;  %v13858_v34 = vcombine.low %v1349_v15, %v1353_v19  ;;  %v1389_v63 = vld [vmem:[%s19818_s1 + $0x2a58] sm:$0xff]  ;;  %v1404_v15 = vld [vmem:[%s19818_s1 + $0x2ad0] sm:$0xff] }
 0x59d   :  { %11689 = vmatpush1.bf16.msra.mxu1 %v13834_v62  ;;  %11157 = vmatprep.subr.bf16.mxu0 %v13841_v1  ;;  %v1393_v62 = vld [vmem:[%s19818_s1 + $0x2a78] sm:$0xff]  ;;  %v13888_v1 = vcombine.low %v1380_v6, %v1384_v52  ;;  %v1408_v19 = vld [vmem:[%s19818_s1 + $0x2af0] sm:$0xff] }
 0x59e   :  { %11690 = vmatprep.subr.bf16.mxu1 %v13843_v45  ;;  %v13890_v45 = vcombine.low %v1381_v51, %v1385_v53  ;;  %v13899_v11 = vcombine.high %v1389_v63, %v1393_v62  ;;  %v13913_v29 = vcombine.high %v1404_v15, %v1408_v19  ;;  %v1432_v28 = vld [vmem:[%s19818_s1 + $0x2bb0] sm:$0xff] }
 0x59f   :  { %v13937_v6 = vcombine.high %v1428_v35, %v1432_v28  ;;  %v1436_v51 = vld [vmem:[%s19818_s1 + $0x2bd0] sm:$0xff] }
 0x5a0   :  { %11158 = vmatpush1.bf16.msra.mxu0 %v13840_v12  ;;  %v1397_v12 = vld [vmem:[%s19818_s1 + $0x2a98] sm:$0xff]  ;;  %v1440_v53 = vld [vmem:[%s19818_s1 + $0x2bf0] sm:$0xff] }
 0x5a1   :  { %11691 = vmatpush1.bf16.msra.mxu1 %v13842_v13  ;;  %11159 = vmatprep.subr.bf16.mxu0 %v13849_v14  ;;  %v1401_v13 = vld [vmem:[%s19818_s1 + $0x2ab8] sm:$0xff]  ;;  %v13896_v14 = vcombine.low %v1388_v9, %v1392_v60  ;;  %v13945_v9 = vcombine.high %v1436_v51, %v1440_v53 }
 0x5a2   :  { %11692 = vmatprep.subr.bf16.mxu1 %v13851_v2  ;;  %v13898_v2 = vcombine.low %v1389_v63, %v1393_v62  ;;  %v13907_v17 = vcombine.high %v1397_v12, %v1401_v13  ;;  %v1444_v63 = vld [vmem:[%s19818_s1 + $0x2c10] sm:$0xff] }
 0x5a3   :  { %v1448_v62 = vld [vmem:[%s19818_s1 + $0x2c30] sm:$0xff] }
 0x5a4   :  { %11160 = vmatpush1.bf16.msra.mxu0 %v13848_v7  ;;  %v1405_v7 = vld [vmem:[%s19818_s1 + $0x2ad8] sm:$0xff] }
 0x5a5   :  { %11693 = vmatpush1.bf16.msra.mxu1 %v13850_v22  ;;  %11161 = vmatprep.subr.bf16.mxu0 %v13857_v25  ;;  %v1409_v22 = vld [vmem:[%s19818_s1 + $0x2af8] sm:$0xff]  ;;  %v13904_v25 = vcombine.low %v1396_v3, %v1400_v58  ;;  %v13953_v3 = vcombine.high %v1444_v63, %v1448_v62 }
 0x5a6   :  { %11694 = vmatprep.subr.bf16.mxu1 %v13859_v26  ;;  %v13906_v26 = vcombine.low %v1397_v12, %v1401_v13  ;;  %v13915_v48 = vcombine.high %v1405_v7, %v1409_v22  ;;  %v1452_v12 = vld [vmem:[%s19818_s1 + $0x2c50] sm:$0xff] }
 0x5a7   :  { %v1456_v13 = vld [vmem:[%s19818_s1 + $0x2c70] sm:$0xff] }
 0x5a8   :  { %11162 = vmatpush1.bf16.msra.mxu0 %v13856_v41  ;;  %v1413_v41 = vld [vmem:[%s19818_s1 + $0x2b18] sm:$0xff] }
 0x5a9   :  { %11695 = vmatpush1.bf16.msra.mxu1 %v13858_v34  ;;  %11163 = vmatprep.subr.bf16.mxu0 %v13865_v8  ;;  %v1417_v34 = vld [vmem:[%s19818_s1 + $0x2b38] sm:$0xff]  ;;  %v13912_v8 = vcombine.low %v1404_v15, %v1408_v19  ;;  %v13961_v15 = vcombine.high %v1452_v12, %v1456_v13 }
 0x5aa   :  { %11696 = vmatprep.subr.bf16.mxu1 %v13867_v59  ;;  %v13914_v59 = vcombine.low %v1405_v7, %v1409_v22  ;;  %v13923_v37 = vcombine.high %v1413_v41, %v1417_v34  ;;  %v1460_v7 = vld [vmem:[%s19818_s1 + $0x2c90] sm:$0xff] }
 0x5ab   :  { %v1464_v22 = vld [vmem:[%s19818_s1 + $0x2cb0] sm:$0xff] }
 0x5ac   :  { %11164 = vmatpush1.bf16.msra.mxu0 %v13864_v43  ;;  %v1421_v43 = vld [vmem:[%s19818_s1 + $0x2b58] sm:$0xff] }
 0x5ad   :  { %11697 = vmatpush1.bf16.msra.mxu1 %v13866_v46  ;;  %11165 = vmatprep.subr.bf16.mxu0 %v13873_v18  ;;  %v1425_v46 = vld [vmem:[%s19818_s1 + $0x2b78] sm:$0xff]  ;;  %v13920_v18 = vcombine.low %v1412_v30, %v1416_v32  ;;  %v13969_v30 = vcombine.high %v1460_v7, %v1464_v22 }
 0x5ae   :  { %11698 = vmatprep.subr.bf16.mxu1 %v13875_v49  ;;  %v13922_v49 = vcombine.low %v1413_v41, %v1417_v34  ;;  %v13931_v5 = vcombine.high %v1421_v43, %v1425_v46  ;;  %v1468_v41 = vld [vmem:[%s19818_s1 + $0x2cd0] sm:$0xff] }
 0x5af   :  { %v1472_v34 = vld [vmem:[%s19818_s1 + $0x2cf0] sm:$0xff] }
 0x5b0   :  { %11166 = vmatpush1.bf16.msra.mxu0 %v13872_v54  ;;  %v1429_v54 = vld [vmem:[%s19818_s1 + $0x2b98] sm:$0xff] }
 0x5b1   :  { %11699 = vmatpush1.bf16.msra.mxu1 %v13874_v47  ;;  %11167 = vmatprep.subr.bf16.mxu0 %v13881_v20  ;;  %v1433_v47 = vld [vmem:[%s19818_s1 + $0x2bb8] sm:$0xff]  ;;  %v13928_v20 = vcombine.low %v1420_v39, %v1424_v40  ;;  %v1476_v40 = vld [vmem:[%s19818_s1 + $0x2d10] sm:$0xff] }
 0x5b2   :  { %11700 = vmatprep.subr.bf16.mxu1 %v13883_v50  ;;  %v13930_v50 = vcombine.low %v1421_v43, %v1425_v46  ;;  %v13939_v52 = vcombine.high %v1429_v54, %v1433_v47  ;;  %v1480_v43 = vld [vmem:[%s19818_s1 + $0x2d30] sm:$0xff]  ;;  %v1481_v46 = vld [vmem:[%s19818_s1 + $0x2d38] sm:$0xff] }
 0x5b4   :  { %11168 = vmatpush1.bf16.msra.mxu0 %v13880_v38  ;;  %v1437_v38 = vld [vmem:[%s19818_s1 + $0x2bd8] sm:$0xff] }
 0x5b5   :  { %11701 = vmatpush1.bf16.msra.mxu1 %v13882_v55  ;;  %11169 = vmatprep.subr.bf16.mxu0 %v13889_v56  ;;  %v1441_v55 = vld [vmem:[%s19818_s1 + $0x2bf8] sm:$0xff]  ;;  %v13936_v56 = vcombine.low %v1428_v35, %v1432_v28  ;;  %v1484_v35 = vld [vmem:[%s19818_s1 + $0x2d50] sm:$0xff] }
 0x5b6   :  { %11702 = vmatprep.subr.bf16.mxu1 %v13891_v61  ;;  %v13938_v61 = vcombine.low %v1429_v54, %v1433_v47  ;;  %v13947_v60 = vcombine.high %v1437_v38, %v1441_v55  ;;  %v1488_v28 = vld [vmem:[%s19818_s1 + $0x2d70] sm:$0xff]  ;;  %v1485_v54 = vld [vmem:[%s19818_s1 + $0x2d58] sm:$0xff] }
 0x5b7   :  { %v1489_v47 = vld [vmem:[%s19818_s1 + $0x2d78] sm:$0xff] }
 0x5b8   :  { %11170 = vmatpush1.bf16.msra.mxu0 %v13888_v1  ;;  %v1445_v1 = vld [vmem:[%s19818_s1 + $0x2c18] sm:$0xff] }
 0x5b9   :  { %11703 = vmatpush1.bf16.msra.mxu1 %v13890_v45  ;;  %11171 = vmatprep.subr.bf16.mxu0 %v13897_v4  ;;  %v1449_v45 = vld [vmem:[%s19818_s1 + $0x2c38] sm:$0xff]  ;;  %v13944_v4 = vcombine.low %v1436_v51, %v1440_v53  ;;  %v1492_v51 = vld [vmem:[%s19818_s1 + $0x2d90] sm:$0xff] }
 0x5ba   :  { %11704 = vmatprep.subr.bf16.mxu1 %v13899_v11  ;;  %v13946_v11 = vcombine.low %v1437_v38, %v1441_v55  ;;  %v13955_v58 = vcombine.high %v1445_v1, %v1449_v45  ;;  %v1496_v53 = vld [vmem:[%s19818_s1 + $0x2db0] sm:$0xff]  ;;  %v1493_v38 = vld [vmem:[%s19818_s1 + $0x2d98] sm:$0xff] }
 0x5bb   :  { %v1497_v55 = vld [vmem:[%s19818_s1 + $0x2db8] sm:$0xff] }
 0x5bc   :  { %11172 = vmatpush1.bf16.msra.mxu0 %v13896_v14  ;;  %v1453_v14 = vld [vmem:[%s19818_s1 + $0x2c58] sm:$0xff] }
 0x5bd   :  { %11705 = vmatpush1.bf16.msra.mxu1 %v13898_v2  ;;  %11173 = vmatprep.subr.bf16.mxu0 %v13905_v10  ;;  %v1457_v2 = vld [vmem:[%s19818_s1 + $0x2c78] sm:$0xff]  ;;  %v13952_v10 = vcombine.low %v1444_v63, %v1448_v62  ;;  %v1500_v63 = vld [vmem:[%s19818_s1 + $0x2dd0] sm:$0xff] }
 0x5be   :  { %11706 = vmatprep.subr.bf16.mxu1 %v13907_v17  ;;  %v13954_v17 = vcombine.low %v1445_v1, %v1449_v45  ;;  %v13963_v19 = vcombine.high %v1453_v14, %v1457_v2  ;;  %v1504_v62 = vld [vmem:[%s19818_s1 + $0x2df0] sm:$0xff]  ;;  %v1501_v1 = vld [vmem:[%s19818_s1 + $0x2dd8] sm:$0xff] }
 0x5bf   :  { %v1505_v45 = vld [vmem:[%s19818_s1 + $0x2df8] sm:$0xff] }
 0x5c0   :  { %11174 = vmatpush1.bf16.msra.mxu0 %v13904_v25  ;;  %v1461_v25 = vld [vmem:[%s19818_s1 + $0x2c98] sm:$0xff] }
 0x5c1   :  { %11707 = vmatpush1.bf16.msra.mxu1 %v13906_v26  ;;  %11175 = vmatprep.subr.bf16.mxu0 %v13913_v29  ;;  %v1465_v26 = vld [vmem:[%s19818_s1 + $0x2cb8] sm:$0xff]  ;;  %v13960_v29 = vcombine.low %v1452_v12, %v1456_v13  ;;  %v1508_v12 = vld [vmem:[%s19818_s1 + $0x2e10] sm:$0xff] }
 0x5c2   :  { %11708 = vmatprep.subr.bf16.mxu1 %v13915_v48  ;;  %v13962_v48 = vcombine.low %v1453_v14, %v1457_v2  ;;  %v13971_v32 = vcombine.high %v1461_v25, %v1465_v26  ;;  %v1512_v13 = vld [vmem:[%s19818_s1 + $0x2e30] sm:$0xff]  ;;  %v1509_v14 = vld [vmem:[%s19818_s1 + $0x2e18] sm:$0xff] }
 0x5c3   :  { %v1513_v2 = vld [vmem:[%s19818_s1 + $0x2e38] sm:$0xff] }
 0x5c4   :  { %11176 = vmatpush1.bf16.msra.mxu0 %v13912_v8  ;;  %v1473_v8 = vld [vmem:[%s19818_s1 + $0x2cf8] sm:$0xff] }
 0x5c5   :  { %11709 = vmatpush1.bf16.msra.mxu1 %v13914_v59  ;;  %11177 = vmatprep.subr.bf16.mxu0 %v13921_v33  ;;  %v13968_v59 = vcombine.low %v1460_v7, %v1464_v22  ;;  %v13970_v33 = vcombine.low %v1461_v25, %v1465_v26  ;;  %v1516_v7 = vld [vmem:[%s19818_s1 + $0x2e50] sm:$0xff]  ;;  %v1517_v25 = vld [vmem:[%s19818_s1 + $0x2e58] sm:$0xff] }
 0x5c6   :  { %11710 = vmatprep.subr.bf16.mxu1 %v13923_v37  ;;  %v13977_v37 = vcombine.high %v1468_v41, %v1472_v34  ;;  %v1520_v22 = vld [vmem:[%s19818_s1 + $0x2e70] sm:$0xff]  ;;  %v1521_v26 = vld [vmem:[%s19818_s1 + $0x2e78] sm:$0xff] }
 0x5c8   :  { %11178 = vmatpush1.bf16.msra.mxu0 %v13920_v18  ;;  %v13976_v18 = vcombine.low %v1468_v41, %v1472_v34  ;;  %v1524_v41 = vld [vmem:[%s19818_s1 + $0x2e90] sm:$0xff] }
 0x5c9   :  { %11711 = vmatpush1.bf16.msra.mxu1 %v13922_v49  ;;  %11179 = vmatprep.subr.bf16.mxu0 %v13929_v57  ;;  %v13985_v57 = vcombine.high %v1476_v40, %v1480_v43  ;;  %v1528_v34 = vld [vmem:[%s19818_s1 + $0x2eb0] sm:$0xff] }
 0x5ca   :  { %11712 = vmatprep.subr.bf16.mxu1 %v13931_v5 }
 0x5cc   :  { %11180 = vmatpush1.bf16.msra.mxu0 %v13928_v20  ;;  %v13984_v20 = vcombine.low %v1476_v40, %v1480_v43  ;;  %v1532_v40 = vld [vmem:[%s19818_s1 + $0x2ed0] sm:$0xff] }
 0x5cd   :  { %11713 = vmatpush1.bf16.msra.mxu1 %v13930_v50  ;;  %11181 = vmatprep.subr.bf16.mxu0 %v13937_v6  ;;  %v13993_v6 = vcombine.high %v1484_v35, %v1488_v28  ;;  %v1536_v43 = vld [vmem:[%s19818_s1 + $0x2ef0] sm:$0xff] }
 0x5ce   :  { %11714 = vmatprep.subr.bf16.mxu1 %v13939_v52  ;;  %v13995_v52 = vcombine.high %v1485_v54, %v1489_v47 }
 0x5d0   :  { %11182 = vmatpush1.bf16.msra.mxu0 %v13936_v56  ;;  %v13992_v56 = vcombine.low %v1484_v35, %v1488_v28  ;;  %v1540_v35 = vld [vmem:[%s19818_s1 + $0x2f10] sm:$0xff] }
 0x5d1   :  { %11715 = vmatpush1.bf16.msra.mxu1 %v13938_v61  ;;  %11183 = vmatprep.subr.bf16.mxu0 %v13945_v9  ;;  %v13994_v61 = vcombine.low %v1485_v54, %v1489_v47  ;;  %v14001_v9 = vcombine.high %v1492_v51, %v1496_v53  ;;  %v1544_v28 = vld [vmem:[%s19818_s1 + $0x2f30] sm:$0xff]  ;;  %v1541_v54 = vld [vmem:[%s19818_s1 + $0x2f18] sm:$0xff] }
 0x5d2   :  { %11716 = vmatprep.subr.bf16.mxu1 %v13947_v60  ;;  %v14003_v60 = vcombine.high %v1493_v38, %v1497_v55  ;;  %v1545_v47 = vld [vmem:[%s19818_s1 + $0x2f38] sm:$0xff] }
 0x5d4   :  { %11184 = vmatpush1.bf16.msra.mxu0 %v13944_v4  ;;  %v14000_v4 = vcombine.low %v1492_v51, %v1496_v53  ;;  %v1548_v51 = vld [vmem:[%s19818_s1 + $0x2f50] sm:$0xff] }
 0x5d5   :  { %11717 = vmatpush1.bf16.msra.mxu1 %v13946_v11  ;;  %11194 = vmatprep.subr.bf16.mxu0 %v13953_v3  ;;  %v14002_v11 = vcombine.low %v1493_v38, %v1497_v55  ;;  %v14009_v3 = vcombine.high %v1500_v63, %v1504_v62  ;;  %v1552_v53 = vld [vmem:[%s19818_s1 + $0x2f70] sm:$0xff]  ;;  %v1549_v38 = vld [vmem:[%s19818_s1 + $0x2f58] sm:$0xff] }
 0x5d6   :  { %11727 = vmatprep.subr.bf16.mxu1 %v13955_v58  ;;  %v14011_v58 = vcombine.high %v1501_v1, %v1505_v45  ;;  %v1553_v55 = vld [vmem:[%s19818_s1 + $0x2f78] sm:$0xff] }
 0x5d7   :  { %11186 = vmatmul.mubr.bf16.vlgmr.msra.gmra.mrb[4].mxu0 %v16919_v21 }
 0x5d8   :  { %11195 = vmatpush1.bf16.msra.mxu0 %v13952_v10  ;;  %11719 = vmatmul.mubr.bf16.vlgmr.msra.gmra.mrb[4].mxu1 %v16919_v21  ;;  %v1469_v21 = vld [vmem:[%s19818_s1 + $0x2cd8] sm:$0xff]  ;;  %v14008_v10 = vcombine.low %v1500_v63, %v1504_v62  ;;  %v1556_v63 = vld [vmem:[%s19818_s1 + $0x2f90] sm:$0xff] }
 0x5d9   :  { %11728 = vmatpush1.bf16.msra.mxu1 %v13954_v17  ;;  %11196 = vmatprep.subr.bf16.mxu0 %v13961_v15  ;;  %v13979_v39 = vcombine.high %v1469_v21, %v1473_v8  ;;  %v13978_v49 = vcombine.low %v1469_v21, %v1473_v8  ;;  %v14010_v17 = vcombine.low %v1501_v1, %v1505_v45  ;;  %v1525_v21 = vld [vmem:[%s19818_s1 + $0x2e98] sm:$0xff]  ;;  %v1560_v62 = vld [vmem:[%s19818_s1 + $0x2fb0] sm:$0xff] }
 0x5da   :  { %11729 = vmatprep.subr.bf16.mxu1 %v13963_v19  ;;  %11226 = vmatprep.mubr.bf16.mxu0 %v16935_v31  ;;  %v14017_v15 = vcombine.high %v1508_v12, %v1512_v13  ;;  %v14019_v19 = vcombine.high %v1509_v14, %v1513_v2  ;;  %v1529_v8 = vld [vmem:[%s19818_s1 + $0x2eb8] sm:$0xff] }
 0x5db   :  { %11759 = vmatprep.mubr.bf16.mxu1 %v16935_v31  ;;  %v1477_v31 = vld [vmem:[%s19818_s1 + $0x2d18] sm:$0xff] }
 0x5dc   :  { %11197 = vmatpush1.bf16.msra.mxu0 %v13960_v29  ;;  %v13987_v5 = vcombine.high %v1477_v31, %v1481_v46  ;;  %v13986_v50 = vcombine.low %v1477_v31, %v1481_v46  ;;  %v14016_v29 = vcombine.low %v1508_v12, %v1512_v13  ;;  %v1533_v31 = vld [vmem:[%s19818_s1 + $0x2ed8] sm:$0xff]  ;;  %v1564_v12 = vld [vmem:[%s19818_s1 + $0x2fd0] sm:$0xff] }
 0x5dd   :  { %11730 = vmatpush1.bf16.msra.mxu1 %v13962_v48  ;;  %11198 = vmatprep.subr.bf16.mxu0 %v13969_v30  ;;  %v14018_v48 = vcombine.low %v1509_v14, %v1513_v2  ;;  %v14025_v30 = vcombine.high %v1516_v7, %v1520_v22  ;;  %v1537_v46 = vld [vmem:[%s19818_s1 + $0x2ef8] sm:$0xff]  ;;  %v1568_v13 = vld [vmem:[%s19818_s1 + $0x2ff0] sm:$0xff] }
 0x5de   :  { %11731 = vmatprep.subr.bf16.mxu1 %v13971_v32  ;;  %v14027_v32 = vcombine.high %v1517_v25, %v1521_v26  ;;  %v1557_v1 = vld [vmem:[%s19818_s1 + $0x2f98] sm:$0xff] }
 0x5df   :  { %v1561_v45 = vld [vmem:[%s19818_s1 + $0x2fb8] sm:$0xff] }
 0x5e0   :  { %11199 = vmatpush1.bf16.msra.mxu0 %v13968_v59  ;;  %v14024_v59 = vcombine.low %v1516_v7, %v1520_v22  ;;  %v1565_v14 = vld [vmem:[%s19818_s1 + $0x2fd8] sm:$0xff]  ;;  %v1572_v7 = vld [vmem:[%s19818_s1 + $0x3010] sm:$0xff] }
 0x5e1   :  { %11732 = vmatpush1.bf16.msra.mxu1 %v13970_v33  ;;  %11200 = vmatprep.subr.bf16.mxu0 %v13977_v37  ;;  %v14026_v33 = vcombine.low %v1517_v25, %v1521_v26  ;;  %v14033_v37 = vcombine.high %v1524_v41, %v1528_v34  ;;  %v1569_v2 = vld [vmem:[%s19818_s1 + $0x2ff8] sm:$0xff]  ;;  %v1576_v22 = vld [vmem:[%s19818_s1 + $0x3030] sm:$0xff] }
 0x5e2   :  { %11733 = vmatprep.subr.bf16.mxu1 %v13979_v39  ;;  %v14035_v39 = vcombine.high %v1525_v21, %v1529_v8  ;;  %v1573_v25 = vld [vmem:[%s19818_s1 + $0x3018] sm:$0xff] }
 0x5e3   :  { %v1577_v26 = vld [vmem:[%s19818_s1 + $0x3038] sm:$0xff] }
 0x5e4   :  { %11201 = vmatpush1.bf16.msra.mxu0 %v13976_v18  ;;  %v14032_v18 = vcombine.low %v1524_v41, %v1528_v34  ;;  %v1580_v41 = vld [vmem:[%s19818_s1 + $0x3050] sm:$0xff] }
 0x5e5   :  { %11734 = vmatpush1.bf16.msra.mxu1 %v13978_v49  ;;  %11202 = vmatprep.subr.bf16.mxu0 %v13985_v57  ;;  %v14034_v49 = vcombine.low %v1525_v21, %v1529_v8  ;;  %v14041_v57 = vcombine.high %v1532_v40, %v1536_v43  ;;  %v1584_v34 = vld [vmem:[%s19818_s1 + $0x3070] sm:$0xff]  ;;  %v1581_v21 = vld [vmem:[%s19818_s1 + $0x3058] sm:$0xff] }
 0x5e6   :  { %11735 = vmatprep.subr.bf16.mxu1 %v13987_v5  ;;  %v14043_v5 = vcombine.high %v1533_v31, %v1537_v46  ;;  %v1585_v8 = vld [vmem:[%s19818_s1 + $0x3078] sm:$0xff] }
 0x5e8   :  { %11203 = vmatpush1.bf16.msra.mxu0 %v13984_v20  ;;  %v14040_v20 = vcombine.low %v1532_v40, %v1536_v43  ;;  %v1588_v40 = vld [vmem:[%s19818_s1 + $0x3090] sm:$0xff] }
 0x5e9   :  { %11736 = vmatpush1.bf16.msra.mxu1 %v13986_v50  ;;  %11204 = vmatprep.subr.bf16.mxu0 %v13993_v6  ;;  %v14042_v50 = vcombine.low %v1533_v31, %v1537_v46  ;;  %v14049_v6 = vcombine.high %v1540_v35, %v1544_v28  ;;  %v1592_v43 = vld [vmem:[%s19818_s1 + $0x30b0] sm:$0xff]  ;;  %v1610_v31 = vsub.s32 1, %v14673_v44  ;;  %v1589_v46 = vld [vmem:[%s19818_s1 + $0x3098] sm:$0xff] }
 0x5ea   :  { %11737 = vmatprep.subr.bf16.mxu1 %v13995_v52  ;;  %v14051_v52 = vcombine.high %v1541_v54, %v1545_v47 }
 0x5ec   :  { %11205 = vmatpush1.bf16.msra.mxu0 %v13992_v56  ;;  %v14048_v56 = vcombine.low %v1540_v35, %v1544_v28  ;;  %v14090_v35 = vcombine.low %v1581_v21, %v1585_v8  ;;  %v14097_v28 = vcombine.high %v1588_v40, %v1592_v43 }
 0x5ed   :  { %11738 = vmatpush1.bf16.msra.mxu1 %v13994_v61  ;;  %11206 = vmatprep.subr.bf16.mxu0 %v14001_v9  ;;  %v14050_v61 = vcombine.low %v1541_v54, %v1545_v47  ;;  %v14057_v9 = vcombine.high %v1548_v51, %v1552_v53  ;;  %v1596_v47 = vld [vmem:[%s19818_s1 + $0x30d0] sm:$0xff] }
 0x5ee   :  { %11739 = vmatprep.subr.bf16.mxu1 %v14003_v60  ;;  %v14059_v60 = vcombine.high %v1549_v38, %v1553_v55 }
 0x5f0   :  { %11207 = vmatpush1.bf16.msra.mxu0 %v14000_v4  ;;  %v14056_v4 = vcombine.low %v1548_v51, %v1552_v53  ;;  %v14096_v51 = vcombine.low %v1588_v40, %v1592_v43  ;;  %v14500_v40 = vld [vmem:[%s19820_s3 + $0xb0] sm:$0xff]   ;;  %v14501_v43 = vld [vmem:[%s19820_s3 + $0x78] sm:$0xff]  }
 0x5f1   :  { %11740 = vmatpush1.bf16.msra.mxu1 %v14002_v11  ;;  %11208 = vmatprep.subr.bf16.mxu0 %v14009_v3  ;;  %v14058_v11 = vcombine.low %v1549_v38, %v1553_v55  ;;  %v14065_v3 = vcombine.high %v1556_v63, %v1560_v62 }
 0x5f2   :  { %11741 = vmatprep.subr.bf16.mxu1 %v14011_v58  ;;  %v14067_v58 = vcombine.high %v1557_v1, %v1561_v45 }
 0x5f4   :  { %11209 = vmatpush1.bf16.msra.mxu0 %v14008_v10  ;;  %v14064_v10 = vcombine.low %v1556_v63, %v1560_v62  ;;  %v14474_v63 = vld [vmem:[%s19820_s3 + $0xc0] sm:$0xff]  }
 0x5f5   :  { %11742 = vmatpush1.bf16.msra.mxu1 %v14010_v17  ;;  %11210 = vmatprep.subr.bf16.mxu0 %v14017_v15  ;;  %v14066_v17 = vcombine.low %v1557_v1, %v1561_v45  ;;  %v14073_v15 = vcombine.high %v1564_v12, %v1568_v13  ;;  %v14477_v45 = vld [vmem:[%s19820_s3 + $0x48] sm:$0xff]  }
 0x5f6   :  { %11743 = vmatprep.subr.bf16.mxu1 %v14019_v19  ;;  %v14075_v19 = vcombine.high %v1565_v14, %v1569_v2 }
 0x5f8   :  { %11211 = vmatpush1.bf16.msra.mxu0 %v14016_v29  ;;  %v14072_v29 = vcombine.low %v1564_v12, %v1568_v13  ;;  %v14480_v12 = vld [vmem:[%s19820_s3 + $0x88] sm:$0xff]   ;;  %v14481_v13 = vld [vmem:[%s19820_s3 + $0x50] sm:$0xff]  }
 0x5f9   :  { %11744 = vmatpush1.bf16.msra.mxu1 %v14018_v48  ;;  %11212 = vmatprep.subr.bf16.mxu0 %v14025_v30  ;;  %v14074_v48 = vcombine.low %v1565_v14, %v1569_v2  ;;  %v14081_v30 = vcombine.high %v1572_v7, %v1576_v22  ;;  %v14483_v14 = vld [vmem:[%s19820_s3 + $0x10] sm:$0xff]  }
 0x5fa   :  { %11745 = vmatprep.subr.bf16.mxu1 %v14027_v32  ;;  %v14083_v32 = vcombine.high %v1573_v25, %v1577_v26  ;;  %v14484_v2 = vld [vmem:[%s19820_s3 + $0x90] sm:$0xff]  }
 0x5fc   :  { %11213 = vmatpush1.bf16.msra.mxu0 %v14024_v59  ;;  %v14080_v59 = vcombine.low %v1572_v7, %v1576_v22  ;;  %v14489_v7 = vld [vmem:[%s19820_s3 + $0x60] sm:$0xff]  }
 0x5fd   :  { %11746 = vmatpush1.bf16.msra.mxu1 %v14026_v33  ;;  %11214 = vmatprep.subr.bf16.mxu0 %v14033_v37  ;;  %v14082_v33 = vcombine.low %v1573_v25, %v1577_v26  ;;  %v14089_v37 = vcombine.high %v1580_v41, %v1584_v34  ;;  %v14490_v22 = vld [vmem:[%s19820_s3 + $0xe0] sm:$0xff]   ;;  %v1606_v26 = vsub.s32 0, %v14673_v44 }
 0x5fe   :  { %11747 = vmatprep.subr.bf16.mxu1 %v14035_v39  ;;  %v14091_v39 = vcombine.high %v1581_v21, %v1585_v8  ;;  %v14491_v25 = vld [vmem:[%s19820_s3 + $0x20] sm:$0xff]   ;;  %v14496_v21 = vld [vmem:[%s19820_s3 + $0xa8] sm:$0xff]   ;;  %v14497_v8 = vld [vmem:[%s19820_s3 + $0x70] sm:$0xff]  }
 0x600   :  { %11215 = vmatpush1.bf16.msra.mxu0 %v14032_v18  ;;  %v1593_v18 = vld [vmem:[%s19818_s1 + $0x30b8] sm:$0xff] }
 0x601   :  { %11748 = vmatpush1.bf16.msra.mxu1 %v14034_v49  ;;  %11216 = vmatprep.subr.bf16.mxu0 %v14041_v57  ;;  %v19568_v49 = vld [vmem:[%s19819_s2] sm:$0xff]  ;;  %v1618_v57 = vsub.s32 3, %v14673_v44  ;;  %v14099_v54 = vcombine.high %v1589_v46, %v1593_v18  ;;  %v14098_v53 = vcombine.low %v1589_v46, %v1593_v18  ;;  %v14502_v46 = vld [vmem:[%s19820_s3 + $0xf8] sm:$0xff]  }
 0x602   :  { %11749 = vmatprep.subr.bf16.mxu1 %v14043_v5  ;;  %v14088_v5 = vcombine.low %v1580_v41, %v1584_v34  ;;  %v14495_v41 = vld [vmem:[%s19820_s3 + $0x28] sm:$0xff]   ;;  %v1607_v34 = vrot.slane %v19568_v49, %v1606_v26 }
 0x604   :  { %11217 = vmatpush1.bf16.msra.mxu0 %v14040_v20  ;;  %v1600_v20 = vld [vmem:[%s19818_s1 + $0x30f0] sm:$0xff] }
 0x605   :  { %11750 = vmatpush1.bf16.msra.mxu1 %v14042_v50  ;;  %11218 = vmatprep.subr.bf16.mxu0 %v14049_v6  ;;  %v1611_v50 = vrot.slane %v19568_v49, %v1610_v31  ;;  %v1601_v6 = vld [vmem:[%s19818_s1 + $0x30f8] sm:$0xff]  ;;  %v14105_v38 = vcombine.high %v1596_v47, %v1600_v20 }
 0x606   :  { %11751 = vmatprep.subr.bf16.mxu1 %v14051_v52  ;;  %v1619_v52 = vrot.slane %v19568_v49, %v1618_v57  ;;  %v14504_v57 = vld [vmem:[%s19820_s3 + $0xb8] sm:$0xff]  }
 0x608   :  { %11219 = vmatpush1.bf16.msra.mxu0 %v14048_v56  ;;  %v14267_v56 = vadd.f32 %v17853_v24, %v1611_v50  ;;  %v14475_v24 = vld [vmem:[%s19820_s3] sm:$0xff]  }
 0x609   :  { %11752 = vmatpush1.bf16.msra.mxu1 %v14050_v61  ;;  %11220 = vmatprep.subr.bf16.mxu0 %v14057_v9  ;;  %v14269_v61 = vadd.f32 %v17861_v27, %v1619_v52  ;;  %v14104_v9 = vcombine.low %v1596_v47, %v1600_v20  ;;  %v14476_v27 = vld [vmem:[%s19820_s3 + $0x80] sm:$0xff]   ;;  %v14509_v20 = vld [vmem:[%s19822_s5 + $0x48] sm:$0xff]  }
 0x60a   :  { %11753 = vmatprep.subr.bf16.mxu1 %v14059_v60  ;;  %v11810_v62 = vmax.f32 %v14267_v56, 0.0  ;;  %v14508_v47 = vld [vmem:[%s19822_s5 + $0x80] sm:$0xff]   ;;  %v14512_v52 = vld [vmem:[%s19822_s5 + $0x88] sm:$0xff]   ;;  %v14517_v56 = vld [vmem:[%s19822_s5 + $0x58] sm:$0xff]  }
 0x60b   :  { %v11812_v1 = vmax.f32 %v14269_v61, 0.0  ;;  %v14518_v61 = vld [vmem:[%s19822_s5 + $0xd8] sm:$0xff]  }
 0x60c   :  { %11221 = vmatpush1.bf16.msra.mxu0 %v14056_v4  ;;  %v11818_v4 = vpack.c.bf16 %v11810_v62, %v11810_v62  ;;  %v14523_v62 = vld [vmem:[%s19822_s5 + $0x20] sm:$0xff]  }
 0x60d   :  { %11754 = vmatpush1.bf16.msra.mxu1 %v14058_v11  ;;  %11222 = vmatprep.subr.bf16.mxu0 %v14065_v3  ;;  %v14478_v11 = vld [vmem:[%s19820_s3 + $0xc8] sm:$0xff]   ;;  %v11820_v3 = vpack.c.bf16 %v11812_v1, %v11812_v1  ;;  %v14524_v1 = vld [vmem:[%s19822_s5 + $0xa0] sm:$0xff]  }
 0x60e   :  { %11755 = vmatprep.subr.bf16.mxu1 %v14067_v58  ;;  %v14479_v58 = vld [vmem:[%s19820_s3 + $0x8] sm:$0xff]  }
 0x610   :  { %11223 = vmatpush1.bf16.msra.mxu0 %v14064_v10  ;;  %v14485_v10 = vld [vmem:[%s19820_s3 + $0x58] sm:$0xff]  }
 0x611   :  { %11756 = vmatpush1.bf16.msra.mxu1 %v14066_v17  ;;  %11224 = vmatprep.subr.bf16.mxu0 %v14073_v15  ;;  %v14486_v17 = vld [vmem:[%s19820_s3 + $0xd8] sm:$0xff]  }
 0x612   :  { %11757 = vmatprep.subr.bf16.mxu1 %v14075_v19  ;;  %v14487_v15 = vld [vmem:[%s19820_s3 + $0x18] sm:$0xff]  }
 0x613   :  { %v14488_v19 = vld [vmem:[%s19820_s3 + $0x98] sm:$0xff]  }
 0x614   :  { %11225 = vmatpush1.bf16.msra.mxu0 %v14072_v29  ;;  %v14492_v29 = vld [vmem:[%s19820_s3 + $0xa0] sm:$0xff]  }
 0x615   :  { %11758 = vmatpush1.bf16.msra.mxu1 %v14074_v48  ;;  %11235 = vmatprep.subr.bf16.mxu0 %v14081_v30  ;;  %v14493_v48 = vld [vmem:[%s19820_s3 + $0x68] sm:$0xff]   ;;  %v1614_v30 = vsub.s32 2, %v14673_v44 }
 0x616   :  { %11768 = vmatprep.subr.bf16.mxu1 %v14083_v32  ;;  %v14494_v32 = vld [vmem:[%s19820_s3 + $0xe8] sm:$0xff]  }
 0x617   :  { %11227 = vmatmul.mubr.bf16.vlgmr.msra.gmra.mrb[4].mxu0 %v17123_v42 }
 0x618   :  { %11236 = vmatpush1.bf16.msra.mxu0 %v14080_v59  ;;  %11760 = vmatmul.mubr.bf16.vlgmr.msra.gmra.mrb[4].mxu1 %v17123_v42  ;;  %v1597_v42 = vld [vmem:[%s19818_s1 + $0x30d8] sm:$0xff]  ;;  %v1615_v59 = vrot.slane %v19568_v49, %v1614_v30 }
 0x619   :  { %11769 = vmatpush1.bf16.msra.mxu1 %v14082_v33  ;;  %11237 = vmatprep.subr.bf16.mxu0 %v14089_v37  ;;  %v14107_v55 = vcombine.high %v1597_v42, %v1601_v6  ;;  %v14106_v60 = vcombine.low %v1597_v42, %v1601_v6  ;;  %v14498_v33 = vld [vmem:[%s19820_s3 + $0xf0] sm:$0xff]   ;;  %v14510_v42 = vld [vmem:[%s19822_s5 + $0xc8] sm:$0xff]  }
 0x61a   :  { %11770 = vmatprep.subr.bf16.mxu1 %v14091_v39  ;;  %11267 = vmatprep.mubr.bf16.mxu0 %v14562_v0  ;;  %v14499_v37 = vld [vmem:[%s19820_s3 + $0x30] sm:$0xff]   ;;  %v14266_v39 = vadd.f32 %v17843_v16, %v1607_v34  ;;  %v14268_v31 = vadd.f32 %v17851_v23, %v1615_v59  ;;  %v14503_v16 = vld [vmem:[%s19820_s3 + $0x38] sm:$0xff]   ;;  %v14505_v23 = vld [vmem:[%s19822_s5 + $0x40] sm:$0xff]  }
 0x61b   :  { %11800 = vmatprep.mubr.bf16.mxu1 %v14562_v0  ;;  %v14473_v0 = vld [vmem:[%s19820_s3 + $0x40] sm:$0xff]   ;;  %v14511_v6 = vld [vmem:[%s19822_s5 + $0x8] sm:$0xff]  }
 0x61c   :  { %11238 = vmatpush1.bf16.msra.mxu0 %v14088_v5  ;;  %v11809_v18 = vmax.f32 %v14266_v39, 0.0  ;;  %v11811_v5 = vmax.f32 %v14268_v31, 0.0 }
 0x61d   :  { %11771 = vmatpush1.bf16.msra.mxu1 %v14090_v35  ;;  %11239 = vmatprep.subr.bf16.mxu0 %v14097_v28  ;;  %v14506_v35 = vld [vmem:[%s19822_s5 + $0xc0] sm:$0xff]  }
 0x61e   :  { %11772 = vmatprep.subr.bf16.mxu1 %v14099_v54  ;;  %v14507_v28 = vld [vmem:[%s19822_s5] sm:$0xff]   ;;  %v11817_v54 = vpack.c.bf16 %v11809_v18, %v11809_v18  ;;  %v11819_v50 = vpack.c.bf16 %v11811_v5, %v11811_v5 }
 0x61f   :  { %v14112_v5 = vld [vmem:[%s19821_s4] ss:$0 sm:$0xff]  ;;  %s14563_s4 = smov [#allocation3]  }
 0x620   :  { %11240 = vmatpush1.bf16.msra.mxu0 %v14096_v51  ;;  %v14513_v51 = vld [vmem:[%s19822_s5 + $0x50] sm:$0xff]   ;;  %s12531_s29 = sshll.u32 %s14563_s4, 4  ;;  %s12532_s29 = int_to_ptr.vmem [resolvable:$true] %s12531_s29 }
 0x621   :  { %11773 = vmatpush1.bf16.msra.mxu1 %v14098_v53  ;;  %11241 = vmatprep.subr.bf16.mxu0 %v14105_v38  ;;  %v14514_v53 = vld [vmem:[%s19822_s5 + $0xd0] sm:$0xff]   ;;  %s14537_s30 = scalar_lea.vmem %s12532_s29, 32  ;;  %p14542_p1 = scmp.lt.s32.totalorder %s12532_s29, %s12532_s29 }
 0x622   :  { %11774 = vmatprep.subr.bf16.mxu1 %v14107_v55  ;;  %v14515_v38 = vld [vmem:[%s19822_s5 + $0x10] sm:$0xff]   ;;  %p14538_p0 = scmp.ne.s32.totalorder %s12532_s29, %s14537_s30  ;;  %p14543_p2 = scmp.lt.s32.totalorder %s14537_s30, %s14537_s30 }
 0x623   :  { %v14516_v55 = vld [vmem:[%s19822_s5 + $0x90] sm:$0xff]  }
 0x624   :  { %11242 = vmatpush1.bf16.msra.mxu0 %v14104_v9  ;;  %v14519_v9 = vld [vmem:[%s19822_s5 + $0x18] sm:$0xff]   ;;  %p14544_p3 = por %p14543_p2, %p14542_p1 }
 0x625   :  { %11775 = vmatpush1.bf16.msra.mxu1 %v14106_v60  ;;  %14178 = vmatprep.subr.bf16.mxu0 %v14473_v0  ;;  %v14520_v60 = vld [vmem:[%s19822_s5 + $0x98] sm:$0xff]   ;;  %v14521_v0 = vld [vmem:[%s19822_s5 + $0x60] sm:$0xff]  }
 0x626   :  { %14200 = vmatprep.subr.bf16.mxu1 %v14474_v63  ;;  %v14522_v63 = vld [vmem:[%s19822_s5 + $0xe0] sm:$0xff]   ;;  %p14545_p4 = pnand %p14544_p3, %p14538_p0 }
 0x627   :  { %14110 = vmatmul.mubr.msk.bf16.vlgmr.msra.gmra.mrb[4].mxu0 %vm9673_vm0, %v17181_v36 }
 0x628   :  { %14111 = vmatmul.mubr.msk.bf16.vlgmr.msra.gmra.mrb[4].mxu1 %vm9673_vm0, %v17181_v36  ;;  %14179 = vmatpush3.bf16.msra.mxu0 %v14475_v24  ;;  %v14482_v36 = vld [vmem:[%s19820_s3 + $0xd0] sm:$0xff]   ;;  %v14525_v24 = vld [vmem:[%s19822_s5 + $0x68] sm:$0xff]  }
 0x629   :  { %12120 = vmatprep.mubr.bf16.mxu0 %v11818_v4  ;;  %14201 = vmatpush3.bf16.msra.mxu1 %v14476_v27  ;;  %v14526_v27 = vld [vmem:[%s19822_s5 + $0xe8] sm:$0xff]  }
 0x62a   :  { %12160 = vmatprep.mubr.bf16.mxu1 %v11820_v3  ;;  %14180 = vmatprep.subr.bf16.mxu0 %v14477_v45  ;;  %v14527_v45 = vld [vmem:[%s19822_s5 + $0x28] sm:$0xff]   ;;  %v14530_v3 = vld [vmem:[%s19822_s5 + $0xf0] sm:$0xff]  }
 0x62b   :  { %14202 = vmatprep.subr.bf16.mxu1 %v14478_v11  ;;  %v14528_v4 = vld [vmem:[%s19822_s5 + $0xa8] sm:$0xff]   ;;  %v14529_v11 = vld [vmem:[%s19822_s5 + $0x70] sm:$0xff]  }
 0x62c   :  { %14181 = vmatpush3.bf16.msra.mxu0 %v14479_v58  ;;  %v14531_v58 = vld [vmem:[%s19822_s5 + $0x30] sm:$0xff]  }
 0x62d   :  { %14203 = vmatpush3.bf16.msra.mxu1 %v14480_v12  ;;  %14182 = vmatprep.subr.bf16.mxu0 %v14481_v13  ;;  %v14532_v12 = vld [vmem:[%s19822_s5 + $0xb0] sm:$0xff]   ;;  %v14533_v13 = vld [vmem:[%s19822_s5 + $0x78] sm:$0xff]  }
 0x62e   :  { %14204 = vmatprep.subr.bf16.mxu1 %v14482_v36  ;;  %v14534_v36 = vld [vmem:[%s19822_s5 + $0xf8] sm:$0xff]  }
 0x630   :  { %14183 = vmatpush3.bf16.msra.mxu0 %v14483_v14  ;;  %v14535_v14 = vld [vmem:[%s19822_s5 + $0x38] sm:$0xff]  }
 0x631   :  { %14205 = vmatpush3.bf16.msra.mxu1 %v14484_v2  ;;  %14184 = vmatprep.subr.bf16.mxu0 %v14485_v10  ;;  %v14536_v2 = vld [vmem:[%s19822_s5 + $0xb8] sm:$0xff]   ;;  %v1622_v10 = vsub.s32 4, %v14673_v44 }
 0x632   :  { %14206 = vmatprep.subr.bf16.mxu1 %v14486_v17  ;;  %v1630_v17 = vsub.s32 6, %v14673_v44 }
 0x634   :  { %14185 = vmatpush3.bf16.msra.mxu0 %v14487_v15  ;;  %v1626_v15 = vsub.s32 5, %v14673_v44 }
 0x635   :  { %14207 = vmatpush3.bf16.msra.mxu1 %v14488_v19  ;;  %14186 = vmatprep.subr.bf16.mxu0 %v14489_v7  ;;  %v1634_v19 = vsub.s32 7, %v14673_v44  ;;  %v1623_v7 = vrot.slane %v19568_v49, %v1622_v10 }
 0x636   :  { %14208 = vmatprep.subr.bf16.mxu1 %v14490_v22  ;;  %v1631_v22 = vrot.slane %v19568_v49, %v1630_v17 }
 0x637   :  { %v1635_v26 = vrot.slane %v19568_v49, %v1634_v19 }
 0x638   :  { %14187 = vmatpush3.bf16.msra.mxu0 %v14491_v25  ;;  %v1627_v25 = vrot.slane %v19568_v49, %v1626_v15 }
 0x639   :  { %14209 = vmatpush3.bf16.msra.mxu1 %v14492_v29  ;;  %14188 = vmatprep.subr.bf16.mxu0 %v14493_v48 }
 0x63a   :  { %14210 = vmatprep.subr.bf16.mxu1 %v14494_v32 }
 0x63c   :  { %14189 = vmatpush3.bf16.msra.mxu0 %v14495_v41 }
 0x63d   :  { %14211 = vmatpush3.bf16.msra.mxu1 %v14496_v21  ;;  %14190 = vmatprep.subr.bf16.mxu0 %v14497_v8 }
 0x63e   :  { %14212 = vmatprep.subr.bf16.mxu1 %v14498_v33 }
 0x640   :  { %14191 = vmatpush3.bf16.msra.mxu0 %v14499_v37 }
 0x641   :  { %14213 = vmatpush3.bf16.msra.mxu1 %v14500_v40  ;;  %14192 = vmatprep.subr.bf16.mxu0 %v14501_v43 }
 0x642   :  { %14214 = vmatprep.subr.bf16.mxu1 %v14502_v46 }
 0x644   :  { %14193 = vmatpush3.bf16.msra.mxu0 %v14503_v16 }
 0x645   :  { %14215 = vmatpush3.bf16.msra.mxu1 %v14504_v57  ;;  %14222 = vmatprep.subr.bf16.mxu0 %v14505_v23 }
 0x646   :  { %14244 = vmatprep.subr.bf16.mxu1 %v14506_v35 }
 0x647   :  { %12121 = vmatmul.mubr.bf16.vlgmr.msra.gmra.mrb[8].mxu0 %v11817_v54 }
 0x648   :  { %12161 = vmatmul.mubr.bf16.vlgmr.msra.gmra.mrb[8].mxu1 %v11819_v50  ;;  %14223 = vmatpush3.bf16.msra.mxu0 %v14507_v28 }
 0x649   :  { %14245 = vmatpush3.bf16.msra.mxu1 %v14508_v47  ;;  %14224 = vmatprep.subr.bf16.mxu0 %v14509_v20 }
 0x64a   :  { %14246 = vmatprep.subr.bf16.mxu1 %v14510_v42 }
 0x64c   :  { %14225 = vmatpush3.bf16.msra.mxu0 %v14511_v6 }
 0x64d   :  { %14247 = vmatpush3.bf16.msra.mxu1 %v14512_v52  ;;  %14226 = vmatprep.subr.bf16.mxu0 %v14513_v51 }
 0x64e   :  { %14248 = vmatprep.subr.bf16.mxu1 %v14514_v53 }
 0x650   :  { %14227 = vmatpush3.bf16.msra.mxu0 %v14515_v38 }
 0x651   :  { %14249 = vmatpush3.bf16.msra.mxu1 %v14516_v55  ;;  %14228 = vmatprep.subr.bf16.mxu0 %v14517_v56  ;;  %v14145_v56 = vld [vmem:[#allocation2] ss:$0 sm:$0xff] }
 0x652   :  { %14250 = vmatprep.subr.bf16.mxu1 %v14518_v61 }
 0x654   :  { %14229 = vmatpush3.bf16.msra.mxu0 %v14519_v9 }
 0x655   :  { %14251 = vmatpush3.bf16.msra.mxu1 %v14520_v60  ;;  %14230 = vmatprep.subr.bf16.mxu0 %v14521_v0 }
 0x656   :  { %14252 = vmatprep.subr.bf16.mxu1 %v14522_v63 }
 0x658   :  { %14231 = vmatpush3.bf16.msra.mxu0 %v14523_v62 }
 0x659   :  { %14253 = vmatpush3.bf16.msra.mxu1 %v14524_v1  ;;  %14232 = vmatprep.subr.bf16.mxu0 %v14525_v24 }
 0x65a   :  { %14254 = vmatprep.subr.bf16.mxu1 %v14526_v27 }
 0x65c   :  { %14233 = vmatpush3.bf16.msra.mxu0 %v14527_v45 }
 0x65d   :  { %14255 = vmatpush3.bf16.msra.mxu1 %v14528_v4  ;;  %14234 = vmatprep.subr.bf16.mxu0 %v14529_v11 }
 0x65e   :  { %14256 = vmatprep.subr.bf16.mxu1 %v14530_v3 }
 0x660   :  { %14235 = vmatpush3.bf16.msra.mxu0 %v14531_v58 }
 0x661   :  { %14257 = vmatpush3.bf16.msra.mxu1 %v14532_v12  ;;  %14236 = vmatprep.subr.bf16.mxu0 %v14533_v13 }
 0x662   :  { %14258 = vmatprep.subr.bf16.mxu1 %v14534_v36 }
 0x664   :  { %14237 = vmatpush3.bf16.msra.mxu0 %v14535_v14 }
 0x665   :  { %14259 = vmatpush3.bf16.msra.mxu1 %v14536_v2 }
 0x6fa   :  { %v11269_v29 = vpop.f32.mrb[4].mxu0 }
 0x6fb   :  { %v14270_v48 = vadd.f32 %v11269_v29, %v1623_v7  ;;  %v11802_v30 = vpop.f32.mrb[4].mxu1  ;;  %v11271_v32 = vpop.f32.mrb[5].mxu0 }
 0x6fc   :  { %v14272_v41 = vadd.f32 %v11802_v30, %v1631_v22  ;;  %v14271_v34 = vadd.f32 %v11271_v32, %v1627_v25  ;;  %v11804_v21 = vpop.f32.mrb[5].mxu1  ;;  %v11273_v8 = vpop.f32.mrb[6].mxu0 }
 0x6fd   :  { %v11813_v59 = vmax.f32 %v14270_v48, 0.0  ;;  %v14273_v33 = vadd.f32 %v11804_v21, %v1635_v26  ;;  %v11806_v37 = vpop.f32.mrb[6].mxu1  ;;  %v11274_v44 = vpop.f32.mrb[7].mxu0 }
 0x6fe   :  { %v11815_v39 = vmax.f32 %v14272_v41, 0.0  ;;  %v11814_v40 = vmax.f32 %v14271_v34, 0.0  ;;  %v11807_v43 = vpop.f32.mrb[7].mxu1 }
 0x6ff   :  { %v11816_v31 = vmax.f32 %v14273_v33, 0.0  ;;  %v11821_v16 = vpack.c.bf16 %v11813_v59, %v11813_v59 }
 0x700   :  { %v11822_v46 = vpack.c.bf16 %v11814_v40, %v11814_v40  ;;  %v11823_v49 = vpack.c.bf16 %v11815_v39, %v11815_v39 }
 0x701   :  { %v11824_v18 = vpack.c.bf16 %v11816_v31, %v11816_v31 }
 0x702   :  { %12463 = vmatprep.mubr.bf16.mxu0 %v11822_v46 }
 0x703   :  { %12503 = vmatprep.mubr.bf16.mxu1 %v11824_v18  ;;  %12464 = vmatmul.mubr.bf16.vlgmr.msra.gmra.mrb[12].mxu0 %v11821_v16 }
 0x704   :  { %12504 = vmatmul.mubr.bf16.vlgmr.msra.gmra.mrb[12].mxu1 %v11823_v49 }
 0x71a   :  { %v14194_v57 = vpop.f32.mrb[8].mxu0 }
 0x71b   :  { %v14216_v23 = vpop.f32.mrb[8].mxu1  ;;  %v14195_v35 = vpop.f32.mrb[9].mxu0 }
 0x71c   :  { %v14196_v28 = vadd.f32 %v14195_v35, %v14194_v57  ;;  %v14217_v54 = vpop.f32.mrb[9].mxu1  ;;  %v14197_v47 = vpop.f32.mrb[10].mxu0 }
 0x71d   :  { %v14218_v20 = vadd.f32 %v14217_v54, %v14216_v23  ;;  %v14219_v50 = vpop.f32.mrb[10].mxu1  ;;  %v14198_v42 = vpop.f32.mrb[11].mxu0 }
 0x71e   :  { %v12123_v6 = vadd.f32 %v14196_v28, %v14112_v5  ;;  %v14220_v52 = vpop.f32.mrb[11].mxu1 }
 0x720   :  { %v12163_v51 = vadd.f32 %v14218_v20, %v12123_v6 }
 0x722   :  { %v12512_v53 = vsel %vm12511_vm1, %v12163_v51, 0.0 }
 0x723   :  { %12513 = vadd.xlane.f32.xlu0 %v12512_v53 }
 0x7b0   :  { %v12514_v4 = vpop.xlane.xlu0 %12513 }
 0x7b1   :  { %v12516_v3 = vmul.f32 0.055555556, %v12514_v4 }
 0x7d6   :  { %v14238_v38 = vpop.f32.mrb[12].mxu0 }
 0x7d7   :  { %v14260_v55 = vpop.f32.mrb[12].mxu1  ;;  %v14239_v61 = vpop.f32.mrb[13].mxu0 }
 0x7d8   :  { %v14240_v9 = vadd.f32 %v14239_v61, %v14238_v38  ;;  %v14261_v60 = vpop.f32.mrb[13].mxu1  ;;  %v14241_v0 = vpop.f32.mrb[14].mxu0 }
 0x7d9   :  { %v14262_v63 = vadd.f32 %v14261_v60, %v14260_v55  ;;  %v14263_v62 = vpop.f32.mrb[14].mxu1  ;;  %v14242_v1 = vpop.f32.mrb[15].mxu0 }
 0x7da   :  { %v12466_v24 = vadd.f32 %v14240_v9, %v14145_v56  ;;  %v14264_v27 = vpop.f32.mrb[15].mxu1 }
 0x7dc   :  { %v12506_v45 = vadd.f32 %v14262_v63, %v12466_v24 }
 0x7de   :  { %12519 = vperm.xlu0 %14469, %v12506_v45  }
 0x85d   :  { %v12520_v11 = vpop.permute.xlu0 %12519 }
 0x85e   :  { %v12522_v58 = vadd.f32 %v12520_v11, %v12163_v51 }
 0x860   :  { %v12523_v12 = vsub.f32 %v12522_v58, %v12516_v3 }
 0x862   :  { %12524 = vst.msk [vmem:[#allocation3] sm:$0x3] %vm12511_vm1, %v12523_v12 }
 0x863   :  { %14548 = shalt.err (!%p14545_p4)
}
 0x864   :  { %s14549_s9 = scalar_lea.hbm %s19824_s7, 32 }
 0x865   :  { %p14550_p5 = scmp.ne.s32.totalorder %s19824_s7, %s14549_s9  ;;  %p14553_p6 = scmp.lt.u32.totalorder %s14549_s9, %s19824_s7 }
 0x867   :  { %p14555_p7 = pnand %p14553_p6, %p14550_p5 }
 0x869   :  { %14558 = shalt.err (!%p14555_p7)
}
 0x86a   :  { %12534 = dma.vmem_to_hbm [thread:$0]  %s12532_s29, 32, %s19824_s7, [#allocation4]  }
 0x86b   :  { %14559 = dma.done.wait [#allocation4], 32  }
 0x86c   :  { %14560 = vsyncadd [#allocation4], 4294967264 }
 0x86d   :  { %12538 = vsyncpa [#allocation4], 1 }

</bundles_post_ra>
